<compile_context>
chip_gen: v5e
topology: v5e:2x2
jax: 0.10.0
libtpu: 0.0.40
codegen_flags: <defaults>
</compile_context>

<pallas_src>
import functools

import jax
import jax.numpy as jnp
from jax.experimental import pallas as pl
from jax.experimental.pallas import tpu as pltpu


def _rup(x, m):
    return (x + m - 1) // m * m


def _choose_tm(M):
    """Adaptive M tile: big tiles to amortize per-step overhead, but keep
    >=2 grid steps when M allows (v7x megacore)."""
    if M >= 1024:
        return 512
    if M >= 512:
        return 256
    return _rup(M, 8)


# ----------------------------------------------------------------------------
# Pallas kernels
# ----------------------------------------------------------------------------
def _mm_bn_act_kernel(*refs, relu, res_mode):
    """out = act((patches @ w) * scale + bias [+ identity]).

    identity is either a precomputed residual tile ("add") or a fused
    1x1-conv + BN branch computed by a second MXU dot ("ds").
    Full K and N per block -> single dot(s) per step, no accumulator revisit.
    MXU operands are bf16, epilogue is f32 on the VPU.
    """
    if res_mode == "ds":
        (p_ref, w_ref, s_ref, b_ref,
         dp_ref, dw_ref, dss_ref, dsb_ref, o_ref) = refs
    elif res_mode == "add":
        p_ref, w_ref, s_ref, b_ref, r_ref, o_ref = refs
    else:  # "none"
        p_ref, w_ref, s_ref, b_ref, o_ref = refs

    y = jnp.dot(p_ref[...], w_ref[...], preferred_element_type=jnp.float32)
    y = y * s_ref[...] + b_ref[...]

    if res_mode == "ds":
        ident = jnp.dot(dp_ref[...], dw_ref[...],
                        preferred_element_type=jnp.float32)
        y = y + (ident * dss_ref[...] + dsb_ref[...])
    elif res_mode == "add":
        y = y + r_ref[...]

    if relu:
        y = jnp.maximum(y, 0.0)
    o_ref[...] = y.astype(o_ref.dtype)


def _maxpool_kernel(t_ref, o_ref):
    # t_ref: (taps, tm, C) -> elementwise max over the taps axis (VPU only)
    o_ref[...] = jnp.max(t_ref[...], axis=0)


# ----------------------------------------------------------------------------
# Matmul wrapper (fused BN + optional residual / downsample branch + ReLU)
# ----------------------------------------------------------------------------
def matmul_bn_act(patches, w, scale, bias, *, relu, residual=None, ds=None,
                  out_dtype=jnp.float32):
    """(M, K) @ (K, N) with per-channel scale/bias, optional fused identity."""
    M, K = patches.shape
    Kw, N = w.shape
    assert K == Kw

    tm = _choose_tm(M)
    Mp = _rup(M, tm)

    def pad_m(a):
        return jnp.pad(a, ((0, Mp - M), (0, 0))) if Mp != M else a

    in_specs = [
        pl.BlockSpec((tm, K), lambda i: (i, 0)),    # LHS tile (bf16)
        pl.BlockSpec((K, N), lambda i: (0, 0)),     # full weights (bf16)
        pl.BlockSpec((1, N), lambda i: (0, 0)),     # folded BN scale (f32)
        pl.BlockSpec((1, N), lambda i: (0, 0)),     # folded BN bias (f32)
    ]
    args = [pad_m(patches), w, scale, bias]

    if ds is not None:
        res_mode = "ds"
        ds_patches, ds_fold = ds
        Kd = ds_patches.shape[1]
        assert ds_patches.shape[0] == M
        in_specs += [
            pl.BlockSpec((tm, Kd), lambda i: (i, 0)),   # 1x1-conv LHS (bf16)
            pl.BlockSpec((Kd, N), lambda i: (0, 0)),    # 1x1-conv weights
            pl.BlockSpec((1, N), lambda i: (0, 0)),     # downsample BN scale
            pl.BlockSpec((1, N), lambda i: (0, 0)),     # downsample BN bias
        ]
        args += [pad_m(ds_patches), ds_fold["w"],
                 ds_fold["scale"], ds_fold["bias"]]
    elif residual is not None:
        res_mode = "add"
        in_specs.append(pl.BlockSpec((tm, N), lambda i: (i, 0)))
        args.append(pad_m(residual))
    else:
        res_mode = "none"

    out = pl.pallas_call(
        functools.partial(_mm_bn_act_kernel, relu=relu, res_mode=res_mode),
        out_shape=jax.ShapeDtypeStruct((Mp, N), out_dtype),
        grid=(Mp // tm,),
        in_specs=in_specs,
        out_specs=pl.BlockSpec((tm, N), lambda i: (i, 0)),
        compiler_params=pltpu.CompilerParams(
            dimension_semantics=("parallel",)),
    )(*args)
    return out[:M] if Mp != M else out


# ----------------------------------------------------------------------------
# Glue: im2col patch extraction (plain JAX slices; emits bf16 patches)
# ----------------------------------------------------------------------------
def _im2col_bf16(x_nhwc, kh, kw, stride, dilation, padding):
    N, H, W, C = x_nhwc.shape
    xp = x_nhwc
    if padding:
        xp = jnp.pad(xp, ((0, 0), (padding, padding),
                          (padding, padding), (0, 0)))
    xp = xp.astype(jnp.bfloat16)
    Hp, Wp = H + 2 * padding, W + 2 * padding
    Ho = (Hp - (dilation * (kh - 1) + 1)) // stride + 1
    Wo = (Wp - (dilation * (kw - 1) + 1)) // stride + 1
    taps = []
    for i in range(kh):
        for j in range(kw):
            hs, ws = i * dilation, j * dilation
            taps.append(xp[:, hs:hs + (Ho - 1) * stride + 1:stride,
                              ws:ws + (Wo - 1) * stride + 1:stride, :])
    if len(taps) == 1:
        patches = taps[0]
    else:
        patches = jnp.concatenate(taps, axis=-1)      # (N, Ho, Wo, kh*kw*C)
    return patches.reshape(N * Ho * Wo, kh * kw * C), (N, Ho, Wo)


# ----------------------------------------------------------------------------
# Layer wrappers (NHWC)
# ----------------------------------------------------------------------------
def conv2d_bn_act(x_nhwc, fold, *, stride, dilation, padding, relu,
                  residual=None, ds=None, out_dtype=jnp.float32):
    kh, kw = fold["kh"], fold["kw"]
    cout = fold["w"].shape[1]
    patches, (N, Ho, Wo) = _im2col_bf16(x_nhwc, kh, kw, stride, dilation,
                                        padding)
    res2d = None
    ds2d = None
    if residual is not None:
        res2d = residual.reshape(N * Ho * Wo, cout).astype(jnp.float32)
    if ds is not None:
        x_src, ds_fold, ds_stride = ds
        dsp, (Nd, Hd, Wd) = _im2col_bf16(x_src, 1, 1, ds_stride, 1, 0)
        assert (Nd, Hd, Wd) == (N, Ho, Wo)
        ds2d = (dsp, ds_fold)
    out = matmul_bn_act(patches, fold["w"], fold["scale"], fold["bias"],
                        relu=relu, residual=res2d, ds=ds2d,
                        out_dtype=out_dtype)
    return out.reshape(N, Ho, Wo, cout)


def maxpool2d(x_nhwc, ksize=3, stride=2, padding=1):
    N, H, W, C = x_nhwc.shape
    neg = float(jnp.finfo(jnp.float32).min)  # PyTorch ignores padded values
    xp = jnp.pad(x_nhwc,
                 ((0, 0), (padding, padding), (padding, padding), (0, 0)),
                 constant_values=neg)
    Hp, Wp = H + 2 * padding, W + 2 * padding
    Ho = (Hp - ksize) // stride + 1
    Wo = (Wp - ksize) // stride + 1
    taps = [xp[:, i:i + (Ho - 1) * stride + 1:stride,
                  j:j + (Wo - 1) * stride + 1:stride, :]
            for i in range(ksize) for j in range(ksize)]
    M = N * Ho * Wo
    t = jnp.stack(taps, axis=0).reshape(ksize * ksize, M, C)

    tm = _choose_tm(M)
    Mp = _rup(M, tm)
    if Mp != M:
        t = jnp.pad(t, ((0, 0), (0, Mp - M), (0, 0)), constant_values=neg)

    out = pl.pallas_call(
        _maxpool_kernel,
        out_shape=jax.ShapeDtypeStruct((Mp, C), jnp.float32),
        grid=(Mp // tm,),
        in_specs=[pl.BlockSpec((ksize * ksize, tm, C), lambda i: (0, i, 0))],
        out_specs=pl.BlockSpec((tm, C), lambda i: (i, 0)),
        compiler_params=pltpu.CompilerParams(
            dimension_semantics=("parallel",)),
    )(t)
    out = out[:M] if Mp != M else out
    return out.reshape(N, Ho, Wo, C)


# ----------------------------------------------------------------------------
# Parameter construction (deterministic, synthetic) + one-time folding
# ----------------------------------------------------------------------------
def _make_conv(key, cout, cin, k):
    std = 1.0 / jnp.sqrt(jnp.float32(cin * k * k))
    return jax.random.normal(key, (cout, cin, k, k), jnp.float32) * std


def _make_bn(key, c):
    k1, k2, k3, k4 = jax.random.split(key, 4)
    gamma = 1.0 + 0.1 * jax.random.normal(k1, (c,), jnp.float32)
    beta = 0.1 * jax.random.normal(k2, (c,), jnp.float32)
    mean = 0.1 * jax.random.normal(k3, (c,), jnp.float32)
    var = 1.0 + 0.1 * jax.random.uniform(k4, (c,), jnp.float32)
    return (gamma, beta, mean, var)


def _make_block(key, cin, cout, conv1_cfg, conv2_cfg, downsample_stride):
    ks = jax.random.split(key, 6)
    blk = {
        "conv1_w": _make_conv(ks[0], cout, cin, 3), "bn1": _make_bn(ks[1], cout),
        "conv1_cfg": conv1_cfg,
        "conv2_w": _make_conv(ks[2], cout, cout, 3), "bn2": _make_bn(ks[3], cout),
        "conv2_cfg": conv2_cfg,
        "downsample": None,
    }
    if cin != cout or downsample_stride != 1:
        blk["downsample"] = {
            "w": _make_conv(ks[4], cout, cin, 1),
            "bn": _make_bn(ks[5], cout),
            "stride": downsample_stride,
        }
    return blk


def make_params(key):
    """Tiny deep-stem ResNet; dilate_scale=8 already applied to layer3/4."""
    ks = jax.random.split(key, 12)
    return {
        "conv1_w": _make_conv(ks[0], 8, 3, 3), "bn1": _make_bn(ks[1], 8),
        "conv2_w": _make_conv(ks[2], 8, 8, 3), "bn2": _make_bn(ks[3], 8),
        "conv3_w": _make_conv(ks[4], 16, 8, 3), "bn3": _make_bn(ks[5], 16),
        # layer1: stride 1, no dilation
        "layer1": _make_block(ks[6], 16, 16, (1, 1, 1), (1, 1, 1), 1),
        # layer2: stride 2, no dilation
        "layer2": _make_block(ks[7], 16, 32, (2, 1, 1), (1, 1, 1), 2),
        # layer3: _nostride_dilate(dilate=2): stride 2 -> 1, dil (1,2), pad (1,2)
        "layer3": _make_block(ks[8], 32, 64, (1, 1, 1), (1, 2, 2), 1),
        # layer4: _nostride_dilate(dilate=4): stride 2 -> 1, dil (2,4), pad (2,4)
        "layer4": _make_block(ks[9], 64, 128, (1, 2, 2), (1, 4, 4), 1),
    }


def _fold_conv_bn(w_oihw, bn, eps=1e-5):
    """Transpose OIHW -> (K, N) (bf16) and fold BN into scale/bias (f32)."""
    gamma, beta, mean, var = bn
    scale = gamma / jnp.sqrt(var + eps)
    bias = beta - mean * scale
    cout, cin, kh, kw = w_oihw.shape
    w2d = jnp.transpose(w_oihw, (2, 3, 1, 0)).reshape(kh * kw * cin, cout)
    return {
        "w": w2d.astype(jnp.bfloat16),
        "scale": scale.reshape(1, cout).astype(jnp.float32),
        "bias": bias.reshape(1, cout).astype(jnp.float32),
        "kh": kh, "kw": kw,
    }


def fold_params(p):
    f = {
        "conv1": _fold_conv_bn(p["conv1_w"], p["bn1"]),
        "conv2": _fold_conv_bn(p["conv2_w"], p["bn2"]),
        "conv3": _fold_conv_bn(p["conv3_w"], p["bn3"]),
    }
    for name in ("layer1", "layer2", "layer3", "layer4"):
        blk = p[name]
        fb = {
            "conv1": _fold_conv_bn(blk["conv1_w"], blk["bn1"]),
            "conv1_cfg": blk["conv1_cfg"],
            "conv2": _fold_conv_bn(blk["conv2_w"], blk["bn2"]),
            "conv2_cfg": blk["conv2_cfg"],
            "downsample": None,
        }
        if blk["downsample"] is not None:
            ds = blk["downsample"]
            fb["downsample"] = {"fold": _fold_conv_bn(ds["w"], ds["bn"]),
                                "stride": ds["stride"]}
        f[name] = fb
    return f


# ----------------------------------------------------------------------------
# Forward pass
# ----------------------------------------------------------------------------
def _basic_block(x, blk):
    s, d, pd = blk["conv1_cfg"]
    # conv1 output only feeds conv2's im2col -> store it in bf16 directly.
    h = conv2d_bn_act(x, blk["conv1"], stride=s, dilation=d, padding=pd,
                      relu=True, out_dtype=jnp.bfloat16)
    s, d, pd = blk["conv2_cfg"]
    if blk["downsample"] is not None:
        dsb = blk["downsample"]
        # downsample 1x1 conv + BN fused into conv2's matmul epilogue
        out = conv2d_bn_act(h, blk["conv2"], stride=s, dilation=d, padding=pd,
                            relu=True, ds=(x, dsb["fold"], dsb["stride"]))
    else:
        # identity residual add + ReLU fused into conv2's matmul epilogue
        out = conv2d_bn_act(h, blk["conv2"], stride=s, dilation=d, padding=pd,
                            relu=True, residual=x)
    return out


def resnet_dilated_forward(fparams, x_nchw, return_feature_maps=False):
    x = jnp.transpose(x_nchw, (0, 2, 3, 1)).astype(jnp.float32)  # NCHW -> NHWC
    conv_out = []
    x = conv2d_bn_act(x, fparams["conv1"], stride=2, dilation=1, padding=1,
                      relu=True, out_dtype=jnp.bfloat16)
    x = conv2d_bn_act(x, fparams["conv2"], stride=1, dilation=1, padding=1,
                      relu=True, out_dtype=jnp.bfloat16)
    x = conv2d_bn_act(x, fparams["conv3"], stride=1, dilation=1, padding=1,
                      relu=True)
    x = maxpool2d(x, ksize=3, stride=2, padding=1)
    for name in ("layer1", "layer2", "layer3", "layer4"):
        x = _basic_block(x, fparams[name])
        conv_out.append(x)

    to_nchw = lambda t: jnp.transpose(t, (0, 3, 1, 2))
    if return_feature_maps:
        return [to_nchw(t) for t in conv_out]
    return [to_nchw(x)]


if __name__ == "__main__":
    key = jax.random.PRNGKey(0)
    kp, kx = jax.random.split(key)
    params = make_params(kp)
    fparams = fold_params(params)            # weights/BN folded once, offline
    x = jax.random.normal(kx, (2, 3, 64, 64), jnp.float32)  # NCHW input

    fwd = jax.jit(lambda inp: resnet_dilated_forward(
        fparams, inp, return_feature_maps=False))
    outs = fwd(x)
    out = jax.block_until_ready(outs[0])
    assert out.shape == (2, 128, 8, 8), out.shape
    assert bool(jnp.all(jnp.isfinite(out)))
    print("KERNEL_OK")
</pallas_src>

<mosaic_0001>
module attributes {stable_mosaic.version = 11 : i64} {
  func.func @_mm_bn_act_kernel(%arg0: i32, %arg1: memref<512x27xbf16, #tpu.memory_space<vmem>>, %arg2: memref<27x8xbf16, #tpu.memory_space<vmem>>, %arg3: memref<1x8xf32, #tpu.memory_space<vmem>>, %arg4: memref<1x8xf32, #tpu.memory_space<vmem>>, %arg5: memref<512x8xbf16, #tpu.memory_space<vmem>>) attributes {dimension_semantics = [#tpu.dimension_semantics<parallel>], iteration_bounds = array<i64: 4>, scalar_prefetch = 0 : i64, scratch_operands = 0 : i64, tpu.core_type = #tpu.core_type<tc>, window_params = [{transform_indices = @transform_0, window_bounds = array<i64: 512, 27>}, {pipeline_mode = #tpu.pipeline_mode<synchronous>, transform_indices = @transform_1, window_bounds = array<i64: 27, 8>}, {pipeline_mode = #tpu.pipeline_mode<synchronous>, transform_indices = @transform_2, window_bounds = array<i64: 1, 8>}, {pipeline_mode = #tpu.pipeline_mode<synchronous>, transform_indices = @transform_3, window_bounds = array<i64: 1, 8>}, {transform_indices = @transform_4, window_bounds = array<i64: 512, 8>}]} {
    %c0 = arith.constant 0 : index
    %c0_0 = arith.constant 0 : index
    %0 = vector.load %arg1[%c0, %c0_0] : memref<512x27xbf16, #tpu.memory_space<vmem>>, vector<512x27xbf16>
    %c0_1 = arith.constant 0 : index
    %c0_2 = arith.constant 0 : index
    %1 = vector.load %arg2[%c0_1, %c0_2] : memref<27x8xbf16, #tpu.memory_space<vmem>>, vector<27x8xbf16>
    %cst = arith.constant dense<0.000000e+00> : vector<512x8xf32>
    %2 = tpu.matmul %0, %1, %cst {dimension_numbers = #tpu.dot_dimension_numbers<[1], [0], [0], [1], [0, 0, 1, 1], [], []>} : vector<512x27xbf16>, vector<27x8xbf16>, vector<512x8xf32> -> vector<512x8xf32>
    %c0_3 = arith.constant 0 : index
    %c0_4 = arith.constant 0 : index
    %3 = vector.load %arg3[%c0_3, %c0_4] : memref<1x8xf32, #tpu.memory_space<vmem>>, vector<1x8xf32>
    %4 = vector.broadcast %3 : vector<1x8xf32> to vector<512x8xf32>
    %5 = arith.mulf %2, %4 : vector<512x8xf32>
    %c0_5 = arith.constant 0 : index
    %c0_6 = arith.constant 0 : index
    %6 = vector.load %arg4[%c0_5, %c0_6] : memref<1x8xf32, #tpu.memory_space<vmem>>, vector<1x8xf32>
    %7 = vector.broadcast %6 : vector<1x8xf32> to vector<512x8xf32>
    %8 = arith.addf %5, %7 : vector<512x8xf32>
    %cst_7 = arith.constant 0.000000e+00 : f32
    %9 = vector.broadcast %cst_7 : f32 to vector<512x8xf32>
    %10 = arith.maximumf %8, %9 : vector<512x8xf32>
    %11 = arith.truncf %10 : vector<512x8xf32> to vector<512x8xbf16>
    %c0_8 = arith.constant 0 : index
    %c0_9 = arith.constant 0 : index
    %12 = vector.load %arg5[%c0_8, %c0_9] : memref<512x8xbf16, #tpu.memory_space<vmem>>, vector<512x8xbf16>
    tpu.vector_store %arg5[%c0_8, %c0_9], %11 {strides = array<i32>} : memref<512x8xbf16, #tpu.memory_space<vmem>>, vector<512x8xbf16>,
    return
  }
  func.func @transform_0(%arg0: i32) -> (i32, i32) {
    %c0_i32 = arith.constant 0 : i32
    %c0_i32_0 = arith.constant 0 : i32
    return %arg0, %c0_i32 : i32, i32
  }
  func.func @transform_1(%arg0: i32) -> (i32, i32) {
    %c0_i32 = arith.constant 0 : i32
    %c0_i32_0 = arith.constant 0 : i32
    %c0_i32_1 = arith.constant 0 : i32
    return %c0_i32, %c0_i32_0 : i32, i32
  }
  func.func @transform_2(%arg0: i32) -> (i32, i32) {
    %c0_i32 = arith.constant 0 : i32
    %c0_i32_0 = arith.constant 0 : i32
    %c0_i32_1 = arith.constant 0 : i32
    return %c0_i32, %c0_i32_0 : i32, i32
  }
  func.func @transform_3(%arg0: i32) -> (i32, i32) {
    %c0_i32 = arith.constant 0 : i32
    %c0_i32_0 = arith.constant 0 : i32
    %c0_i32_1 = arith.constant 0 : i32
    return %c0_i32, %c0_i32_0 : i32, i32
  }
  func.func @transform_4(%arg0: i32) -> (i32, i32) {
    %c0_i32 = arith.constant 0 : i32
    %c0_i32_0 = arith.constant 0 : i32
    return %arg0, %c0_i32 : i32, i32
  }
}

module attributes {stable_mosaic.version = 11 : i64} {
  func.func @_mm_bn_act_kernel(%arg0: i32, %arg1: memref<512x72xbf16, #tpu.memory_space<vmem>>, %arg2: memref<72x8xbf16, #tpu.memory_space<vmem>>, %arg3: memref<1x8xf32, #tpu.memory_space<vmem>>, %arg4: memref<1x8xf32, #tpu.memory_space<vmem>>, %arg5: memref<512x8xbf16, #tpu.memory_space<vmem>>) attributes {dimension_semantics = [#tpu.dimension_semantics<parallel>], iteration_bounds = array<i64: 4>, scalar_prefetch = 0 : i64, scratch_operands = 0 : i64, tpu.core_type = #tpu.core_type<tc>, window_params = [{transform_indices = @transform_0, window_bounds = array<i64: 512, 72>}, {pipeline_mode = #tpu.pipeline_mode<synchronous>, transform_indices = @transform_1, window_bounds = array<i64: 72, 8>}, {pipeline_mode = #tpu.pipeline_mode<synchronous>, transform_indices = @transform_2, window_bounds = array<i64: 1, 8>}, {pipeline_mode = #tpu.pipeline_mode<synchronous>, transform_indices = @transform_3, window_bounds = array<i64: 1, 8>}, {transform_indices = @transform_4, window_bounds = array<i64: 512, 8>}]} {
    %c0 = arith.constant 0 : index
    %c0_0 = arith.constant 0 : index
    %0 = vector.load %arg1[%c0, %c0_0] : memref<512x72xbf16, #tpu.memory_space<vmem>>, vector<512x72xbf16>
    %c0_1 = arith.constant 0 : index
    %c0_2 = arith.constant 0 : index
    %1 = vector.load %arg2[%c0_1, %c0_2] : memref<72x8xbf16, #tpu.memory_space<vmem>>, vector<72x8xbf16>
    %cst = arith.constant dense<0.000000e+00> : vector<512x8xf32>
    %2 = tpu.matmul %0, %1, %cst {dimension_numbers = #tpu.dot_dimension_numbers<[1], [0], [0], [1], [0, 0, 1, 1], [], []>} : vector<512x72xbf16>, vector<72x8xbf16>, vector<512x8xf32> -> vector<512x8xf32>
    %c0_3 = arith.constant 0 : index
    %c0_4 = arith.constant 0 : index
    %3 = vector.load %arg3[%c0_3, %c0_4] : memref<1x8xf32, #tpu.memory_space<vmem>>, vector<1x8xf32>
    %4 = vector.broadcast %3 : vector<1x8xf32> to vector<512x8xf32>
    %5 = arith.mulf %2, %4 : vector<512x8xf32>
    %c0_5 = arith.constant 0 : index
    %c0_6 = arith.constant 0 : index
    %6 = vector.load %arg4[%c0_5, %c0_6] : memref<1x8xf32, #tpu.memory_space<vmem>>, vector<1x8xf32>
    %7 = vector.broadcast %6 : vector<1x8xf32> to vector<512x8xf32>
    %8 = arith.addf %5, %7 : vector<512x8xf32>
    %cst_7 = arith.constant 0.000000e+00 : f32
    %9 = vector.broadcast %cst_7 : f32 to vector<512x8xf32>
    %10 = arith.maximumf %8, %9 : vector<512x8xf32>
    %11 = arith.truncf %10 : vector<512x8xf32> to vector<512x8xbf16>
    %c0_8 = arith.constant 0 : index
    %c0_9 = arith.constant 0 : index
    %12 = vector.load %arg5[%c0_8, %c0_9] : memref<512x8xbf16, #tpu.memory_space<vmem>>, vector<512x8xbf16>
    tpu.vector_store %arg5[%c0_8, %c0_9], %11 {strides = array<i32>} : memref<512x8xbf16, #tpu.memory_space<vmem>>, vector<512x8xbf16>,
    return
  }
  func.func @transform_0(%arg0: i32) -> (i32, i32) {
    %c0_i32 = arith.constant 0 : i32
    %c0_i32_0 = arith.constant 0 : i32
    return %arg0, %c0_i32 : i32, i32
  }
  func.func @transform_1(%arg0: i32) -> (i32, i32) {
    %c0_i32 = arith.constant 0 : i32
    %c0_i32_0 = arith.constant 0 : i32
    %c0_i32_1 = arith.constant 0 : i32
    return %c0_i32, %c0_i32_0 : i32, i32
  }
  func.func @transform_2(%arg0: i32) -> (i32, i32) {
    %c0_i32 = arith.constant 0 : i32
    %c0_i32_0 = arith.constant 0 : i32
    %c0_i32_1 = arith.constant 0 : i32
    return %c0_i32, %c0_i32_0 : i32, i32
  }
  func.func @transform_3(%arg0: i32) -> (i32, i32) {
    %c0_i32 = arith.constant 0 : i32
    %c0_i32_0 = arith.constant 0 : i32
    %c0_i32_1 = arith.constant 0 : i32
    return %c0_i32, %c0_i32_0 : i32, i32
  }
  func.func @transform_4(%arg0: i32) -> (i32, i32) {
    %c0_i32 = arith.constant 0 : i32
    %c0_i32_0 = arith.constant 0 : i32
    return %arg0, %c0_i32 : i32, i32
  }
}

module attributes {stable_mosaic.version = 11 : i64} {
  func.func @_mm_bn_act_kernel(%arg0: i32, %arg1: memref<512x72xbf16, #tpu.memory_space<vmem>>, %arg2: memref<72x16xbf16, #tpu.memory_space<vmem>>, %arg3: memref<1x16xf32, #tpu.memory_space<vmem>>, %arg4: memref<1x16xf32, #tpu.memory_space<vmem>>, %arg5: memref<512x16xf32, #tpu.memory_space<vmem>>) attributes {dimension_semantics = [#tpu.dimension_semantics<parallel>], iteration_bounds = array<i64: 4>, scalar_prefetch = 0 : i64, scratch_operands = 0 : i64, tpu.core_type = #tpu.core_type<tc>, window_params = [{transform_indices = @transform_0, window_bounds = array<i64: 512, 72>}, {pipeline_mode = #tpu.pipeline_mode<synchronous>, transform_indices = @transform_1, window_bounds = array<i64: 72, 16>}, {pipeline_mode = #tpu.pipeline_mode<synchronous>, transform_indices = @transform_2, window_bounds = array<i64: 1, 16>}, {pipeline_mode = #tpu.pipeline_mode<synchronous>, transform_indices = @transform_3, window_bounds = array<i64: 1, 16>}, {transform_indices = @transform_4, window_bounds = array<i64: 512, 16>}]} {
    %c0 = arith.constant 0 : index
    %c0_0 = arith.constant 0 : index
    %0 = vector.load %arg1[%c0, %c0_0] : memref<512x72xbf16, #tpu.memory_space<vmem>>, vector<512x72xbf16>
    %c0_1 = arith.constant 0 : index
    %c0_2 = arith.constant 0 : index
    %1 = vector.load %arg2[%c0_1, %c0_2] : memref<72x16xbf16, #tpu.memory_space<vmem>>, vector<72x16xbf16>
    %cst = arith.constant dense<0.000000e+00> : vector<512x16xf32>
    %2 = tpu.matmul %0, %1, %cst {dimension_numbers = #tpu.dot_dimension_numbers<[1], [0], [0], [1], [0, 0, 1, 1], [], []>} : vector<512x72xbf16>, vector<72x16xbf16>, vector<512x16xf32> -> vector<512x16xf32>
    %c0_3 = arith.constant 0 : index
    %c0_4 = arith.constant 0 : index
    %3 = vector.load %arg3[%c0_3, %c0_4] : memref<1x16xf32, #tpu.memory_space<vmem>>, vector<1x16xf32>
    %4 = vector.broadcast %3 : vector<1x16xf32> to vector<512x16xf32>
    %5 = arith.mulf %2, %4 : vector<512x16xf32>
    %c0_5 = arith.constant 0 : index
    %c0_6 = arith.constant 0 : index
    %6 = vector.load %arg4[%c0_5, %c0_6] : memref<1x16xf32, #tpu.memory_space<vmem>>, vector<1x16xf32>
    %7 = vector.broadcast %6 : vector<1x16xf32> to vector<512x16xf32>
    %8 = arith.addf %5, %7 : vector<512x16xf32>
    %cst_7 = arith.constant 0.000000e+00 : f32
    %9 = vector.broadcast %cst_7 : f32 to vector<512x16xf32>
    %10 = arith.maximumf %8, %9 : vector<512x16xf32>
    %c0_8 = arith.constant 0 : index
    %c0_9 = arith.constant 0 : index
    %11 = vector.load %arg5[%c0_8, %c0_9] : memref<512x16xf32, #tpu.memory_space<vmem>>, vector<512x16xf32>
    tpu.vector_store %arg5[%c0_8, %c0_9], %10 {strides = array<i32>} : memref<512x16xf32, #tpu.memory_space<vmem>>, vector<512x16xf32>,
    return
  }
  func.func @transform_0(%arg0: i32) -> (i32, i32) {
    %c0_i32 = arith.constant 0 : i32
    %c0_i32_0 = arith.constant 0 : i32
    return %arg0, %c0_i32 : i32, i32
  }
  func.func @transform_1(%arg0: i32) -> (i32, i32) {
    %c0_i32 = arith.constant 0 : i32
    %c0_i32_0 = arith.constant 0 : i32
    %c0_i32_1 = arith.constant 0 : i32
    return %c0_i32, %c0_i32_0 : i32, i32
  }
  func.func @transform_2(%arg0: i32) -> (i32, i32) {
    %c0_i32 = arith.constant 0 : i32
    %c0_i32_0 = arith.constant 0 : i32
    %c0_i32_1 = arith.constant 0 : i32
    return %c0_i32, %c0_i32_0 : i32, i32
  }
  func.func @transform_3(%arg0: i32) -> (i32, i32) {
    %c0_i32 = arith.constant 0 : i32
    %c0_i32_0 = arith.constant 0 : i32
    %c0_i32_1 = arith.constant 0 : i32
    return %c0_i32, %c0_i32_0 : i32, i32
  }
  func.func @transform_4(%arg0: i32) -> (i32, i32) {
    %c0_i32 = arith.constant 0 : i32
    %c0_i32_0 = arith.constant 0 : i32
    return %arg0, %c0_i32 : i32, i32
  }
}

module attributes {stable_mosaic.version = 11 : i64} {
  func.func @_maxpool_kernel(%arg0: i32, %arg1: memref<9x256x16xf32, #tpu.memory_space<vmem>>, %arg2: memref<256x16xf32, #tpu.memory_space<vmem>>) attributes {dimension_semantics = [#tpu.dimension_semantics<parallel>], iteration_bounds = array<i64: 2>, scalar_prefetch = 0 : i64, scratch_operands = 0 : i64, tpu.core_type = #tpu.core_type<tc>, window_params = [{transform_indices = @transform_0, window_bounds = array<i64: 9, 256, 16>}, {transform_indices = @transform_1, window_bounds = array<i64: 256, 16>}]} {
    %c0 = arith.constant 0 : index
    %c0_0 = arith.constant 0 : index
    %c0_1 = arith.constant 0 : index
    %0 = vector.load %arg1[%c0, %c0_0, %c0_1] : memref<9x256x16xf32, #tpu.memory_space<vmem>>, vector<9x256x16xf32>
    %cst = arith.constant dense<0xFF800000> : vector<256x16xf32>
    %1 = vector.multi_reduction <maximumf>, %0, %cst [0] : vector<9x256x16xf32> to vector<256x16xf32>
    %c0_2 = arith.constant 0 : index
    %c0_3 = arith.constant 0 : index
    %2 = vector.load %arg2[%c0_2, %c0_3] : memref<256x16xf32, #tpu.memory_space<vmem>>, vector<256x16xf32>
    tpu.vector_store %arg2[%c0_2, %c0_3], %1 {strides = array<i32>} : memref<256x16xf32, #tpu.memory_space<vmem>>, vector<256x16xf32>,
    return
  }
  func.func @transform_0(%arg0: i32) -> (i32, i32, i32) {
    %c0_i32 = arith.constant 0 : i32
    %c0_i32_0 = arith.constant 0 : i32
    %c0_i32_1 = arith.constant 0 : i32
    return %c0_i32, %arg0, %c0_i32_0 : i32, i32, i32
  }
  func.func @transform_1(%arg0: i32) -> (i32, i32) {
    %c0_i32 = arith.constant 0 : i32
    %c0_i32_0 = arith.constant 0 : i32
    return %arg0, %c0_i32 : i32, i32
  }
}

module attributes {stable_mosaic.version = 11 : i64} {
  func.func @_mm_bn_act_kernel(%arg0: i32, %arg1: memref<256x144xbf16, #tpu.memory_space<vmem>>, %arg2: memref<144x16xbf16, #tpu.memory_space<vmem>>, %arg3: memref<1x16xf32, #tpu.memory_space<vmem>>, %arg4: memref<1x16xf32, #tpu.memory_space<vmem>>, %arg5: memref<256x16xbf16, #tpu.memory_space<vmem>>) attributes {dimension_semantics = [#tpu.dimension_semantics<parallel>], iteration_bounds = array<i64: 2>, scalar_prefetch = 0 : i64, scratch_operands = 0 : i64, tpu.core_type = #tpu.core_type<tc>, window_params = [{transform_indices = @transform_0, window_bounds = array<i64: 256, 144>}, {pipeline_mode = #tpu.pipeline_mode<synchronous>, transform_indices = @transform_1, window_bounds = array<i64: 144, 16>}, {pipeline_mode = #tpu.pipeline_mode<synchronous>, transform_indices = @transform_2, window_bounds = array<i64: 1, 16>}, {pipeline_mode = #tpu.pipeline_mode<synchronous>, transform_indices = @transform_3, window_bounds = array<i64: 1, 16>}, {transform_indices = @transform_4, window_bounds = array<i64: 256, 16>}]} {
    %c0 = arith.constant 0 : index
    %c0_0 = arith.constant 0 : index
    %0 = vector.load %arg1[%c0, %c0_0] : memref<256x144xbf16, #tpu.memory_space<vmem>>, vector<256x144xbf16>
    %c0_1 = arith.constant 0 : index
    %c0_2 = arith.constant 0 : index
    %1 = vector.load %arg2[%c0_1, %c0_2] : memref<144x16xbf16, #tpu.memory_space<vmem>>, vector<144x16xbf16>
    %cst = arith.constant dense<0.000000e+00> : vector<256x16xf32>
    %2 = tpu.matmul %0, %1, %cst {dimension_numbers = #tpu.dot_dimension_numbers<[1], [0], [0], [1], [0, 0, 1, 1], [], []>} : vector<256x144xbf16>, vector<144x16xbf16>, vector<256x16xf32> -> vector<256x16xf32>
    %c0_3 = arith.constant 0 : index
    %c0_4 = arith.constant 0 : index
    %3 = vector.load %arg3[%c0_3, %c0_4] : memref<1x16xf32, #tpu.memory_space<vmem>>, vector<1x16xf32>
    %4 = vector.broadcast %3 : vector<1x16xf32> to vector<256x16xf32>
    %5 = arith.mulf %2, %4 : vector<256x16xf32>
    %c0_5 = arith.constant 0 : index
    %c0_6 = arith.constant 0 : index
    %6 = vector.load %arg4[%c0_5, %c0_6] : memref<1x16xf32, #tpu.memory_space<vmem>>, vector<1x16xf32>
    %7 = vector.broadcast %6 : vector<1x16xf32> to vector<256x16xf32>
    %8 = arith.addf %5, %7 : vector<256x16xf32>
    %cst_7 = arith.constant 0.000000e+00 : f32
    %9 = vector.broadcast %cst_7 : f32 to vector<256x16xf32>
    %10 = arith.maximumf %8, %9 : vector<256x16xf32>
    %11 = arith.truncf %10 : vector<256x16xf32> to vector<256x16xbf16>
    %c0_8 = arith.constant 0 : index
    %c0_9 = arith.constant 0 : index
    %12 = vector.load %arg5[%c0_8, %c0_9] : memref<256x16xbf16, #tpu.memory_space<vmem>>, vector<256x16xbf16>
    tpu.vector_store %arg5[%c0_8, %c0_9], %11 {strides = array<i32>} : memref<256x16xbf16, #tpu.memory_space<vmem>>, vector<256x16xbf16>,
    return
  }
  func.func @transform_0(%arg0: i32) -> (i32, i32) {
    %c0_i32 = arith.constant 0 : i32
    %c0_i32_0 = arith.constant 0 : i32
    return %arg0, %c0_i32 : i32, i32
  }
  func.func @transform_1(%arg0: i32) -> (i32, i32) {
    %c0_i32 = arith.constant 0 : i32
    %c0_i32_0 = arith.constant 0 : i32
    %c0_i32_1 = arith.constant 0 : i32
    return %c0_i32, %c0_i32_0 : i32, i32
  }
  func.func @transform_2(%arg0: i32) -> (i32, i32) {
    %c0_i32 = arith.constant 0 : i32
    %c0_i32_0 = arith.constant 0 : i32
    %c0_i32_1 = arith.constant 0 : i32
    return %c0_i32, %c0_i32_0 : i32, i32
  }
  func.func @transform_3(%arg0: i32) -> (i32, i32) {
    %c0_i32 = arith.constant 0 : i32
    %c0_i32_0 = arith.constant 0 : i32
    %c0_i32_1 = arith.constant 0 : i32
    return %c0_i32, %c0_i32_0 : i32, i32
  }
  func.func @transform_4(%arg0: i32) -> (i32, i32) {
    %c0_i32 = arith.constant 0 : i32
    %c0_i32_0 = arith.constant 0 : i32
    return %arg0, %c0_i32 : i32, i32
  }
}

module attributes {stable_mosaic.version = 11 : i64} {
  func.func @_mm_bn_act_kernel(%arg0: i32, %arg1: memref<256x144xbf16, #tpu.memory_space<vmem>>, %arg2: memref<144x16xbf16, #tpu.memory_space<vmem>>, %arg3: memref<1x16xf32, #tpu.memory_space<vmem>>, %arg4: memref<1x16xf32, #tpu.memory_space<vmem>>, %arg5: memref<256x16xf32, #tpu.memory_space<vmem>>, %arg6: memref<256x16xf32, #tpu.memory_space<vmem>>) attributes {dimension_semantics = [#tpu.dimension_semantics<parallel>], iteration_bounds = array<i64: 2>, scalar_prefetch = 0 : i64, scratch_operands = 0 : i64, tpu.core_type = #tpu.core_type<tc>, window_params = [{transform_indices = @transform_0, window_bounds = array<i64: 256, 144>}, {pipeline_mode = #tpu.pipeline_mode<synchronous>, transform_indices = @transform_1, window_bounds = array<i64: 144, 16>}, {pipeline_mode = #tpu.pipeline_mode<synchronous>, transform_indices = @transform_2, window_bounds = array<i64: 1, 16>}, {pipeline_mode = #tpu.pipeline_mode<synchronous>, transform_indices = @transform_3, window_bounds = array<i64: 1, 16>}, {transform_indices = @transform_4, window_bounds = array<i64: 256, 16>}, {transform_indices = @transform_5, window_bounds = array<i64: 256, 16>}]} {
    %c0 = arith.constant 0 : index
    %c0_0 = arith.constant 0 : index
    %0 = vector.load %arg1[%c0, %c0_0] : memref<256x144xbf16, #tpu.memory_space<vmem>>, vector<256x144xbf16>
    %c0_1 = arith.constant 0 : index
    %c0_2 = arith.constant 0 : index
    %1 = vector.load %arg2[%c0_1, %c0_2] : memref<144x16xbf16, #tpu.memory_space<vmem>>, vector<144x16xbf16>
    %cst = arith.constant dense<0.000000e+00> : vector<256x16xf32>
    %2 = tpu.matmul %0, %1, %cst {dimension_numbers = #tpu.dot_dimension_numbers<[1], [0], [0], [1], [0, 0, 1, 1], [], []>} : vector<256x144xbf16>, vector<144x16xbf16>, vector<256x16xf32> -> vector<256x16xf32>
    %c0_3 = arith.constant 0 : index
    %c0_4 = arith.constant 0 : index
    %3 = vector.load %arg3[%c0_3, %c0_4] : memref<1x16xf32, #tpu.memory_space<vmem>>, vector<1x16xf32>
    %4 = vector.broadcast %3 : vector<1x16xf32> to vector<256x16xf32>
    %5 = arith.mulf %2, %4 : vector<256x16xf32>
    %c0_5 = arith.constant 0 : index
    %c0_6 = arith.constant 0 : index
    %6 = vector.load %arg4[%c0_5, %c0_6] : memref<1x16xf32, #tpu.memory_space<vmem>>, vector<1x16xf32>
    %7 = vector.broadcast %6 : vector<1x16xf32> to vector<256x16xf32>
    %8 = arith.addf %5, %7 : vector<256x16xf32>
    %c0_7 = arith.constant 0 : index
    %c0_8 = arith.constant 0 : index
    %9 = vector.load %arg5[%c0_7, %c0_8] : memref<256x16xf32, #tpu.memory_space<vmem>>, vector<256x16xf32>
    %10 = arith.addf %8, %9 : vector<256x16xf32>
    %cst_9 = arith.constant 0.000000e+00 : f32
    %11 = vector.broadcast %cst_9 : f32 to vector<256x16xf32>
    %12 = arith.maximumf %10, %11 : vector<256x16xf32>
    %c0_10 = arith.constant 0 : index
    %c0_11 = arith.constant 0 : index
    %13 = vector.load %arg6[%c0_10, %c0_11] : memref<256x16xf32, #tpu.memory_space<vmem>>, vector<256x16xf32>
    tpu.vector_store %arg6[%c0_10, %c0_11], %12 {strides = array<i32>} : memref<256x16xf32, #tpu.memory_space<vmem>>, vector<256x16xf32>,
    return
  }
  func.func @transform_0(%arg0: i32) -> (i32, i32) {
    %c0_i32 = arith.constant 0 : i32
    %c0_i32_0 = arith.constant 0 : i32
    return %arg0, %c0_i32 : i32, i32
  }
  func.func @transform_1(%arg0: i32) -> (i32, i32) {
    %c0_i32 = arith.constant 0 : i32
    %c0_i32_0 = arith.constant 0 : i32
    %c0_i32_1 = arith.constant 0 : i32
    return %c0_i32, %c0_i32_0 : i32, i32
  }
  func.func @transform_2(%arg0: i32) -> (i32, i32) {
    %c0_i32 = arith.constant 0 : i32
    %c0_i32_0 = arith.constant 0 : i32
    %c0_i32_1 = arith.constant 0 : i32
    return %c0_i32, %c0_i32_0 : i32, i32
  }
  func.func @transform_3(%arg0: i32) -> (i32, i32) {
    %c0_i32 = arith.constant 0 : i32
    %c0_i32_0 = arith.constant 0 : i32
    %c0_i32_1 = arith.constant 0 : i32
    return %c0_i32, %c0_i32_0 : i32, i32
  }
  func.func @transform_4(%arg0: i32) -> (i32, i32) {
    %c0_i32 = arith.constant 0 : i32
    %c0_i32_0 = arith.constant 0 : i32
    return %arg0, %c0_i32 : i32, i32
  }
  func.func @transform_5(%arg0: i32) -> (i32, i32) {
    %c0_i32 = arith.constant 0 : i32
    %c0_i32_0 = arith.constant 0 : i32
    return %arg0, %c0_i32 : i32, i32
  }
}

module attributes {stable_mosaic.version = 11 : i64} {
  func.func @_mm_bn_act_kernel(%arg0: i32, %arg1: memref<128x144xbf16, #tpu.memory_space<vmem>>, %arg2: memref<144x32xbf16, #tpu.memory_space<vmem>>, %arg3: memref<1x32xf32, #tpu.memory_space<vmem>>, %arg4: memref<1x32xf32, #tpu.memory_space<vmem>>, %arg5: memref<128x32xbf16, #tpu.memory_space<vmem>>) attributes {dimension_semantics = [#tpu.dimension_semantics<parallel>], iteration_bounds = array<i64: 1>, scalar_prefetch = 0 : i64, scratch_operands = 0 : i64, tpu.core_type = #tpu.core_type<tc>, window_params = [{transform_indices = @transform_0, window_bounds = array<i64: 128, 144>}, {pipeline_mode = #tpu.pipeline_mode<synchronous>, transform_indices = @transform_1, window_bounds = array<i64: 144, 32>}, {pipeline_mode = #tpu.pipeline_mode<synchronous>, transform_indices = @transform_2, window_bounds = array<i64: 1, 32>}, {pipeline_mode = #tpu.pipeline_mode<synchronous>, transform_indices = @transform_3, window_bounds = array<i64: 1, 32>}, {transform_indices = @transform_4, window_bounds = array<i64: 128, 32>}]} {
    %c0 = arith.constant 0 : index
    %c0_0 = arith.constant 0 : index
    %0 = vector.load %arg1[%c0, %c0_0] : memref<128x144xbf16, #tpu.memory_space<vmem>>, vector<128x144xbf16>
    %c0_1 = arith.constant 0 : index
    %c0_2 = arith.constant 0 : index
    %1 = vector.load %arg2[%c0_1, %c0_2] : memref<144x32xbf16, #tpu.memory_space<vmem>>, vector<144x32xbf16>
    %cst = arith.constant dense<0.000000e+00> : vector<128x32xf32>
    %2 = tpu.matmul %0, %1, %cst {dimension_numbers = #tpu.dot_dimension_numbers<[1], [0], [0], [1], [0, 0, 1, 1], [], []>} : vector<128x144xbf16>, vector<144x32xbf16>, vector<128x32xf32> -> vector<128x32xf32>
    %c0_3 = arith.constant 0 : index
    %c0_4 = arith.constant 0 : index
    %3 = vector.load %arg3[%c0_3, %c0_4] : memref<1x32xf32, #tpu.memory_space<vmem>>, vector<1x32xf32>
    %4 = vector.broadcast %3 : vector<1x32xf32> to vector<128x32xf32>
    %5 = arith.mulf %2, %4 : vector<128x32xf32>
    %c0_5 = arith.constant 0 : index
    %c0_6 = arith.constant 0 : index
    %6 = vector.load %arg4[%c0_5, %c0_6] : memref<1x32xf32, #tpu.memory_space<vmem>>, vector<1x32xf32>
    %7 = vector.broadcast %6 : vector<1x32xf32> to vector<128x32xf32>
    %8 = arith.addf %5, %7 : vector<128x32xf32>
    %cst_7 = arith.constant 0.000000e+00 : f32
    %9 = vector.broadcast %cst_7 : f32 to vector<128x32xf32>
    %10 = arith.maximumf %8, %9 : vector<128x32xf32>
    %11 = arith.truncf %10 : vector<128x32xf32> to vector<128x32xbf16>
    %c0_8 = arith.constant 0 : index
    %c0_9 = arith.constant 0 : index
    %12 = vector.load %arg5[%c0_8, %c0_9] : memref<128x32xbf16, #tpu.memory_space<vmem>>, vector<128x32xbf16>
    tpu.vector_store %arg5[%c0_8, %c0_9], %11 {strides = array<i32>} : memref<128x32xbf16, #tpu.memory_space<vmem>>, vector<128x32xbf16>,
    return
  }
  func.func @transform_0(%arg0: i32) -> (i32, i32) {
    %c0_i32 = arith.constant 0 : i32
    %c0_i32_0 = arith.constant 0 : i32
    return %arg0, %c0_i32 : i32, i32
  }
  func.func @transform_1(%arg0: i32) -> (i32, i32) {
    %c0_i32 = arith.constant 0 : i32
    %c0_i32_0 = arith.constant 0 : i32
    %c0_i32_1 = arith.constant 0 : i32
    return %c0_i32, %c0_i32_0 : i32, i32
  }
  func.func @transform_2(%arg0: i32) -> (i32, i32) {
    %c0_i32 = arith.constant 0 : i32
    %c0_i32_0 = arith.constant 0 : i32
    %c0_i32_1 = arith.constant 0 : i32
    return %c0_i32, %c0_i32_0 : i32, i32
  }
  func.func @transform_3(%arg0: i32) -> (i32, i32) {
    %c0_i32 = arith.constant 0 : i32
    %c0_i32_0 = arith.constant 0 : i32
    %c0_i32_1 = arith.constant 0 : i32
    return %c0_i32, %c0_i32_0 : i32, i32
  }
  func.func @transform_4(%arg0: i32) -> (i32, i32) {
    %c0_i32 = arith.constant 0 : i32
    %c0_i32_0 = arith.constant 0 : i32
    return %arg0, %c0_i32 : i32, i32
  }
}

module attributes {stable_mosaic.version = 11 : i64} {
  func.func @_mm_bn_act_kernel(%arg0: i32, %arg1: memref<128x288xbf16, #tpu.memory_space<vmem>>, %arg2: memref<288x32xbf16, #tpu.memory_space<vmem>>, %arg3: memref<1x32xf32, #tpu.memory_space<vmem>>, %arg4: memref<1x32xf32, #tpu.memory_space<vmem>>, %arg5: memref<128x16xbf16, #tpu.memory_space<vmem>>, %arg6: memref<16x32xbf16, #tpu.memory_space<vmem>>, %arg7: memref<1x32xf32, #tpu.memory_space<vmem>>, %arg8: memref<1x32xf32, #tpu.memory_space<vmem>>, %arg9: memref<128x32xf32, #tpu.memory_space<vmem>>) attributes {dimension_semantics = [#tpu.dimension_semantics<parallel>], iteration_bounds = array<i64: 1>, scalar_prefetch = 0 : i64, scratch_operands = 0 : i64, tpu.core_type = #tpu.core_type<tc>, window_params = [{transform_indices = @transform_0, window_bounds = array<i64: 128, 288>}, {pipeline_mode = #tpu.pipeline_mode<synchronous>, transform_indices = @transform_1, window_bounds = array<i64: 288, 32>}, {pipeline_mode = #tpu.pipeline_mode<synchronous>, transform_indices = @transform_2, window_bounds = array<i64: 1, 32>}, {pipeline_mode = #tpu.pipeline_mode<synchronous>, transform_indices = @transform_3, window_bounds = array<i64: 1, 32>}, {transform_indices = @transform_4, window_bounds = array<i64: 128, 16>}, {pipeline_mode = #tpu.pipeline_mode<synchronous>, transform_indices = @transform_5, window_bounds = array<i64: 16, 32>}, {pipeline_mode = #tpu.pipeline_mode<synchronous>, transform_indices = @transform_6, window_bounds = array<i64: 1, 32>}, {pipeline_mode = #tpu.pipeline_mode<synchronous>, transform_indices = @transform_7, window_bounds = array<i64: 1, 32>}, {transform_indices = @transform_8, window_bounds = array<i64: 128, 32>}]} {
    %c0 = arith.constant 0 : index
    %c0_0 = arith.constant 0 : index
    %0 = vector.load %arg1[%c0, %c0_0] : memref<128x288xbf16, #tpu.memory_space<vmem>>, vector<128x288xbf16>
    %c0_1 = arith.constant 0 : index
    %c0_2 = arith.constant 0 : index
    %1 = vector.load %arg2[%c0_1, %c0_2] : memref<288x32xbf16, #tpu.memory_space<vmem>>, vector<288x32xbf16>
    %cst = arith.constant dense<0.000000e+00> : vector<128x32xf32>
    %2 = tpu.matmul %0, %1, %cst {dimension_numbers = #tpu.dot_dimension_numbers<[1], [0], [0], [1], [0, 0, 1, 1], [], []>} : vector<128x288xbf16>, vector<288x32xbf16>, vector<128x32xf32> -> vector<128x32xf32>
    %c0_3 = arith.constant 0 : index
    %c0_4 = arith.constant 0 : index
    %3 = vector.load %arg3[%c0_3, %c0_4] : memref<1x32xf32, #tpu.memory_space<vmem>>, vector<1x32xf32>
    %4 = vector.broadcast %3 : vector<1x32xf32> to vector<128x32xf32>
    %5 = arith.mulf %2, %4 : vector<128x32xf32>
    %c0_5 = arith.constant 0 : index
    %c0_6 = arith.constant 0 : index
    %6 = vector.load %arg4[%c0_5, %c0_6] : memref<1x32xf32, #tpu.memory_space<vmem>>, vector<1x32xf32>
    %7 = vector.broadcast %6 : vector<1x32xf32> to vector<128x32xf32>
    %8 = arith.addf %5, %7 : vector<128x32xf32>
    %c0_7 = arith.constant 0 : index
    %c0_8 = arith.constant 0 : index
    %9 = vector.load %arg5[%c0_7, %c0_8] : memref<128x16xbf16, #tpu.memory_space<vmem>>, vector<128x16xbf16>
    %c0_9 = arith.constant 0 : index
    %c0_10 = arith.constant 0 : index
    %10 = vector.load %arg6[%c0_9, %c0_10] : memref<16x32xbf16, #tpu.memory_space<vmem>>, vector<16x32xbf16>
    %cst_11 = arith.constant dense<0.000000e+00> : vector<128x32xf32>
    %11 = tpu.matmul %9, %10, %cst_11 {dimension_numbers = #tpu.dot_dimension_numbers<[1], [0], [0], [1], [0, 0, 1, 1], [], []>} : vector<128x16xbf16>, vector<16x32xbf16>, vector<128x32xf32> -> vector<128x32xf32>
    %c0_12 = arith.constant 0 : index
    %c0_13 = arith.constant 0 : index
    %12 = vector.load %arg7[%c0_12, %c0_13] : memref<1x32xf32, #tpu.memory_space<vmem>>, vector<1x32xf32>
    %13 = vector.broadcast %12 : vector<1x32xf32> to vector<128x32xf32>
    %14 = arith.mulf %11, %13 : vector<128x32xf32>
    %c0_14 = arith.constant 0 : index
    %c0_15 = arith.constant 0 : index
    %15 = vector.load %arg8[%c0_14, %c0_15] : memref<1x32xf32, #tpu.memory_space<vmem>>, vector<1x32xf32>
    %16 = vector.broadcast %15 : vector<1x32xf32> to vector<128x32xf32>
    %17 = arith.addf %14, %16 : vector<128x32xf32>
    %18 = arith.addf %8, %17 : vector<128x32xf32>
    %cst_16 = arith.constant 0.000000e+00 : f32
    %19 = vector.broadcast %cst_16 : f32 to vector<128x32xf32>
    %20 = arith.maximumf %18, %19 : vector<128x32xf32>
    %c0_17 = arith.constant 0 : index
    %c0_18 = arith.constant 0 : index
    %21 = vector.load %arg9[%c0_17, %c0_18] : memref<128x32xf32, #tpu.memory_space<vmem>>, vector<128x32xf32>
    tpu.vector_store %arg9[%c0_17, %c0_18], %20 {strides = array<i32>} : memref<128x32xf32, #tpu.memory_space<vmem>>, vector<128x32xf32>,
    return
  }
  func.func @transform_0(%arg0: i32) -> (i32, i32) {
    %c0_i32 = arith.constant 0 : i32
    %c0_i32_0 = arith.constant 0 : i32
    return %arg0, %c0_i32 : i32, i32
  }
  func.func @transform_1(%arg0: i32) -> (i32, i32) {
    %c0_i32 = arith.constant 0 : i32
    %c0_i32_0 = arith.constant 0 : i32
    %c0_i32_1 = arith.constant 0 : i32
    return %c0_i32, %c0_i32_0 : i32, i32
  }
  func.func @transform_2(%arg0: i32) -> (i32, i32) {
    %c0_i32 = arith.constant 0 : i32
    %c0_i32_0 = arith.constant 0 : i32
    %c0_i32_1 = arith.constant 0 : i32
    return %c0_i32, %c0_i32_0 : i32, i32
  }
  func.func @transform_3(%arg0: i32) -> (i32, i32) {
    %c0_i32 = arith.constant 0 : i32
    %c0_i32_0 = arith.constant 0 : i32
    %c0_i32_1 = arith.constant 0 : i32
    return %c0_i32, %c0_i32_0 : i32, i32
  }
  func.func @transform_4(%arg0: i32) -> (i32, i32) {
    %c0_i32 = arith.constant 0 : i32
    %c0_i32_0 = arith.constant 0 : i32
    return %arg0, %c0_i32 : i32, i32
  }
  func.func @transform_5(%arg0: i32) -> (i32, i32) {
    %c0_i32 = arith.constant 0 : i32
    %c0_i32_0 = arith.constant 0 : i32
    %c0_i32_1 = arith.constant 0 : i32
    return %c0_i32, %c0_i32_0 : i32, i32
  }
  func.func @transform_6(%arg0: i32) -> (i32, i32) {
    %c0_i32 = arith.constant 0 : i32
    %c0_i32_0 = arith.constant 0 : i32
    %c0_i32_1 = arith.constant 0 : i32
    return %c0_i32, %c0_i32_0 : i32, i32
  }
  func.func @transform_7(%arg0: i32) -> (i32, i32) {
    %c0_i32 = arith.constant 0 : i32
    %c0_i32_0 = arith.constant 0 : i32
    %c0_i32_1 = arith.constant 0 : i32
    return %c0_i32, %c0_i32_0 : i32, i32
  }
  func.func @transform_8(%arg0: i32) -> (i32, i32) {
    %c0_i32 = arith.constant 0 : i32
    %c0_i32_0 = arith.constant 0 : i32
    return %arg0, %c0_i32 : i32, i32
  }
}

module attributes {stable_mosaic.version = 11 : i64} {
  func.func @_mm_bn_act_kernel(%arg0: i32, %arg1: memref<128x288xbf16, #tpu.memory_space<vmem>>, %arg2: memref<288x64xbf16, #tpu.memory_space<vmem>>, %arg3: memref<1x64xf32, #tpu.memory_space<vmem>>, %arg4: memref<1x64xf32, #tpu.memory_space<vmem>>, %arg5: memref<128x64xbf16, #tpu.memory_space<vmem>>) attributes {dimension_semantics = [#tpu.dimension_semantics<parallel>], iteration_bounds = array<i64: 1>, scalar_prefetch = 0 : i64, scratch_operands = 0 : i64, tpu.core_type = #tpu.core_type<tc>, window_params = [{transform_indices = @transform_0, window_bounds = array<i64: 128, 288>}, {pipeline_mode = #tpu.pipeline_mode<synchronous>, transform_indices = @transform_1, window_bounds = array<i64: 288, 64>}, {pipeline_mode = #tpu.pipeline_mode<synchronous>, transform_indices = @transform_2, window_bounds = array<i64: 1, 64>}, {pipeline_mode = #tpu.pipeline_mode<synchronous>, transform_indices = @transform_3, window_bounds = array<i64: 1, 64>}, {transform_indices = @transform_4, window_bounds = array<i64: 128, 64>}]} {
    %c0 = arith.constant 0 : index
    %c0_0 = arith.constant 0 : index
    %0 = vector.load %arg1[%c0, %c0_0] : memref<128x288xbf16, #tpu.memory_space<vmem>>, vector<128x288xbf16>
    %c0_1 = arith.constant 0 : index
    %c0_2 = arith.constant 0 : index
    %1 = vector.load %arg2[%c0_1, %c0_2] : memref<288x64xbf16, #tpu.memory_space<vmem>>, vector<288x64xbf16>
    %cst = arith.constant dense<0.000000e+00> : vector<128x64xf32>
    %2 = tpu.matmul %0, %1, %cst {dimension_numbers = #tpu.dot_dimension_numbers<[1], [0], [0], [1], [0, 0, 1, 1], [], []>} : vector<128x288xbf16>, vector<288x64xbf16>, vector<128x64xf32> -> vector<128x64xf32>
    %c0_3 = arith.constant 0 : index
    %c0_4 = arith.constant 0 : index
    %3 = vector.load %arg3[%c0_3, %c0_4] : memref<1x64xf32, #tpu.memory_space<vmem>>, vector<1x64xf32>
    %4 = vector.broadcast %3 : vector<1x64xf32> to vector<128x64xf32>
    %5 = arith.mulf %2, %4 : vector<128x64xf32>
    %c0_5 = arith.constant 0 : index
    %c0_6 = arith.constant 0 : index
    %6 = vector.load %arg4[%c0_5, %c0_6] : memref<1x64xf32, #tpu.memory_space<vmem>>, vector<1x64xf32>
    %7 = vector.broadcast %6 : vector<1x64xf32> to vector<128x64xf32>
    %8 = arith.addf %5, %7 : vector<128x64xf32>
    %cst_7 = arith.constant 0.000000e+00 : f32
    %9 = vector.broadcast %cst_7 : f32 to vector<128x64xf32>
    %10 = arith.maximumf %8, %9 : vector<128x64xf32>
    %11 = arith.truncf %10 : vector<128x64xf32> to vector<128x64xbf16>
    %c0_8 = arith.constant 0 : index
    %c0_9 = arith.constant 0 : index
    %12 = vector.load %arg5[%c0_8, %c0_9] : memref<128x64xbf16, #tpu.memory_space<vmem>>, vector<128x64xbf16>
    tpu.vector_store %arg5[%c0_8, %c0_9], %11 {strides = array<i32>} : memref<128x64xbf16, #tpu.memory_space<vmem>>, vector<128x64xbf16>,
    return
  }
  func.func @transform_0(%arg0: i32) -> (i32, i32) {
    %c0_i32 = arith.constant 0 : i32
    %c0_i32_0 = arith.constant 0 : i32
    return %arg0, %c0_i32 : i32, i32
  }
  func.func @transform_1(%arg0: i32) -> (i32, i32) {
    %c0_i32 = arith.constant 0 : i32
    %c0_i32_0 = arith.constant 0 : i32
    %c0_i32_1 = arith.constant 0 : i32
    return %c0_i32, %c0_i32_0 : i32, i32
  }
  func.func @transform_2(%arg0: i32) -> (i32, i32) {
    %c0_i32 = arith.constant 0 : i32
    %c0_i32_0 = arith.constant 0 : i32
    %c0_i32_1 = arith.constant 0 : i32
    return %c0_i32, %c0_i32_0 : i32, i32
  }
  func.func @transform_3(%arg0: i32) -> (i32, i32) {
    %c0_i32 = arith.constant 0 : i32
    %c0_i32_0 = arith.constant 0 : i32
    %c0_i32_1 = arith.constant 0 : i32
    return %c0_i32, %c0_i32_0 : i32, i32
  }
  func.func @transform_4(%arg0: i32) -> (i32, i32) {
    %c0_i32 = arith.constant 0 : i32
    %c0_i32_0 = arith.constant 0 : i32
    return %arg0, %c0_i32 : i32, i32
  }
}

module attributes {stable_mosaic.version = 11 : i64} {
  func.func @_mm_bn_act_kernel(%arg0: i32, %arg1: memref<128x576xbf16, #tpu.memory_space<vmem>>, %arg2: memref<576x64xbf16, #tpu.memory_space<vmem>>, %arg3: memref<1x64xf32, #tpu.memory_space<vmem>>, %arg4: memref<1x64xf32, #tpu.memory_space<vmem>>, %arg5: memref<128x32xbf16, #tpu.memory_space<vmem>>, %arg6: memref<32x64xbf16, #tpu.memory_space<vmem>>, %arg7: memref<1x64xf32, #tpu.memory_space<vmem>>, %arg8: memref<1x64xf32, #tpu.memory_space<vmem>>, %arg9: memref<128x64xf32, #tpu.memory_space<vmem>>) attributes {dimension_semantics = [#tpu.dimension_semantics<parallel>], iteration_bounds = array<i64: 1>, scalar_prefetch = 0 : i64, scratch_operands = 0 : i64, tpu.core_type = #tpu.core_type<tc>, window_params = [{transform_indices = @transform_0, window_bounds = array<i64: 128, 576>}, {pipeline_mode = #tpu.pipeline_mode<synchronous>, transform_indices = @transform_1, window_bounds = array<i64: 576, 64>}, {pipeline_mode = #tpu.pipeline_mode<synchronous>, transform_indices = @transform_2, window_bounds = array<i64: 1, 64>}, {pipeline_mode = #tpu.pipeline_mode<synchronous>, transform_indices = @transform_3, window_bounds = array<i64: 1, 64>}, {transform_indices = @transform_4, window_bounds = array<i64: 128, 32>}, {pipeline_mode = #tpu.pipeline_mode<synchronous>, transform_indices = @transform_5, window_bounds = array<i64: 32, 64>}, {pipeline_mode = #tpu.pipeline_mode<synchronous>, transform_indices = @transform_6, window_bounds = array<i64: 1, 64>}, {pipeline_mode = #tpu.pipeline_mode<synchronous>, transform_indices = @transform_7, window_bounds = array<i64: 1, 64>}, {transform_indices = @transform_8, window_bounds = array<i64: 128, 64>}]} {
    %c0 = arith.constant 0 : index
    %c0_0 = arith.constant 0 : index
    %0 = vector.load %arg1[%c0, %c0_0] : memref<128x576xbf16, #tpu.memory_space<vmem>>, vector<128x576xbf16>
    %c0_1 = arith.constant 0 : index
    %c0_2 = arith.constant 0 : index
    %1 = vector.load %arg2[%c0_1, %c0_2] : memref<576x64xbf16, #tpu.memory_space<vmem>>, vector<576x64xbf16>
    %cst = arith.constant dense<0.000000e+00> : vector<128x64xf32>
    %2 = tpu.matmul %0, %1, %cst {dimension_numbers = #tpu.dot_dimension_numbers<[1], [0], [0], [1], [0, 0, 1, 1], [], []>} : vector<128x576xbf16>, vector<576x64xbf16>, vector<128x64xf32> -> vector<128x64xf32>
    %c0_3 = arith.constant 0 : index
    %c0_4 = arith.constant 0 : index
    %3 = vector.load %arg3[%c0_3, %c0_4] : memref<1x64xf32, #tpu.memory_space<vmem>>, vector<1x64xf32>
    %4 = vector.broadcast %3 : vector<1x64xf32> to vector<128x64xf32>
    %5 = arith.mulf %2, %4 : vector<128x64xf32>
    %c0_5 = arith.constant 0 : index
    %c0_6 = arith.constant 0 : index
    %6 = vector.load %arg4[%c0_5, %c0_6] : memref<1x64xf32, #tpu.memory_space<vmem>>, vector<1x64xf32>
    %7 = vector.broadcast %6 : vector<1x64xf32> to vector<128x64xf32>
    %8 = arith.addf %5, %7 : vector<128x64xf32>
    %c0_7 = arith.constant 0 : index
    %c0_8 = arith.constant 0 : index
    %9 = vector.load %arg5[%c0_7, %c0_8] : memref<128x32xbf16, #tpu.memory_space<vmem>>, vector<128x32xbf16>
    %c0_9 = arith.constant 0 : index
    %c0_10 = arith.constant 0 : index
    %10 = vector.load %arg6[%c0_9, %c0_10] : memref<32x64xbf16, #tpu.memory_space<vmem>>, vector<32x64xbf16>
    %cst_11 = arith.constant dense<0.000000e+00> : vector<128x64xf32>
    %11 = tpu.matmul %9, %10, %cst_11 {dimension_numbers = #tpu.dot_dimension_numbers<[1], [0], [0], [1], [0, 0, 1, 1], [], []>} : vector<128x32xbf16>, vector<32x64xbf16>, vector<128x64xf32> -> vector<128x64xf32>
    %c0_12 = arith.constant 0 : index
    %c0_13 = arith.constant 0 : index
    %12 = vector.load %arg7[%c0_12, %c0_13] : memref<1x64xf32, #tpu.memory_space<vmem>>, vector<1x64xf32>
    %13 = vector.broadcast %12 : vector<1x64xf32> to vector<128x64xf32>
    %14 = arith.mulf %11, %13 : vector<128x64xf32>
    %c0_14 = arith.constant 0 : index
    %c0_15 = arith.constant 0 : index
    %15 = vector.load %arg8[%c0_14, %c0_15] : memref<1x64xf32, #tpu.memory_space<vmem>>, vector<1x64xf32>
    %16 = vector.broadcast %15 : vector<1x64xf32> to vector<128x64xf32>
    %17 = arith.addf %14, %16 : vector<128x64xf32>
    %18 = arith.addf %8, %17 : vector<128x64xf32>
    %cst_16 = arith.constant 0.000000e+00 : f32
    %19 = vector.broadcast %cst_16 : f32 to vector<128x64xf32>
    %20 = arith.maximumf %18, %19 : vector<128x64xf32>
    %c0_17 = arith.constant 0 : index
    %c0_18 = arith.constant 0 : index
    %21 = vector.load %arg9[%c0_17, %c0_18] : memref<128x64xf32, #tpu.memory_space<vmem>>, vector<128x64xf32>
    tpu.vector_store %arg9[%c0_17, %c0_18], %20 {strides = array<i32>} : memref<128x64xf32, #tpu.memory_space<vmem>>, vector<128x64xf32>,
    return
  }
  func.func @transform_0(%arg0: i32) -> (i32, i32) {
    %c0_i32 = arith.constant 0 : i32
    %c0_i32_0 = arith.constant 0 : i32
    return %arg0, %c0_i32 : i32, i32
  }
  func.func @transform_1(%arg0: i32) -> (i32, i32) {
    %c0_i32 = arith.constant 0 : i32
    %c0_i32_0 = arith.constant 0 : i32
    %c0_i32_1 = arith.constant 0 : i32
    return %c0_i32, %c0_i32_0 : i32, i32
  }
  func.func @transform_2(%arg0: i32) -> (i32, i32) {
    %c0_i32 = arith.constant 0 : i32
    %c0_i32_0 = arith.constant 0 : i32
    %c0_i32_1 = arith.constant 0 : i32
    return %c0_i32, %c0_i32_0 : i32, i32
  }
  func.func @transform_3(%arg0: i32) -> (i32, i32) {
    %c0_i32 = arith.constant 0 : i32
    %c0_i32_0 = arith.constant 0 : i32
    %c0_i32_1 = arith.constant 0 : i32
    return %c0_i32, %c0_i32_0 : i32, i32
  }
  func.func @transform_4(%arg0: i32) -> (i32, i32) {
    %c0_i32 = arith.constant 0 : i32
    %c0_i32_0 = arith.constant 0 : i32
    return %arg0, %c0_i32 : i32, i32
  }
  func.func @transform_5(%arg0: i32) -> (i32, i32) {
    %c0_i32 = arith.constant 0 : i32
    %c0_i32_0 = arith.constant 0 : i32
    %c0_i32_1 = arith.constant 0 : i32
    return %c0_i32, %c0_i32_0 : i32, i32
  }
  func.func @transform_6(%arg0: i32) -> (i32, i32) {
    %c0_i32 = arith.constant 0 : i32
    %c0_i32_0 = arith.constant 0 : i32
    %c0_i32_1 = arith.constant 0 : i32
    return %c0_i32, %c0_i32_0 : i32, i32
  }
  func.func @transform_7(%arg0: i32) -> (i32, i32) {
    %c0_i32 = arith.constant 0 : i32
    %c0_i32_0 = arith.constant 0 : i32
    %c0_i32_1 = arith.constant 0 : i32
    return %c0_i32, %c0_i32_0 : i32, i32
  }
  func.func @transform_8(%arg0: i32) -> (i32, i32) {
    %c0_i32 = arith.constant 0 : i32
    %c0_i32_0 = arith.constant 0 : i32
    return %arg0, %c0_i32 : i32, i32
  }
}

module attributes {stable_mosaic.version = 11 : i64} {
  func.func @_mm_bn_act_kernel(%arg0: i32, %arg1: memref<128x576xbf16, #tpu.memory_space<vmem>>, %arg2: memref<576x128xbf16, #tpu.memory_space<vmem>>, %arg3: memref<1x128xf32, #tpu.memory_space<vmem>>, %arg4: memref<1x128xf32, #tpu.memory_space<vmem>>, %arg5: memref<128x128xbf16, #tpu.memory_space<vmem>>) attributes {dimension_semantics = [#tpu.dimension_semantics<parallel>], iteration_bounds = array<i64: 1>, scalar_prefetch = 0 : i64, scratch_operands = 0 : i64, tpu.core_type = #tpu.core_type<tc>, window_params = [{transform_indices = @transform_0, window_bounds = array<i64: 128, 576>}, {pipeline_mode = #tpu.pipeline_mode<synchronous>, transform_indices = @transform_1, window_bounds = array<i64: 576, 128>}, {pipeline_mode = #tpu.pipeline_mode<synchronous>, transform_indices = @transform_2, window_bounds = array<i64: 1, 128>}, {pipeline_mode = #tpu.pipeline_mode<synchronous>, transform_indices = @transform_3, window_bounds = array<i64: 1, 128>}, {transform_indices = @transform_4, window_bounds = array<i64: 128, 128>}]} {
    %c0 = arith.constant 0 : index
    %c0_0 = arith.constant 0 : index
    %0 = vector.load %arg1[%c0, %c0_0] : memref<128x576xbf16, #tpu.memory_space<vmem>>, vector<128x576xbf16>
    %c0_1 = arith.constant 0 : index
    %c0_2 = arith.constant 0 : index
    %1 = vector.load %arg2[%c0_1, %c0_2] : memref<576x128xbf16, #tpu.memory_space<vmem>>, vector<576x128xbf16>
    %cst = arith.constant dense<0.000000e+00> : vector<128x128xf32>
    %2 = tpu.matmul %0, %1, %cst {dimension_numbers = #tpu.dot_dimension_numbers<[1], [0], [0], [1], [0, 0, 1, 1], [], []>} : vector<128x576xbf16>, vector<576x128xbf16>, vector<128x128xf32> -> vector<128x128xf32>
    %c0_3 = arith.constant 0 : index
    %c0_4 = arith.constant 0 : index
    %3 = vector.load %arg3[%c0_3, %c0_4] : memref<1x128xf32, #tpu.memory_space<vmem>>, vector<1x128xf32>
    %4 = vector.broadcast %3 : vector<1x128xf32> to vector<128x128xf32>
    %5 = arith.mulf %2, %4 : vector<128x128xf32>
    %c0_5 = arith.constant 0 : index
    %c0_6 = arith.constant 0 : index
    %6 = vector.load %arg4[%c0_5, %c0_6] : memref<1x128xf32, #tpu.memory_space<vmem>>, vector<1x128xf32>
    %7 = vector.broadcast %6 : vector<1x128xf32> to vector<128x128xf32>
    %8 = arith.addf %5, %7 : vector<128x128xf32>
    %cst_7 = arith.constant 0.000000e+00 : f32
    %9 = vector.broadcast %cst_7 : f32 to vector<128x128xf32>
    %10 = arith.maximumf %8, %9 : vector<128x128xf32>
    %11 = arith.truncf %10 : vector<128x128xf32> to vector<128x128xbf16>
    %c0_8 = arith.constant 0 : index
    %c0_9 = arith.constant 0 : index
    %12 = vector.load %arg5[%c0_8, %c0_9] : memref<128x128xbf16, #tpu.memory_space<vmem>>, vector<128x128xbf16>
    tpu.vector_store %arg5[%c0_8, %c0_9], %11 {strides = array<i32>} : memref<128x128xbf16, #tpu.memory_space<vmem>>, vector<128x128xbf16>,
    return
  }
  func.func @transform_0(%arg0: i32) -> (i32, i32) {
    %c0_i32 = arith.constant 0 : i32
    %c0_i32_0 = arith.constant 0 : i32
    return %arg0, %c0_i32 : i32, i32
  }
  func.func @transform_1(%arg0: i32) -> (i32, i32) {
    %c0_i32 = arith.constant 0 : i32
    %c0_i32_0 = arith.constant 0 : i32
    %c0_i32_1 = arith.constant 0 : i32
    return %c0_i32, %c0_i32_0 : i32, i32
  }
  func.func @transform_2(%arg0: i32) -> (i32, i32) {
    %c0_i32 = arith.constant 0 : i32
    %c0_i32_0 = arith.constant 0 : i32
    %c0_i32_1 = arith.constant 0 : i32
    return %c0_i32, %c0_i32_0 : i32, i32
  }
  func.func @transform_3(%arg0: i32) -> (i32, i32) {
    %c0_i32 = arith.constant 0 : i32
    %c0_i32_0 = arith.constant 0 : i32
    %c0_i32_1 = arith.constant 0 : i32
    return %c0_i32, %c0_i32_0 : i32, i32
  }
  func.func @transform_4(%arg0: i32) -> (i32, i32) {
    %c0_i32 = arith.constant 0 : i32
    %c0_i32_0 = arith.constant 0 : i32
    return %arg0, %c0_i32 : i32, i32
  }
}

module attributes {stable_mosaic.version = 11 : i64} {
  func.func @_mm_bn_act_kernel(%arg0: i32, %arg1: memref<128x1152xbf16, #tpu.memory_space<vmem>>, %arg2: memref<1152x128xbf16, #tpu.memory_space<vmem>>, %arg3: memref<1x128xf32, #tpu.memory_space<vmem>>, %arg4: memref<1x128xf32, #tpu.memory_space<vmem>>, %arg5: memref<128x64xbf16, #tpu.memory_space<vmem>>, %arg6: memref<64x128xbf16, #tpu.memory_space<vmem>>, %arg7: memref<1x128xf32, #tpu.memory_space<vmem>>, %arg8: memref<1x128xf32, #tpu.memory_space<vmem>>, %arg9: memref<128x128xf32, #tpu.memory_space<vmem>>) attributes {dimension_semantics = [#tpu.dimension_semantics<parallel>], iteration_bounds = array<i64: 1>, scalar_prefetch = 0 : i64, scratch_operands = 0 : i64, tpu.core_type = #tpu.core_type<tc>, window_params = [{transform_indices = @transform_0, window_bounds = array<i64: 128, 1152>}, {pipeline_mode = #tpu.pipeline_mode<synchronous>, transform_indices = @transform_1, window_bounds = array<i64: 1152, 128>}, {pipeline_mode = #tpu.pipeline_mode<synchronous>, transform_indices = @transform_2, window_bounds = array<i64: 1, 128>}, {pipeline_mode = #tpu.pipeline_mode<synchronous>, transform_indices = @transform_3, window_bounds = array<i64: 1, 128>}, {transform_indices = @transform_4, window_bounds = array<i64: 128, 64>}, {pipeline_mode = #tpu.pipeline_mode<synchronous>, transform_indices = @transform_5, window_bounds = array<i64: 64, 128>}, {pipeline_mode = #tpu.pipeline_mode<synchronous>, transform_indices = @transform_6, window_bounds = array<i64: 1, 128>}, {pipeline_mode = #tpu.pipeline_mode<synchronous>, transform_indices = @transform_7, window_bounds = array<i64: 1, 128>}, {transform_indices = @transform_8, window_bounds = array<i64: 128, 128>}]} {
    %c0 = arith.constant 0 : index
    %c0_0 = arith.constant 0 : index
    %0 = vector.load %arg1[%c0, %c0_0] : memref<128x1152xbf16, #tpu.memory_space<vmem>>, vector<128x1152xbf16>
    %c0_1 = arith.constant 0 : index
    %c0_2 = arith.constant 0 : index
    %1 = vector.load %arg2[%c0_1, %c0_2] : memref<1152x128xbf16, #tpu.memory_space<vmem>>, vector<1152x128xbf16>
    %cst = arith.constant dense<0.000000e+00> : vector<128x128xf32>
    %2 = tpu.matmul %0, %1, %cst {dimension_numbers = #tpu.dot_dimension_numbers<[1], [0], [0], [1], [0, 0, 1, 1], [], []>} : vector<128x1152xbf16>, vector<1152x128xbf16>, vector<128x128xf32> -> vector<128x128xf32>
    %c0_3 = arith.constant 0 : index
    %c0_4 = arith.constant 0 : index
    %3 = vector.load %arg3[%c0_3, %c0_4] : memref<1x128xf32, #tpu.memory_space<vmem>>, vector<1x128xf32>
    %4 = vector.broadcast %3 : vector<1x128xf32> to vector<128x128xf32>
    %5 = arith.mulf %2, %4 : vector<128x128xf32>
    %c0_5 = arith.constant 0 : index
    %c0_6 = arith.constant 0 : index
    %6 = vector.load %arg4[%c0_5, %c0_6] : memref<1x128xf32, #tpu.memory_space<vmem>>, vector<1x128xf32>
    %7 = vector.broadcast %6 : vector<1x128xf32> to vector<128x128xf32>
    %8 = arith.addf %5, %7 : vector<128x128xf32>
    %c0_7 = arith.constant 0 : index
    %c0_8 = arith.constant 0 : index
    %9 = vector.load %arg5[%c0_7, %c0_8] : memref<128x64xbf16, #tpu.memory_space<vmem>>, vector<128x64xbf16>
    %c0_9 = arith.constant 0 : index
    %c0_10 = arith.constant 0 : index
    %10 = vector.load %arg6[%c0_9, %c0_10] : memref<64x128xbf16, #tpu.memory_space<vmem>>, vector<64x128xbf16>
    %cst_11 = arith.constant dense<0.000000e+00> : vector<128x128xf32>
    %11 = tpu.matmul %9, %10, %cst_11 {dimension_numbers = #tpu.dot_dimension_numbers<[1], [0], [0], [1], [0, 0, 1, 1], [], []>} : vector<128x64xbf16>, vector<64x128xbf16>, vector<128x128xf32> -> vector<128x128xf32>
    %c0_12 = arith.constant 0 : index
    %c0_13 = arith.constant 0 : index
    %12 = vector.load %arg7[%c0_12, %c0_13] : memref<1x128xf32, #tpu.memory_space<vmem>>, vector<1x128xf32>
    %13 = vector.broadcast %12 : vector<1x128xf32> to vector<128x128xf32>
    %14 = arith.mulf %11, %13 : vector<128x128xf32>
    %c0_14 = arith.constant 0 : index
    %c0_15 = arith.constant 0 : index
    %15 = vector.load %arg8[%c0_14, %c0_15] : memref<1x128xf32, #tpu.memory_space<vmem>>, vector<1x128xf32>
    %16 = vector.broadcast %15 : vector<1x128xf32> to vector<128x128xf32>
    %17 = arith.addf %14, %16 : vector<128x128xf32>
    %18 = arith.addf %8, %17 : vector<128x128xf32>
    %cst_16 = arith.constant 0.000000e+00 : f32
    %19 = vector.broadcast %cst_16 : f32 to vector<128x128xf32>
    %20 = arith.maximumf %18, %19 : vector<128x128xf32>
    %c0_17 = arith.constant 0 : index
    %c0_18 = arith.constant 0 : index
    %21 = vector.load %arg9[%c0_17, %c0_18] : memref<128x128xf32, #tpu.memory_space<vmem>>, vector<128x128xf32>
    tpu.vector_store %arg9[%c0_17, %c0_18], %20 {strides = array<i32>} : memref<128x128xf32, #tpu.memory_space<vmem>>, vector<128x128xf32>,
    return
  }
  func.func @transform_0(%arg0: i32) -> (i32, i32) {
    %c0_i32 = arith.constant 0 : i32
    %c0_i32_0 = arith.constant 0 : i32
    return %arg0, %c0_i32 : i32, i32
  }
  func.func @transform_1(%arg0: i32) -> (i32, i32) {
    %c0_i32 = arith.constant 0 : i32
    %c0_i32_0 = arith.constant 0 : i32
    %c0_i32_1 = arith.constant 0 : i32
    return %c0_i32, %c0_i32_0 : i32, i32
  }
  func.func @transform_2(%arg0: i32) -> (i32, i32) {
    %c0_i32 = arith.constant 0 : i32
    %c0_i32_0 = arith.constant 0 : i32
    %c0_i32_1 = arith.constant 0 : i32
    return %c0_i32, %c0_i32_0 : i32, i32
  }
  func.func @transform_3(%arg0: i32) -> (i32, i32) {
    %c0_i32 = arith.constant 0 : i32
    %c0_i32_0 = arith.constant 0 : i32
    %c0_i32_1 = arith.constant 0 : i32
    return %c0_i32, %c0_i32_0 : i32, i32
  }
  func.func @transform_4(%arg0: i32) -> (i32, i32) {
    %c0_i32 = arith.constant 0 : i32
    %c0_i32_0 = arith.constant 0 : i32
    return %arg0, %c0_i32 : i32, i32
  }
  func.func @transform_5(%arg0: i32) -> (i32, i32) {
    %c0_i32 = arith.constant 0 : i32
    %c0_i32_0 = arith.constant 0 : i32
    %c0_i32_1 = arith.constant 0 : i32
    return %c0_i32, %c0_i32_0 : i32, i32
  }
  func.func @transform_6(%arg0: i32) -> (i32, i32) {
    %c0_i32 = arith.constant 0 : i32
    %c0_i32_0 = arith.constant 0 : i32
    %c0_i32_1 = arith.constant 0 : i32
    return %c0_i32, %c0_i32_0 : i32, i32
  }
  func.func @transform_7(%arg0: i32) -> (i32, i32) {
    %c0_i32 = arith.constant 0 : i32
    %c0_i32_0 = arith.constant 0 : i32
    %c0_i32_1 = arith.constant 0 : i32
    return %c0_i32, %c0_i32_0 : i32, i32
  }
  func.func @transform_8(%arg0: i32) -> (i32, i32) {
    %c0_i32 = arith.constant 0 : i32
    %c0_i32_0 = arith.constant 0 : i32
    return %arg0, %c0_i32 : i32, i32
  }
}

</mosaic_0001>

<bundles_post_ra>
// kernel: _lambda_.12
= control target key start
LH: loop header
LB: loop body
LE: loop exit
PB: predicated region body
PF: predicated region fallthrough
CT: control target
= control target key end

     0   :  { %s1363_s15 = smov 0   ;;  %s1730_s0 = inlined_call_operand.vmem [shape: bf16[2048,27], index: 0, kind: input, shape index: {}]   ;;  %s1731_s1 = inlined_call_operand.vmem [shape: bf16[27,8], index: 1, kind: input, shape index: {}]   ;;  %s1732_s2 = inlined_call_operand.vmem [shape: f32[1,8], index: 2, kind: input, shape index: {}]   ;;  %s1733_s3 = inlined_call_operand.vmem [shape: f32[1,8], index: 3, kind: input, shape index: {}]   ;;  %s1734_s4 = inlined_call_operand.vmem [shape: bf16[2048,8], index: 4, kind: output, shape index: {}]  }
   0x1 LB: > { %s1099_s16 = sadd.s32 4294967295, %s1335_s15   ;;  %p1103_p0 = scmp.ge.s32.totalorder %s1335_s15, 1  ;;  %s1335_s15 = sphi %s1363_s15, %s14_s15  }
   0x2   : > { %p163_p1 = scmp.lt.s32.totalorder %s1335_s15, 5 }
   0x4   : > { %p164_p2 = pnand %p1103_p0, %p163_p1 }
   0x5   : > { %s1104_s21 = sshll.u32 (!%p164_p2), %s1099_s16, 6 }
   0x6   : > { %167 = sbr.rel (%p164_p2) target bundleno = 287 (0x11f), region = 36  ;;  %p190_p3 = scmp.lt.s32.totalorder (!%p164_p2), %s1104_s21, 255 }
   0xb   : > { %v1242_v0 = vld [vmem:[%s1731_s1 + $0x8] sm:$0xf]  ;;  %v1311_v1 = vld [vmem:[%s1731_s1 + $0x8] sm:$0x30]  ;;  %vm538_vm0 = vcmask 1044480   ;;  %vm539_vm1 = vcmask 1045504  }
   0xc   : > { %v1243_v2 = vor.u32 %v1311_v1, %v1242_v0  ;;  %v1337_v3 = vmov 65535   ;;  %s1736_s21 = smov (!%p190_p3, %s1104_s21), 255  ;;  %v1310_v7 = vld [vmem:[%s1731_s1] sm:$0xff]  ;;  %vm441_vm2 = vcmask 220160   ;;  %vm978_vm3 = vcmask 60416  }
   0xd   : > { %v540_v4 = vsel %vm538_vm0, 4294967295, %v1337_v3  ;;  %s1105_s24 = sshll.u32 %s1736_s21, 2  ;;  %v1457_v40 = vld [vmem:[%s1732_s2] ss:$0 sm:$0xff] }
   0xe   : > { %v541_v5 = vsel %vm539_vm1, %v540_v4, 0  ;;  %s1388_s27 = scalar_lea.vmem %s1730_s0, %s1105_s24  ;;  %v1462_v41 = vld [vmem:[%s1733_s3] ss:$0 sm:$0xff]  ;;  %s1473_s8 = scalar_lea.vmem %s1734_s4, %s1105_s24 }
   0xf   : > { %v543_v6 = vand.u32 %v1243_v2, %v541_v5  ;;  %v1278_v8 = vld [vmem:[%s1388_s27] sm:$0xff]  ;;  %v1279_v12 = vld [vmem:[%s1388_s27 + $0x8] sm:$0xff]  ;;  %v1280_v16 = vld [vmem:[%s1388_s27 + $0x10] sm:$0xff] }
  0x10   : > { %v1286_v9 = vld [vmem:[%s1388_s27 + $0x40] sm:$0xff]  ;;  %v1287_v13 = vld [vmem:[%s1388_s27 + $0x48] sm:$0xff]  ;;  %v1288_v17 = vld [vmem:[%s1388_s27 + $0x50] sm:$0xff] }
  0x11   : > { %551 = vmatpush.bf16.msra.mxu0 %v543_v6  ;;  %1312 = vmatpush.bf16.msra.mxu1 %v543_v6  ;;  %v1294_v10 = vld [vmem:[%s1388_s27 + $0x80] sm:$0xff]  ;;  %v1295_v14 = vld [vmem:[%s1388_s27 + $0x88] sm:$0xff]  ;;  %v1296_v18 = vld [vmem:[%s1388_s27 + $0x90] sm:$0xff] }
  0x12   : > { %1313 = vmatpush.bf16.msra.mxu2 %v543_v6  ;;  %1314 = vmatpush.bf16.msra.mxu3 %v543_v6  ;;  %v1302_v11 = vld [vmem:[%s1388_s27 + $0xc0] sm:$0xff]  ;;  %v1303_v15 = vld [vmem:[%s1388_s27 + $0xc8] sm:$0xff]  ;;  %v1304_v19 = vld [vmem:[%s1388_s27 + $0xd0] sm:$0xff] }
  0x13   : > { %v1281_v20 = vld [vmem:[%s1388_s27 + $0x18] sm:$0xff]  ;;  %v1282_v24 = vld [vmem:[%s1388_s27 + $0x20] sm:$0xff]  ;;  %v1283_v28 = vld [vmem:[%s1388_s27 + $0x28] sm:$0xff] }
  0x14   : > { %v1289_v21 = vld [vmem:[%s1388_s27 + $0x58] sm:$0xff]  ;;  %v1290_v25 = vld [vmem:[%s1388_s27 + $0x60] sm:$0xff]  ;;  %v1291_v29 = vld [vmem:[%s1388_s27 + $0x68] sm:$0xff] }
  0x15   : > { %552 = vmatpush.bf16.msra.mxu0 %v1310_v7  ;;  %1315 = vmatpush.bf16.msra.mxu1 %v1310_v7  ;;  %v1297_v22 = vld [vmem:[%s1388_s27 + $0x98] sm:$0xff]  ;;  %v1298_v26 = vld [vmem:[%s1388_s27 + $0xa0] sm:$0xff]  ;;  %v1299_v30 = vld [vmem:[%s1388_s27 + $0xa8] sm:$0xff] }
  0x16   : > { %1316 = vmatpush.bf16.msra.mxu2 %v1310_v7  ;;  %1317 = vmatpush.bf16.msra.mxu3 %v1310_v7  ;;  %v1305_v23 = vld [vmem:[%s1388_s27 + $0xd8] sm:$0xff]  ;;  %v1306_v27 = vld [vmem:[%s1388_s27 + $0xe0] sm:$0xff]  ;;  %v1307_v31 = vld [vmem:[%s1388_s27 + $0xe8] sm:$0xff] }
  0x17   : > { %v1284_v32 = vld [vmem:[%s1388_s27 + $0x30] sm:$0xff]  ;;  %v1285_v36 = vld [vmem:[%s1388_s27 + $0x38] sm:$0xff] }
  0x18   : > { %1244 = vmatmul.msk.bf16.vlgmr.msra.gmra.mxu0 %vm441_vm2, %v1278_v8  ;;  %1252 = vmatmul.msk.bf16.vlgmr.msra.gmra.mxu1 %vm441_vm2, %v1286_v9  ;;  %v1292_v33 = vld [vmem:[%s1388_s27 + $0x70] sm:$0xff]  ;;  %v1293_v37 = vld [vmem:[%s1388_s27 + $0x78] sm:$0xff] }
  0x19   : > { %1260 = vmatmul.msk.bf16.vlgmr.msra.gmra.mxu2 %vm441_vm2, %v1294_v10  ;;  %1268 = vmatmul.msk.bf16.vlgmr.msra.gmra.mxu3 %vm441_vm2, %v1302_v11  ;;  %v1300_v34 = vld [vmem:[%s1388_s27 + $0xb0] sm:$0xff]  ;;  %v1301_v38 = vld [vmem:[%s1388_s27 + $0xb8] sm:$0xff] }
  0x1a   : > { %v1308_v35 = vld [vmem:[%s1388_s27 + $0xf0] sm:$0xff]  ;;  %v1309_v39 = vld [vmem:[%s1388_s27 + $0xf8] sm:$0xff] }
  0x28   : > { %1245 = vmatmul.msk.bf16.gmra.mxu0 %vm441_vm2, %v1279_v12  ;;  %1253 = vmatmul.msk.bf16.gmra.mxu1 %vm441_vm2, %v1287_v13 }
  0x29   : > { %1261 = vmatmul.msk.bf16.gmra.mxu2 %vm441_vm2, %v1295_v14  ;;  %1269 = vmatmul.msk.bf16.gmra.mxu3 %vm441_vm2, %v1303_v15 }
  0x38   : > { %1246 = vmatmul.msk.bf16.gmra.mxu0 %vm441_vm2, %v1280_v16  ;;  %1254 = vmatmul.msk.bf16.gmra.mxu1 %vm441_vm2, %v1288_v17 }
  0x39   : > { %1262 = vmatmul.msk.bf16.gmra.mxu2 %vm441_vm2, %v1296_v18  ;;  %1270 = vmatmul.msk.bf16.gmra.mxu3 %vm441_vm2, %v1304_v19 }
  0x48   : > { %1247 = vmatmul.msk.bf16.gmra.mxu0 %vm441_vm2, %v1281_v20  ;;  %1255 = vmatmul.msk.bf16.gmra.mxu1 %vm441_vm2, %v1289_v21 }
  0x49   : > { %1263 = vmatmul.msk.bf16.gmra.mxu2 %vm441_vm2, %v1297_v22  ;;  %1271 = vmatmul.msk.bf16.gmra.mxu3 %vm441_vm2, %v1305_v23 }
  0x58   : > { %1248 = vmatmul.msk.bf16.gmra.mxu0 %vm441_vm2, %v1282_v24  ;;  %1256 = vmatmul.msk.bf16.gmra.mxu1 %vm441_vm2, %v1290_v25 }
  0x59   : > { %1264 = vmatmul.msk.bf16.gmra.mxu2 %vm441_vm2, %v1298_v26  ;;  %1272 = vmatmul.msk.bf16.gmra.mxu3 %vm441_vm2, %v1306_v27 }
  0x68   : > { %1249 = vmatmul.msk.bf16.gmra.mxu0 %vm441_vm2, %v1283_v28  ;;  %1257 = vmatmul.msk.bf16.gmra.mxu1 %vm441_vm2, %v1291_v29 }
  0x69   : > { %1265 = vmatmul.msk.bf16.gmra.mxu2 %vm441_vm2, %v1299_v30  ;;  %1273 = vmatmul.msk.bf16.gmra.mxu3 %vm441_vm2, %v1307_v31 }
  0x78   : > { %1250 = vmatmul.msk.bf16.gmra.mxu0 %vm441_vm2, %v1284_v32  ;;  %1258 = vmatmul.msk.bf16.gmra.mxu1 %vm441_vm2, %v1292_v33 }
  0x79   : > { %1266 = vmatmul.msk.bf16.gmra.mxu2 %vm441_vm2, %v1300_v34  ;;  %1274 = vmatmul.msk.bf16.gmra.mxu3 %vm441_vm2, %v1308_v35 }
  0x88   : > { %1251 = vmatmul.msk.bf16.gmra.mxu0 %vm441_vm2, %v1285_v36  ;;  %1259 = vmatmul.msk.bf16.gmra.mxu1 %vm441_vm2, %v1293_v37 }
  0x89   : > { %1267 = vmatmul.msk.bf16.gmra.mxu2 %vm441_vm2, %v1301_v38  ;;  %1275 = vmatmul.msk.bf16.gmra.mxu3 %vm441_vm2, %v1309_v39 }
  0x95   : > { %v554_v42 = vpop.f32.mrf.mxu0  ;;  %v594_v43 = vpop.f32.mrf.mxu1 }
  0x96   : > { %v718_v44 = vmul.f32 %v1457_v40, %v554_v42  ;;  %v734_v45 = vmul.f32 %v1457_v40, %v594_v43 }
  0x98   : > { %v786_v46 = vadd.f32 %v1462_v41, %v718_v44  ;;  %v802_v47 = vadd.f32 %v1462_v41, %v734_v45 }
  0x9a   : > { %v850_v48 = vmax.f32 %v786_v46, 0.0  ;;  %v866_v49 = vmax.f32 %v802_v47, 0.0 }
  0x9c   : > { %v914_v50 = vpack.c.bf16 %v850_v48, %v850_v48  ;;  %v930_v51 = vpack.c.bf16 %v866_v49, %v866_v49  ;;  %v634_v52 = vpop.f32.mrf.mxu2  ;;  %v674_v53 = vpop.f32.mrf.mxu3 }
  0x9d   : > { %v750_v54 = vmul.f32 %v1457_v40, %v634_v52  ;;  %v766_v55 = vmul.f32 %v1457_v40, %v674_v53  ;;  %v556_v56 = vpop.f32.mrf.mxu0  ;;  %v596_v57 = vpop.f32.mrf.mxu1 }
  0x9e   : > { %979 = vst.msk [vmem:[%s1473_s8] sm:$0xf] %vm978_vm3, %v914_v50  ;;  %v719_v58 = vmul.f32 %v1457_v40, %v556_v56  ;;  %v735_v59 = vmul.f32 %v1457_v40, %v596_v57 }
  0x9f   : > { %995 = vst.msk [vmem:[%s1473_s8 + $0x40] sm:$0xf] %vm978_vm3, %v930_v51  ;;  %v818_v60 = vadd.f32 %v1462_v41, %v750_v54  ;;  %v834_v61 = vadd.f32 %v1462_v41, %v766_v55 }
  0xa0   : > { %v787_v62 = vadd.f32 %v1462_v41, %v719_v58  ;;  %v803_v63 = vadd.f32 %v1462_v41, %v735_v59 }
  0xa1   : > { %v882_v0 = vmax.f32 %v818_v60, 0.0  ;;  %v898_v1 = vmax.f32 %v834_v61, 0.0 }
  0xa2   : > { %v851_v2 = vmax.f32 %v787_v62, 0.0  ;;  %v867_v3 = vmax.f32 %v803_v63, 0.0 }
  0xa3   : > { %v946_v4 = vpack.c.bf16 %v882_v0, %v882_v0  ;;  %v962_v5 = vpack.c.bf16 %v898_v1, %v898_v1 }
  0xa4   : > { %v915_v6 = vpack.c.bf16 %v851_v2, %v851_v2  ;;  %v931_v7 = vpack.c.bf16 %v867_v3, %v867_v3  ;;  %v636_v8 = vpop.f32.mrf.mxu2  ;;  %v676_v9 = vpop.f32.mrf.mxu3 }
  0xa5   : > { %1011 = vst.msk [vmem:[%s1473_s8 + $0x80] sm:$0xf] %vm978_vm3, %v946_v4  ;;  %v751_v10 = vmul.f32 %v1457_v40, %v636_v8  ;;  %v767_v11 = vmul.f32 %v1457_v40, %v676_v9  ;;  %v559_v12 = vpop.f32.mrf.mxu0  ;;  %v599_v13 = vpop.f32.mrf.mxu1 }
  0xa6   : > { %1027 = vst.msk [vmem:[%s1473_s8 + $0xc0] sm:$0xf] %vm978_vm3, %v962_v5  ;;  %v720_v14 = vmul.f32 %v1457_v40, %v559_v12  ;;  %v736_v15 = vmul.f32 %v1457_v40, %v599_v13 }
  0xa7   : > { %980 = vst.msk [vmem:[%s1473_s8 + $0x4] sm:$0xf] %vm978_vm3, %v915_v6  ;;  %v819_v16 = vadd.f32 %v1462_v41, %v751_v10  ;;  %v835_v17 = vadd.f32 %v1462_v41, %v767_v11 }
  0xa8   : > { %996 = vst.msk [vmem:[%s1473_s8 + $0x44] sm:$0xf] %vm978_vm3, %v931_v7  ;;  %v788_v18 = vadd.f32 %v1462_v41, %v720_v14  ;;  %v804_v19 = vadd.f32 %v1462_v41, %v736_v15 }
  0xa9   : > { %v883_v20 = vmax.f32 %v819_v16, 0.0  ;;  %v899_v21 = vmax.f32 %v835_v17, 0.0 }
  0xaa   : > { %v852_v22 = vmax.f32 %v788_v18, 0.0  ;;  %v868_v23 = vmax.f32 %v804_v19, 0.0 }
  0xab   : > { %v947_v24 = vpack.c.bf16 %v883_v20, %v883_v20  ;;  %v963_v25 = vpack.c.bf16 %v899_v21, %v899_v21 }
  0xac   : > { %v916_v26 = vpack.c.bf16 %v852_v22, %v852_v22  ;;  %v932_v27 = vpack.c.bf16 %v868_v23, %v868_v23  ;;  %v639_v28 = vpop.f32.mrf.mxu2  ;;  %v679_v29 = vpop.f32.mrf.mxu3 }
  0xad   : > { %1012 = vst.msk [vmem:[%s1473_s8 + $0x84] sm:$0xf] %vm978_vm3, %v947_v24  ;;  %v752_v30 = vmul.f32 %v1457_v40, %v639_v28  ;;  %v768_v31 = vmul.f32 %v1457_v40, %v679_v29  ;;  %v561_v32 = vpop.f32.mrf.mxu0  ;;  %v601_v33 = vpop.f32.mrf.mxu1 }
  0xae   : > { %1028 = vst.msk [vmem:[%s1473_s8 + $0xc4] sm:$0xf] %vm978_vm3, %v963_v25  ;;  %v721_v34 = vmul.f32 %v1457_v40, %v561_v32  ;;  %v737_v35 = vmul.f32 %v1457_v40, %v601_v33 }
  0xaf   : > { %981 = vst.msk [vmem:[%s1473_s8 + $0x8] sm:$0xf] %vm978_vm3, %v916_v26  ;;  %v820_v36 = vadd.f32 %v1462_v41, %v752_v30  ;;  %v836_v37 = vadd.f32 %v1462_v41, %v768_v31 }
  0xb0   : > { %997 = vst.msk [vmem:[%s1473_s8 + $0x48] sm:$0xf] %vm978_vm3, %v932_v27  ;;  %v789_v38 = vadd.f32 %v1462_v41, %v721_v34  ;;  %v805_v39 = vadd.f32 %v1462_v41, %v737_v35 }
  0xb1   : > { %v884_v42 = vmax.f32 %v820_v36, 0.0  ;;  %v900_v43 = vmax.f32 %v836_v37, 0.0 }
  0xb2   : > { %v853_v44 = vmax.f32 %v789_v38, 0.0  ;;  %v869_v45 = vmax.f32 %v805_v39, 0.0 }
  0xb3   : > { %v948_v46 = vpack.c.bf16 %v884_v42, %v884_v42  ;;  %v964_v47 = vpack.c.bf16 %v900_v43, %v900_v43 }
  0xb4   : > { %v917_v48 = vpack.c.bf16 %v853_v44, %v853_v44  ;;  %v933_v49 = vpack.c.bf16 %v869_v45, %v869_v45  ;;  %v641_v50 = vpop.f32.mrf.mxu2  ;;  %v681_v51 = vpop.f32.mrf.mxu3 }
  0xb5   : > { %1013 = vst.msk [vmem:[%s1473_s8 + $0x88] sm:$0xf] %vm978_vm3, %v948_v46  ;;  %v753_v52 = vmul.f32 %v1457_v40, %v641_v50  ;;  %v769_v53 = vmul.f32 %v1457_v40, %v681_v51  ;;  %v564_v54 = vpop.f32.mrf.mxu0  ;;  %v604_v55 = vpop.f32.mrf.mxu1 }
  0xb6   : > { %1029 = vst.msk [vmem:[%s1473_s8 + $0xc8] sm:$0xf] %vm978_vm3, %v964_v47  ;;  %v722_v56 = vmul.f32 %v1457_v40, %v564_v54  ;;  %v738_v57 = vmul.f32 %v1457_v40, %v604_v55 }
  0xb7   : > { %982 = vst.msk [vmem:[%s1473_s8 + $0xc] sm:$0xf] %vm978_vm3, %v917_v48  ;;  %v821_v58 = vadd.f32 %v1462_v41, %v753_v52  ;;  %v837_v59 = vadd.f32 %v1462_v41, %v769_v53 }
  0xb8   : > { %998 = vst.msk [vmem:[%s1473_s8 + $0x4c] sm:$0xf] %vm978_vm3, %v933_v49  ;;  %v790_v60 = vadd.f32 %v1462_v41, %v722_v56  ;;  %v806_v61 = vadd.f32 %v1462_v41, %v738_v57 }
  0xb9   : > { %v885_v62 = vmax.f32 %v821_v58, 0.0  ;;  %v901_v63 = vmax.f32 %v837_v59, 0.0 }
  0xba   : > { %v854_v0 = vmax.f32 %v790_v60, 0.0  ;;  %v870_v1 = vmax.f32 %v806_v61, 0.0 }
  0xbb   : > { %v949_v2 = vpack.c.bf16 %v885_v62, %v885_v62  ;;  %v965_v3 = vpack.c.bf16 %v901_v63, %v901_v63 }
  0xbc   : > { %v918_v4 = vpack.c.bf16 %v854_v0, %v854_v0  ;;  %v934_v5 = vpack.c.bf16 %v870_v1, %v870_v1  ;;  %v644_v6 = vpop.f32.mrf.mxu2  ;;  %v684_v7 = vpop.f32.mrf.mxu3 }
  0xbd   : > { %1014 = vst.msk [vmem:[%s1473_s8 + $0x8c] sm:$0xf] %vm978_vm3, %v949_v2  ;;  %v754_v8 = vmul.f32 %v1457_v40, %v644_v6  ;;  %v770_v9 = vmul.f32 %v1457_v40, %v684_v7  ;;  %v566_v10 = vpop.f32.mrf.mxu0  ;;  %v606_v11 = vpop.f32.mrf.mxu1 }
  0xbe   : > { %1030 = vst.msk [vmem:[%s1473_s8 + $0xcc] sm:$0xf] %vm978_vm3, %v965_v3  ;;  %v723_v12 = vmul.f32 %v1457_v40, %v566_v10  ;;  %v739_v13 = vmul.f32 %v1457_v40, %v606_v11 }
  0xbf   : > { %983 = vst.msk [vmem:[%s1473_s8 + $0x10] sm:$0xf] %vm978_vm3, %v918_v4  ;;  %v822_v14 = vadd.f32 %v1462_v41, %v754_v8  ;;  %v838_v15 = vadd.f32 %v1462_v41, %v770_v9 }
  0xc0   : > { %999 = vst.msk [vmem:[%s1473_s8 + $0x50] sm:$0xf] %vm978_vm3, %v934_v5  ;;  %v791_v16 = vadd.f32 %v1462_v41, %v723_v12  ;;  %v807_v17 = vadd.f32 %v1462_v41, %v739_v13 }
  0xc1   : > { %v886_v18 = vmax.f32 %v822_v14, 0.0  ;;  %v902_v19 = vmax.f32 %v838_v15, 0.0 }
  0xc2   : > { %v855_v20 = vmax.f32 %v791_v16, 0.0  ;;  %v871_v21 = vmax.f32 %v807_v17, 0.0 }
  0xc3   : > { %v950_v22 = vpack.c.bf16 %v886_v18, %v886_v18  ;;  %v966_v23 = vpack.c.bf16 %v902_v19, %v902_v19 }
  0xc4   : > { %v919_v24 = vpack.c.bf16 %v855_v20, %v855_v20  ;;  %v935_v25 = vpack.c.bf16 %v871_v21, %v871_v21  ;;  %v646_v26 = vpop.f32.mrf.mxu2  ;;  %v686_v27 = vpop.f32.mrf.mxu3 }
  0xc5   : > { %1015 = vst.msk [vmem:[%s1473_s8 + $0x90] sm:$0xf] %vm978_vm3, %v950_v22  ;;  %v755_v28 = vmul.f32 %v1457_v40, %v646_v26  ;;  %v771_v29 = vmul.f32 %v1457_v40, %v686_v27  ;;  %v569_v30 = vpop.f32.mrf.mxu0  ;;  %v609_v31 = vpop.f32.mrf.mxu1 }
  0xc6   : > { %1031 = vst.msk [vmem:[%s1473_s8 + $0xd0] sm:$0xf] %vm978_vm3, %v966_v23  ;;  %v724_v32 = vmul.f32 %v1457_v40, %v569_v30  ;;  %v740_v33 = vmul.f32 %v1457_v40, %v609_v31 }
  0xc7   : > { %984 = vst.msk [vmem:[%s1473_s8 + $0x14] sm:$0xf] %vm978_vm3, %v919_v24  ;;  %v823_v34 = vadd.f32 %v1462_v41, %v755_v28  ;;  %v839_v35 = vadd.f32 %v1462_v41, %v771_v29 }
  0xc8   : > { %1000 = vst.msk [vmem:[%s1473_s8 + $0x54] sm:$0xf] %vm978_vm3, %v935_v25  ;;  %v792_v36 = vadd.f32 %v1462_v41, %v724_v32  ;;  %v808_v37 = vadd.f32 %v1462_v41, %v740_v33 }
  0xc9   : > { %v887_v38 = vmax.f32 %v823_v34, 0.0  ;;  %v903_v39 = vmax.f32 %v839_v35, 0.0 }
  0xca   : > { %v856_v42 = vmax.f32 %v792_v36, 0.0  ;;  %v872_v43 = vmax.f32 %v808_v37, 0.0 }
  0xcb   : > { %v951_v44 = vpack.c.bf16 %v887_v38, %v887_v38  ;;  %v967_v45 = vpack.c.bf16 %v903_v39, %v903_v39 }
  0xcc   : > { %v920_v46 = vpack.c.bf16 %v856_v42, %v856_v42  ;;  %v936_v47 = vpack.c.bf16 %v872_v43, %v872_v43  ;;  %v649_v48 = vpop.f32.mrf.mxu2  ;;  %v689_v49 = vpop.f32.mrf.mxu3 }
  0xcd   : > { %1016 = vst.msk [vmem:[%s1473_s8 + $0x94] sm:$0xf] %vm978_vm3, %v951_v44  ;;  %v756_v50 = vmul.f32 %v1457_v40, %v649_v48  ;;  %v772_v51 = vmul.f32 %v1457_v40, %v689_v49  ;;  %v571_v52 = vpop.f32.mrf.mxu0  ;;  %v611_v53 = vpop.f32.mrf.mxu1 }
  0xce   : > { %1032 = vst.msk [vmem:[%s1473_s8 + $0xd4] sm:$0xf] %vm978_vm3, %v967_v45  ;;  %v725_v54 = vmul.f32 %v1457_v40, %v571_v52  ;;  %v741_v55 = vmul.f32 %v1457_v40, %v611_v53 }
  0xcf   : > { %985 = vst.msk [vmem:[%s1473_s8 + $0x18] sm:$0xf] %vm978_vm3, %v920_v46  ;;  %v824_v56 = vadd.f32 %v1462_v41, %v756_v50  ;;  %v840_v57 = vadd.f32 %v1462_v41, %v772_v51 }
  0xd0   : > { %1001 = vst.msk [vmem:[%s1473_s8 + $0x58] sm:$0xf] %vm978_vm3, %v936_v47  ;;  %v793_v58 = vadd.f32 %v1462_v41, %v725_v54  ;;  %v809_v59 = vadd.f32 %v1462_v41, %v741_v55 }
  0xd1   : > { %v888_v60 = vmax.f32 %v824_v56, 0.0  ;;  %v904_v61 = vmax.f32 %v840_v57, 0.0 }
  0xd2   : > { %v857_v62 = vmax.f32 %v793_v58, 0.0  ;;  %v873_v63 = vmax.f32 %v809_v59, 0.0 }
  0xd3   : > { %v952_v0 = vpack.c.bf16 %v888_v60, %v888_v60  ;;  %v968_v1 = vpack.c.bf16 %v904_v61, %v904_v61 }
  0xd4   : > { %v921_v2 = vpack.c.bf16 %v857_v62, %v857_v62  ;;  %v937_v3 = vpack.c.bf16 %v873_v63, %v873_v63  ;;  %v651_v4 = vpop.f32.mrf.mxu2  ;;  %v691_v5 = vpop.f32.mrf.mxu3 }
  0xd5   : > { %1017 = vst.msk [vmem:[%s1473_s8 + $0x98] sm:$0xf] %vm978_vm3, %v952_v0  ;;  %v757_v6 = vmul.f32 %v1457_v40, %v651_v4  ;;  %v773_v7 = vmul.f32 %v1457_v40, %v691_v5  ;;  %v574_v8 = vpop.f32.mrf.mxu0  ;;  %v614_v9 = vpop.f32.mrf.mxu1 }
  0xd6   : > { %1033 = vst.msk [vmem:[%s1473_s8 + $0xd8] sm:$0xf] %vm978_vm3, %v968_v1  ;;  %v726_v10 = vmul.f32 %v1457_v40, %v574_v8  ;;  %v742_v11 = vmul.f32 %v1457_v40, %v614_v9 }
  0xd7   : > { %986 = vst.msk [vmem:[%s1473_s8 + $0x1c] sm:$0xf] %vm978_vm3, %v921_v2  ;;  %v825_v12 = vadd.f32 %v1462_v41, %v757_v6  ;;  %v841_v13 = vadd.f32 %v1462_v41, %v773_v7 }
  0xd8   : > { %1002 = vst.msk [vmem:[%s1473_s8 + $0x5c] sm:$0xf] %vm978_vm3, %v937_v3  ;;  %v794_v14 = vadd.f32 %v1462_v41, %v726_v10  ;;  %v810_v15 = vadd.f32 %v1462_v41, %v742_v11 }
  0xd9   : > { %v889_v16 = vmax.f32 %v825_v12, 0.0  ;;  %v905_v17 = vmax.f32 %v841_v13, 0.0 }
  0xda   : > { %v858_v18 = vmax.f32 %v794_v14, 0.0  ;;  %v874_v19 = vmax.f32 %v810_v15, 0.0 }
  0xdb   : > { %v953_v20 = vpack.c.bf16 %v889_v16, %v889_v16  ;;  %v969_v21 = vpack.c.bf16 %v905_v17, %v905_v17 }
  0xdc   : > { %v922_v22 = vpack.c.bf16 %v858_v18, %v858_v18  ;;  %v938_v23 = vpack.c.bf16 %v874_v19, %v874_v19  ;;  %v654_v24 = vpop.f32.mrf.mxu2  ;;  %v694_v25 = vpop.f32.mrf.mxu3 }
  0xdd   : > { %1018 = vst.msk [vmem:[%s1473_s8 + $0x9c] sm:$0xf] %vm978_vm3, %v953_v20  ;;  %v758_v26 = vmul.f32 %v1457_v40, %v654_v24  ;;  %v774_v27 = vmul.f32 %v1457_v40, %v694_v25  ;;  %v576_v28 = vpop.f32.mrf.mxu0  ;;  %v616_v29 = vpop.f32.mrf.mxu1 }
  0xde   : > { %1034 = vst.msk [vmem:[%s1473_s8 + $0xdc] sm:$0xf] %vm978_vm3, %v969_v21  ;;  %v727_v30 = vmul.f32 %v1457_v40, %v576_v28  ;;  %v743_v31 = vmul.f32 %v1457_v40, %v616_v29 }
  0xdf   : > { %987 = vst.msk [vmem:[%s1473_s8 + $0x20] sm:$0xf] %vm978_vm3, %v922_v22  ;;  %v826_v32 = vadd.f32 %v1462_v41, %v758_v26  ;;  %v842_v33 = vadd.f32 %v1462_v41, %v774_v27 }
  0xe0   : > { %1003 = vst.msk [vmem:[%s1473_s8 + $0x60] sm:$0xf] %vm978_vm3, %v938_v23  ;;  %v795_v34 = vadd.f32 %v1462_v41, %v727_v30  ;;  %v811_v35 = vadd.f32 %v1462_v41, %v743_v31 }
  0xe1   : > { %v890_v36 = vmax.f32 %v826_v32, 0.0  ;;  %v906_v37 = vmax.f32 %v842_v33, 0.0 }
  0xe2   : > { %v859_v38 = vmax.f32 %v795_v34, 0.0  ;;  %v875_v39 = vmax.f32 %v811_v35, 0.0 }
  0xe3   : > { %v954_v42 = vpack.c.bf16 %v890_v36, %v890_v36  ;;  %v970_v43 = vpack.c.bf16 %v906_v37, %v906_v37 }
  0xe4   : > { %v923_v44 = vpack.c.bf16 %v859_v38, %v859_v38  ;;  %v939_v45 = vpack.c.bf16 %v875_v39, %v875_v39  ;;  %v656_v46 = vpop.f32.mrf.mxu2  ;;  %v696_v47 = vpop.f32.mrf.mxu3 }
  0xe5   : > { %1019 = vst.msk [vmem:[%s1473_s8 + $0xa0] sm:$0xf] %vm978_vm3, %v954_v42  ;;  %v759_v48 = vmul.f32 %v1457_v40, %v656_v46  ;;  %v775_v49 = vmul.f32 %v1457_v40, %v696_v47  ;;  %v579_v50 = vpop.f32.mrf.mxu0  ;;  %v619_v51 = vpop.f32.mrf.mxu1 }
  0xe6   : > { %1035 = vst.msk [vmem:[%s1473_s8 + $0xe0] sm:$0xf] %vm978_vm3, %v970_v43  ;;  %v728_v52 = vmul.f32 %v1457_v40, %v579_v50  ;;  %v744_v53 = vmul.f32 %v1457_v40, %v619_v51 }
  0xe7   : > { %988 = vst.msk [vmem:[%s1473_s8 + $0x24] sm:$0xf] %vm978_vm3, %v923_v44  ;;  %v827_v54 = vadd.f32 %v1462_v41, %v759_v48  ;;  %v843_v55 = vadd.f32 %v1462_v41, %v775_v49 }
  0xe8   : > { %1004 = vst.msk [vmem:[%s1473_s8 + $0x64] sm:$0xf] %vm978_vm3, %v939_v45  ;;  %v796_v56 = vadd.f32 %v1462_v41, %v728_v52  ;;  %v812_v57 = vadd.f32 %v1462_v41, %v744_v53 }
  0xe9   : > { %v891_v58 = vmax.f32 %v827_v54, 0.0  ;;  %v907_v59 = vmax.f32 %v843_v55, 0.0 }
  0xea   : > { %v860_v60 = vmax.f32 %v796_v56, 0.0  ;;  %v876_v61 = vmax.f32 %v812_v57, 0.0 }
  0xeb   : > { %v955_v62 = vpack.c.bf16 %v891_v58, %v891_v58  ;;  %v971_v63 = vpack.c.bf16 %v907_v59, %v907_v59 }
  0xec   : > { %v924_v0 = vpack.c.bf16 %v860_v60, %v860_v60  ;;  %v940_v1 = vpack.c.bf16 %v876_v61, %v876_v61  ;;  %v659_v2 = vpop.f32.mrf.mxu2  ;;  %v699_v3 = vpop.f32.mrf.mxu3 }
  0xed   : > { %1020 = vst.msk [vmem:[%s1473_s8 + $0xa4] sm:$0xf] %vm978_vm3, %v955_v62  ;;  %v760_v4 = vmul.f32 %v1457_v40, %v659_v2  ;;  %v776_v5 = vmul.f32 %v1457_v40, %v699_v3  ;;  %v581_v6 = vpop.f32.mrf.mxu0  ;;  %v621_v7 = vpop.f32.mrf.mxu1 }
  0xee   : > { %1036 = vst.msk [vmem:[%s1473_s8 + $0xe4] sm:$0xf] %vm978_vm3, %v971_v63  ;;  %v729_v8 = vmul.f32 %v1457_v40, %v581_v6  ;;  %v745_v9 = vmul.f32 %v1457_v40, %v621_v7 }
  0xef   : > { %989 = vst.msk [vmem:[%s1473_s8 + $0x28] sm:$0xf] %vm978_vm3, %v924_v0  ;;  %v828_v10 = vadd.f32 %v1462_v41, %v760_v4  ;;  %v844_v11 = vadd.f32 %v1462_v41, %v776_v5 }
  0xf0   : > { %1005 = vst.msk [vmem:[%s1473_s8 + $0x68] sm:$0xf] %vm978_vm3, %v940_v1  ;;  %v797_v12 = vadd.f32 %v1462_v41, %v729_v8  ;;  %v813_v13 = vadd.f32 %v1462_v41, %v745_v9 }
  0xf1   : > { %v892_v14 = vmax.f32 %v828_v10, 0.0  ;;  %v908_v15 = vmax.f32 %v844_v11, 0.0 }
  0xf2   : > { %v861_v16 = vmax.f32 %v797_v12, 0.0  ;;  %v877_v17 = vmax.f32 %v813_v13, 0.0 }
  0xf3   : > { %v956_v18 = vpack.c.bf16 %v892_v14, %v892_v14  ;;  %v972_v19 = vpack.c.bf16 %v908_v15, %v908_v15 }
  0xf4   : > { %v925_v20 = vpack.c.bf16 %v861_v16, %v861_v16  ;;  %v941_v21 = vpack.c.bf16 %v877_v17, %v877_v17  ;;  %v661_v22 = vpop.f32.mrf.mxu2  ;;  %v701_v23 = vpop.f32.mrf.mxu3 }
  0xf5   : > { %1021 = vst.msk [vmem:[%s1473_s8 + $0xa8] sm:$0xf] %vm978_vm3, %v956_v18  ;;  %v761_v24 = vmul.f32 %v1457_v40, %v661_v22  ;;  %v777_v25 = vmul.f32 %v1457_v40, %v701_v23  ;;  %v584_v26 = vpop.f32.mrf.mxu0  ;;  %v624_v27 = vpop.f32.mrf.mxu1 }
  0xf6   : > { %1037 = vst.msk [vmem:[%s1473_s8 + $0xe8] sm:$0xf] %vm978_vm3, %v972_v19  ;;  %v730_v28 = vmul.f32 %v1457_v40, %v584_v26  ;;  %v746_v29 = vmul.f32 %v1457_v40, %v624_v27 }
  0xf7   : > { %990 = vst.msk [vmem:[%s1473_s8 + $0x2c] sm:$0xf] %vm978_vm3, %v925_v20  ;;  %v829_v30 = vadd.f32 %v1462_v41, %v761_v24  ;;  %v845_v31 = vadd.f32 %v1462_v41, %v777_v25 }
  0xf8   : > { %1006 = vst.msk [vmem:[%s1473_s8 + $0x6c] sm:$0xf] %vm978_vm3, %v941_v21  ;;  %v798_v32 = vadd.f32 %v1462_v41, %v730_v28  ;;  %v814_v33 = vadd.f32 %v1462_v41, %v746_v29 }
  0xf9   : > { %v893_v34 = vmax.f32 %v829_v30, 0.0  ;;  %v909_v35 = vmax.f32 %v845_v31, 0.0 }
  0xfa   : > { %v862_v36 = vmax.f32 %v798_v32, 0.0  ;;  %v878_v37 = vmax.f32 %v814_v33, 0.0 }
  0xfb   : > { %v957_v38 = vpack.c.bf16 %v893_v34, %v893_v34  ;;  %v973_v39 = vpack.c.bf16 %v909_v35, %v909_v35 }
  0xfc   : > { %v926_v42 = vpack.c.bf16 %v862_v36, %v862_v36  ;;  %v942_v43 = vpack.c.bf16 %v878_v37, %v878_v37  ;;  %v664_v44 = vpop.f32.mrf.mxu2  ;;  %v704_v45 = vpop.f32.mrf.mxu3 }
  0xfd   : > { %1022 = vst.msk [vmem:[%s1473_s8 + $0xac] sm:$0xf] %vm978_vm3, %v957_v38  ;;  %v762_v46 = vmul.f32 %v1457_v40, %v664_v44  ;;  %v778_v47 = vmul.f32 %v1457_v40, %v704_v45  ;;  %v586_v48 = vpop.f32.mrf.mxu0  ;;  %v626_v49 = vpop.f32.mrf.mxu1 }
  0xfe   : > { %1038 = vst.msk [vmem:[%s1473_s8 + $0xec] sm:$0xf] %vm978_vm3, %v973_v39  ;;  %v731_v50 = vmul.f32 %v1457_v40, %v586_v48  ;;  %v747_v51 = vmul.f32 %v1457_v40, %v626_v49 }
  0xff   : > { %991 = vst.msk [vmem:[%s1473_s8 + $0x30] sm:$0xf] %vm978_vm3, %v926_v42  ;;  %v830_v52 = vadd.f32 %v1462_v41, %v762_v46  ;;  %v846_v53 = vadd.f32 %v1462_v41, %v778_v47 }
 0x100   : > { %1007 = vst.msk [vmem:[%s1473_s8 + $0x70] sm:$0xf] %vm978_vm3, %v942_v43  ;;  %v799_v54 = vadd.f32 %v1462_v41, %v731_v50  ;;  %v815_v55 = vadd.f32 %v1462_v41, %v747_v51 }
 0x101   : > { %v894_v56 = vmax.f32 %v830_v52, 0.0  ;;  %v910_v57 = vmax.f32 %v846_v53, 0.0 }
 0x102   : > { %v863_v58 = vmax.f32 %v799_v54, 0.0  ;;  %v879_v59 = vmax.f32 %v815_v55, 0.0 }
 0x103   : > { %v958_v60 = vpack.c.bf16 %v894_v56, %v894_v56  ;;  %v974_v61 = vpack.c.bf16 %v910_v57, %v910_v57 }
 0x104   : > { %v927_v62 = vpack.c.bf16 %v863_v58, %v863_v58  ;;  %v943_v63 = vpack.c.bf16 %v879_v59, %v879_v59  ;;  %v666_v0 = vpop.f32.mrf.mxu2  ;;  %v706_v1 = vpop.f32.mrf.mxu3 }
 0x105   : > { %1023 = vst.msk [vmem:[%s1473_s8 + $0xb0] sm:$0xf] %vm978_vm3, %v958_v60  ;;  %v763_v2 = vmul.f32 %v1457_v40, %v666_v0  ;;  %v779_v3 = vmul.f32 %v1457_v40, %v706_v1  ;;  %v589_v4 = vpop.f32.mrf.mxu0  ;;  %v629_v5 = vpop.f32.mrf.mxu1 }
 0x106   : > { %1039 = vst.msk [vmem:[%s1473_s8 + $0xf0] sm:$0xf] %vm978_vm3, %v974_v61  ;;  %v732_v6 = vmul.f32 %v1457_v40, %v589_v4  ;;  %v748_v7 = vmul.f32 %v1457_v40, %v629_v5 }
 0x107   : > { %992 = vst.msk [vmem:[%s1473_s8 + $0x34] sm:$0xf] %vm978_vm3, %v927_v62  ;;  %v831_v8 = vadd.f32 %v1462_v41, %v763_v2  ;;  %v847_v9 = vadd.f32 %v1462_v41, %v779_v3 }
 0x108   : > { %1008 = vst.msk [vmem:[%s1473_s8 + $0x74] sm:$0xf] %vm978_vm3, %v943_v63  ;;  %v800_v10 = vadd.f32 %v1462_v41, %v732_v6  ;;  %v816_v11 = vadd.f32 %v1462_v41, %v748_v7 }
 0x109   : > { %v895_v12 = vmax.f32 %v831_v8, 0.0  ;;  %v911_v13 = vmax.f32 %v847_v9, 0.0 }
 0x10a   : > { %v864_v14 = vmax.f32 %v800_v10, 0.0  ;;  %v880_v15 = vmax.f32 %v816_v11, 0.0 }
 0x10b   : > { %v959_v16 = vpack.c.bf16 %v895_v12, %v895_v12  ;;  %v975_v17 = vpack.c.bf16 %v911_v13, %v911_v13 }
 0x10c   : > { %v928_v18 = vpack.c.bf16 %v864_v14, %v864_v14  ;;  %v944_v19 = vpack.c.bf16 %v880_v15, %v880_v15  ;;  %v669_v20 = vpop.f32.mrf.mxu2  ;;  %v709_v21 = vpop.f32.mrf.mxu3 }
 0x10d   : > { %1024 = vst.msk [vmem:[%s1473_s8 + $0xb4] sm:$0xf] %vm978_vm3, %v959_v16  ;;  %v764_v22 = vmul.f32 %v1457_v40, %v669_v20  ;;  %v780_v23 = vmul.f32 %v1457_v40, %v709_v21  ;;  %v591_v24 = vpop.f32.mrf.mxu0  ;;  %v631_v25 = vpop.f32.mrf.mxu1 }
 0x10e   : > { %1040 = vst.msk [vmem:[%s1473_s8 + $0xf4] sm:$0xf] %vm978_vm3, %v975_v17  ;;  %v733_v26 = vmul.f32 %v1457_v40, %v591_v24  ;;  %v749_v27 = vmul.f32 %v1457_v40, %v631_v25 }
 0x10f   : > { %993 = vst.msk [vmem:[%s1473_s8 + $0x38] sm:$0xf] %vm978_vm3, %v928_v18  ;;  %v832_v28 = vadd.f32 %v1462_v41, %v764_v22  ;;  %v848_v29 = vadd.f32 %v1462_v41, %v780_v23 }
 0x110   : > { %1009 = vst.msk [vmem:[%s1473_s8 + $0x78] sm:$0xf] %vm978_vm3, %v944_v19  ;;  %v801_v30 = vadd.f32 %v1462_v41, %v733_v26  ;;  %v817_v31 = vadd.f32 %v1462_v41, %v749_v27 }
 0x111   : > { %v896_v32 = vmax.f32 %v832_v28, 0.0  ;;  %v912_v33 = vmax.f32 %v848_v29, 0.0 }
 0x112   : > { %v865_v34 = vmax.f32 %v801_v30, 0.0  ;;  %v881_v35 = vmax.f32 %v817_v31, 0.0 }
 0x113   : > { %v960_v36 = vpack.c.bf16 %v896_v32, %v896_v32  ;;  %v976_v37 = vpack.c.bf16 %v912_v33, %v912_v33 }
 0x114   : > { %v929_v38 = vpack.c.bf16 %v865_v34, %v865_v34  ;;  %v945_v39 = vpack.c.bf16 %v881_v35, %v881_v35  ;;  %v671_v42 = vpop.f32.mrf.mxu2  ;;  %v711_v43 = vpop.f32.mrf.mxu3 }
 0x115   : > { %1025 = vst.msk [vmem:[%s1473_s8 + $0xb8] sm:$0xf] %vm978_vm3, %v960_v36  ;;  %v765_v44 = vmul.f32 %v1457_v40, %v671_v42  ;;  %v781_v45 = vmul.f32 %v1457_v40, %v711_v43 }
 0x116   : > { %1041 = vst.msk [vmem:[%s1473_s8 + $0xf8] sm:$0xf] %vm978_vm3, %v976_v37 }
 0x117   : > { %994 = vst.msk [vmem:[%s1473_s8 + $0x3c] sm:$0xf] %vm978_vm3, %v929_v38  ;;  %v833_v46 = vadd.f32 %v1462_v41, %v765_v44  ;;  %v849_v47 = vadd.f32 %v1462_v41, %v781_v45 }
 0x118   : > { %1010 = vst.msk [vmem:[%s1473_s8 + $0x7c] sm:$0xf] %vm978_vm3, %v945_v39 }
 0x119   : > { %v897_v48 = vmax.f32 %v833_v46, 0.0  ;;  %v913_v49 = vmax.f32 %v849_v47, 0.0 }
 0x11b   : > { %v961_v50 = vpack.c.bf16 %v897_v48, %v897_v48  ;;  %v977_v51 = vpack.c.bf16 %v913_v49, %v913_v49 }
 0x11d   : > { %1026 = vst.msk [vmem:[%s1473_s8 + $0xbc] sm:$0xf] %vm978_vm3, %v961_v50 }
 0x11e   : > { %1042 = vst.msk [vmem:[%s1473_s8 + $0xfc] sm:$0xf] %vm978_vm3, %v977_v51 }
 0x11f PF: > { %s14_s15 = sadd.s32 1, %s1335_s15  }
 0x120   : > { %p11_p4 = scmp.ge.s32.totalorder %s14_s15, 6  }
 0x122   :  { %13 = sbr.rel (!%p11_p4) target bundleno = 1 (0x1), region = 66 }

// kernel: _lambda_.13
= control target key start
LH: loop header
LB: loop body
LE: loop exit
PB: predicated region body
PF: predicated region fallthrough
CT: control target
= control target key end

     0   :  { %s1398_s15 = smov 0   ;;  %s1771_s0 = inlined_call_operand.vmem [shape: bf16[2048,72], index: 0, kind: input, shape index: {}]   ;;  %s1772_s1 = inlined_call_operand.vmem [shape: bf16[72,8], index: 1, kind: input, shape index: {}]   ;;  %s1773_s2 = inlined_call_operand.vmem [shape: f32[1,8], index: 2, kind: input, shape index: {}]   ;;  %s1774_s3 = inlined_call_operand.vmem [shape: f32[1,8], index: 3, kind: input, shape index: {}]   ;;  %s1775_s4 = inlined_call_operand.vmem [shape: bf16[2048,8], index: 4, kind: output, shape index: {}]  }
   0x1 LB: > { %s1117_s16 = sadd.s32 4294967295, %s1371_s15   ;;  %p1121_p0 = scmp.ge.s32.totalorder %s1371_s15, 1  ;;  %s1371_s15 = sphi %s1398_s15, %s14_s15  }
   0x2   : > { %p163_p1 = scmp.lt.s32.totalorder %s1371_s15, 5 }
   0x4   : > { %p164_p2 = pnand %p1121_p0, %p163_p1 }
   0x5   : > { %s1122_s19 = sshll.u32 (!%p164_p2), %s1117_s16, 6 }
   0x6   : > { %167 = sbr.rel (%p164_p2) target bundleno = 299 (0x12b), region = 36  ;;  %p190_p3 = scmp.lt.s32.totalorder (!%p164_p2), %s1122_s19, 255 }
   0xb   : > { %v274_v0 = vld [vmem:[%s1772_s1 + $0x20] sm:$0xf]  ;;  %vm559_vm0 = vcmask 1043456   ;;  %v1339_v4 = vld [vmem:[%s1772_s1 + $0x18] sm:$0xff]  ;;  %v1338_v5 = vld [vmem:[%s1772_s1 + $0x10] sm:$0xff]  ;;  %s1777_s19 = smov (!%p190_p3, %s1122_s19), 255 }
   0xc   : > { %v452_v1 = vunpack.c.l.b16 %v274_v0  ;;  %v1337_v6 = vld [vmem:[%s1772_s1 + $0x8] sm:$0xff]  ;;  %s1123_s26 = sshll.u32 %s1777_s19, 2  ;;  %v1336_v7 = vld [vmem:[%s1772_s1] sm:$0xff]  ;;  %vm462_vm1 = vcmask 588800   ;;  %vm996_vm2 = vcmask 60416  }
   0xd   : > { %s1429_s5 = scalar_lea.vmem %s1771_s0, %s1123_s26  ;;  %v1498_v40 = vld [vmem:[%s1773_s2] ss:$0 sm:$0xff]  ;;  %s1514_s12 = scalar_lea.vmem %s1775_s4, %s1123_s26 }
   0xe   : > { %v457_v2 = vpack.c.b16 %v452_v1, %v452_v1  ;;  %v1304_v8 = vld [vmem:[%s1429_s5] sm:$0xff]  ;;  %v1305_v12 = vld [vmem:[%s1429_s5 + $0x8] sm:$0xff]  ;;  %v1306_v16 = vld [vmem:[%s1429_s5 + $0x10] sm:$0xff] }
   0xf   : > { %v1312_v9 = vld [vmem:[%s1429_s5 + $0x40] sm:$0xff]  ;;  %v1313_v13 = vld [vmem:[%s1429_s5 + $0x48] sm:$0xff]  ;;  %v1314_v17 = vld [vmem:[%s1429_s5 + $0x50] sm:$0xff] }
  0x10   : > { %v561_v3 = vsel %vm559_vm0, %v457_v2, 0  ;;  %v1320_v10 = vld [vmem:[%s1429_s5 + $0x80] sm:$0xff]  ;;  %v1321_v14 = vld [vmem:[%s1429_s5 + $0x88] sm:$0xff]  ;;  %v1322_v18 = vld [vmem:[%s1429_s5 + $0x90] sm:$0xff] }
  0x11   : > { %566 = vmatpush.bf16.msra.mxu0 %v561_v3  ;;  %1340 = vmatpush.bf16.msra.mxu1 %v561_v3  ;;  %v1328_v11 = vld [vmem:[%s1429_s5 + $0xc0] sm:$0xff]  ;;  %v1329_v15 = vld [vmem:[%s1429_s5 + $0xc8] sm:$0xff]  ;;  %v1330_v19 = vld [vmem:[%s1429_s5 + $0xd0] sm:$0xff] }
  0x12   : > { %1341 = vmatpush.bf16.msra.mxu2 %v561_v3  ;;  %1342 = vmatpush.bf16.msra.mxu3 %v561_v3  ;;  %v1307_v20 = vld [vmem:[%s1429_s5 + $0x18] sm:$0xff]  ;;  %v1308_v24 = vld [vmem:[%s1429_s5 + $0x20] sm:$0xff]  ;;  %v1309_v28 = vld [vmem:[%s1429_s5 + $0x28] sm:$0xff] }
  0x13   : > { %v1315_v21 = vld [vmem:[%s1429_s5 + $0x58] sm:$0xff]  ;;  %v1316_v25 = vld [vmem:[%s1429_s5 + $0x60] sm:$0xff]  ;;  %v1317_v29 = vld [vmem:[%s1429_s5 + $0x68] sm:$0xff] }
  0x14   : > { %v1323_v22 = vld [vmem:[%s1429_s5 + $0x98] sm:$0xff]  ;;  %v1324_v26 = vld [vmem:[%s1429_s5 + $0xa0] sm:$0xff]  ;;  %v1325_v30 = vld [vmem:[%s1429_s5 + $0xa8] sm:$0xff] }
  0x15   : > { %567 = vmatpush.bf16.msra.mxu0 %v1339_v4  ;;  %1343 = vmatpush.bf16.msra.mxu1 %v1339_v4  ;;  %v1331_v23 = vld [vmem:[%s1429_s5 + $0xd8] sm:$0xff]  ;;  %v1332_v27 = vld [vmem:[%s1429_s5 + $0xe0] sm:$0xff]  ;;  %v1333_v31 = vld [vmem:[%s1429_s5 + $0xe8] sm:$0xff] }
  0x16   : > { %1344 = vmatpush.bf16.msra.mxu2 %v1339_v4  ;;  %1345 = vmatpush.bf16.msra.mxu3 %v1339_v4  ;;  %v1310_v32 = vld [vmem:[%s1429_s5 + $0x30] sm:$0xff]  ;;  %v1311_v36 = vld [vmem:[%s1429_s5 + $0x38] sm:$0xff]  ;;  %v1503_v41 = vld [vmem:[%s1774_s3] ss:$0 sm:$0xff] }
  0x17   : > { %v1318_v33 = vld [vmem:[%s1429_s5 + $0x70] sm:$0xff]  ;;  %v1319_v37 = vld [vmem:[%s1429_s5 + $0x78] sm:$0xff] }
  0x18   : > { %v1326_v34 = vld [vmem:[%s1429_s5 + $0xb0] sm:$0xff]  ;;  %v1327_v38 = vld [vmem:[%s1429_s5 + $0xb8] sm:$0xff] }
  0x19   : > { %568 = vmatpush.bf16.msra.mxu0 %v1338_v5  ;;  %1346 = vmatpush.bf16.msra.mxu1 %v1338_v5  ;;  %v1334_v35 = vld [vmem:[%s1429_s5 + $0xf0] sm:$0xff]  ;;  %v1335_v39 = vld [vmem:[%s1429_s5 + $0xf8] sm:$0xff] }
  0x1a   : > { %1347 = vmatpush.bf16.msra.mxu2 %v1338_v5  ;;  %1348 = vmatpush.bf16.msra.mxu3 %v1338_v5 }
  0x1d   : > { %569 = vmatpush.bf16.msra.mxu0 %v1337_v6  ;;  %1349 = vmatpush.bf16.msra.mxu1 %v1337_v6 }
  0x1e   : > { %1350 = vmatpush.bf16.msra.mxu2 %v1337_v6  ;;  %1351 = vmatpush.bf16.msra.mxu3 %v1337_v6 }
  0x21   : > { %570 = vmatpush.bf16.msra.mxu0 %v1336_v7  ;;  %1352 = vmatpush.bf16.msra.mxu1 %v1336_v7 }
  0x22   : > { %1353 = vmatpush.bf16.msra.mxu2 %v1336_v7  ;;  %1354 = vmatpush.bf16.msra.mxu3 %v1336_v7 }
  0x24   : > { %1270 = vmatmul.msk.bf16.vlgmr.msra.gmra.mxu0 %vm462_vm1, %v1304_v8  ;;  %1278 = vmatmul.msk.bf16.vlgmr.msra.gmra.mxu1 %vm462_vm1, %v1312_v9 }
  0x25   : > { %1286 = vmatmul.msk.bf16.vlgmr.msra.gmra.mxu2 %vm462_vm1, %v1320_v10  ;;  %1294 = vmatmul.msk.bf16.vlgmr.msra.gmra.mxu3 %vm462_vm1, %v1328_v11 }
  0x34   : > { %1271 = vmatmul.msk.bf16.gmra.mxu0 %vm462_vm1, %v1305_v12  ;;  %1279 = vmatmul.msk.bf16.gmra.mxu1 %vm462_vm1, %v1313_v13 }
  0x35   : > { %1287 = vmatmul.msk.bf16.gmra.mxu2 %vm462_vm1, %v1321_v14  ;;  %1295 = vmatmul.msk.bf16.gmra.mxu3 %vm462_vm1, %v1329_v15 }
  0x44   : > { %1272 = vmatmul.msk.bf16.gmra.mxu0 %vm462_vm1, %v1306_v16  ;;  %1280 = vmatmul.msk.bf16.gmra.mxu1 %vm462_vm1, %v1314_v17 }
  0x45   : > { %1288 = vmatmul.msk.bf16.gmra.mxu2 %vm462_vm1, %v1322_v18  ;;  %1296 = vmatmul.msk.bf16.gmra.mxu3 %vm462_vm1, %v1330_v19 }
  0x54   : > { %1273 = vmatmul.msk.bf16.gmra.mxu0 %vm462_vm1, %v1307_v20  ;;  %1281 = vmatmul.msk.bf16.gmra.mxu1 %vm462_vm1, %v1315_v21 }
  0x55   : > { %1289 = vmatmul.msk.bf16.gmra.mxu2 %vm462_vm1, %v1323_v22  ;;  %1297 = vmatmul.msk.bf16.gmra.mxu3 %vm462_vm1, %v1331_v23 }
  0x64   : > { %1274 = vmatmul.msk.bf16.gmra.mxu0 %vm462_vm1, %v1308_v24  ;;  %1282 = vmatmul.msk.bf16.gmra.mxu1 %vm462_vm1, %v1316_v25 }
  0x65   : > { %1290 = vmatmul.msk.bf16.gmra.mxu2 %vm462_vm1, %v1324_v26  ;;  %1298 = vmatmul.msk.bf16.gmra.mxu3 %vm462_vm1, %v1332_v27 }
  0x74   : > { %1275 = vmatmul.msk.bf16.gmra.mxu0 %vm462_vm1, %v1309_v28  ;;  %1283 = vmatmul.msk.bf16.gmra.mxu1 %vm462_vm1, %v1317_v29 }
  0x75   : > { %1291 = vmatmul.msk.bf16.gmra.mxu2 %vm462_vm1, %v1325_v30  ;;  %1299 = vmatmul.msk.bf16.gmra.mxu3 %vm462_vm1, %v1333_v31 }
  0x84   : > { %1276 = vmatmul.msk.bf16.gmra.mxu0 %vm462_vm1, %v1310_v32  ;;  %1284 = vmatmul.msk.bf16.gmra.mxu1 %vm462_vm1, %v1318_v33 }
  0x85   : > { %1292 = vmatmul.msk.bf16.gmra.mxu2 %vm462_vm1, %v1326_v34  ;;  %1300 = vmatmul.msk.bf16.gmra.mxu3 %vm462_vm1, %v1334_v35 }
  0x94   : > { %1277 = vmatmul.msk.bf16.gmra.mxu0 %vm462_vm1, %v1311_v36  ;;  %1285 = vmatmul.msk.bf16.gmra.mxu1 %vm462_vm1, %v1319_v37 }
  0x95   : > { %1293 = vmatmul.msk.bf16.gmra.mxu2 %vm462_vm1, %v1327_v38  ;;  %1301 = vmatmul.msk.bf16.gmra.mxu3 %vm462_vm1, %v1335_v39 }
  0xa1   : > { %v572_v42 = vpop.f32.mrf.mxu0  ;;  %v612_v43 = vpop.f32.mrf.mxu1 }
  0xa2   : > { %v736_v44 = vmul.f32 %v1498_v40, %v572_v42  ;;  %v752_v45 = vmul.f32 %v1498_v40, %v612_v43 }
  0xa4   : > { %v804_v46 = vadd.f32 %v1503_v41, %v736_v44  ;;  %v820_v47 = vadd.f32 %v1503_v41, %v752_v45 }
  0xa6   : > { %v868_v48 = vmax.f32 %v804_v46, 0.0  ;;  %v884_v49 = vmax.f32 %v820_v47, 0.0 }
  0xa8   : > { %v932_v50 = vpack.c.bf16 %v868_v48, %v868_v48  ;;  %v948_v51 = vpack.c.bf16 %v884_v49, %v884_v49  ;;  %v652_v52 = vpop.f32.mrf.mxu2  ;;  %v692_v53 = vpop.f32.mrf.mxu3 }
  0xa9   : > { %v768_v54 = vmul.f32 %v1498_v40, %v652_v52  ;;  %v784_v55 = vmul.f32 %v1498_v40, %v692_v53  ;;  %v574_v56 = vpop.f32.mrf.mxu0  ;;  %v614_v57 = vpop.f32.mrf.mxu1 }
  0xaa   : > { %997 = vst.msk [vmem:[%s1514_s12] sm:$0xf] %vm996_vm2, %v932_v50  ;;  %v737_v58 = vmul.f32 %v1498_v40, %v574_v56  ;;  %v753_v59 = vmul.f32 %v1498_v40, %v614_v57 }
  0xab   : > { %1013 = vst.msk [vmem:[%s1514_s12 + $0x40] sm:$0xf] %vm996_vm2, %v948_v51  ;;  %v836_v60 = vadd.f32 %v1503_v41, %v768_v54  ;;  %v852_v61 = vadd.f32 %v1503_v41, %v784_v55 }
  0xac   : > { %v805_v62 = vadd.f32 %v1503_v41, %v737_v58  ;;  %v821_v63 = vadd.f32 %v1503_v41, %v753_v59 }
  0xad   : > { %v900_v0 = vmax.f32 %v836_v60, 0.0  ;;  %v916_v1 = vmax.f32 %v852_v61, 0.0 }
  0xae   : > { %v869_v2 = vmax.f32 %v805_v62, 0.0  ;;  %v885_v3 = vmax.f32 %v821_v63, 0.0 }
  0xaf   : > { %v964_v4 = vpack.c.bf16 %v900_v0, %v900_v0  ;;  %v980_v5 = vpack.c.bf16 %v916_v1, %v916_v1 }
  0xb0   : > { %v933_v6 = vpack.c.bf16 %v869_v2, %v869_v2  ;;  %v949_v7 = vpack.c.bf16 %v885_v3, %v885_v3  ;;  %v654_v8 = vpop.f32.mrf.mxu2  ;;  %v694_v9 = vpop.f32.mrf.mxu3 }
  0xb1   : > { %1029 = vst.msk [vmem:[%s1514_s12 + $0x80] sm:$0xf] %vm996_vm2, %v964_v4  ;;  %v769_v10 = vmul.f32 %v1498_v40, %v654_v8  ;;  %v785_v11 = vmul.f32 %v1498_v40, %v694_v9  ;;  %v577_v12 = vpop.f32.mrf.mxu0  ;;  %v617_v13 = vpop.f32.mrf.mxu1 }
  0xb2   : > { %1045 = vst.msk [vmem:[%s1514_s12 + $0xc0] sm:$0xf] %vm996_vm2, %v980_v5  ;;  %v738_v14 = vmul.f32 %v1498_v40, %v577_v12  ;;  %v754_v15 = vmul.f32 %v1498_v40, %v617_v13 }
  0xb3   : > { %998 = vst.msk [vmem:[%s1514_s12 + $0x4] sm:$0xf] %vm996_vm2, %v933_v6  ;;  %v837_v16 = vadd.f32 %v1503_v41, %v769_v10  ;;  %v853_v17 = vadd.f32 %v1503_v41, %v785_v11 }
  0xb4   : > { %1014 = vst.msk [vmem:[%s1514_s12 + $0x44] sm:$0xf] %vm996_vm2, %v949_v7  ;;  %v806_v18 = vadd.f32 %v1503_v41, %v738_v14  ;;  %v822_v19 = vadd.f32 %v1503_v41, %v754_v15 }
  0xb5   : > { %v901_v20 = vmax.f32 %v837_v16, 0.0  ;;  %v917_v21 = vmax.f32 %v853_v17, 0.0 }
  0xb6   : > { %v870_v22 = vmax.f32 %v806_v18, 0.0  ;;  %v886_v23 = vmax.f32 %v822_v19, 0.0 }
  0xb7   : > { %v965_v24 = vpack.c.bf16 %v901_v20, %v901_v20  ;;  %v981_v25 = vpack.c.bf16 %v917_v21, %v917_v21 }
  0xb8   : > { %v934_v26 = vpack.c.bf16 %v870_v22, %v870_v22  ;;  %v950_v27 = vpack.c.bf16 %v886_v23, %v886_v23  ;;  %v657_v28 = vpop.f32.mrf.mxu2  ;;  %v697_v29 = vpop.f32.mrf.mxu3 }
  0xb9   : > { %1030 = vst.msk [vmem:[%s1514_s12 + $0x84] sm:$0xf] %vm996_vm2, %v965_v24  ;;  %v770_v30 = vmul.f32 %v1498_v40, %v657_v28  ;;  %v786_v31 = vmul.f32 %v1498_v40, %v697_v29  ;;  %v579_v32 = vpop.f32.mrf.mxu0  ;;  %v619_v33 = vpop.f32.mrf.mxu1 }
  0xba   : > { %1046 = vst.msk [vmem:[%s1514_s12 + $0xc4] sm:$0xf] %vm996_vm2, %v981_v25  ;;  %v739_v34 = vmul.f32 %v1498_v40, %v579_v32  ;;  %v755_v35 = vmul.f32 %v1498_v40, %v619_v33 }
  0xbb   : > { %999 = vst.msk [vmem:[%s1514_s12 + $0x8] sm:$0xf] %vm996_vm2, %v934_v26  ;;  %v838_v36 = vadd.f32 %v1503_v41, %v770_v30  ;;  %v854_v37 = vadd.f32 %v1503_v41, %v786_v31 }
  0xbc   : > { %1015 = vst.msk [vmem:[%s1514_s12 + $0x48] sm:$0xf] %vm996_vm2, %v950_v27  ;;  %v807_v38 = vadd.f32 %v1503_v41, %v739_v34  ;;  %v823_v39 = vadd.f32 %v1503_v41, %v755_v35 }
  0xbd   : > { %v902_v42 = vmax.f32 %v838_v36, 0.0  ;;  %v918_v43 = vmax.f32 %v854_v37, 0.0 }
  0xbe   : > { %v871_v44 = vmax.f32 %v807_v38, 0.0  ;;  %v887_v45 = vmax.f32 %v823_v39, 0.0 }
  0xbf   : > { %v966_v46 = vpack.c.bf16 %v902_v42, %v902_v42  ;;  %v982_v47 = vpack.c.bf16 %v918_v43, %v918_v43 }
  0xc0   : > { %v935_v48 = vpack.c.bf16 %v871_v44, %v871_v44  ;;  %v951_v49 = vpack.c.bf16 %v887_v45, %v887_v45  ;;  %v659_v50 = vpop.f32.mrf.mxu2  ;;  %v699_v51 = vpop.f32.mrf.mxu3 }
  0xc1   : > { %1031 = vst.msk [vmem:[%s1514_s12 + $0x88] sm:$0xf] %vm996_vm2, %v966_v46  ;;  %v771_v52 = vmul.f32 %v1498_v40, %v659_v50  ;;  %v787_v53 = vmul.f32 %v1498_v40, %v699_v51  ;;  %v582_v54 = vpop.f32.mrf.mxu0  ;;  %v622_v55 = vpop.f32.mrf.mxu1 }
  0xc2   : > { %1047 = vst.msk [vmem:[%s1514_s12 + $0xc8] sm:$0xf] %vm996_vm2, %v982_v47  ;;  %v740_v56 = vmul.f32 %v1498_v40, %v582_v54  ;;  %v756_v57 = vmul.f32 %v1498_v40, %v622_v55 }
  0xc3   : > { %1000 = vst.msk [vmem:[%s1514_s12 + $0xc] sm:$0xf] %vm996_vm2, %v935_v48  ;;  %v839_v58 = vadd.f32 %v1503_v41, %v771_v52  ;;  %v855_v59 = vadd.f32 %v1503_v41, %v787_v53 }
  0xc4   : > { %1016 = vst.msk [vmem:[%s1514_s12 + $0x4c] sm:$0xf] %vm996_vm2, %v951_v49  ;;  %v808_v60 = vadd.f32 %v1503_v41, %v740_v56  ;;  %v824_v61 = vadd.f32 %v1503_v41, %v756_v57 }
  0xc5   : > { %v903_v62 = vmax.f32 %v839_v58, 0.0  ;;  %v919_v63 = vmax.f32 %v855_v59, 0.0 }
  0xc6   : > { %v872_v0 = vmax.f32 %v808_v60, 0.0  ;;  %v888_v1 = vmax.f32 %v824_v61, 0.0 }
  0xc7   : > { %v967_v2 = vpack.c.bf16 %v903_v62, %v903_v62  ;;  %v983_v3 = vpack.c.bf16 %v919_v63, %v919_v63 }
  0xc8   : > { %v936_v4 = vpack.c.bf16 %v872_v0, %v872_v0  ;;  %v952_v5 = vpack.c.bf16 %v888_v1, %v888_v1  ;;  %v662_v6 = vpop.f32.mrf.mxu2  ;;  %v702_v7 = vpop.f32.mrf.mxu3 }
  0xc9   : > { %1032 = vst.msk [vmem:[%s1514_s12 + $0x8c] sm:$0xf] %vm996_vm2, %v967_v2  ;;  %v772_v8 = vmul.f32 %v1498_v40, %v662_v6  ;;  %v788_v9 = vmul.f32 %v1498_v40, %v702_v7  ;;  %v584_v10 = vpop.f32.mrf.mxu0  ;;  %v624_v11 = vpop.f32.mrf.mxu1 }
  0xca   : > { %1048 = vst.msk [vmem:[%s1514_s12 + $0xcc] sm:$0xf] %vm996_vm2, %v983_v3  ;;  %v741_v12 = vmul.f32 %v1498_v40, %v584_v10  ;;  %v757_v13 = vmul.f32 %v1498_v40, %v624_v11 }
  0xcb   : > { %1001 = vst.msk [vmem:[%s1514_s12 + $0x10] sm:$0xf] %vm996_vm2, %v936_v4  ;;  %v840_v14 = vadd.f32 %v1503_v41, %v772_v8  ;;  %v856_v15 = vadd.f32 %v1503_v41, %v788_v9 }
  0xcc   : > { %1017 = vst.msk [vmem:[%s1514_s12 + $0x50] sm:$0xf] %vm996_vm2, %v952_v5  ;;  %v809_v16 = vadd.f32 %v1503_v41, %v741_v12  ;;  %v825_v17 = vadd.f32 %v1503_v41, %v757_v13 }
  0xcd   : > { %v904_v18 = vmax.f32 %v840_v14, 0.0  ;;  %v920_v19 = vmax.f32 %v856_v15, 0.0 }
  0xce   : > { %v873_v20 = vmax.f32 %v809_v16, 0.0  ;;  %v889_v21 = vmax.f32 %v825_v17, 0.0 }
  0xcf   : > { %v968_v22 = vpack.c.bf16 %v904_v18, %v904_v18  ;;  %v984_v23 = vpack.c.bf16 %v920_v19, %v920_v19 }
  0xd0   : > { %v937_v24 = vpack.c.bf16 %v873_v20, %v873_v20  ;;  %v953_v25 = vpack.c.bf16 %v889_v21, %v889_v21  ;;  %v664_v26 = vpop.f32.mrf.mxu2  ;;  %v704_v27 = vpop.f32.mrf.mxu3 }
  0xd1   : > { %1033 = vst.msk [vmem:[%s1514_s12 + $0x90] sm:$0xf] %vm996_vm2, %v968_v22  ;;  %v773_v28 = vmul.f32 %v1498_v40, %v664_v26  ;;  %v789_v29 = vmul.f32 %v1498_v40, %v704_v27  ;;  %v587_v30 = vpop.f32.mrf.mxu0  ;;  %v627_v31 = vpop.f32.mrf.mxu1 }
  0xd2   : > { %1049 = vst.msk [vmem:[%s1514_s12 + $0xd0] sm:$0xf] %vm996_vm2, %v984_v23  ;;  %v742_v32 = vmul.f32 %v1498_v40, %v587_v30  ;;  %v758_v33 = vmul.f32 %v1498_v40, %v627_v31 }
  0xd3   : > { %1002 = vst.msk [vmem:[%s1514_s12 + $0x14] sm:$0xf] %vm996_vm2, %v937_v24  ;;  %v841_v34 = vadd.f32 %v1503_v41, %v773_v28  ;;  %v857_v35 = vadd.f32 %v1503_v41, %v789_v29 }
  0xd4   : > { %1018 = vst.msk [vmem:[%s1514_s12 + $0x54] sm:$0xf] %vm996_vm2, %v953_v25  ;;  %v810_v36 = vadd.f32 %v1503_v41, %v742_v32  ;;  %v826_v37 = vadd.f32 %v1503_v41, %v758_v33 }
  0xd5   : > { %v905_v38 = vmax.f32 %v841_v34, 0.0  ;;  %v921_v39 = vmax.f32 %v857_v35, 0.0 }
  0xd6   : > { %v874_v42 = vmax.f32 %v810_v36, 0.0  ;;  %v890_v43 = vmax.f32 %v826_v37, 0.0 }
  0xd7   : > { %v969_v44 = vpack.c.bf16 %v905_v38, %v905_v38  ;;  %v985_v45 = vpack.c.bf16 %v921_v39, %v921_v39 }
  0xd8   : > { %v938_v46 = vpack.c.bf16 %v874_v42, %v874_v42  ;;  %v954_v47 = vpack.c.bf16 %v890_v43, %v890_v43  ;;  %v667_v48 = vpop.f32.mrf.mxu2  ;;  %v707_v49 = vpop.f32.mrf.mxu3 }
  0xd9   : > { %1034 = vst.msk [vmem:[%s1514_s12 + $0x94] sm:$0xf] %vm996_vm2, %v969_v44  ;;  %v774_v50 = vmul.f32 %v1498_v40, %v667_v48  ;;  %v790_v51 = vmul.f32 %v1498_v40, %v707_v49  ;;  %v589_v52 = vpop.f32.mrf.mxu0  ;;  %v629_v53 = vpop.f32.mrf.mxu1 }
  0xda   : > { %1050 = vst.msk [vmem:[%s1514_s12 + $0xd4] sm:$0xf] %vm996_vm2, %v985_v45  ;;  %v743_v54 = vmul.f32 %v1498_v40, %v589_v52  ;;  %v759_v55 = vmul.f32 %v1498_v40, %v629_v53 }
  0xdb   : > { %1003 = vst.msk [vmem:[%s1514_s12 + $0x18] sm:$0xf] %vm996_vm2, %v938_v46  ;;  %v842_v56 = vadd.f32 %v1503_v41, %v774_v50  ;;  %v858_v57 = vadd.f32 %v1503_v41, %v790_v51 }
  0xdc   : > { %1019 = vst.msk [vmem:[%s1514_s12 + $0x58] sm:$0xf] %vm996_vm2, %v954_v47  ;;  %v811_v58 = vadd.f32 %v1503_v41, %v743_v54  ;;  %v827_v59 = vadd.f32 %v1503_v41, %v759_v55 }
  0xdd   : > { %v906_v60 = vmax.f32 %v842_v56, 0.0  ;;  %v922_v61 = vmax.f32 %v858_v57, 0.0 }
  0xde   : > { %v875_v62 = vmax.f32 %v811_v58, 0.0  ;;  %v891_v63 = vmax.f32 %v827_v59, 0.0 }
  0xdf   : > { %v970_v0 = vpack.c.bf16 %v906_v60, %v906_v60  ;;  %v986_v1 = vpack.c.bf16 %v922_v61, %v922_v61 }
  0xe0   : > { %v939_v2 = vpack.c.bf16 %v875_v62, %v875_v62  ;;  %v955_v3 = vpack.c.bf16 %v891_v63, %v891_v63  ;;  %v669_v4 = vpop.f32.mrf.mxu2  ;;  %v709_v5 = vpop.f32.mrf.mxu3 }
  0xe1   : > { %1035 = vst.msk [vmem:[%s1514_s12 + $0x98] sm:$0xf] %vm996_vm2, %v970_v0  ;;  %v775_v6 = vmul.f32 %v1498_v40, %v669_v4  ;;  %v791_v7 = vmul.f32 %v1498_v40, %v709_v5  ;;  %v592_v8 = vpop.f32.mrf.mxu0  ;;  %v632_v9 = vpop.f32.mrf.mxu1 }
  0xe2   : > { %1051 = vst.msk [vmem:[%s1514_s12 + $0xd8] sm:$0xf] %vm996_vm2, %v986_v1  ;;  %v744_v10 = vmul.f32 %v1498_v40, %v592_v8  ;;  %v760_v11 = vmul.f32 %v1498_v40, %v632_v9 }
  0xe3   : > { %1004 = vst.msk [vmem:[%s1514_s12 + $0x1c] sm:$0xf] %vm996_vm2, %v939_v2  ;;  %v843_v12 = vadd.f32 %v1503_v41, %v775_v6  ;;  %v859_v13 = vadd.f32 %v1503_v41, %v791_v7 }
  0xe4   : > { %1020 = vst.msk [vmem:[%s1514_s12 + $0x5c] sm:$0xf] %vm996_vm2, %v955_v3  ;;  %v812_v14 = vadd.f32 %v1503_v41, %v744_v10  ;;  %v828_v15 = vadd.f32 %v1503_v41, %v760_v11 }
  0xe5   : > { %v907_v16 = vmax.f32 %v843_v12, 0.0  ;;  %v923_v17 = vmax.f32 %v859_v13, 0.0 }
  0xe6   : > { %v876_v18 = vmax.f32 %v812_v14, 0.0  ;;  %v892_v19 = vmax.f32 %v828_v15, 0.0 }
  0xe7   : > { %v971_v20 = vpack.c.bf16 %v907_v16, %v907_v16  ;;  %v987_v21 = vpack.c.bf16 %v923_v17, %v923_v17 }
  0xe8   : > { %v940_v22 = vpack.c.bf16 %v876_v18, %v876_v18  ;;  %v956_v23 = vpack.c.bf16 %v892_v19, %v892_v19  ;;  %v672_v24 = vpop.f32.mrf.mxu2  ;;  %v712_v25 = vpop.f32.mrf.mxu3 }
  0xe9   : > { %1036 = vst.msk [vmem:[%s1514_s12 + $0x9c] sm:$0xf] %vm996_vm2, %v971_v20  ;;  %v776_v26 = vmul.f32 %v1498_v40, %v672_v24  ;;  %v792_v27 = vmul.f32 %v1498_v40, %v712_v25  ;;  %v594_v28 = vpop.f32.mrf.mxu0  ;;  %v634_v29 = vpop.f32.mrf.mxu1 }
  0xea   : > { %1052 = vst.msk [vmem:[%s1514_s12 + $0xdc] sm:$0xf] %vm996_vm2, %v987_v21  ;;  %v745_v30 = vmul.f32 %v1498_v40, %v594_v28  ;;  %v761_v31 = vmul.f32 %v1498_v40, %v634_v29 }
  0xeb   : > { %1005 = vst.msk [vmem:[%s1514_s12 + $0x20] sm:$0xf] %vm996_vm2, %v940_v22  ;;  %v844_v32 = vadd.f32 %v1503_v41, %v776_v26  ;;  %v860_v33 = vadd.f32 %v1503_v41, %v792_v27 }
  0xec   : > { %1021 = vst.msk [vmem:[%s1514_s12 + $0x60] sm:$0xf] %vm996_vm2, %v956_v23  ;;  %v813_v34 = vadd.f32 %v1503_v41, %v745_v30  ;;  %v829_v35 = vadd.f32 %v1503_v41, %v761_v31 }
  0xed   : > { %v908_v36 = vmax.f32 %v844_v32, 0.0  ;;  %v924_v37 = vmax.f32 %v860_v33, 0.0 }
  0xee   : > { %v877_v38 = vmax.f32 %v813_v34, 0.0  ;;  %v893_v39 = vmax.f32 %v829_v35, 0.0 }
  0xef   : > { %v972_v42 = vpack.c.bf16 %v908_v36, %v908_v36  ;;  %v988_v43 = vpack.c.bf16 %v924_v37, %v924_v37 }
  0xf0   : > { %v941_v44 = vpack.c.bf16 %v877_v38, %v877_v38  ;;  %v957_v45 = vpack.c.bf16 %v893_v39, %v893_v39  ;;  %v674_v46 = vpop.f32.mrf.mxu2  ;;  %v714_v47 = vpop.f32.mrf.mxu3 }
  0xf1   : > { %1037 = vst.msk [vmem:[%s1514_s12 + $0xa0] sm:$0xf] %vm996_vm2, %v972_v42  ;;  %v777_v48 = vmul.f32 %v1498_v40, %v674_v46  ;;  %v793_v49 = vmul.f32 %v1498_v40, %v714_v47  ;;  %v597_v50 = vpop.f32.mrf.mxu0  ;;  %v637_v51 = vpop.f32.mrf.mxu1 }
  0xf2   : > { %1053 = vst.msk [vmem:[%s1514_s12 + $0xe0] sm:$0xf] %vm996_vm2, %v988_v43  ;;  %v746_v52 = vmul.f32 %v1498_v40, %v597_v50  ;;  %v762_v53 = vmul.f32 %v1498_v40, %v637_v51 }
  0xf3   : > { %1006 = vst.msk [vmem:[%s1514_s12 + $0x24] sm:$0xf] %vm996_vm2, %v941_v44  ;;  %v845_v54 = vadd.f32 %v1503_v41, %v777_v48  ;;  %v861_v55 = vadd.f32 %v1503_v41, %v793_v49 }
  0xf4   : > { %1022 = vst.msk [vmem:[%s1514_s12 + $0x64] sm:$0xf] %vm996_vm2, %v957_v45  ;;  %v814_v56 = vadd.f32 %v1503_v41, %v746_v52  ;;  %v830_v57 = vadd.f32 %v1503_v41, %v762_v53 }
  0xf5   : > { %v909_v58 = vmax.f32 %v845_v54, 0.0  ;;  %v925_v59 = vmax.f32 %v861_v55, 0.0 }
  0xf6   : > { %v878_v60 = vmax.f32 %v814_v56, 0.0  ;;  %v894_v61 = vmax.f32 %v830_v57, 0.0 }
  0xf7   : > { %v973_v62 = vpack.c.bf16 %v909_v58, %v909_v58  ;;  %v989_v63 = vpack.c.bf16 %v925_v59, %v925_v59 }
  0xf8   : > { %v942_v0 = vpack.c.bf16 %v878_v60, %v878_v60  ;;  %v958_v1 = vpack.c.bf16 %v894_v61, %v894_v61  ;;  %v677_v2 = vpop.f32.mrf.mxu2  ;;  %v717_v3 = vpop.f32.mrf.mxu3 }
  0xf9   : > { %1038 = vst.msk [vmem:[%s1514_s12 + $0xa4] sm:$0xf] %vm996_vm2, %v973_v62  ;;  %v778_v4 = vmul.f32 %v1498_v40, %v677_v2  ;;  %v794_v5 = vmul.f32 %v1498_v40, %v717_v3  ;;  %v599_v6 = vpop.f32.mrf.mxu0  ;;  %v639_v7 = vpop.f32.mrf.mxu1 }
  0xfa   : > { %1054 = vst.msk [vmem:[%s1514_s12 + $0xe4] sm:$0xf] %vm996_vm2, %v989_v63  ;;  %v747_v8 = vmul.f32 %v1498_v40, %v599_v6  ;;  %v763_v9 = vmul.f32 %v1498_v40, %v639_v7 }
  0xfb   : > { %1007 = vst.msk [vmem:[%s1514_s12 + $0x28] sm:$0xf] %vm996_vm2, %v942_v0  ;;  %v846_v10 = vadd.f32 %v1503_v41, %v778_v4  ;;  %v862_v11 = vadd.f32 %v1503_v41, %v794_v5 }
  0xfc   : > { %1023 = vst.msk [vmem:[%s1514_s12 + $0x68] sm:$0xf] %vm996_vm2, %v958_v1  ;;  %v815_v12 = vadd.f32 %v1503_v41, %v747_v8  ;;  %v831_v13 = vadd.f32 %v1503_v41, %v763_v9 }
  0xfd   : > { %v910_v14 = vmax.f32 %v846_v10, 0.0  ;;  %v926_v15 = vmax.f32 %v862_v11, 0.0 }
  0xfe   : > { %v879_v16 = vmax.f32 %v815_v12, 0.0  ;;  %v895_v17 = vmax.f32 %v831_v13, 0.0 }
  0xff   : > { %v974_v18 = vpack.c.bf16 %v910_v14, %v910_v14  ;;  %v990_v19 = vpack.c.bf16 %v926_v15, %v926_v15 }
 0x100   : > { %v943_v20 = vpack.c.bf16 %v879_v16, %v879_v16  ;;  %v959_v21 = vpack.c.bf16 %v895_v17, %v895_v17  ;;  %v679_v22 = vpop.f32.mrf.mxu2  ;;  %v719_v23 = vpop.f32.mrf.mxu3 }
 0x101   : > { %1039 = vst.msk [vmem:[%s1514_s12 + $0xa8] sm:$0xf] %vm996_vm2, %v974_v18  ;;  %v779_v24 = vmul.f32 %v1498_v40, %v679_v22  ;;  %v795_v25 = vmul.f32 %v1498_v40, %v719_v23  ;;  %v602_v26 = vpop.f32.mrf.mxu0  ;;  %v642_v27 = vpop.f32.mrf.mxu1 }
 0x102   : > { %1055 = vst.msk [vmem:[%s1514_s12 + $0xe8] sm:$0xf] %vm996_vm2, %v990_v19  ;;  %v748_v28 = vmul.f32 %v1498_v40, %v602_v26  ;;  %v764_v29 = vmul.f32 %v1498_v40, %v642_v27 }
 0x103   : > { %1008 = vst.msk [vmem:[%s1514_s12 + $0x2c] sm:$0xf] %vm996_vm2, %v943_v20  ;;  %v847_v30 = vadd.f32 %v1503_v41, %v779_v24  ;;  %v863_v31 = vadd.f32 %v1503_v41, %v795_v25 }
 0x104   : > { %1024 = vst.msk [vmem:[%s1514_s12 + $0x6c] sm:$0xf] %vm996_vm2, %v959_v21  ;;  %v816_v32 = vadd.f32 %v1503_v41, %v748_v28  ;;  %v832_v33 = vadd.f32 %v1503_v41, %v764_v29 }
 0x105   : > { %v911_v34 = vmax.f32 %v847_v30, 0.0  ;;  %v927_v35 = vmax.f32 %v863_v31, 0.0 }
 0x106   : > { %v880_v36 = vmax.f32 %v816_v32, 0.0  ;;  %v896_v37 = vmax.f32 %v832_v33, 0.0 }
 0x107   : > { %v975_v38 = vpack.c.bf16 %v911_v34, %v911_v34  ;;  %v991_v39 = vpack.c.bf16 %v927_v35, %v927_v35 }
 0x108   : > { %v944_v42 = vpack.c.bf16 %v880_v36, %v880_v36  ;;  %v960_v43 = vpack.c.bf16 %v896_v37, %v896_v37  ;;  %v682_v44 = vpop.f32.mrf.mxu2  ;;  %v722_v45 = vpop.f32.mrf.mxu3 }
 0x109   : > { %1040 = vst.msk [vmem:[%s1514_s12 + $0xac] sm:$0xf] %vm996_vm2, %v975_v38  ;;  %v780_v46 = vmul.f32 %v1498_v40, %v682_v44  ;;  %v796_v47 = vmul.f32 %v1498_v40, %v722_v45  ;;  %v604_v48 = vpop.f32.mrf.mxu0  ;;  %v644_v49 = vpop.f32.mrf.mxu1 }
 0x10a   : > { %1056 = vst.msk [vmem:[%s1514_s12 + $0xec] sm:$0xf] %vm996_vm2, %v991_v39  ;;  %v749_v50 = vmul.f32 %v1498_v40, %v604_v48  ;;  %v765_v51 = vmul.f32 %v1498_v40, %v644_v49 }
 0x10b   : > { %1009 = vst.msk [vmem:[%s1514_s12 + $0x30] sm:$0xf] %vm996_vm2, %v944_v42  ;;  %v848_v52 = vadd.f32 %v1503_v41, %v780_v46  ;;  %v864_v53 = vadd.f32 %v1503_v41, %v796_v47 }
 0x10c   : > { %1025 = vst.msk [vmem:[%s1514_s12 + $0x70] sm:$0xf] %vm996_vm2, %v960_v43  ;;  %v817_v54 = vadd.f32 %v1503_v41, %v749_v50  ;;  %v833_v55 = vadd.f32 %v1503_v41, %v765_v51 }
 0x10d   : > { %v912_v56 = vmax.f32 %v848_v52, 0.0  ;;  %v928_v57 = vmax.f32 %v864_v53, 0.0 }
 0x10e   : > { %v881_v58 = vmax.f32 %v817_v54, 0.0  ;;  %v897_v59 = vmax.f32 %v833_v55, 0.0 }
 0x10f   : > { %v976_v60 = vpack.c.bf16 %v912_v56, %v912_v56  ;;  %v992_v61 = vpack.c.bf16 %v928_v57, %v928_v57 }
 0x110   : > { %v945_v62 = vpack.c.bf16 %v881_v58, %v881_v58  ;;  %v961_v63 = vpack.c.bf16 %v897_v59, %v897_v59  ;;  %v684_v0 = vpop.f32.mrf.mxu2  ;;  %v724_v1 = vpop.f32.mrf.mxu3 }
 0x111   : > { %1041 = vst.msk [vmem:[%s1514_s12 + $0xb0] sm:$0xf] %vm996_vm2, %v976_v60  ;;  %v781_v2 = vmul.f32 %v1498_v40, %v684_v0  ;;  %v797_v3 = vmul.f32 %v1498_v40, %v724_v1  ;;  %v607_v4 = vpop.f32.mrf.mxu0  ;;  %v647_v5 = vpop.f32.mrf.mxu1 }
 0x112   : > { %1057 = vst.msk [vmem:[%s1514_s12 + $0xf0] sm:$0xf] %vm996_vm2, %v992_v61  ;;  %v750_v6 = vmul.f32 %v1498_v40, %v607_v4  ;;  %v766_v7 = vmul.f32 %v1498_v40, %v647_v5 }
 0x113   : > { %1010 = vst.msk [vmem:[%s1514_s12 + $0x34] sm:$0xf] %vm996_vm2, %v945_v62  ;;  %v849_v8 = vadd.f32 %v1503_v41, %v781_v2  ;;  %v865_v9 = vadd.f32 %v1503_v41, %v797_v3 }
 0x114   : > { %1026 = vst.msk [vmem:[%s1514_s12 + $0x74] sm:$0xf] %vm996_vm2, %v961_v63  ;;  %v818_v10 = vadd.f32 %v1503_v41, %v750_v6  ;;  %v834_v11 = vadd.f32 %v1503_v41, %v766_v7 }
 0x115   : > { %v913_v12 = vmax.f32 %v849_v8, 0.0  ;;  %v929_v13 = vmax.f32 %v865_v9, 0.0 }
 0x116   : > { %v882_v14 = vmax.f32 %v818_v10, 0.0  ;;  %v898_v15 = vmax.f32 %v834_v11, 0.0 }
 0x117   : > { %v977_v16 = vpack.c.bf16 %v913_v12, %v913_v12  ;;  %v993_v17 = vpack.c.bf16 %v929_v13, %v929_v13 }
 0x118   : > { %v946_v18 = vpack.c.bf16 %v882_v14, %v882_v14  ;;  %v962_v19 = vpack.c.bf16 %v898_v15, %v898_v15  ;;  %v687_v20 = vpop.f32.mrf.mxu2  ;;  %v727_v21 = vpop.f32.mrf.mxu3 }
 0x119   : > { %1042 = vst.msk [vmem:[%s1514_s12 + $0xb4] sm:$0xf] %vm996_vm2, %v977_v16  ;;  %v782_v22 = vmul.f32 %v1498_v40, %v687_v20  ;;  %v798_v23 = vmul.f32 %v1498_v40, %v727_v21  ;;  %v609_v24 = vpop.f32.mrf.mxu0  ;;  %v649_v25 = vpop.f32.mrf.mxu1 }
 0x11a   : > { %1058 = vst.msk [vmem:[%s1514_s12 + $0xf4] sm:$0xf] %vm996_vm2, %v993_v17  ;;  %v751_v26 = vmul.f32 %v1498_v40, %v609_v24  ;;  %v767_v27 = vmul.f32 %v1498_v40, %v649_v25 }
 0x11b   : > { %1011 = vst.msk [vmem:[%s1514_s12 + $0x38] sm:$0xf] %vm996_vm2, %v946_v18  ;;  %v850_v28 = vadd.f32 %v1503_v41, %v782_v22  ;;  %v866_v29 = vadd.f32 %v1503_v41, %v798_v23 }
 0x11c   : > { %1027 = vst.msk [vmem:[%s1514_s12 + $0x78] sm:$0xf] %vm996_vm2, %v962_v19  ;;  %v819_v30 = vadd.f32 %v1503_v41, %v751_v26  ;;  %v835_v31 = vadd.f32 %v1503_v41, %v767_v27 }
 0x11d   : > { %v914_v32 = vmax.f32 %v850_v28, 0.0  ;;  %v930_v33 = vmax.f32 %v866_v29, 0.0 }
 0x11e   : > { %v883_v34 = vmax.f32 %v819_v30, 0.0  ;;  %v899_v35 = vmax.f32 %v835_v31, 0.0 }
 0x11f   : > { %v978_v36 = vpack.c.bf16 %v914_v32, %v914_v32  ;;  %v994_v37 = vpack.c.bf16 %v930_v33, %v930_v33 }
 0x120   : > { %v947_v38 = vpack.c.bf16 %v883_v34, %v883_v34  ;;  %v963_v39 = vpack.c.bf16 %v899_v35, %v899_v35  ;;  %v689_v42 = vpop.f32.mrf.mxu2  ;;  %v729_v43 = vpop.f32.mrf.mxu3 }
 0x121   : > { %1043 = vst.msk [vmem:[%s1514_s12 + $0xb8] sm:$0xf] %vm996_vm2, %v978_v36  ;;  %v783_v44 = vmul.f32 %v1498_v40, %v689_v42  ;;  %v799_v45 = vmul.f32 %v1498_v40, %v729_v43 }
 0x122   : > { %1059 = vst.msk [vmem:[%s1514_s12 + $0xf8] sm:$0xf] %vm996_vm2, %v994_v37 }
 0x123   : > { %1012 = vst.msk [vmem:[%s1514_s12 + $0x3c] sm:$0xf] %vm996_vm2, %v947_v38  ;;  %v851_v46 = vadd.f32 %v1503_v41, %v783_v44  ;;  %v867_v47 = vadd.f32 %v1503_v41, %v799_v45 }
 0x124   : > { %1028 = vst.msk [vmem:[%s1514_s12 + $0x7c] sm:$0xf] %vm996_vm2, %v963_v39 }
 0x125   : > { %v915_v48 = vmax.f32 %v851_v46, 0.0  ;;  %v931_v49 = vmax.f32 %v867_v47, 0.0 }
 0x127   : > { %v979_v50 = vpack.c.bf16 %v915_v48, %v915_v48  ;;  %v995_v51 = vpack.c.bf16 %v931_v49, %v931_v49 }
 0x129   : > { %1044 = vst.msk [vmem:[%s1514_s12 + $0xbc] sm:$0xf] %vm996_vm2, %v979_v50 }
 0x12a   : > { %1060 = vst.msk [vmem:[%s1514_s12 + $0xfc] sm:$0xf] %vm996_vm2, %v995_v51 }
 0x12b PF: > { %s14_s15 = sadd.s32 1, %s1371_s15  }
 0x12c   : > { %p11_p4 = scmp.ge.s32.totalorder %s14_s15, 6  }
 0x12e   :  { %13 = sbr.rel (!%p11_p4) target bundleno = 1 (0x1), region = 66 }

// kernel: _lambda_.14
= control target key start
LH: loop header
LB: loop body
LE: loop exit
PB: predicated region body
PF: predicated region fallthrough
CT: control target
= control target key end

     0   :  { %s1334_s15 = smov 0   ;;  %s1704_s0 = inlined_call_operand.vmem [shape: bf16[2048,72], index: 0, kind: input, shape index: {}]   ;;  %s1705_s1 = inlined_call_operand.vmem [shape: bf16[72,16], index: 1, kind: input, shape index: {}]   ;;  %s1706_s2 = inlined_call_operand.vmem [shape: f32[1,16], index: 2, kind: input, shape index: {}]   ;;  %s1707_s3 = inlined_call_operand.vmem [shape: f32[1,16], index: 3, kind: input, shape index: {}]   ;;  %s1708_s4 = inlined_call_operand.vmem [shape: f32[2048,16], index: 4, kind: output, shape index: {}]  }
   0x1 LB: > { %s1053_s16 = sadd.s32 4294967295, %s1307_s15   ;;  %p1057_p0 = scmp.ge.s32.totalorder %s1307_s15, 1  ;;  %s1307_s15 = sphi %s1334_s15, %s14_s15  }
   0x2   : > { %p163_p1 = scmp.lt.s32.totalorder %s1307_s15, 5 }
   0x4   : > { %p164_p2 = pnand %p1057_p0, %p163_p1 }
   0x5   : > { %s1058_s19 = sshll.u32 (!%p164_p2), %s1053_s16, 6 }
   0x6   : > { %167 = sbr.rel (%p164_p2) target bundleno = 297 (0x129), region = 36  ;;  %p190_p3 = scmp.lt.s32.totalorder (!%p164_p2), %s1058_s19, 255 }
   0xb   : > { %v274_v0 = vld [vmem:[%s1705_s1 + $0x20] sm:$0xf]  ;;  %vm559_vm0 = vcmask 1043456   ;;  %v1275_v4 = vld [vmem:[%s1705_s1 + $0x18] sm:$0xff]  ;;  %v1274_v5 = vld [vmem:[%s1705_s1 + $0x10] sm:$0xff]  ;;  %s1710_s19 = smov (!%p190_p3, %s1058_s19), 255 }
   0xc   : > { %v452_v1 = vunpack.c.l.b16 %v274_v0  ;;  %v1273_v6 = vld [vmem:[%s1705_s1 + $0x8] sm:$0xff]  ;;  %s1059_s26 = sshll.u32 %s1710_s19, 2  ;;  %v1272_v7 = vld [vmem:[%s1705_s1] sm:$0xff]  ;;  %vm462_vm1 = vcmask 588800   ;;  %s1061_s10 = sshll.u32 %s1710_s19, 3  ;;  %vm932_vm2 = vcmask 130048  }
   0xd   : > { %s1363_s5 = scalar_lea.vmem %s1704_s0, %s1059_s26  ;;  %v1432_v40 = vld [vmem:[%s1706_s2] ss:$0 sm:$0xff]  ;;  %s1447_s13 = scalar_lea.vmem %s1708_s4, %s1061_s10 }
   0xe   : > { %v457_v2 = vpack.c.b16 %v452_v1, %v452_v1  ;;  %v1240_v8 = vld [vmem:[%s1363_s5] sm:$0xff]  ;;  %v1241_v12 = vld [vmem:[%s1363_s5 + $0x8] sm:$0xff]  ;;  %v1242_v16 = vld [vmem:[%s1363_s5 + $0x10] sm:$0xff] }
   0xf   : > { %v1248_v9 = vld [vmem:[%s1363_s5 + $0x40] sm:$0xff]  ;;  %v1249_v13 = vld [vmem:[%s1363_s5 + $0x48] sm:$0xff]  ;;  %v1250_v17 = vld [vmem:[%s1363_s5 + $0x50] sm:$0xff] }
  0x10   : > { %v561_v3 = vsel %vm559_vm0, %v457_v2, 0  ;;  %v1256_v10 = vld [vmem:[%s1363_s5 + $0x80] sm:$0xff]  ;;  %v1257_v14 = vld [vmem:[%s1363_s5 + $0x88] sm:$0xff]  ;;  %v1258_v18 = vld [vmem:[%s1363_s5 + $0x90] sm:$0xff] }
  0x11   : > { %566 = vmatpush.bf16.msra.mxu0 %v561_v3  ;;  %1276 = vmatpush.bf16.msra.mxu1 %v561_v3  ;;  %v1264_v11 = vld [vmem:[%s1363_s5 + $0xc0] sm:$0xff]  ;;  %v1265_v15 = vld [vmem:[%s1363_s5 + $0xc8] sm:$0xff]  ;;  %v1266_v19 = vld [vmem:[%s1363_s5 + $0xd0] sm:$0xff] }
  0x12   : > { %1277 = vmatpush.bf16.msra.mxu2 %v561_v3  ;;  %1278 = vmatpush.bf16.msra.mxu3 %v561_v3  ;;  %v1243_v20 = vld [vmem:[%s1363_s5 + $0x18] sm:$0xff]  ;;  %v1244_v24 = vld [vmem:[%s1363_s5 + $0x20] sm:$0xff]  ;;  %v1245_v28 = vld [vmem:[%s1363_s5 + $0x28] sm:$0xff] }
  0x13   : > { %v1251_v21 = vld [vmem:[%s1363_s5 + $0x58] sm:$0xff]  ;;  %v1252_v25 = vld [vmem:[%s1363_s5 + $0x60] sm:$0xff]  ;;  %v1253_v29 = vld [vmem:[%s1363_s5 + $0x68] sm:$0xff] }
  0x14   : > { %v1259_v22 = vld [vmem:[%s1363_s5 + $0x98] sm:$0xff]  ;;  %v1260_v26 = vld [vmem:[%s1363_s5 + $0xa0] sm:$0xff]  ;;  %v1261_v30 = vld [vmem:[%s1363_s5 + $0xa8] sm:$0xff] }
  0x15   : > { %567 = vmatpush.bf16.msra.mxu0 %v1275_v4  ;;  %1279 = vmatpush.bf16.msra.mxu1 %v1275_v4  ;;  %v1267_v23 = vld [vmem:[%s1363_s5 + $0xd8] sm:$0xff]  ;;  %v1268_v27 = vld [vmem:[%s1363_s5 + $0xe0] sm:$0xff]  ;;  %v1269_v31 = vld [vmem:[%s1363_s5 + $0xe8] sm:$0xff] }
  0x16   : > { %1280 = vmatpush.bf16.msra.mxu2 %v1275_v4  ;;  %1281 = vmatpush.bf16.msra.mxu3 %v1275_v4  ;;  %v1246_v32 = vld [vmem:[%s1363_s5 + $0x30] sm:$0xff]  ;;  %v1247_v36 = vld [vmem:[%s1363_s5 + $0x38] sm:$0xff]  ;;  %v1437_v41 = vld [vmem:[%s1707_s3] ss:$0 sm:$0xff] }
  0x17   : > { %v1254_v33 = vld [vmem:[%s1363_s5 + $0x70] sm:$0xff]  ;;  %v1255_v37 = vld [vmem:[%s1363_s5 + $0x78] sm:$0xff] }
  0x18   : > { %v1262_v34 = vld [vmem:[%s1363_s5 + $0xb0] sm:$0xff]  ;;  %v1263_v38 = vld [vmem:[%s1363_s5 + $0xb8] sm:$0xff] }
  0x19   : > { %568 = vmatpush.bf16.msra.mxu0 %v1274_v5  ;;  %1282 = vmatpush.bf16.msra.mxu1 %v1274_v5  ;;  %v1270_v35 = vld [vmem:[%s1363_s5 + $0xf0] sm:$0xff]  ;;  %v1271_v39 = vld [vmem:[%s1363_s5 + $0xf8] sm:$0xff] }
  0x1a   : > { %1283 = vmatpush.bf16.msra.mxu2 %v1274_v5  ;;  %1284 = vmatpush.bf16.msra.mxu3 %v1274_v5 }
  0x1d   : > { %569 = vmatpush.bf16.msra.mxu0 %v1273_v6  ;;  %1285 = vmatpush.bf16.msra.mxu1 %v1273_v6 }
  0x1e   : > { %1286 = vmatpush.bf16.msra.mxu2 %v1273_v6  ;;  %1287 = vmatpush.bf16.msra.mxu3 %v1273_v6 }
  0x21   : > { %570 = vmatpush.bf16.msra.mxu0 %v1272_v7  ;;  %1288 = vmatpush.bf16.msra.mxu1 %v1272_v7 }
  0x22   : > { %1289 = vmatpush.bf16.msra.mxu2 %v1272_v7  ;;  %1290 = vmatpush.bf16.msra.mxu3 %v1272_v7 }
  0x24   : > { %1206 = vmatmul.msk.bf16.vlgmr.msra.gmra.mxu0 %vm462_vm1, %v1240_v8  ;;  %1214 = vmatmul.msk.bf16.vlgmr.msra.gmra.mxu1 %vm462_vm1, %v1248_v9 }
  0x25   : > { %1222 = vmatmul.msk.bf16.vlgmr.msra.gmra.mxu2 %vm462_vm1, %v1256_v10  ;;  %1230 = vmatmul.msk.bf16.vlgmr.msra.gmra.mxu3 %vm462_vm1, %v1264_v11 }
  0x34   : > { %1207 = vmatmul.msk.bf16.gmra.mxu0 %vm462_vm1, %v1241_v12  ;;  %1215 = vmatmul.msk.bf16.gmra.mxu1 %vm462_vm1, %v1249_v13 }
  0x35   : > { %1223 = vmatmul.msk.bf16.gmra.mxu2 %vm462_vm1, %v1257_v14  ;;  %1231 = vmatmul.msk.bf16.gmra.mxu3 %vm462_vm1, %v1265_v15 }
  0x44   : > { %1208 = vmatmul.msk.bf16.gmra.mxu0 %vm462_vm1, %v1242_v16  ;;  %1216 = vmatmul.msk.bf16.gmra.mxu1 %vm462_vm1, %v1250_v17 }
  0x45   : > { %1224 = vmatmul.msk.bf16.gmra.mxu2 %vm462_vm1, %v1258_v18  ;;  %1232 = vmatmul.msk.bf16.gmra.mxu3 %vm462_vm1, %v1266_v19 }
  0x54   : > { %1209 = vmatmul.msk.bf16.gmra.mxu0 %vm462_vm1, %v1243_v20  ;;  %1217 = vmatmul.msk.bf16.gmra.mxu1 %vm462_vm1, %v1251_v21 }
  0x55   : > { %1225 = vmatmul.msk.bf16.gmra.mxu2 %vm462_vm1, %v1259_v22  ;;  %1233 = vmatmul.msk.bf16.gmra.mxu3 %vm462_vm1, %v1267_v23 }
  0x64   : > { %1210 = vmatmul.msk.bf16.gmra.mxu0 %vm462_vm1, %v1244_v24  ;;  %1218 = vmatmul.msk.bf16.gmra.mxu1 %vm462_vm1, %v1252_v25 }
  0x65   : > { %1226 = vmatmul.msk.bf16.gmra.mxu2 %vm462_vm1, %v1260_v26  ;;  %1234 = vmatmul.msk.bf16.gmra.mxu3 %vm462_vm1, %v1268_v27 }
  0x74   : > { %1211 = vmatmul.msk.bf16.gmra.mxu0 %vm462_vm1, %v1245_v28  ;;  %1219 = vmatmul.msk.bf16.gmra.mxu1 %vm462_vm1, %v1253_v29 }
  0x75   : > { %1227 = vmatmul.msk.bf16.gmra.mxu2 %vm462_vm1, %v1261_v30  ;;  %1235 = vmatmul.msk.bf16.gmra.mxu3 %vm462_vm1, %v1269_v31 }
  0x84   : > { %1212 = vmatmul.msk.bf16.gmra.mxu0 %vm462_vm1, %v1246_v32  ;;  %1220 = vmatmul.msk.bf16.gmra.mxu1 %vm462_vm1, %v1254_v33 }
  0x85   : > { %1228 = vmatmul.msk.bf16.gmra.mxu2 %vm462_vm1, %v1262_v34  ;;  %1236 = vmatmul.msk.bf16.gmra.mxu3 %vm462_vm1, %v1270_v35 }
  0x94   : > { %1213 = vmatmul.msk.bf16.gmra.mxu0 %vm462_vm1, %v1247_v36  ;;  %1221 = vmatmul.msk.bf16.gmra.mxu1 %vm462_vm1, %v1255_v37 }
  0x95   : > { %1229 = vmatmul.msk.bf16.gmra.mxu2 %vm462_vm1, %v1263_v38  ;;  %1237 = vmatmul.msk.bf16.gmra.mxu3 %vm462_vm1, %v1271_v39 }
  0xa1   : > { %v572_v42 = vpop.f32.mrf.mxu0  ;;  %v612_v43 = vpop.f32.mrf.mxu1 }
  0xa2   : > { %v736_v44 = vmul.f32 %v1432_v40, %v572_v42  ;;  %v752_v45 = vmul.f32 %v1432_v40, %v612_v43 }
  0xa4   : > { %v804_v46 = vadd.f32 %v1437_v41, %v736_v44  ;;  %v820_v47 = vadd.f32 %v1437_v41, %v752_v45 }
  0xa6   : > { %v868_v48 = vmax.f32 %v804_v46, 0.0  ;;  %v884_v49 = vmax.f32 %v820_v47, 0.0 }
  0xa8   : > { %933 = vst.msk [vmem:[%s1447_s13] sm:$0xff] %vm932_vm2, %v868_v48  ;;  %v652_v50 = vpop.f32.mrf.mxu2  ;;  %v692_v51 = vpop.f32.mrf.mxu3 }
  0xa9   : > { %949 = vst.msk [vmem:[%s1447_s13 + $0x80] sm:$0xff] %vm932_vm2, %v884_v49  ;;  %v768_v52 = vmul.f32 %v1432_v40, %v652_v50  ;;  %v784_v53 = vmul.f32 %v1432_v40, %v692_v51  ;;  %v574_v54 = vpop.f32.mrf.mxu0  ;;  %v614_v55 = vpop.f32.mrf.mxu1 }
  0xaa   : > { %v737_v56 = vmul.f32 %v1432_v40, %v574_v54  ;;  %v753_v57 = vmul.f32 %v1432_v40, %v614_v55 }
  0xab   : > { %v836_v58 = vadd.f32 %v1437_v41, %v768_v52  ;;  %v852_v59 = vadd.f32 %v1437_v41, %v784_v53 }
  0xac   : > { %v805_v60 = vadd.f32 %v1437_v41, %v737_v56  ;;  %v821_v61 = vadd.f32 %v1437_v41, %v753_v57 }
  0xad   : > { %v900_v62 = vmax.f32 %v836_v58, 0.0  ;;  %v916_v63 = vmax.f32 %v852_v59, 0.0 }
  0xae   : > { %v869_v0 = vmax.f32 %v805_v60, 0.0  ;;  %v885_v1 = vmax.f32 %v821_v61, 0.0 }
  0xaf   : > { %965 = vst.msk [vmem:[%s1447_s13 + $0x100] sm:$0xff] %vm932_vm2, %v900_v62 }
  0xb0   : > { %981 = vst.msk [vmem:[%s1447_s13 + $0x180] sm:$0xff] %vm932_vm2, %v916_v63  ;;  %v654_v2 = vpop.f32.mrf.mxu2  ;;  %v694_v3 = vpop.f32.mrf.mxu3 }
  0xb1   : > { %934 = vst.msk [vmem:[%s1447_s13 + $0x8] sm:$0xff] %vm932_vm2, %v869_v0  ;;  %v769_v4 = vmul.f32 %v1432_v40, %v654_v2  ;;  %v785_v5 = vmul.f32 %v1432_v40, %v694_v3  ;;  %v577_v6 = vpop.f32.mrf.mxu0  ;;  %v617_v7 = vpop.f32.mrf.mxu1 }
  0xb2   : > { %950 = vst.msk [vmem:[%s1447_s13 + $0x88] sm:$0xff] %vm932_vm2, %v885_v1  ;;  %v738_v8 = vmul.f32 %v1432_v40, %v577_v6  ;;  %v754_v9 = vmul.f32 %v1432_v40, %v617_v7 }
  0xb3   : > { %v837_v10 = vadd.f32 %v1437_v41, %v769_v4  ;;  %v853_v11 = vadd.f32 %v1437_v41, %v785_v5 }
  0xb4   : > { %v806_v12 = vadd.f32 %v1437_v41, %v738_v8  ;;  %v822_v13 = vadd.f32 %v1437_v41, %v754_v9 }
  0xb5   : > { %v901_v14 = vmax.f32 %v837_v10, 0.0  ;;  %v917_v15 = vmax.f32 %v853_v11, 0.0 }
  0xb6   : > { %v870_v16 = vmax.f32 %v806_v12, 0.0  ;;  %v886_v17 = vmax.f32 %v822_v13, 0.0 }
  0xb7   : > { %966 = vst.msk [vmem:[%s1447_s13 + $0x108] sm:$0xff] %vm932_vm2, %v901_v14 }
  0xb8   : > { %982 = vst.msk [vmem:[%s1447_s13 + $0x188] sm:$0xff] %vm932_vm2, %v917_v15  ;;  %v657_v18 = vpop.f32.mrf.mxu2  ;;  %v697_v19 = vpop.f32.mrf.mxu3 }
  0xb9   : > { %935 = vst.msk [vmem:[%s1447_s13 + $0x10] sm:$0xff] %vm932_vm2, %v870_v16  ;;  %v770_v20 = vmul.f32 %v1432_v40, %v657_v18  ;;  %v786_v21 = vmul.f32 %v1432_v40, %v697_v19  ;;  %v579_v22 = vpop.f32.mrf.mxu0  ;;  %v619_v23 = vpop.f32.mrf.mxu1 }
  0xba   : > { %951 = vst.msk [vmem:[%s1447_s13 + $0x90] sm:$0xff] %vm932_vm2, %v886_v17  ;;  %v739_v24 = vmul.f32 %v1432_v40, %v579_v22  ;;  %v755_v25 = vmul.f32 %v1432_v40, %v619_v23 }
  0xbb   : > { %v838_v26 = vadd.f32 %v1437_v41, %v770_v20  ;;  %v854_v27 = vadd.f32 %v1437_v41, %v786_v21 }
  0xbc   : > { %v807_v28 = vadd.f32 %v1437_v41, %v739_v24  ;;  %v823_v29 = vadd.f32 %v1437_v41, %v755_v25 }
  0xbd   : > { %v902_v30 = vmax.f32 %v838_v26, 0.0  ;;  %v918_v31 = vmax.f32 %v854_v27, 0.0 }
  0xbe   : > { %v871_v32 = vmax.f32 %v807_v28, 0.0  ;;  %v887_v33 = vmax.f32 %v823_v29, 0.0 }
  0xbf   : > { %967 = vst.msk [vmem:[%s1447_s13 + $0x110] sm:$0xff] %vm932_vm2, %v902_v30 }
  0xc0   : > { %983 = vst.msk [vmem:[%s1447_s13 + $0x190] sm:$0xff] %vm932_vm2, %v918_v31  ;;  %v659_v34 = vpop.f32.mrf.mxu2  ;;  %v699_v35 = vpop.f32.mrf.mxu3 }
  0xc1   : > { %936 = vst.msk [vmem:[%s1447_s13 + $0x18] sm:$0xff] %vm932_vm2, %v871_v32  ;;  %v771_v36 = vmul.f32 %v1432_v40, %v659_v34  ;;  %v787_v37 = vmul.f32 %v1432_v40, %v699_v35  ;;  %v582_v38 = vpop.f32.mrf.mxu0  ;;  %v622_v39 = vpop.f32.mrf.mxu1 }
  0xc2   : > { %952 = vst.msk [vmem:[%s1447_s13 + $0x98] sm:$0xff] %vm932_vm2, %v887_v33  ;;  %v740_v42 = vmul.f32 %v1432_v40, %v582_v38  ;;  %v756_v43 = vmul.f32 %v1432_v40, %v622_v39 }
  0xc3   : > { %v839_v44 = vadd.f32 %v1437_v41, %v771_v36  ;;  %v855_v45 = vadd.f32 %v1437_v41, %v787_v37 }
  0xc4   : > { %v808_v46 = vadd.f32 %v1437_v41, %v740_v42  ;;  %v824_v47 = vadd.f32 %v1437_v41, %v756_v43 }
  0xc5   : > { %v903_v48 = vmax.f32 %v839_v44, 0.0  ;;  %v919_v49 = vmax.f32 %v855_v45, 0.0 }
  0xc6   : > { %v872_v50 = vmax.f32 %v808_v46, 0.0  ;;  %v888_v51 = vmax.f32 %v824_v47, 0.0 }
  0xc7   : > { %968 = vst.msk [vmem:[%s1447_s13 + $0x118] sm:$0xff] %vm932_vm2, %v903_v48 }
  0xc8   : > { %984 = vst.msk [vmem:[%s1447_s13 + $0x198] sm:$0xff] %vm932_vm2, %v919_v49  ;;  %v662_v52 = vpop.f32.mrf.mxu2  ;;  %v702_v53 = vpop.f32.mrf.mxu3 }
  0xc9   : > { %937 = vst.msk [vmem:[%s1447_s13 + $0x20] sm:$0xff] %vm932_vm2, %v872_v50  ;;  %v772_v54 = vmul.f32 %v1432_v40, %v662_v52  ;;  %v788_v55 = vmul.f32 %v1432_v40, %v702_v53  ;;  %v584_v56 = vpop.f32.mrf.mxu0  ;;  %v624_v57 = vpop.f32.mrf.mxu1 }
  0xca   : > { %953 = vst.msk [vmem:[%s1447_s13 + $0xa0] sm:$0xff] %vm932_vm2, %v888_v51  ;;  %v741_v58 = vmul.f32 %v1432_v40, %v584_v56  ;;  %v757_v59 = vmul.f32 %v1432_v40, %v624_v57 }
  0xcb   : > { %v840_v60 = vadd.f32 %v1437_v41, %v772_v54  ;;  %v856_v61 = vadd.f32 %v1437_v41, %v788_v55 }
  0xcc   : > { %v809_v62 = vadd.f32 %v1437_v41, %v741_v58  ;;  %v825_v63 = vadd.f32 %v1437_v41, %v757_v59 }
  0xcd   : > { %v904_v0 = vmax.f32 %v840_v60, 0.0  ;;  %v920_v1 = vmax.f32 %v856_v61, 0.0 }
  0xce   : > { %v873_v2 = vmax.f32 %v809_v62, 0.0  ;;  %v889_v3 = vmax.f32 %v825_v63, 0.0 }
  0xcf   : > { %969 = vst.msk [vmem:[%s1447_s13 + $0x120] sm:$0xff] %vm932_vm2, %v904_v0 }
  0xd0   : > { %985 = vst.msk [vmem:[%s1447_s13 + $0x1a0] sm:$0xff] %vm932_vm2, %v920_v1  ;;  %v664_v4 = vpop.f32.mrf.mxu2  ;;  %v704_v5 = vpop.f32.mrf.mxu3 }
  0xd1   : > { %938 = vst.msk [vmem:[%s1447_s13 + $0x28] sm:$0xff] %vm932_vm2, %v873_v2  ;;  %v773_v6 = vmul.f32 %v1432_v40, %v664_v4  ;;  %v789_v7 = vmul.f32 %v1432_v40, %v704_v5  ;;  %v587_v8 = vpop.f32.mrf.mxu0  ;;  %v627_v9 = vpop.f32.mrf.mxu1 }
  0xd2   : > { %954 = vst.msk [vmem:[%s1447_s13 + $0xa8] sm:$0xff] %vm932_vm2, %v889_v3  ;;  %v742_v10 = vmul.f32 %v1432_v40, %v587_v8  ;;  %v758_v11 = vmul.f32 %v1432_v40, %v627_v9 }
  0xd3   : > { %v841_v12 = vadd.f32 %v1437_v41, %v773_v6  ;;  %v857_v13 = vadd.f32 %v1437_v41, %v789_v7 }
  0xd4   : > { %v810_v14 = vadd.f32 %v1437_v41, %v742_v10  ;;  %v826_v15 = vadd.f32 %v1437_v41, %v758_v11 }
  0xd5   : > { %v905_v16 = vmax.f32 %v841_v12, 0.0  ;;  %v921_v17 = vmax.f32 %v857_v13, 0.0 }
  0xd6   : > { %v874_v18 = vmax.f32 %v810_v14, 0.0  ;;  %v890_v19 = vmax.f32 %v826_v15, 0.0 }
  0xd7   : > { %970 = vst.msk [vmem:[%s1447_s13 + $0x128] sm:$0xff] %vm932_vm2, %v905_v16 }
  0xd8   : > { %986 = vst.msk [vmem:[%s1447_s13 + $0x1a8] sm:$0xff] %vm932_vm2, %v921_v17  ;;  %v667_v20 = vpop.f32.mrf.mxu2  ;;  %v707_v21 = vpop.f32.mrf.mxu3 }
  0xd9   : > { %939 = vst.msk [vmem:[%s1447_s13 + $0x30] sm:$0xff] %vm932_vm2, %v874_v18  ;;  %v774_v22 = vmul.f32 %v1432_v40, %v667_v20  ;;  %v790_v23 = vmul.f32 %v1432_v40, %v707_v21  ;;  %v589_v24 = vpop.f32.mrf.mxu0  ;;  %v629_v25 = vpop.f32.mrf.mxu1 }
  0xda   : > { %955 = vst.msk [vmem:[%s1447_s13 + $0xb0] sm:$0xff] %vm932_vm2, %v890_v19  ;;  %v743_v26 = vmul.f32 %v1432_v40, %v589_v24  ;;  %v759_v27 = vmul.f32 %v1432_v40, %v629_v25 }
  0xdb   : > { %v842_v28 = vadd.f32 %v1437_v41, %v774_v22  ;;  %v858_v29 = vadd.f32 %v1437_v41, %v790_v23 }
  0xdc   : > { %v811_v30 = vadd.f32 %v1437_v41, %v743_v26  ;;  %v827_v31 = vadd.f32 %v1437_v41, %v759_v27 }
  0xdd   : > { %v906_v32 = vmax.f32 %v842_v28, 0.0  ;;  %v922_v33 = vmax.f32 %v858_v29, 0.0 }
  0xde   : > { %v875_v34 = vmax.f32 %v811_v30, 0.0  ;;  %v891_v35 = vmax.f32 %v827_v31, 0.0 }
  0xdf   : > { %971 = vst.msk [vmem:[%s1447_s13 + $0x130] sm:$0xff] %vm932_vm2, %v906_v32 }
  0xe0   : > { %987 = vst.msk [vmem:[%s1447_s13 + $0x1b0] sm:$0xff] %vm932_vm2, %v922_v33  ;;  %v669_v36 = vpop.f32.mrf.mxu2  ;;  %v709_v37 = vpop.f32.mrf.mxu3 }
  0xe1   : > { %940 = vst.msk [vmem:[%s1447_s13 + $0x38] sm:$0xff] %vm932_vm2, %v875_v34  ;;  %v775_v38 = vmul.f32 %v1432_v40, %v669_v36  ;;  %v791_v39 = vmul.f32 %v1432_v40, %v709_v37  ;;  %v592_v42 = vpop.f32.mrf.mxu0  ;;  %v632_v43 = vpop.f32.mrf.mxu1 }
  0xe2   : > { %956 = vst.msk [vmem:[%s1447_s13 + $0xb8] sm:$0xff] %vm932_vm2, %v891_v35  ;;  %v744_v44 = vmul.f32 %v1432_v40, %v592_v42  ;;  %v760_v45 = vmul.f32 %v1432_v40, %v632_v43 }
  0xe3   : > { %v843_v46 = vadd.f32 %v1437_v41, %v775_v38  ;;  %v859_v47 = vadd.f32 %v1437_v41, %v791_v39 }
  0xe4   : > { %v812_v48 = vadd.f32 %v1437_v41, %v744_v44  ;;  %v828_v49 = vadd.f32 %v1437_v41, %v760_v45 }
  0xe5   : > { %v907_v50 = vmax.f32 %v843_v46, 0.0  ;;  %v923_v51 = vmax.f32 %v859_v47, 0.0 }
  0xe6   : > { %v876_v52 = vmax.f32 %v812_v48, 0.0  ;;  %v892_v53 = vmax.f32 %v828_v49, 0.0 }
  0xe7   : > { %972 = vst.msk [vmem:[%s1447_s13 + $0x138] sm:$0xff] %vm932_vm2, %v907_v50 }
  0xe8   : > { %988 = vst.msk [vmem:[%s1447_s13 + $0x1b8] sm:$0xff] %vm932_vm2, %v923_v51  ;;  %v672_v54 = vpop.f32.mrf.mxu2  ;;  %v712_v55 = vpop.f32.mrf.mxu3 }
  0xe9   : > { %941 = vst.msk [vmem:[%s1447_s13 + $0x40] sm:$0xff] %vm932_vm2, %v876_v52  ;;  %v776_v56 = vmul.f32 %v1432_v40, %v672_v54  ;;  %v792_v57 = vmul.f32 %v1432_v40, %v712_v55  ;;  %v594_v58 = vpop.f32.mrf.mxu0  ;;  %v634_v59 = vpop.f32.mrf.mxu1 }
  0xea   : > { %957 = vst.msk [vmem:[%s1447_s13 + $0xc0] sm:$0xff] %vm932_vm2, %v892_v53  ;;  %v745_v60 = vmul.f32 %v1432_v40, %v594_v58  ;;  %v761_v61 = vmul.f32 %v1432_v40, %v634_v59 }
  0xeb   : > { %v844_v62 = vadd.f32 %v1437_v41, %v776_v56  ;;  %v860_v63 = vadd.f32 %v1437_v41, %v792_v57 }
  0xec   : > { %v813_v0 = vadd.f32 %v1437_v41, %v745_v60  ;;  %v829_v1 = vadd.f32 %v1437_v41, %v761_v61 }
  0xed   : > { %v908_v2 = vmax.f32 %v844_v62, 0.0  ;;  %v924_v3 = vmax.f32 %v860_v63, 0.0 }
  0xee   : > { %v877_v4 = vmax.f32 %v813_v0, 0.0  ;;  %v893_v5 = vmax.f32 %v829_v1, 0.0 }
  0xef   : > { %973 = vst.msk [vmem:[%s1447_s13 + $0x140] sm:$0xff] %vm932_vm2, %v908_v2 }
  0xf0   : > { %989 = vst.msk [vmem:[%s1447_s13 + $0x1c0] sm:$0xff] %vm932_vm2, %v924_v3  ;;  %v674_v6 = vpop.f32.mrf.mxu2  ;;  %v714_v7 = vpop.f32.mrf.mxu3 }
  0xf1   : > { %942 = vst.msk [vmem:[%s1447_s13 + $0x48] sm:$0xff] %vm932_vm2, %v877_v4  ;;  %v777_v8 = vmul.f32 %v1432_v40, %v674_v6  ;;  %v793_v9 = vmul.f32 %v1432_v40, %v714_v7  ;;  %v597_v10 = vpop.f32.mrf.mxu0  ;;  %v637_v11 = vpop.f32.mrf.mxu1 }
  0xf2   : > { %958 = vst.msk [vmem:[%s1447_s13 + $0xc8] sm:$0xff] %vm932_vm2, %v893_v5  ;;  %v746_v12 = vmul.f32 %v1432_v40, %v597_v10  ;;  %v762_v13 = vmul.f32 %v1432_v40, %v637_v11 }
  0xf3   : > { %v845_v14 = vadd.f32 %v1437_v41, %v777_v8  ;;  %v861_v15 = vadd.f32 %v1437_v41, %v793_v9 }
  0xf4   : > { %v814_v16 = vadd.f32 %v1437_v41, %v746_v12  ;;  %v830_v17 = vadd.f32 %v1437_v41, %v762_v13 }
  0xf5   : > { %v909_v18 = vmax.f32 %v845_v14, 0.0  ;;  %v925_v19 = vmax.f32 %v861_v15, 0.0 }
  0xf6   : > { %v878_v20 = vmax.f32 %v814_v16, 0.0  ;;  %v894_v21 = vmax.f32 %v830_v17, 0.0 }
  0xf7   : > { %974 = vst.msk [vmem:[%s1447_s13 + $0x148] sm:$0xff] %vm932_vm2, %v909_v18 }
  0xf8   : > { %990 = vst.msk [vmem:[%s1447_s13 + $0x1c8] sm:$0xff] %vm932_vm2, %v925_v19  ;;  %v677_v22 = vpop.f32.mrf.mxu2  ;;  %v717_v23 = vpop.f32.mrf.mxu3 }
  0xf9   : > { %943 = vst.msk [vmem:[%s1447_s13 + $0x50] sm:$0xff] %vm932_vm2, %v878_v20  ;;  %v778_v24 = vmul.f32 %v1432_v40, %v677_v22  ;;  %v794_v25 = vmul.f32 %v1432_v40, %v717_v23  ;;  %v599_v26 = vpop.f32.mrf.mxu0  ;;  %v639_v27 = vpop.f32.mrf.mxu1 }
  0xfa   : > { %959 = vst.msk [vmem:[%s1447_s13 + $0xd0] sm:$0xff] %vm932_vm2, %v894_v21  ;;  %v747_v28 = vmul.f32 %v1432_v40, %v599_v26  ;;  %v763_v29 = vmul.f32 %v1432_v40, %v639_v27 }
  0xfb   : > { %v846_v30 = vadd.f32 %v1437_v41, %v778_v24  ;;  %v862_v31 = vadd.f32 %v1437_v41, %v794_v25 }
  0xfc   : > { %v815_v32 = vadd.f32 %v1437_v41, %v747_v28  ;;  %v831_v33 = vadd.f32 %v1437_v41, %v763_v29 }
  0xfd   : > { %v910_v34 = vmax.f32 %v846_v30, 0.0  ;;  %v926_v35 = vmax.f32 %v862_v31, 0.0 }
  0xfe   : > { %v879_v36 = vmax.f32 %v815_v32, 0.0  ;;  %v895_v37 = vmax.f32 %v831_v33, 0.0 }
  0xff   : > { %975 = vst.msk [vmem:[%s1447_s13 + $0x150] sm:$0xff] %vm932_vm2, %v910_v34 }
 0x100   : > { %991 = vst.msk [vmem:[%s1447_s13 + $0x1d0] sm:$0xff] %vm932_vm2, %v926_v35  ;;  %v679_v38 = vpop.f32.mrf.mxu2  ;;  %v719_v39 = vpop.f32.mrf.mxu3 }
 0x101   : > { %944 = vst.msk [vmem:[%s1447_s13 + $0x58] sm:$0xff] %vm932_vm2, %v879_v36  ;;  %v779_v42 = vmul.f32 %v1432_v40, %v679_v38  ;;  %v795_v43 = vmul.f32 %v1432_v40, %v719_v39  ;;  %v602_v44 = vpop.f32.mrf.mxu0  ;;  %v642_v45 = vpop.f32.mrf.mxu1 }
 0x102   : > { %960 = vst.msk [vmem:[%s1447_s13 + $0xd8] sm:$0xff] %vm932_vm2, %v895_v37  ;;  %v748_v46 = vmul.f32 %v1432_v40, %v602_v44  ;;  %v764_v47 = vmul.f32 %v1432_v40, %v642_v45 }
 0x103   : > { %v847_v48 = vadd.f32 %v1437_v41, %v779_v42  ;;  %v863_v49 = vadd.f32 %v1437_v41, %v795_v43 }
 0x104   : > { %v816_v50 = vadd.f32 %v1437_v41, %v748_v46  ;;  %v832_v51 = vadd.f32 %v1437_v41, %v764_v47 }
 0x105   : > { %v911_v52 = vmax.f32 %v847_v48, 0.0  ;;  %v927_v53 = vmax.f32 %v863_v49, 0.0 }
 0x106   : > { %v880_v54 = vmax.f32 %v816_v50, 0.0  ;;  %v896_v55 = vmax.f32 %v832_v51, 0.0 }
 0x107   : > { %976 = vst.msk [vmem:[%s1447_s13 + $0x158] sm:$0xff] %vm932_vm2, %v911_v52 }
 0x108   : > { %992 = vst.msk [vmem:[%s1447_s13 + $0x1d8] sm:$0xff] %vm932_vm2, %v927_v53  ;;  %v682_v56 = vpop.f32.mrf.mxu2  ;;  %v722_v57 = vpop.f32.mrf.mxu3 }
 0x109   : > { %945 = vst.msk [vmem:[%s1447_s13 + $0x60] sm:$0xff] %vm932_vm2, %v880_v54  ;;  %v780_v58 = vmul.f32 %v1432_v40, %v682_v56  ;;  %v796_v59 = vmul.f32 %v1432_v40, %v722_v57  ;;  %v604_v60 = vpop.f32.mrf.mxu0  ;;  %v644_v61 = vpop.f32.mrf.mxu1 }
 0x10a   : > { %961 = vst.msk [vmem:[%s1447_s13 + $0xe0] sm:$0xff] %vm932_vm2, %v896_v55  ;;  %v749_v62 = vmul.f32 %v1432_v40, %v604_v60  ;;  %v765_v63 = vmul.f32 %v1432_v40, %v644_v61 }
 0x10b   : > { %v848_v0 = vadd.f32 %v1437_v41, %v780_v58  ;;  %v864_v1 = vadd.f32 %v1437_v41, %v796_v59 }
 0x10c   : > { %v817_v2 = vadd.f32 %v1437_v41, %v749_v62  ;;  %v833_v3 = vadd.f32 %v1437_v41, %v765_v63 }
 0x10d   : > { %v912_v4 = vmax.f32 %v848_v0, 0.0  ;;  %v928_v5 = vmax.f32 %v864_v1, 0.0 }
 0x10e   : > { %v881_v6 = vmax.f32 %v817_v2, 0.0  ;;  %v897_v7 = vmax.f32 %v833_v3, 0.0 }
 0x10f   : > { %977 = vst.msk [vmem:[%s1447_s13 + $0x160] sm:$0xff] %vm932_vm2, %v912_v4 }
 0x110   : > { %993 = vst.msk [vmem:[%s1447_s13 + $0x1e0] sm:$0xff] %vm932_vm2, %v928_v5  ;;  %v684_v8 = vpop.f32.mrf.mxu2  ;;  %v724_v9 = vpop.f32.mrf.mxu3 }
 0x111   : > { %946 = vst.msk [vmem:[%s1447_s13 + $0x68] sm:$0xff] %vm932_vm2, %v881_v6  ;;  %v781_v10 = vmul.f32 %v1432_v40, %v684_v8  ;;  %v797_v11 = vmul.f32 %v1432_v40, %v724_v9  ;;  %v607_v12 = vpop.f32.mrf.mxu0  ;;  %v647_v13 = vpop.f32.mrf.mxu1 }
 0x112   : > { %962 = vst.msk [vmem:[%s1447_s13 + $0xe8] sm:$0xff] %vm932_vm2, %v897_v7  ;;  %v750_v14 = vmul.f32 %v1432_v40, %v607_v12  ;;  %v766_v15 = vmul.f32 %v1432_v40, %v647_v13 }
 0x113   : > { %v849_v16 = vadd.f32 %v1437_v41, %v781_v10  ;;  %v865_v17 = vadd.f32 %v1437_v41, %v797_v11 }
 0x114   : > { %v818_v18 = vadd.f32 %v1437_v41, %v750_v14  ;;  %v834_v19 = vadd.f32 %v1437_v41, %v766_v15 }
 0x115   : > { %v913_v20 = vmax.f32 %v849_v16, 0.0  ;;  %v929_v21 = vmax.f32 %v865_v17, 0.0 }
 0x116   : > { %v882_v22 = vmax.f32 %v818_v18, 0.0  ;;  %v898_v23 = vmax.f32 %v834_v19, 0.0 }
 0x117   : > { %978 = vst.msk [vmem:[%s1447_s13 + $0x168] sm:$0xff] %vm932_vm2, %v913_v20 }
 0x118   : > { %994 = vst.msk [vmem:[%s1447_s13 + $0x1e8] sm:$0xff] %vm932_vm2, %v929_v21  ;;  %v687_v24 = vpop.f32.mrf.mxu2  ;;  %v727_v25 = vpop.f32.mrf.mxu3 }
 0x119   : > { %947 = vst.msk [vmem:[%s1447_s13 + $0x70] sm:$0xff] %vm932_vm2, %v882_v22  ;;  %v782_v26 = vmul.f32 %v1432_v40, %v687_v24  ;;  %v798_v27 = vmul.f32 %v1432_v40, %v727_v25  ;;  %v609_v28 = vpop.f32.mrf.mxu0  ;;  %v649_v29 = vpop.f32.mrf.mxu1 }
 0x11a   : > { %963 = vst.msk [vmem:[%s1447_s13 + $0xf0] sm:$0xff] %vm932_vm2, %v898_v23  ;;  %v751_v30 = vmul.f32 %v1432_v40, %v609_v28  ;;  %v767_v31 = vmul.f32 %v1432_v40, %v649_v29 }
 0x11b   : > { %v850_v32 = vadd.f32 %v1437_v41, %v782_v26  ;;  %v866_v33 = vadd.f32 %v1437_v41, %v798_v27 }
 0x11c   : > { %v819_v34 = vadd.f32 %v1437_v41, %v751_v30  ;;  %v835_v35 = vadd.f32 %v1437_v41, %v767_v31 }
 0x11d   : > { %v914_v36 = vmax.f32 %v850_v32, 0.0  ;;  %v930_v37 = vmax.f32 %v866_v33, 0.0 }
 0x11e   : > { %v883_v38 = vmax.f32 %v819_v34, 0.0  ;;  %v899_v39 = vmax.f32 %v835_v35, 0.0 }
 0x11f   : > { %979 = vst.msk [vmem:[%s1447_s13 + $0x170] sm:$0xff] %vm932_vm2, %v914_v36 }
 0x120   : > { %995 = vst.msk [vmem:[%s1447_s13 + $0x1f0] sm:$0xff] %vm932_vm2, %v930_v37  ;;  %v689_v42 = vpop.f32.mrf.mxu2  ;;  %v729_v43 = vpop.f32.mrf.mxu3 }
 0x121   : > { %948 = vst.msk [vmem:[%s1447_s13 + $0x78] sm:$0xff] %vm932_vm2, %v883_v38  ;;  %v783_v44 = vmul.f32 %v1432_v40, %v689_v42  ;;  %v799_v45 = vmul.f32 %v1432_v40, %v729_v43 }
 0x122   : > { %964 = vst.msk [vmem:[%s1447_s13 + $0xf8] sm:$0xff] %vm932_vm2, %v899_v39 }
 0x123   : > { %v851_v46 = vadd.f32 %v1437_v41, %v783_v44  ;;  %v867_v47 = vadd.f32 %v1437_v41, %v799_v45 }
 0x125   : > { %v915_v48 = vmax.f32 %v851_v46, 0.0  ;;  %v931_v49 = vmax.f32 %v867_v47, 0.0 }
 0x127   : > { %980 = vst.msk [vmem:[%s1447_s13 + $0x178] sm:$0xff] %vm932_vm2, %v915_v48 }
 0x128   : > { %996 = vst.msk [vmem:[%s1447_s13 + $0x1f8] sm:$0xff] %vm932_vm2, %v931_v49 }
 0x129 PF: > { %s14_s15 = sadd.s32 1, %s1307_s15  }
 0x12a   : > { %p11_p4 = scmp.ge.s32.totalorder %s14_s15, 6  }
 0x12c   :  { %13 = sbr.rel (!%p11_p4) target bundleno = 1 (0x1), region = 66 }

// kernel: _lambda_.15
= control target key start
LH: loop header
LB: loop body
LE: loop exit
PB: predicated region body
PF: predicated region fallthrough
CT: control target
= control target key end

     0   :  { %s3499_s6 = smov 0   ;;  %s3501_s7 = smov 0   ;;  %s4787_s0 = inlined_call_operand.vmem [shape: f32[9,512,16], index: 0, kind: input, shape index: {}]   ;;  %s4788_s1 = inlined_call_operand.vmem [shape: f32[512,16], index: 1, kind: output, shape index: {}]  }
   0x1   :  { %s3503_s8 = smov 0  }
   0x2 LB: > { %s3427_s9 = sadd.s32 4294967295, %s3487_s8   ;;  %s3516_s10 = sadd.s32 1, %s3487_s8   ;;  %s3487_s8 = sphi %s3503_s8, %s4791_s8   ;;  %s3483_s7 = sphi %s3501_s7, %s4790_s7   ;;  %s3479_s6 = sphi %s3499_s6, %s4789_s6  }
   0x3   : > { %s15_s11 = ssub.s32 %s3487_s8, %s3516_s10  ;;  %s18_s12 = sadd.s32 1, %s3483_s7 }
   0x4   : > { %p16_p0 = scmp.eq.s32.totalorder %s15_s11, 0  ;;  %p25_p1 = scmp.ne.s32.totalorder %s3483_s7, %s3479_s6 }
   0x5   : > { %p26_p2 = scmp.eq.s32.totalorder %s3487_s8, 0  ;;  %p3430_p4 = scmp.ge.s32.totalorder %s3487_s8, 2 }
   0x6   : > { %s3525_s13 = scalar_select %p16_p0, %s3483_s7, %s18_s12  }
   0x7   : > { %p27_p3 = por %p26_p2, %p25_p1  ;;  %77 = sbr.rel (%p3430_p4) target bundleno = 304 (0x130), region = 16 }
   0xc   : > { %80 = sbr.rel (!%p27_p3) target bundleno = 304 (0x130), region = 20  ;;  %s82_s14 = sand.u32 (%p27_p3), 1, %s3483_s7  }
   0xd   : > { %s3438_s15 = sshll.u32 (%p27_p3), %s3487_s8, 8  ;;  %s3439_s16 = smul.u32 (%p27_p3), 2304, %s82_s14 }
   0xe   : > { %s3533_s19 = scalar_lea.vmem (%p27_p3), %s4787_s0, %s3438_s15 }
   0xf   : > { %v691_v0 = vld [vmem:[%s3533_s19] sm:$0xff] (%p27_p3)  ;;  %v693_v1 = vld [vmem:[%s3533_s19 + $0x8] sm:$0xff] (%p27_p3)  ;;  %v695_v2 = vld [vmem:[%s3533_s19 + $0x10] sm:$0xff] (%p27_p3)  ;;  %s3538_s20 = scalar_lea.vmem (%p27_p3), [#allocation2], %s3439_s16 }
  0x10   : > { %692 = vst [vmem:[%s3538_s20] sm:$0xff] (%p27_p3), %v691_v0  ;;  %v697_v3 = vld [vmem:[%s3533_s19 + $0x18] sm:$0xff] (%p27_p3)  ;;  %v699_v4 = vld [vmem:[%s3533_s19 + $0x20] sm:$0xff] (%p27_p3)  ;;  %v701_v5 = vld [vmem:[%s3533_s19 + $0x28] sm:$0xff] (%p27_p3) }
  0x11   : > { %694 = vst [vmem:[%s3538_s20 + $0x8] sm:$0xff] %v693_v1  ;;  %v703_v6 = vld [vmem:[%s3533_s19 + $0x30] sm:$0xff]  ;;  %v705_v7 = vld [vmem:[%s3533_s19 + $0x38] sm:$0xff]  ;;  %v707_v8 = vld [vmem:[%s3533_s19 + $0x40] sm:$0xff] }
  0x12   : > { %696 = vst [vmem:[%s3538_s20 + $0x10] sm:$0xff] %v695_v2  ;;  %v709_v9 = vld [vmem:[%s3533_s19 + $0x48] sm:$0xff]  ;;  %v711_v10 = vld [vmem:[%s3533_s19 + $0x50] sm:$0xff]  ;;  %v713_v11 = vld [vmem:[%s3533_s19 + $0x58] sm:$0xff] }
  0x13   : > { %698 = vst [vmem:[%s3538_s20 + $0x18] sm:$0xff] %v697_v3  ;;  %v715_v12 = vld [vmem:[%s3533_s19 + $0x60] sm:$0xff]  ;;  %v717_v13 = vld [vmem:[%s3533_s19 + $0x68] sm:$0xff]  ;;  %v719_v14 = vld [vmem:[%s3533_s19 + $0x70] sm:$0xff] }
  0x14   : > { %700 = vst [vmem:[%s3538_s20 + $0x20] sm:$0xff] %v699_v4  ;;  %v721_v15 = vld [vmem:[%s3533_s19 + $0x78] sm:$0xff]  ;;  %v723_v16 = vld [vmem:[%s3533_s19 + $0x80] sm:$0xff]  ;;  %v725_v17 = vld [vmem:[%s3533_s19 + $0x88] sm:$0xff] }
  0x15   : > { %702 = vst [vmem:[%s3538_s20 + $0x28] sm:$0xff] %v701_v5  ;;  %v727_v18 = vld [vmem:[%s3533_s19 + $0x90] sm:$0xff]  ;;  %v729_v19 = vld [vmem:[%s3533_s19 + $0x98] sm:$0xff]  ;;  %v731_v20 = vld [vmem:[%s3533_s19 + $0xa0] sm:$0xff] }
  0x16   : > { %704 = vst [vmem:[%s3538_s20 + $0x30] sm:$0xff] %v703_v6  ;;  %v733_v21 = vld [vmem:[%s3533_s19 + $0xa8] sm:$0xff]  ;;  %v735_v22 = vld [vmem:[%s3533_s19 + $0xb0] sm:$0xff]  ;;  %v737_v23 = vld [vmem:[%s3533_s19 + $0xb8] sm:$0xff] }
  0x17   : > { %706 = vst [vmem:[%s3538_s20 + $0x38] sm:$0xff] %v705_v7  ;;  %v739_v24 = vld [vmem:[%s3533_s19 + $0xc0] sm:$0xff]  ;;  %v741_v25 = vld [vmem:[%s3533_s19 + $0xc8] sm:$0xff]  ;;  %v743_v26 = vld [vmem:[%s3533_s19 + $0xd0] sm:$0xff] }
  0x18   : > { %708 = vst [vmem:[%s3538_s20 + $0x40] sm:$0xff] %v707_v8  ;;  %v745_v27 = vld [vmem:[%s3533_s19 + $0xd8] sm:$0xff]  ;;  %v747_v28 = vld [vmem:[%s3533_s19 + $0xe0] sm:$0xff]  ;;  %v749_v29 = vld [vmem:[%s3533_s19 + $0xe8] sm:$0xff] }
  0x19   : > { %710 = vst [vmem:[%s3538_s20 + $0x48] sm:$0xff] %v709_v9  ;;  %v751_v30 = vld [vmem:[%s3533_s19 + $0xf0] sm:$0xff]  ;;  %v753_v31 = vld [vmem:[%s3533_s19 + $0xf8] sm:$0xff]  ;;  %v755_v32 = vld [vmem:[%s3533_s19 + $0x200] sm:$0xff] }
  0x1a   : > { %712 = vst [vmem:[%s3538_s20 + $0x50] sm:$0xff] %v711_v10  ;;  %v757_v33 = vld [vmem:[%s3533_s19 + $0x208] sm:$0xff]  ;;  %v759_v34 = vld [vmem:[%s3533_s19 + $0x210] sm:$0xff]  ;;  %v761_v35 = vld [vmem:[%s3533_s19 + $0x218] sm:$0xff] }
  0x1b   : > { %714 = vst [vmem:[%s3538_s20 + $0x58] sm:$0xff] %v713_v11  ;;  %v763_v36 = vld [vmem:[%s3533_s19 + $0x220] sm:$0xff]  ;;  %v765_v37 = vld [vmem:[%s3533_s19 + $0x228] sm:$0xff]  ;;  %v767_v38 = vld [vmem:[%s3533_s19 + $0x230] sm:$0xff] }
  0x1c   : > { %716 = vst [vmem:[%s3538_s20 + $0x60] sm:$0xff] %v715_v12  ;;  %v769_v39 = vld [vmem:[%s3533_s19 + $0x238] sm:$0xff]  ;;  %v771_v40 = vld [vmem:[%s3533_s19 + $0x240] sm:$0xff]  ;;  %v773_v41 = vld [vmem:[%s3533_s19 + $0x248] sm:$0xff] }
  0x1d   : > { %718 = vst [vmem:[%s3538_s20 + $0x68] sm:$0xff] %v717_v13  ;;  %v775_v42 = vld [vmem:[%s3533_s19 + $0x250] sm:$0xff]  ;;  %v777_v43 = vld [vmem:[%s3533_s19 + $0x258] sm:$0xff]  ;;  %v779_v44 = vld [vmem:[%s3533_s19 + $0x260] sm:$0xff] }
  0x1e   : > { %720 = vst [vmem:[%s3538_s20 + $0x70] sm:$0xff] %v719_v14  ;;  %v781_v45 = vld [vmem:[%s3533_s19 + $0x268] sm:$0xff]  ;;  %v783_v46 = vld [vmem:[%s3533_s19 + $0x270] sm:$0xff]  ;;  %v785_v47 = vld [vmem:[%s3533_s19 + $0x278] sm:$0xff] }
  0x1f   : > { %722 = vst [vmem:[%s3538_s20 + $0x78] sm:$0xff] %v721_v15  ;;  %v787_v48 = vld [vmem:[%s3533_s19 + $0x280] sm:$0xff]  ;;  %v789_v49 = vld [vmem:[%s3533_s19 + $0x288] sm:$0xff]  ;;  %v791_v50 = vld [vmem:[%s3533_s19 + $0x290] sm:$0xff] }
  0x20   : > { %724 = vst [vmem:[%s3538_s20 + $0x80] sm:$0xff] %v723_v16  ;;  %v793_v51 = vld [vmem:[%s3533_s19 + $0x298] sm:$0xff]  ;;  %v795_v52 = vld [vmem:[%s3533_s19 + $0x2a0] sm:$0xff]  ;;  %v797_v53 = vld [vmem:[%s3533_s19 + $0x2a8] sm:$0xff] }
  0x21   : > { %726 = vst [vmem:[%s3538_s20 + $0x88] sm:$0xff] %v725_v17  ;;  %v799_v54 = vld [vmem:[%s3533_s19 + $0x2b0] sm:$0xff]  ;;  %v801_v55 = vld [vmem:[%s3533_s19 + $0x2b8] sm:$0xff]  ;;  %v803_v56 = vld [vmem:[%s3533_s19 + $0x2c0] sm:$0xff] }
  0x22   : > { %728 = vst [vmem:[%s3538_s20 + $0x90] sm:$0xff] %v727_v18  ;;  %v805_v57 = vld [vmem:[%s3533_s19 + $0x2c8] sm:$0xff]  ;;  %v807_v58 = vld [vmem:[%s3533_s19 + $0x2d0] sm:$0xff]  ;;  %v809_v59 = vld [vmem:[%s3533_s19 + $0x2d8] sm:$0xff] }
  0x23   : > { %730 = vst [vmem:[%s3538_s20 + $0x98] sm:$0xff] %v729_v19  ;;  %v811_v60 = vld [vmem:[%s3533_s19 + $0x2e0] sm:$0xff]  ;;  %v813_v61 = vld [vmem:[%s3533_s19 + $0x2e8] sm:$0xff]  ;;  %v815_v62 = vld [vmem:[%s3533_s19 + $0x2f0] sm:$0xff] }
  0x24   : > { %732 = vst [vmem:[%s3538_s20 + $0xa0] sm:$0xff] %v731_v20  ;;  %v817_v63 = vld [vmem:[%s3533_s19 + $0x2f8] sm:$0xff]  ;;  %v819_v0 = vld [vmem:[%s3533_s19 + $0x400] sm:$0xff]  ;;  %v821_v1 = vld [vmem:[%s3533_s19 + $0x408] sm:$0xff] }
  0x25   : > { %734 = vst [vmem:[%s3538_s20 + $0xa8] sm:$0xff] %v733_v21  ;;  %v823_v2 = vld [vmem:[%s3533_s19 + $0x410] sm:$0xff]  ;;  %v825_v3 = vld [vmem:[%s3533_s19 + $0x418] sm:$0xff]  ;;  %v827_v4 = vld [vmem:[%s3533_s19 + $0x420] sm:$0xff] }
  0x26   : > { %736 = vst [vmem:[%s3538_s20 + $0xb0] sm:$0xff] %v735_v22  ;;  %v829_v5 = vld [vmem:[%s3533_s19 + $0x428] sm:$0xff]  ;;  %v831_v6 = vld [vmem:[%s3533_s19 + $0x430] sm:$0xff]  ;;  %v833_v7 = vld [vmem:[%s3533_s19 + $0x438] sm:$0xff] }
  0x27   : > { %738 = vst [vmem:[%s3538_s20 + $0xb8] sm:$0xff] %v737_v23  ;;  %v835_v8 = vld [vmem:[%s3533_s19 + $0x440] sm:$0xff]  ;;  %v837_v9 = vld [vmem:[%s3533_s19 + $0x448] sm:$0xff]  ;;  %v839_v10 = vld [vmem:[%s3533_s19 + $0x450] sm:$0xff] }
  0x28   : > { %740 = vst [vmem:[%s3538_s20 + $0xc0] sm:$0xff] %v739_v24  ;;  %v841_v11 = vld [vmem:[%s3533_s19 + $0x458] sm:$0xff]  ;;  %v843_v12 = vld [vmem:[%s3533_s19 + $0x460] sm:$0xff]  ;;  %v845_v13 = vld [vmem:[%s3533_s19 + $0x468] sm:$0xff] }
  0x29   : > { %742 = vst [vmem:[%s3538_s20 + $0xc8] sm:$0xff] %v741_v25  ;;  %v847_v14 = vld [vmem:[%s3533_s19 + $0x470] sm:$0xff]  ;;  %v849_v15 = vld [vmem:[%s3533_s19 + $0x478] sm:$0xff]  ;;  %v851_v16 = vld [vmem:[%s3533_s19 + $0x480] sm:$0xff] }
  0x2a   : > { %744 = vst [vmem:[%s3538_s20 + $0xd0] sm:$0xff] %v743_v26  ;;  %v853_v17 = vld [vmem:[%s3533_s19 + $0x488] sm:$0xff]  ;;  %v855_v18 = vld [vmem:[%s3533_s19 + $0x490] sm:$0xff]  ;;  %v857_v19 = vld [vmem:[%s3533_s19 + $0x498] sm:$0xff] }
  0x2b   : > { %746 = vst [vmem:[%s3538_s20 + $0xd8] sm:$0xff] %v745_v27  ;;  %v859_v20 = vld [vmem:[%s3533_s19 + $0x4a0] sm:$0xff]  ;;  %v861_v21 = vld [vmem:[%s3533_s19 + $0x4a8] sm:$0xff]  ;;  %v863_v22 = vld [vmem:[%s3533_s19 + $0x4b0] sm:$0xff] }
  0x2c   : > { %748 = vst [vmem:[%s3538_s20 + $0xe0] sm:$0xff] %v747_v28  ;;  %v865_v23 = vld [vmem:[%s3533_s19 + $0x4b8] sm:$0xff]  ;;  %v867_v24 = vld [vmem:[%s3533_s19 + $0x4c0] sm:$0xff]  ;;  %v869_v25 = vld [vmem:[%s3533_s19 + $0x4c8] sm:$0xff] }
  0x2d   : > { %750 = vst [vmem:[%s3538_s20 + $0xe8] sm:$0xff] %v749_v29  ;;  %v871_v26 = vld [vmem:[%s3533_s19 + $0x4d0] sm:$0xff]  ;;  %v873_v27 = vld [vmem:[%s3533_s19 + $0x4d8] sm:$0xff]  ;;  %v875_v28 = vld [vmem:[%s3533_s19 + $0x4e0] sm:$0xff] }
  0x2e   : > { %752 = vst [vmem:[%s3538_s20 + $0xf0] sm:$0xff] %v751_v30  ;;  %v877_v29 = vld [vmem:[%s3533_s19 + $0x4e8] sm:$0xff]  ;;  %v879_v30 = vld [vmem:[%s3533_s19 + $0x4f0] sm:$0xff] }
  0x2f   : > { %754 = vst [vmem:[%s3538_s20 + $0xf8] sm:$0xff] %v753_v31  ;;  %v881_v31 = vld [vmem:[%s3533_s19 + $0x4f8] sm:$0xff] }
  0x30   : > { %756 = vst [vmem:[%s3538_s20 + $0x100] sm:$0xff] %v755_v32  ;;  %v883_v32 = vld [vmem:[%s3533_s19 + $0x600] sm:$0xff] }
  0x31   : > { %758 = vst [vmem:[%s3538_s20 + $0x108] sm:$0xff] %v757_v33  ;;  %v885_v33 = vld [vmem:[%s3533_s19 + $0x608] sm:$0xff] }
  0x32   : > { %760 = vst [vmem:[%s3538_s20 + $0x110] sm:$0xff] %v759_v34  ;;  %v887_v34 = vld [vmem:[%s3533_s19 + $0x610] sm:$0xff] }
  0x33   : > { %762 = vst [vmem:[%s3538_s20 + $0x118] sm:$0xff] %v761_v35  ;;  %v889_v35 = vld [vmem:[%s3533_s19 + $0x618] sm:$0xff] }
  0x34   : > { %764 = vst [vmem:[%s3538_s20 + $0x120] sm:$0xff] %v763_v36  ;;  %v891_v36 = vld [vmem:[%s3533_s19 + $0x620] sm:$0xff] }
  0x35   : > { %766 = vst [vmem:[%s3538_s20 + $0x128] sm:$0xff] %v765_v37  ;;  %v893_v37 = vld [vmem:[%s3533_s19 + $0x628] sm:$0xff] }
  0x36   : > { %768 = vst [vmem:[%s3538_s20 + $0x130] sm:$0xff] %v767_v38  ;;  %v895_v38 = vld [vmem:[%s3533_s19 + $0x630] sm:$0xff] }
  0x37   : > { %770 = vst [vmem:[%s3538_s20 + $0x138] sm:$0xff] %v769_v39  ;;  %v897_v39 = vld [vmem:[%s3533_s19 + $0x638] sm:$0xff] }
  0x38   : > { %772 = vst [vmem:[%s3538_s20 + $0x140] sm:$0xff] %v771_v40  ;;  %v899_v40 = vld [vmem:[%s3533_s19 + $0x640] sm:$0xff] }
  0x39   : > { %774 = vst [vmem:[%s3538_s20 + $0x148] sm:$0xff] %v773_v41  ;;  %v901_v41 = vld [vmem:[%s3533_s19 + $0x648] sm:$0xff] }
  0x3a   : > { %776 = vst [vmem:[%s3538_s20 + $0x150] sm:$0xff] %v775_v42  ;;  %v903_v42 = vld [vmem:[%s3533_s19 + $0x650] sm:$0xff] }
  0x3b   : > { %778 = vst [vmem:[%s3538_s20 + $0x158] sm:$0xff] %v777_v43  ;;  %v905_v43 = vld [vmem:[%s3533_s19 + $0x658] sm:$0xff] }
  0x3c   : > { %780 = vst [vmem:[%s3538_s20 + $0x160] sm:$0xff] %v779_v44  ;;  %v907_v44 = vld [vmem:[%s3533_s19 + $0x660] sm:$0xff] }
  0x3d   : > { %782 = vst [vmem:[%s3538_s20 + $0x168] sm:$0xff] %v781_v45  ;;  %v909_v45 = vld [vmem:[%s3533_s19 + $0x668] sm:$0xff] }
  0x3e   : > { %784 = vst [vmem:[%s3538_s20 + $0x170] sm:$0xff] %v783_v46  ;;  %v911_v46 = vld [vmem:[%s3533_s19 + $0x670] sm:$0xff] }
  0x3f   : > { %786 = vst [vmem:[%s3538_s20 + $0x178] sm:$0xff] %v785_v47  ;;  %v913_v47 = vld [vmem:[%s3533_s19 + $0x678] sm:$0xff] }
  0x40   : > { %788 = vst [vmem:[%s3538_s20 + $0x180] sm:$0xff] %v787_v48  ;;  %v915_v48 = vld [vmem:[%s3533_s19 + $0x680] sm:$0xff] }
  0x41   : > { %790 = vst [vmem:[%s3538_s20 + $0x188] sm:$0xff] %v789_v49  ;;  %v917_v49 = vld [vmem:[%s3533_s19 + $0x688] sm:$0xff] }
  0x42   : > { %792 = vst [vmem:[%s3538_s20 + $0x190] sm:$0xff] %v791_v50  ;;  %v919_v50 = vld [vmem:[%s3533_s19 + $0x690] sm:$0xff] }
  0x43   : > { %794 = vst [vmem:[%s3538_s20 + $0x198] sm:$0xff] %v793_v51  ;;  %v921_v51 = vld [vmem:[%s3533_s19 + $0x698] sm:$0xff] }
  0x44   : > { %796 = vst [vmem:[%s3538_s20 + $0x1a0] sm:$0xff] %v795_v52  ;;  %v923_v52 = vld [vmem:[%s3533_s19 + $0x6a0] sm:$0xff] }
  0x45   : > { %798 = vst [vmem:[%s3538_s20 + $0x1a8] sm:$0xff] %v797_v53  ;;  %v925_v53 = vld [vmem:[%s3533_s19 + $0x6a8] sm:$0xff] }
  0x46   : > { %800 = vst [vmem:[%s3538_s20 + $0x1b0] sm:$0xff] %v799_v54  ;;  %v927_v54 = vld [vmem:[%s3533_s19 + $0x6b0] sm:$0xff] }
  0x47   : > { %802 = vst [vmem:[%s3538_s20 + $0x1b8] sm:$0xff] %v801_v55  ;;  %v929_v55 = vld [vmem:[%s3533_s19 + $0x6b8] sm:$0xff] }
  0x48   : > { %804 = vst [vmem:[%s3538_s20 + $0x1c0] sm:$0xff] %v803_v56  ;;  %v931_v56 = vld [vmem:[%s3533_s19 + $0x6c0] sm:$0xff] }
  0x49   : > { %806 = vst [vmem:[%s3538_s20 + $0x1c8] sm:$0xff] %v805_v57  ;;  %v933_v57 = vld [vmem:[%s3533_s19 + $0x6c8] sm:$0xff] }
  0x4a   : > { %808 = vst [vmem:[%s3538_s20 + $0x1d0] sm:$0xff] %v807_v58  ;;  %v935_v58 = vld [vmem:[%s3533_s19 + $0x6d0] sm:$0xff] }
  0x4b   : > { %810 = vst [vmem:[%s3538_s20 + $0x1d8] sm:$0xff] %v809_v59  ;;  %v937_v59 = vld [vmem:[%s3533_s19 + $0x6d8] sm:$0xff] }
  0x4c   : > { %812 = vst [vmem:[%s3538_s20 + $0x1e0] sm:$0xff] %v811_v60  ;;  %v939_v60 = vld [vmem:[%s3533_s19 + $0x6e0] sm:$0xff] }
  0x4d   : > { %814 = vst [vmem:[%s3538_s20 + $0x1e8] sm:$0xff] %v813_v61  ;;  %v941_v61 = vld [vmem:[%s3533_s19 + $0x6e8] sm:$0xff] }
  0x4e   : > { %816 = vst [vmem:[%s3538_s20 + $0x1f0] sm:$0xff] %v815_v62  ;;  %v943_v62 = vld [vmem:[%s3533_s19 + $0x6f0] sm:$0xff] }
  0x4f   : > { %818 = vst [vmem:[%s3538_s20 + $0x1f8] sm:$0xff] %v817_v63  ;;  %v945_v63 = vld [vmem:[%s3533_s19 + $0x6f8] sm:$0xff] }
  0x50   : > { %820 = vst [vmem:[%s3538_s20 + $0x200] sm:$0xff] %v819_v0  ;;  %v947_v0 = vld [vmem:[%s3533_s19 + $0x800] sm:$0xff] }
  0x51   : > { %822 = vst [vmem:[%s3538_s20 + $0x208] sm:$0xff] %v821_v1  ;;  %v949_v1 = vld [vmem:[%s3533_s19 + $0x808] sm:$0xff] }
  0x52   : > { %824 = vst [vmem:[%s3538_s20 + $0x210] sm:$0xff] %v823_v2  ;;  %v951_v2 = vld [vmem:[%s3533_s19 + $0x810] sm:$0xff] }
  0x53   : > { %826 = vst [vmem:[%s3538_s20 + $0x218] sm:$0xff] %v825_v3  ;;  %v953_v3 = vld [vmem:[%s3533_s19 + $0x818] sm:$0xff] }
  0x54   : > { %828 = vst [vmem:[%s3538_s20 + $0x220] sm:$0xff] %v827_v4  ;;  %v955_v4 = vld [vmem:[%s3533_s19 + $0x820] sm:$0xff] }
  0x55   : > { %830 = vst [vmem:[%s3538_s20 + $0x228] sm:$0xff] %v829_v5  ;;  %v957_v5 = vld [vmem:[%s3533_s19 + $0x828] sm:$0xff] }
  0x56   : > { %832 = vst [vmem:[%s3538_s20 + $0x230] sm:$0xff] %v831_v6  ;;  %v959_v6 = vld [vmem:[%s3533_s19 + $0x830] sm:$0xff] }
  0x57   : > { %834 = vst [vmem:[%s3538_s20 + $0x238] sm:$0xff] %v833_v7  ;;  %v961_v7 = vld [vmem:[%s3533_s19 + $0x838] sm:$0xff] }
  0x58   : > { %836 = vst [vmem:[%s3538_s20 + $0x240] sm:$0xff] %v835_v8  ;;  %v963_v8 = vld [vmem:[%s3533_s19 + $0x840] sm:$0xff] }
  0x59   : > { %838 = vst [vmem:[%s3538_s20 + $0x248] sm:$0xff] %v837_v9  ;;  %v965_v9 = vld [vmem:[%s3533_s19 + $0x848] sm:$0xff] }
  0x5a   : > { %840 = vst [vmem:[%s3538_s20 + $0x250] sm:$0xff] %v839_v10  ;;  %v967_v10 = vld [vmem:[%s3533_s19 + $0x850] sm:$0xff] }
  0x5b   : > { %842 = vst [vmem:[%s3538_s20 + $0x258] sm:$0xff] %v841_v11  ;;  %v969_v11 = vld [vmem:[%s3533_s19 + $0x858] sm:$0xff] }
  0x5c   : > { %844 = vst [vmem:[%s3538_s20 + $0x260] sm:$0xff] %v843_v12  ;;  %v971_v12 = vld [vmem:[%s3533_s19 + $0x860] sm:$0xff] }
  0x5d   : > { %846 = vst [vmem:[%s3538_s20 + $0x268] sm:$0xff] %v845_v13  ;;  %v973_v13 = vld [vmem:[%s3533_s19 + $0x868] sm:$0xff] }
  0x5e   : > { %848 = vst [vmem:[%s3538_s20 + $0x270] sm:$0xff] %v847_v14  ;;  %v975_v14 = vld [vmem:[%s3533_s19 + $0x870] sm:$0xff] }
  0x5f   : > { %850 = vst [vmem:[%s3538_s20 + $0x278] sm:$0xff] %v849_v15  ;;  %v977_v15 = vld [vmem:[%s3533_s19 + $0x878] sm:$0xff] }
  0x60   : > { %852 = vst [vmem:[%s3538_s20 + $0x280] sm:$0xff] %v851_v16  ;;  %v979_v16 = vld [vmem:[%s3533_s19 + $0x880] sm:$0xff] }
  0x61   : > { %854 = vst [vmem:[%s3538_s20 + $0x288] sm:$0xff] %v853_v17  ;;  %v981_v17 = vld [vmem:[%s3533_s19 + $0x888] sm:$0xff] }
  0x62   : > { %856 = vst [vmem:[%s3538_s20 + $0x290] sm:$0xff] %v855_v18  ;;  %v983_v18 = vld [vmem:[%s3533_s19 + $0x890] sm:$0xff] }
  0x63   : > { %858 = vst [vmem:[%s3538_s20 + $0x298] sm:$0xff] %v857_v19  ;;  %v985_v19 = vld [vmem:[%s3533_s19 + $0x898] sm:$0xff] }
  0x64   : > { %860 = vst [vmem:[%s3538_s20 + $0x2a0] sm:$0xff] %v859_v20  ;;  %v987_v20 = vld [vmem:[%s3533_s19 + $0x8a0] sm:$0xff] }
  0x65   : > { %862 = vst [vmem:[%s3538_s20 + $0x2a8] sm:$0xff] %v861_v21  ;;  %v989_v21 = vld [vmem:[%s3533_s19 + $0x8a8] sm:$0xff] }
  0x66   : > { %864 = vst [vmem:[%s3538_s20 + $0x2b0] sm:$0xff] %v863_v22  ;;  %v991_v22 = vld [vmem:[%s3533_s19 + $0x8b0] sm:$0xff] }
  0x67   : > { %866 = vst [vmem:[%s3538_s20 + $0x2b8] sm:$0xff] %v865_v23  ;;  %v993_v23 = vld [vmem:[%s3533_s19 + $0x8b8] sm:$0xff] }
  0x68   : > { %868 = vst [vmem:[%s3538_s20 + $0x2c0] sm:$0xff] %v867_v24  ;;  %v995_v24 = vld [vmem:[%s3533_s19 + $0x8c0] sm:$0xff] }
  0x69   : > { %870 = vst [vmem:[%s3538_s20 + $0x2c8] sm:$0xff] %v869_v25  ;;  %v997_v25 = vld [vmem:[%s3533_s19 + $0x8c8] sm:$0xff] }
  0x6a   : > { %872 = vst [vmem:[%s3538_s20 + $0x2d0] sm:$0xff] %v871_v26  ;;  %v999_v26 = vld [vmem:[%s3533_s19 + $0x8d0] sm:$0xff] }
  0x6b   : > { %874 = vst [vmem:[%s3538_s20 + $0x2d8] sm:$0xff] %v873_v27  ;;  %v1001_v27 = vld [vmem:[%s3533_s19 + $0x8d8] sm:$0xff] }
  0x6c   : > { %876 = vst [vmem:[%s3538_s20 + $0x2e0] sm:$0xff] %v875_v28  ;;  %v1003_v28 = vld [vmem:[%s3533_s19 + $0x8e0] sm:$0xff] }
  0x6d   : > { %878 = vst [vmem:[%s3538_s20 + $0x2e8] sm:$0xff] %v877_v29  ;;  %v1005_v29 = vld [vmem:[%s3533_s19 + $0x8e8] sm:$0xff] }
  0x6e   : > { %880 = vst [vmem:[%s3538_s20 + $0x2f0] sm:$0xff] %v879_v30  ;;  %v1007_v30 = vld [vmem:[%s3533_s19 + $0x8f0] sm:$0xff] }
  0x6f   : > { %882 = vst [vmem:[%s3538_s20 + $0x2f8] sm:$0xff] %v881_v31  ;;  %v1009_v31 = vld [vmem:[%s3533_s19 + $0x8f8] sm:$0xff] }
  0x70   : > { %884 = vst [vmem:[%s3538_s20 + $0x300] sm:$0xff] %v883_v32  ;;  %v1011_v32 = vld [vmem:[%s3533_s19 + $0xa00] sm:$0xff] }
  0x71   : > { %886 = vst [vmem:[%s3538_s20 + $0x308] sm:$0xff] %v885_v33  ;;  %v1013_v33 = vld [vmem:[%s3533_s19 + $0xa08] sm:$0xff] }
  0x72   : > { %888 = vst [vmem:[%s3538_s20 + $0x310] sm:$0xff] %v887_v34  ;;  %v1015_v34 = vld [vmem:[%s3533_s19 + $0xa10] sm:$0xff] }
  0x73   : > { %890 = vst [vmem:[%s3538_s20 + $0x318] sm:$0xff] %v889_v35  ;;  %v1017_v35 = vld [vmem:[%s3533_s19 + $0xa18] sm:$0xff] }
  0x74   : > { %892 = vst [vmem:[%s3538_s20 + $0x320] sm:$0xff] %v891_v36  ;;  %v1019_v36 = vld [vmem:[%s3533_s19 + $0xa20] sm:$0xff] }
  0x75   : > { %894 = vst [vmem:[%s3538_s20 + $0x328] sm:$0xff] %v893_v37  ;;  %v1021_v37 = vld [vmem:[%s3533_s19 + $0xa28] sm:$0xff] }
  0x76   : > { %896 = vst [vmem:[%s3538_s20 + $0x330] sm:$0xff] %v895_v38  ;;  %v1023_v38 = vld [vmem:[%s3533_s19 + $0xa30] sm:$0xff] }
  0x77   : > { %898 = vst [vmem:[%s3538_s20 + $0x338] sm:$0xff] %v897_v39  ;;  %v1025_v39 = vld [vmem:[%s3533_s19 + $0xa38] sm:$0xff] }
  0x78   : > { %900 = vst [vmem:[%s3538_s20 + $0x340] sm:$0xff] %v899_v40  ;;  %v1027_v40 = vld [vmem:[%s3533_s19 + $0xa40] sm:$0xff] }
  0x79   : > { %902 = vst [vmem:[%s3538_s20 + $0x348] sm:$0xff] %v901_v41  ;;  %v1029_v41 = vld [vmem:[%s3533_s19 + $0xa48] sm:$0xff] }
  0x7a   : > { %904 = vst [vmem:[%s3538_s20 + $0x350] sm:$0xff] %v903_v42  ;;  %v1031_v42 = vld [vmem:[%s3533_s19 + $0xa50] sm:$0xff] }
  0x7b   : > { %906 = vst [vmem:[%s3538_s20 + $0x358] sm:$0xff] %v905_v43  ;;  %v1033_v43 = vld [vmem:[%s3533_s19 + $0xa58] sm:$0xff] }
  0x7c   : > { %908 = vst [vmem:[%s3538_s20 + $0x360] sm:$0xff] %v907_v44  ;;  %v1035_v44 = vld [vmem:[%s3533_s19 + $0xa60] sm:$0xff] }
  0x7d   : > { %910 = vst [vmem:[%s3538_s20 + $0x368] sm:$0xff] %v909_v45  ;;  %v1037_v45 = vld [vmem:[%s3533_s19 + $0xa68] sm:$0xff] }
  0x7e   : > { %912 = vst [vmem:[%s3538_s20 + $0x370] sm:$0xff] %v911_v46  ;;  %v1039_v46 = vld [vmem:[%s3533_s19 + $0xa70] sm:$0xff] }
  0x7f   : > { %914 = vst [vmem:[%s3538_s20 + $0x378] sm:$0xff] %v913_v47  ;;  %v1041_v47 = vld [vmem:[%s3533_s19 + $0xa78] sm:$0xff] }
  0x80   : > { %916 = vst [vmem:[%s3538_s20 + $0x380] sm:$0xff] %v915_v48  ;;  %v1043_v48 = vld [vmem:[%s3533_s19 + $0xa80] sm:$0xff] }
  0x81   : > { %918 = vst [vmem:[%s3538_s20 + $0x388] sm:$0xff] %v917_v49  ;;  %v1045_v49 = vld [vmem:[%s3533_s19 + $0xa88] sm:$0xff] }
  0x82   : > { %920 = vst [vmem:[%s3538_s20 + $0x390] sm:$0xff] %v919_v50  ;;  %v1047_v50 = vld [vmem:[%s3533_s19 + $0xa90] sm:$0xff] }
  0x83   : > { %922 = vst [vmem:[%s3538_s20 + $0x398] sm:$0xff] %v921_v51  ;;  %v1049_v51 = vld [vmem:[%s3533_s19 + $0xa98] sm:$0xff] }
  0x84   : > { %924 = vst [vmem:[%s3538_s20 + $0x3a0] sm:$0xff] %v923_v52  ;;  %v1051_v52 = vld [vmem:[%s3533_s19 + $0xaa0] sm:$0xff] }
  0x85   : > { %926 = vst [vmem:[%s3538_s20 + $0x3a8] sm:$0xff] %v925_v53  ;;  %v1053_v53 = vld [vmem:[%s3533_s19 + $0xaa8] sm:$0xff] }
  0x86   : > { %928 = vst [vmem:[%s3538_s20 + $0x3b0] sm:$0xff] %v927_v54  ;;  %v1055_v54 = vld [vmem:[%s3533_s19 + $0xab0] sm:$0xff] }
  0x87   : > { %930 = vst [vmem:[%s3538_s20 + $0x3b8] sm:$0xff] %v929_v55  ;;  %v1057_v55 = vld [vmem:[%s3533_s19 + $0xab8] sm:$0xff] }
  0x88   : > { %932 = vst [vmem:[%s3538_s20 + $0x3c0] sm:$0xff] %v931_v56  ;;  %v1059_v56 = vld [vmem:[%s3533_s19 + $0xac0] sm:$0xff] }
  0x89   : > { %934 = vst [vmem:[%s3538_s20 + $0x3c8] sm:$0xff] %v933_v57  ;;  %v1061_v57 = vld [vmem:[%s3533_s19 + $0xac8] sm:$0xff] }
  0x8a   : > { %936 = vst [vmem:[%s3538_s20 + $0x3d0] sm:$0xff] %v935_v58  ;;  %v1063_v58 = vld [vmem:[%s3533_s19 + $0xad0] sm:$0xff] }
  0x8b   : > { %938 = vst [vmem:[%s3538_s20 + $0x3d8] sm:$0xff] %v937_v59  ;;  %v1065_v59 = vld [vmem:[%s3533_s19 + $0xad8] sm:$0xff] }
  0x8c   : > { %940 = vst [vmem:[%s3538_s20 + $0x3e0] sm:$0xff] %v939_v60  ;;  %v1067_v60 = vld [vmem:[%s3533_s19 + $0xae0] sm:$0xff] }
  0x8d   : > { %942 = vst [vmem:[%s3538_s20 + $0x3e8] sm:$0xff] %v941_v61  ;;  %v1069_v61 = vld [vmem:[%s3533_s19 + $0xae8] sm:$0xff] }
  0x8e   : > { %944 = vst [vmem:[%s3538_s20 + $0x3f0] sm:$0xff] %v943_v62  ;;  %v1071_v62 = vld [vmem:[%s3533_s19 + $0xaf0] sm:$0xff] }
  0x8f   : > { %946 = vst [vmem:[%s3538_s20 + $0x3f8] sm:$0xff] %v945_v63  ;;  %v1073_v63 = vld [vmem:[%s3533_s19 + $0xaf8] sm:$0xff] }
  0x90   : > { %948 = vst [vmem:[%s3538_s20 + $0x400] sm:$0xff] %v947_v0  ;;  %v1075_v0 = vld [vmem:[%s3533_s19 + $0xc00] sm:$0xff] }
  0x91   : > { %950 = vst [vmem:[%s3538_s20 + $0x408] sm:$0xff] %v949_v1  ;;  %v1077_v1 = vld [vmem:[%s3533_s19 + $0xc08] sm:$0xff] }
  0x92   : > { %952 = vst [vmem:[%s3538_s20 + $0x410] sm:$0xff] %v951_v2  ;;  %v1079_v2 = vld [vmem:[%s3533_s19 + $0xc10] sm:$0xff] }
  0x93   : > { %954 = vst [vmem:[%s3538_s20 + $0x418] sm:$0xff] %v953_v3  ;;  %v1081_v3 = vld [vmem:[%s3533_s19 + $0xc18] sm:$0xff] }
  0x94   : > { %956 = vst [vmem:[%s3538_s20 + $0x420] sm:$0xff] %v955_v4  ;;  %v1083_v4 = vld [vmem:[%s3533_s19 + $0xc20] sm:$0xff] }
  0x95   : > { %958 = vst [vmem:[%s3538_s20 + $0x428] sm:$0xff] %v957_v5  ;;  %v1085_v5 = vld [vmem:[%s3533_s19 + $0xc28] sm:$0xff] }
  0x96   : > { %960 = vst [vmem:[%s3538_s20 + $0x430] sm:$0xff] %v959_v6  ;;  %v1087_v6 = vld [vmem:[%s3533_s19 + $0xc30] sm:$0xff] }
  0x97   : > { %962 = vst [vmem:[%s3538_s20 + $0x438] sm:$0xff] %v961_v7  ;;  %v1089_v7 = vld [vmem:[%s3533_s19 + $0xc38] sm:$0xff] }
  0x98   : > { %964 = vst [vmem:[%s3538_s20 + $0x440] sm:$0xff] %v963_v8  ;;  %v1091_v8 = vld [vmem:[%s3533_s19 + $0xc40] sm:$0xff] }
  0x99   : > { %966 = vst [vmem:[%s3538_s20 + $0x448] sm:$0xff] %v965_v9  ;;  %v1093_v9 = vld [vmem:[%s3533_s19 + $0xc48] sm:$0xff] }
  0x9a   : > { %968 = vst [vmem:[%s3538_s20 + $0x450] sm:$0xff] %v967_v10  ;;  %v1095_v10 = vld [vmem:[%s3533_s19 + $0xc50] sm:$0xff] }
  0x9b   : > { %970 = vst [vmem:[%s3538_s20 + $0x458] sm:$0xff] %v969_v11  ;;  %v1097_v11 = vld [vmem:[%s3533_s19 + $0xc58] sm:$0xff] }
  0x9c   : > { %972 = vst [vmem:[%s3538_s20 + $0x460] sm:$0xff] %v971_v12  ;;  %v1099_v12 = vld [vmem:[%s3533_s19 + $0xc60] sm:$0xff] }
  0x9d   : > { %974 = vst [vmem:[%s3538_s20 + $0x468] sm:$0xff] %v973_v13  ;;  %v1101_v13 = vld [vmem:[%s3533_s19 + $0xc68] sm:$0xff] }
  0x9e   : > { %976 = vst [vmem:[%s3538_s20 + $0x470] sm:$0xff] %v975_v14  ;;  %v1103_v14 = vld [vmem:[%s3533_s19 + $0xc70] sm:$0xff] }
  0x9f   : > { %978 = vst [vmem:[%s3538_s20 + $0x478] sm:$0xff] %v977_v15  ;;  %v1105_v15 = vld [vmem:[%s3533_s19 + $0xc78] sm:$0xff] }
  0xa0   : > { %980 = vst [vmem:[%s3538_s20 + $0x480] sm:$0xff] %v979_v16  ;;  %v1107_v16 = vld [vmem:[%s3533_s19 + $0xc80] sm:$0xff] }
  0xa1   : > { %982 = vst [vmem:[%s3538_s20 + $0x488] sm:$0xff] %v981_v17  ;;  %v1109_v17 = vld [vmem:[%s3533_s19 + $0xc88] sm:$0xff] }
  0xa2   : > { %984 = vst [vmem:[%s3538_s20 + $0x490] sm:$0xff] %v983_v18  ;;  %v1111_v18 = vld [vmem:[%s3533_s19 + $0xc90] sm:$0xff] }
  0xa3   : > { %986 = vst [vmem:[%s3538_s20 + $0x498] sm:$0xff] %v985_v19  ;;  %v1113_v19 = vld [vmem:[%s3533_s19 + $0xc98] sm:$0xff] }
  0xa4   : > { %988 = vst [vmem:[%s3538_s20 + $0x4a0] sm:$0xff] %v987_v20  ;;  %v1115_v20 = vld [vmem:[%s3533_s19 + $0xca0] sm:$0xff] }
  0xa5   : > { %990 = vst [vmem:[%s3538_s20 + $0x4a8] sm:$0xff] %v989_v21  ;;  %v1117_v21 = vld [vmem:[%s3533_s19 + $0xca8] sm:$0xff] }
  0xa6   : > { %992 = vst [vmem:[%s3538_s20 + $0x4b0] sm:$0xff] %v991_v22  ;;  %v1119_v22 = vld [vmem:[%s3533_s19 + $0xcb0] sm:$0xff] }
  0xa7   : > { %994 = vst [vmem:[%s3538_s20 + $0x4b8] sm:$0xff] %v993_v23  ;;  %v1121_v23 = vld [vmem:[%s3533_s19 + $0xcb8] sm:$0xff] }
  0xa8   : > { %996 = vst [vmem:[%s3538_s20 + $0x4c0] sm:$0xff] %v995_v24  ;;  %v1123_v24 = vld [vmem:[%s3533_s19 + $0xcc0] sm:$0xff] }
  0xa9   : > { %998 = vst [vmem:[%s3538_s20 + $0x4c8] sm:$0xff] %v997_v25  ;;  %v1125_v25 = vld [vmem:[%s3533_s19 + $0xcc8] sm:$0xff] }
  0xaa   : > { %1000 = vst [vmem:[%s3538_s20 + $0x4d0] sm:$0xff] %v999_v26  ;;  %v1127_v26 = vld [vmem:[%s3533_s19 + $0xcd0] sm:$0xff] }
  0xab   : > { %1002 = vst [vmem:[%s3538_s20 + $0x4d8] sm:$0xff] %v1001_v27  ;;  %v1129_v27 = vld [vmem:[%s3533_s19 + $0xcd8] sm:$0xff] }
  0xac   : > { %1004 = vst [vmem:[%s3538_s20 + $0x4e0] sm:$0xff] %v1003_v28  ;;  %v1131_v28 = vld [vmem:[%s3533_s19 + $0xce0] sm:$0xff] }
  0xad   : > { %1006 = vst [vmem:[%s3538_s20 + $0x4e8] sm:$0xff] %v1005_v29  ;;  %v1133_v29 = vld [vmem:[%s3533_s19 + $0xce8] sm:$0xff] }
  0xae   : > { %1008 = vst [vmem:[%s3538_s20 + $0x4f0] sm:$0xff] %v1007_v30  ;;  %v1135_v30 = vld [vmem:[%s3533_s19 + $0xcf0] sm:$0xff] }
  0xaf   : > { %1010 = vst [vmem:[%s3538_s20 + $0x4f8] sm:$0xff] %v1009_v31  ;;  %v1137_v31 = vld [vmem:[%s3533_s19 + $0xcf8] sm:$0xff] }
  0xb0   : > { %1012 = vst [vmem:[%s3538_s20 + $0x500] sm:$0xff] %v1011_v32  ;;  %v1139_v32 = vld [vmem:[%s3533_s19 + $0xe00] sm:$0xff] }
  0xb1   : > { %1014 = vst [vmem:[%s3538_s20 + $0x508] sm:$0xff] %v1013_v33  ;;  %v1141_v33 = vld [vmem:[%s3533_s19 + $0xe08] sm:$0xff] }
  0xb2   : > { %1016 = vst [vmem:[%s3538_s20 + $0x510] sm:$0xff] %v1015_v34  ;;  %v1143_v34 = vld [vmem:[%s3533_s19 + $0xe10] sm:$0xff] }
  0xb3   : > { %1018 = vst [vmem:[%s3538_s20 + $0x518] sm:$0xff] %v1017_v35  ;;  %v1145_v35 = vld [vmem:[%s3533_s19 + $0xe18] sm:$0xff] }
  0xb4   : > { %1020 = vst [vmem:[%s3538_s20 + $0x520] sm:$0xff] %v1019_v36  ;;  %v1147_v36 = vld [vmem:[%s3533_s19 + $0xe20] sm:$0xff] }
  0xb5   : > { %1022 = vst [vmem:[%s3538_s20 + $0x528] sm:$0xff] %v1021_v37  ;;  %v1149_v37 = vld [vmem:[%s3533_s19 + $0xe28] sm:$0xff] }
  0xb6   : > { %1024 = vst [vmem:[%s3538_s20 + $0x530] sm:$0xff] %v1023_v38  ;;  %v1151_v38 = vld [vmem:[%s3533_s19 + $0xe30] sm:$0xff] }
  0xb7   : > { %1026 = vst [vmem:[%s3538_s20 + $0x538] sm:$0xff] %v1025_v39  ;;  %v1153_v39 = vld [vmem:[%s3533_s19 + $0xe38] sm:$0xff] }
  0xb8   : > { %1028 = vst [vmem:[%s3538_s20 + $0x540] sm:$0xff] %v1027_v40  ;;  %v1155_v40 = vld [vmem:[%s3533_s19 + $0xe40] sm:$0xff] }
  0xb9   : > { %1030 = vst [vmem:[%s3538_s20 + $0x548] sm:$0xff] %v1029_v41  ;;  %v1157_v41 = vld [vmem:[%s3533_s19 + $0xe48] sm:$0xff] }
  0xba   : > { %1032 = vst [vmem:[%s3538_s20 + $0x550] sm:$0xff] %v1031_v42  ;;  %v1159_v42 = vld [vmem:[%s3533_s19 + $0xe50] sm:$0xff] }
  0xbb   : > { %1034 = vst [vmem:[%s3538_s20 + $0x558] sm:$0xff] %v1033_v43  ;;  %v1161_v43 = vld [vmem:[%s3533_s19 + $0xe58] sm:$0xff] }
  0xbc   : > { %1036 = vst [vmem:[%s3538_s20 + $0x560] sm:$0xff] %v1035_v44  ;;  %v1163_v44 = vld [vmem:[%s3533_s19 + $0xe60] sm:$0xff] }
  0xbd   : > { %1038 = vst [vmem:[%s3538_s20 + $0x568] sm:$0xff] %v1037_v45  ;;  %v1165_v45 = vld [vmem:[%s3533_s19 + $0xe68] sm:$0xff] }
  0xbe   : > { %1040 = vst [vmem:[%s3538_s20 + $0x570] sm:$0xff] %v1039_v46  ;;  %v1167_v46 = vld [vmem:[%s3533_s19 + $0xe70] sm:$0xff] }
  0xbf   : > { %1042 = vst [vmem:[%s3538_s20 + $0x578] sm:$0xff] %v1041_v47  ;;  %v1169_v47 = vld [vmem:[%s3533_s19 + $0xe78] sm:$0xff] }
  0xc0   : > { %1044 = vst [vmem:[%s3538_s20 + $0x580] sm:$0xff] %v1043_v48  ;;  %v1171_v48 = vld [vmem:[%s3533_s19 + $0xe80] sm:$0xff] }
  0xc1   : > { %1046 = vst [vmem:[%s3538_s20 + $0x588] sm:$0xff] %v1045_v49  ;;  %v1173_v49 = vld [vmem:[%s3533_s19 + $0xe88] sm:$0xff] }
  0xc2   : > { %1048 = vst [vmem:[%s3538_s20 + $0x590] sm:$0xff] %v1047_v50  ;;  %v1175_v50 = vld [vmem:[%s3533_s19 + $0xe90] sm:$0xff] }
  0xc3   : > { %1050 = vst [vmem:[%s3538_s20 + $0x598] sm:$0xff] %v1049_v51  ;;  %v1177_v51 = vld [vmem:[%s3533_s19 + $0xe98] sm:$0xff] }
  0xc4   : > { %1052 = vst [vmem:[%s3538_s20 + $0x5a0] sm:$0xff] %v1051_v52  ;;  %v1179_v52 = vld [vmem:[%s3533_s19 + $0xea0] sm:$0xff] }
  0xc5   : > { %1054 = vst [vmem:[%s3538_s20 + $0x5a8] sm:$0xff] %v1053_v53  ;;  %v1181_v53 = vld [vmem:[%s3533_s19 + $0xea8] sm:$0xff] }
  0xc6   : > { %1056 = vst [vmem:[%s3538_s20 + $0x5b0] sm:$0xff] %v1055_v54  ;;  %v1183_v54 = vld [vmem:[%s3533_s19 + $0xeb0] sm:$0xff] }
  0xc7   : > { %1058 = vst [vmem:[%s3538_s20 + $0x5b8] sm:$0xff] %v1057_v55  ;;  %v1185_v55 = vld [vmem:[%s3533_s19 + $0xeb8] sm:$0xff] }
  0xc8   : > { %1060 = vst [vmem:[%s3538_s20 + $0x5c0] sm:$0xff] %v1059_v56  ;;  %v1187_v56 = vld [vmem:[%s3533_s19 + $0xec0] sm:$0xff] }
  0xc9   : > { %1062 = vst [vmem:[%s3538_s20 + $0x5c8] sm:$0xff] %v1061_v57  ;;  %v1189_v57 = vld [vmem:[%s3533_s19 + $0xec8] sm:$0xff] }
  0xca   : > { %1064 = vst [vmem:[%s3538_s20 + $0x5d0] sm:$0xff] %v1063_v58  ;;  %v1191_v58 = vld [vmem:[%s3533_s19 + $0xed0] sm:$0xff] }
  0xcb   : > { %1066 = vst [vmem:[%s3538_s20 + $0x5d8] sm:$0xff] %v1065_v59  ;;  %v1193_v59 = vld [vmem:[%s3533_s19 + $0xed8] sm:$0xff] }
  0xcc   : > { %1068 = vst [vmem:[%s3538_s20 + $0x5e0] sm:$0xff] %v1067_v60  ;;  %v1195_v60 = vld [vmem:[%s3533_s19 + $0xee0] sm:$0xff] }
  0xcd   : > { %1070 = vst [vmem:[%s3538_s20 + $0x5e8] sm:$0xff] %v1069_v61  ;;  %v1197_v61 = vld [vmem:[%s3533_s19 + $0xee8] sm:$0xff] }
  0xce   : > { %1072 = vst [vmem:[%s3538_s20 + $0x5f0] sm:$0xff] %v1071_v62  ;;  %v1199_v62 = vld [vmem:[%s3533_s19 + $0xef0] sm:$0xff] }
  0xcf   : > { %1074 = vst [vmem:[%s3538_s20 + $0x5f8] sm:$0xff] %v1073_v63  ;;  %v1201_v63 = vld [vmem:[%s3533_s19 + $0xef8] sm:$0xff] }
  0xd0   : > { %1076 = vst [vmem:[%s3538_s20 + $0x600] sm:$0xff] %v1075_v0  ;;  %v1203_v0 = vld [vmem:[%s3533_s19 + $0x1000] sm:$0xff] }
  0xd1   : > { %1078 = vst [vmem:[%s3538_s20 + $0x608] sm:$0xff] %v1077_v1  ;;  %v1205_v1 = vld [vmem:[%s3533_s19 + $0x1008] sm:$0xff] }
  0xd2   : > { %1080 = vst [vmem:[%s3538_s20 + $0x610] sm:$0xff] %v1079_v2  ;;  %v1207_v2 = vld [vmem:[%s3533_s19 + $0x1010] sm:$0xff] }
  0xd3   : > { %1082 = vst [vmem:[%s3538_s20 + $0x618] sm:$0xff] %v1081_v3  ;;  %v1209_v3 = vld [vmem:[%s3533_s19 + $0x1018] sm:$0xff] }
  0xd4   : > { %1084 = vst [vmem:[%s3538_s20 + $0x620] sm:$0xff] %v1083_v4  ;;  %v1211_v4 = vld [vmem:[%s3533_s19 + $0x1020] sm:$0xff] }
  0xd5   : > { %1086 = vst [vmem:[%s3538_s20 + $0x628] sm:$0xff] %v1085_v5  ;;  %v1213_v5 = vld [vmem:[%s3533_s19 + $0x1028] sm:$0xff] }
  0xd6   : > { %1088 = vst [vmem:[%s3538_s20 + $0x630] sm:$0xff] %v1087_v6  ;;  %v1215_v6 = vld [vmem:[%s3533_s19 + $0x1030] sm:$0xff] }
  0xd7   : > { %1090 = vst [vmem:[%s3538_s20 + $0x638] sm:$0xff] %v1089_v7  ;;  %v1217_v7 = vld [vmem:[%s3533_s19 + $0x1038] sm:$0xff] }
  0xd8   : > { %1092 = vst [vmem:[%s3538_s20 + $0x640] sm:$0xff] %v1091_v8  ;;  %v1219_v8 = vld [vmem:[%s3533_s19 + $0x1040] sm:$0xff] }
  0xd9   : > { %1094 = vst [vmem:[%s3538_s20 + $0x648] sm:$0xff] %v1093_v9  ;;  %v1221_v9 = vld [vmem:[%s3533_s19 + $0x1048] sm:$0xff] }
  0xda   : > { %1096 = vst [vmem:[%s3538_s20 + $0x650] sm:$0xff] %v1095_v10  ;;  %v1223_v10 = vld [vmem:[%s3533_s19 + $0x1050] sm:$0xff] }
  0xdb   : > { %1098 = vst [vmem:[%s3538_s20 + $0x658] sm:$0xff] %v1097_v11  ;;  %v1225_v11 = vld [vmem:[%s3533_s19 + $0x1058] sm:$0xff] }
  0xdc   : > { %1100 = vst [vmem:[%s3538_s20 + $0x660] sm:$0xff] %v1099_v12  ;;  %v1227_v12 = vld [vmem:[%s3533_s19 + $0x1060] sm:$0xff] }
  0xdd   : > { %1102 = vst [vmem:[%s3538_s20 + $0x668] sm:$0xff] %v1101_v13  ;;  %v1229_v13 = vld [vmem:[%s3533_s19 + $0x1068] sm:$0xff] }
  0xde   : > { %1104 = vst [vmem:[%s3538_s20 + $0x670] sm:$0xff] %v1103_v14  ;;  %v1231_v14 = vld [vmem:[%s3533_s19 + $0x1070] sm:$0xff] }
  0xdf   : > { %1106 = vst [vmem:[%s3538_s20 + $0x678] sm:$0xff] %v1105_v15  ;;  %v1233_v15 = vld [vmem:[%s3533_s19 + $0x1078] sm:$0xff] }
  0xe0   : > { %1108 = vst [vmem:[%s3538_s20 + $0x680] sm:$0xff] %v1107_v16  ;;  %v1235_v16 = vld [vmem:[%s3533_s19 + $0x1080] sm:$0xff] }
  0xe1   : > { %1110 = vst [vmem:[%s3538_s20 + $0x688] sm:$0xff] %v1109_v17  ;;  %v1237_v17 = vld [vmem:[%s3533_s19 + $0x1088] sm:$0xff] }
  0xe2   : > { %1112 = vst [vmem:[%s3538_s20 + $0x690] sm:$0xff] %v1111_v18  ;;  %v1239_v18 = vld [vmem:[%s3533_s19 + $0x1090] sm:$0xff] }
  0xe3   : > { %1114 = vst [vmem:[%s3538_s20 + $0x698] sm:$0xff] %v1113_v19  ;;  %v1241_v19 = vld [vmem:[%s3533_s19 + $0x1098] sm:$0xff] }
  0xe4   : > { %1116 = vst [vmem:[%s3538_s20 + $0x6a0] sm:$0xff] %v1115_v20  ;;  %v1243_v20 = vld [vmem:[%s3533_s19 + $0x10a0] sm:$0xff] }
  0xe5   : > { %1118 = vst [vmem:[%s3538_s20 + $0x6a8] sm:$0xff] %v1117_v21  ;;  %v1245_v21 = vld [vmem:[%s3533_s19 + $0x10a8] sm:$0xff] }
  0xe6   : > { %1120 = vst [vmem:[%s3538_s20 + $0x6b0] sm:$0xff] %v1119_v22  ;;  %v1247_v22 = vld [vmem:[%s3533_s19 + $0x10b0] sm:$0xff] }
  0xe7   : > { %1122 = vst [vmem:[%s3538_s20 + $0x6b8] sm:$0xff] %v1121_v23  ;;  %v1249_v23 = vld [vmem:[%s3533_s19 + $0x10b8] sm:$0xff] }
  0xe8   : > { %1124 = vst [vmem:[%s3538_s20 + $0x6c0] sm:$0xff] %v1123_v24  ;;  %v1251_v24 = vld [vmem:[%s3533_s19 + $0x10c0] sm:$0xff] }
  0xe9   : > { %1126 = vst [vmem:[%s3538_s20 + $0x6c8] sm:$0xff] %v1125_v25  ;;  %v1253_v25 = vld [vmem:[%s3533_s19 + $0x10c8] sm:$0xff] }
  0xea   : > { %1128 = vst [vmem:[%s3538_s20 + $0x6d0] sm:$0xff] %v1127_v26  ;;  %v1255_v26 = vld [vmem:[%s3533_s19 + $0x10d0] sm:$0xff] }
  0xeb   : > { %1130 = vst [vmem:[%s3538_s20 + $0x6d8] sm:$0xff] %v1129_v27  ;;  %v1257_v27 = vld [vmem:[%s3533_s19 + $0x10d8] sm:$0xff] }
  0xec   : > { %1132 = vst [vmem:[%s3538_s20 + $0x6e0] sm:$0xff] %v1131_v28  ;;  %v1259_v28 = vld [vmem:[%s3533_s19 + $0x10e0] sm:$0xff] }
  0xed   : > { %1134 = vst [vmem:[%s3538_s20 + $0x6e8] sm:$0xff] %v1133_v29  ;;  %v1261_v29 = vld [vmem:[%s3533_s19 + $0x10e8] sm:$0xff] }
  0xee   : > { %1136 = vst [vmem:[%s3538_s20 + $0x6f0] sm:$0xff] %v1135_v30  ;;  %v1263_v30 = vld [vmem:[%s3533_s19 + $0x10f0] sm:$0xff] }
  0xef   : > { %1138 = vst [vmem:[%s3538_s20 + $0x6f8] sm:$0xff] %v1137_v31  ;;  %v1265_v31 = vld [vmem:[%s3533_s19 + $0x10f8] sm:$0xff] }
  0xf0   : > { %1140 = vst [vmem:[%s3538_s20 + $0x700] sm:$0xff] %v1139_v32 }
  0xf1   : > { %1142 = vst [vmem:[%s3538_s20 + $0x708] sm:$0xff] %v1141_v33 }
  0xf2   : > { %1144 = vst [vmem:[%s3538_s20 + $0x710] sm:$0xff] %v1143_v34 }
  0xf3   : > { %1146 = vst [vmem:[%s3538_s20 + $0x718] sm:$0xff] %v1145_v35 }
  0xf4   : > { %1148 = vst [vmem:[%s3538_s20 + $0x720] sm:$0xff] %v1147_v36 }
  0xf5   : > { %1150 = vst [vmem:[%s3538_s20 + $0x728] sm:$0xff] %v1149_v37 }
  0xf6   : > { %1152 = vst [vmem:[%s3538_s20 + $0x730] sm:$0xff] %v1151_v38 }
  0xf7   : > { %1154 = vst [vmem:[%s3538_s20 + $0x738] sm:$0xff] %v1153_v39 }
  0xf8   : > { %1156 = vst [vmem:[%s3538_s20 + $0x740] sm:$0xff] %v1155_v40 }
  0xf9   : > { %1158 = vst [vmem:[%s3538_s20 + $0x748] sm:$0xff] %v1157_v41 }
  0xfa   : > { %1160 = vst [vmem:[%s3538_s20 + $0x750] sm:$0xff] %v1159_v42 }
  0xfb   : > { %1162 = vst [vmem:[%s3538_s20 + $0x758] sm:$0xff] %v1161_v43 }
  0xfc   : > { %1164 = vst [vmem:[%s3538_s20 + $0x760] sm:$0xff] %v1163_v44 }
  0xfd   : > { %1166 = vst [vmem:[%s3538_s20 + $0x768] sm:$0xff] %v1165_v45 }
  0xfe   : > { %1168 = vst [vmem:[%s3538_s20 + $0x770] sm:$0xff] %v1167_v46 }
  0xff   : > { %1170 = vst [vmem:[%s3538_s20 + $0x778] sm:$0xff] %v1169_v47 }
 0x100   : > { %1172 = vst [vmem:[%s3538_s20 + $0x780] sm:$0xff] %v1171_v48 }
 0x101   : > { %1174 = vst [vmem:[%s3538_s20 + $0x788] sm:$0xff] %v1173_v49 }
 0x102   : > { %1176 = vst [vmem:[%s3538_s20 + $0x790] sm:$0xff] %v1175_v50 }
 0x103   : > { %1178 = vst [vmem:[%s3538_s20 + $0x798] sm:$0xff] %v1177_v51 }
 0x104   : > { %1180 = vst [vmem:[%s3538_s20 + $0x7a0] sm:$0xff] %v1179_v52 }
 0x105   : > { %1182 = vst [vmem:[%s3538_s20 + $0x7a8] sm:$0xff] %v1181_v53 }
 0x106   : > { %1184 = vst [vmem:[%s3538_s20 + $0x7b0] sm:$0xff] %v1183_v54 }
 0x107   : > { %1186 = vst [vmem:[%s3538_s20 + $0x7b8] sm:$0xff] %v1185_v55 }
 0x108   : > { %1188 = vst [vmem:[%s3538_s20 + $0x7c0] sm:$0xff] %v1187_v56 }
 0x109   : > { %1190 = vst [vmem:[%s3538_s20 + $0x7c8] sm:$0xff] %v1189_v57 }
 0x10a   : > { %1192 = vst [vmem:[%s3538_s20 + $0x7d0] sm:$0xff] %v1191_v58 }
 0x10b   : > { %1194 = vst [vmem:[%s3538_s20 + $0x7d8] sm:$0xff] %v1193_v59 }
 0x10c   : > { %1196 = vst [vmem:[%s3538_s20 + $0x7e0] sm:$0xff] %v1195_v60 }
 0x10d   : > { %1198 = vst [vmem:[%s3538_s20 + $0x7e8] sm:$0xff] %v1197_v61 }
 0x10e   : > { %1200 = vst [vmem:[%s3538_s20 + $0x7f0] sm:$0xff] %v1199_v62 }
 0x10f   : > { %1202 = vst [vmem:[%s3538_s20 + $0x7f8] sm:$0xff] %v1201_v63 }
 0x110   : > { %1204 = vst [vmem:[%s3538_s20 + $0x800] sm:$0xff] %v1203_v0 }
 0x111   : > { %1206 = vst [vmem:[%s3538_s20 + $0x808] sm:$0xff] %v1205_v1 }
 0x112   : > { %1208 = vst [vmem:[%s3538_s20 + $0x810] sm:$0xff] %v1207_v2 }
 0x113   : > { %1210 = vst [vmem:[%s3538_s20 + $0x818] sm:$0xff] %v1209_v3 }
 0x114   : > { %1212 = vst [vmem:[%s3538_s20 + $0x820] sm:$0xff] %v1211_v4 }
 0x115   : > { %1214 = vst [vmem:[%s3538_s20 + $0x828] sm:$0xff] %v1213_v5 }
 0x116   : > { %1216 = vst [vmem:[%s3538_s20 + $0x830] sm:$0xff] %v1215_v6 }
 0x117   : > { %1218 = vst [vmem:[%s3538_s20 + $0x838] sm:$0xff] %v1217_v7 }
 0x118   : > { %1220 = vst [vmem:[%s3538_s20 + $0x840] sm:$0xff] %v1219_v8 }
 0x119   : > { %1222 = vst [vmem:[%s3538_s20 + $0x848] sm:$0xff] %v1221_v9 }
 0x11a   : > { %1224 = vst [vmem:[%s3538_s20 + $0x850] sm:$0xff] %v1223_v10 }
 0x11b   : > { %1226 = vst [vmem:[%s3538_s20 + $0x858] sm:$0xff] %v1225_v11 }
 0x11c   : > { %1228 = vst [vmem:[%s3538_s20 + $0x860] sm:$0xff] %v1227_v12 }
 0x11d   : > { %1230 = vst [vmem:[%s3538_s20 + $0x868] sm:$0xff] %v1229_v13 }
 0x11e   : > { %1232 = vst [vmem:[%s3538_s20 + $0x870] sm:$0xff] %v1231_v14 }
 0x11f   : > { %1234 = vst [vmem:[%s3538_s20 + $0x878] sm:$0xff] %v1233_v15 }
 0x120   : > { %1236 = vst [vmem:[%s3538_s20 + $0x880] sm:$0xff] %v1235_v16 }
 0x121   : > { %1238 = vst [vmem:[%s3538_s20 + $0x888] sm:$0xff] %v1237_v17 }
 0x122   : > { %1240 = vst [vmem:[%s3538_s20 + $0x890] sm:$0xff] %v1239_v18 }
 0x123   : > { %1242 = vst [vmem:[%s3538_s20 + $0x898] sm:$0xff] %v1241_v19 }
 0x124   : > { %1244 = vst [vmem:[%s3538_s20 + $0x8a0] sm:$0xff] %v1243_v20 }
 0x125   : > { %1246 = vst [vmem:[%s3538_s20 + $0x8a8] sm:$0xff] %v1245_v21 }
 0x126   : > { %1248 = vst [vmem:[%s3538_s20 + $0x8b0] sm:$0xff] %v1247_v22 }
 0x127   : > { %1250 = vst [vmem:[%s3538_s20 + $0x8b8] sm:$0xff] %v1249_v23 }
 0x128   : > { %1252 = vst [vmem:[%s3538_s20 + $0x8c0] sm:$0xff] %v1251_v24 }
 0x129   : > { %1254 = vst [vmem:[%s3538_s20 + $0x8c8] sm:$0xff] %v1253_v25 }
 0x12a   : > { %1256 = vst [vmem:[%s3538_s20 + $0x8d0] sm:$0xff] %v1255_v26 }
 0x12b   : > { %1258 = vst [vmem:[%s3538_s20 + $0x8d8] sm:$0xff] %v1257_v27 }
 0x12c   : > { %1260 = vst [vmem:[%s3538_s20 + $0x8e0] sm:$0xff] %v1259_v28 }
 0x12d   : > { %1262 = vst [vmem:[%s3538_s20 + $0x8e8] sm:$0xff] %v1261_v29 }
 0x12e   : > { %1264 = vst [vmem:[%s3538_s20 + $0x8f0] sm:$0xff] %v1263_v30 }
 0x12f   : > { %1266 = vst [vmem:[%s3538_s20 + $0x8f8] sm:$0xff] %v1265_v31 }
 0x130 PF: > { %p3433_p5 = scmp.ge.s32.totalorder %s3487_s8, 1  ;;  %p2458_p6 = scmp.lt.s32.totalorder %s3487_s8, 3 }
 0x132   : > { %p2459_p7 = pnand %p3433_p5, %p2458_p6 }
 0x133   : > { %s2465_s21 = sand.u32 (!%p2459_p7), 1, %s3479_s6   ;;  %s4123_s24 = sshll.u32 (!%p2459_p7), %s3427_s9, 5 }
 0x134   : > { %2462 = sbr.rel (%p2459_p7) target bundleno = 460 (0x1cc), region = 72  ;;  %p2486_p8 = scmp.lt.s32.totalorder (!%p2459_p7), %s4123_s24, 63 }
 0x135   : > { %s3440_s22 = smul.u32 (!%p2459_p7), 2304, %s2465_s21 }
 0x137   : > { %s4116_s23 = scalar_lea.vmem (!%p2459_p7), [#allocation2], %s3440_s22 }
 0x139   : > { %vm2779_vm0 = vcmask 130048   ;;  %v2491_v32 = vld [vmem:[%s4116_s23] sm:$0xff]  ;;  %v2492_v45 = vld [vmem:[%s4116_s23 + $0x8] sm:$0xff]  ;;  %v2493_v1 = vld [vmem:[%s4116_s23 + $0x10] sm:$0xff]  ;;  %s4793_s24 = smov (!%p2486_p8, %s4123_s24), 63 }
 0x13a   : > { %v2523_v33 = vld [vmem:[%s4116_s23 + $0x100] sm:$0xff]  ;;  %v2780_v36 = vsel %vm2779_vm0, %v2491_v32, -inf  ;;  %v2524_v46 = vld [vmem:[%s4116_s23 + $0x108] sm:$0xff]  ;;  %v2797_v51 = vsel %vm2779_vm0, %v2492_v45, -inf  ;;  %v2525_v2 = vld [vmem:[%s4116_s23 + $0x110] sm:$0xff]  ;;  %v2814_v8 = vsel %vm2779_vm0, %v2493_v1, -inf }
 0x13b   : > { %v2555_v34 = vld [vmem:[%s4116_s23 + $0x200] sm:$0xff]  ;;  %v2781_v37 = vsel %vm2779_vm0, %v2523_v33, -inf  ;;  %v2556_v49 = vld [vmem:[%s4116_s23 + $0x208] sm:$0xff]  ;;  %v2798_v52 = vsel %vm2779_vm0, %v2524_v46, -inf  ;;  %v2557_v5 = vld [vmem:[%s4116_s23 + $0x210] sm:$0xff]  ;;  %v2815_v9 = vsel %vm2779_vm0, %v2525_v2, -inf }
 0x13c   : > { %v2587_v35 = vld [vmem:[%s4116_s23 + $0x300] sm:$0xff]  ;;  %v2783_v38 = vsel %vm2779_vm0, %v2555_v34, -inf  ;;  %v2782_v42 = vmax.f32 %v2780_v36, %v2781_v37  ;;  %v2588_v50 = vld [vmem:[%s4116_s23 + $0x308] sm:$0xff]  ;;  %v2799_v58 = vmax.f32 %v2797_v51, %v2798_v52  ;;  %v2800_v59 = vsel %vm2779_vm0, %v2556_v49, -inf  ;;  %v2589_v6 = vld [vmem:[%s4116_s23 + $0x310] sm:$0xff]  ;;  %s3435_s25 = sshll.u32 %s4793_s24, 3 }
 0x13d   : > { %v2619_v39 = vld [vmem:[%s4116_s23 + $0x400] sm:$0xff]  ;;  %v2785_v44 = vsel %vm2779_vm0, %v2587_v35, -inf  ;;  %v2620_v55 = vld [vmem:[%s4116_s23 + $0x408] sm:$0xff]  ;;  %v2802_v0 = vsel %vm2779_vm0, %v2588_v50, -inf  ;;  %v2621_v7 = vld [vmem:[%s4116_s23 + $0x410] sm:$0xff]  ;;  %v2816_v13 = vmax.f32 %v2814_v8, %v2815_v9  ;;  %v2817_v14 = vsel %vm2779_vm0, %v2557_v5, -inf  ;;  %s4201_s28 = scalar_lea.vmem %s4788_s1, %s3435_s25 }
 0x13e   : > { %v2651_v40 = vld [vmem:[%s4116_s23 + $0x500] sm:$0xff]  ;;  %v2784_v48 = vmax.f32 %v2782_v42, %v2783_v38  ;;  %v2787_v53 = vsel %vm2779_vm0, %v2619_v39, -inf  ;;  %v2652_v56 = vld [vmem:[%s4116_s23 + $0x508] sm:$0xff]  ;;  %v2801_v4 = vmax.f32 %v2799_v58, %v2800_v59  ;;  %v2804_v12 = vsel %vm2779_vm0, %v2620_v55, -inf  ;;  %v2653_v18 = vld [vmem:[%s4116_s23 + $0x510] sm:$0xff] }
 0x13f   : > { %v2683_v41 = vld [vmem:[%s4116_s23 + $0x600] sm:$0xff]  ;;  %v2789_v54 = vsel %vm2779_vm0, %v2651_v40, -inf  ;;  %v2684_v57 = vld [vmem:[%s4116_s23 + $0x608] sm:$0xff]  ;;  %v2806_v16 = vsel %vm2779_vm0, %v2652_v56, -inf  ;;  %v2819_v19 = vsel %vm2779_vm0, %v2589_v6, -inf  ;;  %v2494_v20 = vld [vmem:[%s4116_s23 + $0x18] sm:$0xff]  ;;  %v2818_v25 = vmax.f32 %v2816_v13, %v2817_v14 }
 0x140   : > { %v2715_v43 = vld [vmem:[%s4116_s23 + $0x700] sm:$0xff]  ;;  %v2786_v60 = vmax.f32 %v2784_v48, %v2785_v44  ;;  %v2791_v61 = vsel %vm2779_vm0, %v2683_v41, -inf  ;;  %v2716_v63 = vld [vmem:[%s4116_s23 + $0x708] sm:$0xff]  ;;  %v2803_v15 = vmax.f32 %v2801_v4, %v2802_v0  ;;  %v2808_v17 = vsel %vm2779_vm0, %v2684_v57, -inf  ;;  %v2526_v21 = vld [vmem:[%s4116_s23 + $0x118] sm:$0xff] }
 0x141   : > { %v2747_v47 = vld [vmem:[%s4116_s23 + $0x800] sm:$0xff]  ;;  %v4150_v62 = vsel %vm2779_vm0, %v2715_v43, -inf  ;;  %v2748_v11 = vld [vmem:[%s4116_s23 + $0x808] sm:$0xff]  ;;  %v2810_v23 = vsel %vm2779_vm0, %v2716_v63, -inf  ;;  %v2685_v24 = vld [vmem:[%s4116_s23 + $0x610] sm:$0xff]  ;;  %v2821_v26 = vsel %vm2779_vm0, %v2621_v7, -inf  ;;  %v2820_v36 = vmax.f32 %v2818_v25, %v2819_v19 }
 0x142   : > { %v2795_v3 = vsel %vm2779_vm0, %v2747_v47, -inf  ;;  %v2788_v10 = vmax.f32 %v2786_v60, %v2787_v53  ;;  %v2558_v27 = vld [vmem:[%s4116_s23 + $0x218] sm:$0xff]  ;;  %v2805_v29 = vmax.f32 %v2803_v15, %v2804_v12  ;;  %v2717_v30 = vld [vmem:[%s4116_s23 + $0x710] sm:$0xff]  ;;  %v2831_v31 = vsel %vm2779_vm0, %v2494_v20, -inf  ;;  %v2495_v39 = vld [vmem:[%s4116_s23 + $0x20] sm:$0xff] }
 0x143   : > { %v2590_v28 = vld [vmem:[%s4116_s23 + $0x318] sm:$0xff]  ;;  %v2832_v32 = vsel %vm2779_vm0, %v2526_v21, -inf  ;;  %v2834_v33 = vsel %vm2779_vm0, %v2558_v27, -inf  ;;  %v2812_v35 = vsel %vm2779_vm0, %v2748_v11, -inf  ;;  %v2527_v40 = vld [vmem:[%s4116_s23 + $0x120] sm:$0xff]  ;;  %v2823_v42 = vsel %vm2779_vm0, %v2653_v18, -inf }
 0x144   : > { %v2790_v22 = vmax.f32 %v2788_v10, %v2789_v54  ;;  %v2622_v37 = vld [vmem:[%s4116_s23 + $0x418] sm:$0xff]  ;;  %v2833_v38 = vmax.f32 %v2831_v31, %v2832_v32  ;;  %v2807_v41 = vmax.f32 %v2805_v29, %v2806_v16  ;;  %v2825_v43 = vsel %vm2779_vm0, %v2685_v24, -inf  ;;  %v2559_v50 = vld [vmem:[%s4116_s23 + $0x220] sm:$0xff]  ;;  %v2749_v53 = vld [vmem:[%s4116_s23 + $0x810] sm:$0xff] }
 0x145   : > { %v2836_v44 = vsel %vm2779_vm0, %v2590_v28, -inf  ;;  %v2822_v46 = vmax.f32 %v2820_v36, %v2821_v26  ;;  %v2827_v47 = vsel %vm2779_vm0, %v2717_v30, -inf  ;;  %v2654_v48 = vld [vmem:[%s4116_s23 + $0x518] sm:$0xff]  ;;  %v2591_v51 = vld [vmem:[%s4116_s23 + $0x320] sm:$0xff]  ;;  %v2838_v54 = vsel %vm2779_vm0, %v2622_v37, -inf  ;;  %v2496_v5 = vld [vmem:[%s4116_s23 + $0x28] sm:$0xff] }
 0x146   : > { %v2792_v34 = vmax.f32 %v2790_v22, %v2791_v61  ;;  %v2835_v49 = vmax.f32 %v2833_v38, %v2834_v33  ;;  %v2809_v52 = vmax.f32 %v2807_v41, %v2808_v17  ;;  %v2848_v55 = vsel %vm2779_vm0, %v2495_v39, -inf  ;;  %v2686_v59 = vld [vmem:[%s4116_s23 + $0x618] sm:$0xff]  ;;  %v2655_v8 = vld [vmem:[%s4116_s23 + $0x520] sm:$0xff]  ;;  %v2528_v10 = vld [vmem:[%s4116_s23 + $0x128] sm:$0xff] }
 0x147   : > { %v2849_v56 = vsel %vm2779_vm0, %v2527_v40, -inf  ;;  %v2824_v58 = vmax.f32 %v2822_v46, %v2823_v42  ;;  %v2718_v60 = vld [vmem:[%s4116_s23 + $0x718] sm:$0xff]  ;;  %v2840_v1 = vsel %vm2779_vm0, %v2654_v48, -inf  ;;  %v2851_v2 = vsel %vm2779_vm0, %v2559_v50, -inf  ;;  %v2560_v11 = vld [vmem:[%s4116_s23 + $0x228] sm:$0xff]  ;;  %v2687_v19 = vld [vmem:[%s4116_s23 + $0x620] sm:$0xff] }
 0x148   : > { %v2794_v45 = vmax.f32 %v2792_v34, %v4150_v62  ;;  %v2837_v61 = vmax.f32 %v2835_v49, %v2836_v44  ;;  %v2623_v62 = vld [vmem:[%s4116_s23 + $0x420] sm:$0xff]  ;;  %v2850_v63 = vmax.f32 %v2848_v55, %v2849_v56  ;;  %v2811_v0 = vmax.f32 %v2809_v52, %v2810_v23  ;;  %v2750_v13 = vld [vmem:[%s4116_s23 + $0x818] sm:$0xff]  ;;  %v2592_v22 = vld [vmem:[%s4116_s23 + $0x328] sm:$0xff] }
 0x149   : > { %v2853_v4 = vsel %vm2779_vm0, %v2591_v51, -inf  ;;  %v2829_v6 = vsel %vm2779_vm0, %v2749_v53, -inf  ;;  %v2842_v14 = vsel %vm2779_vm0, %v2686_v59, -inf  ;;  %v2844_v15 = vsel %vm2779_vm0, %v2718_v60, -inf  ;;  %v2719_v20 = vld [vmem:[%s4116_s23 + $0x720] sm:$0xff]  ;;  %v2497_v28 = vld [vmem:[%s4116_s23 + $0x30] sm:$0xff] }
 0x14a   : > { %v2796_v57 = vmax.f32 %v2794_v45, %v2795_v3  ;;  %v2826_v3 = vmax.f32 %v2824_v58, %v2825_v43  ;;  %v2839_v7 = vmax.f32 %v2837_v61, %v2838_v54  ;;  %v2852_v9 = vmax.f32 %v2850_v63, %v2851_v2  ;;  %v2751_v24 = vld [vmem:[%s4116_s23 + $0x820] sm:$0xff]  ;;  %v2624_v32 = vld [vmem:[%s4116_s23 + $0x428] sm:$0xff]  ;;  %v2529_v34 = vld [vmem:[%s4116_s23 + $0x130] sm:$0xff] }
 0x14b   : > { %v2813_v12 = vmax.f32 %v2811_v0, %v2812_v35  ;;  %v2855_v16 = vsel %vm2779_vm0, %v2623_v62, -inf  ;;  %v2865_v23 = vsel %vm2779_vm0, %v2496_v5, -inf  ;;  %v2857_v25 = vsel %vm2779_vm0, %v2655_v8, -inf  ;;  %v2561_v35 = vld [vmem:[%s4116_s23 + $0x230] sm:$0xff]  ;;  %v2656_v39 = vld [vmem:[%s4116_s23 + $0x528] sm:$0xff]  ;;  %v2498_v53 = vld [vmem:[%s4116_s23 + $0x38] sm:$0xff] }
 0x14c   : > { %3324 = vst.msk [vmem:[%s4201_s28] sm:$0xff] %vm2779_vm0, %v2796_v57  ;;  %v2828_v17 = vmax.f32 %v2826_v3, %v2827_v47  ;;  %v2841_v18 = vmax.f32 %v2839_v7, %v2840_v1  ;;  %v2854_v21 = vmax.f32 %v2852_v9, %v2853_v4  ;;  %v2866_v26 = vsel %vm2779_vm0, %v2528_v10, -inf  ;;  %v2688_v43 = vld [vmem:[%s4116_s23 + $0x628] sm:$0xff]  ;;  %v2593_v46 = vld [vmem:[%s4116_s23 + $0x330] sm:$0xff]  ;;  %v2530_v59 = vld [vmem:[%s4116_s23 + $0x138] sm:$0xff] }
 0x14d   : > { %3325 = vst.msk [vmem:[%s4201_s28 + $0x8] sm:$0xff] %vm2779_vm0, %v2813_v12  ;;  %v2868_v27 = vsel %vm2779_vm0, %v2560_v11, -inf  ;;  %v2867_v33 = vmax.f32 %v2865_v23, %v2866_v26  ;;  %v2846_v36 = vsel %vm2779_vm0, %v2750_v13, -inf  ;;  %v2859_v37 = vsel %vm2779_vm0, %v2687_v19, -inf  ;;  %v2720_v44 = vld [vmem:[%s4116_s23 + $0x728] sm:$0xff]  ;;  %v2625_v57 = vld [vmem:[%s4116_s23 + $0x430] sm:$0xff] }
 0x14e   : > { %v2830_v29 = vmax.f32 %v2828_v17, %v2829_v6  ;;  %v2843_v30 = vmax.f32 %v2841_v18, %v2842_v14  ;;  %v2856_v31 = vmax.f32 %v2854_v21, %v2855_v16  ;;  %v2861_v38 = vsel %vm2779_vm0, %v2719_v20, -inf  ;;  %v2752_v49 = vld [vmem:[%s4116_s23 + $0x828] sm:$0xff]  ;;  %v2562_v60 = vld [vmem:[%s4116_s23 + $0x238] sm:$0xff]  ;;  %v2657_v0 = vld [vmem:[%s4116_s23 + $0x530] sm:$0xff] }
 0x14f   : > { %v2870_v40 = vsel %vm2779_vm0, %v2592_v22, -inf  ;;  %v2869_v45 = vmax.f32 %v2867_v33, %v2868_v27  ;;  %v2882_v47 = vsel %vm2779_vm0, %v2497_v28, -inf  ;;  %v2863_v48 = vsel %vm2779_vm0, %v2751_v24, -inf  ;;  %v2689_v5 = vld [vmem:[%s4116_s23 + $0x630] sm:$0xff]  ;;  %v2594_v7 = vld [vmem:[%s4116_s23 + $0x338] sm:$0xff]  ;;  %v2499_v14 = vld [vmem:[%s4116_s23 + $0x40] sm:$0xff] }
 0x150   : > { %3326 = vst.msk [vmem:[%s4201_s28 + $0x10] sm:$0xff] %vm2779_vm0, %v2830_v29  ;;  %v2845_v41 = vmax.f32 %v2843_v30, %v2844_v15  ;;  %v2858_v42 = vmax.f32 %v2856_v31, %v2857_v25  ;;  %v2872_v50 = vsel %vm2779_vm0, %v2624_v32, -inf  ;;  %v2883_v51 = vsel %vm2779_vm0, %v2529_v34, -inf  ;;  %v2721_v3 = vld [vmem:[%s4116_s23 + $0x730] sm:$0xff]  ;;  %v2626_v18 = vld [vmem:[%s4116_s23 + $0x438] sm:$0xff]  ;;  %v2531_v20 = vld [vmem:[%s4116_s23 + $0x140] sm:$0xff] }
 0x151   : > { %v2885_v52 = vsel %vm2779_vm0, %v2561_v35, -inf  ;;  %v2871_v56 = vmax.f32 %v2869_v45, %v2870_v40  ;;  %v2884_v58 = vmax.f32 %v2882_v47, %v2883_v51  ;;  %v2874_v61 = vsel %vm2779_vm0, %v2656_v39, -inf  ;;  %v2753_v10 = vld [vmem:[%s4116_s23 + $0x830] sm:$0xff]  ;;  %v2563_v21 = vld [vmem:[%s4116_s23 + $0x240] sm:$0xff]  ;;  %v2658_v25 = vld [vmem:[%s4116_s23 + $0x538] sm:$0xff] }
 0x152   : > { %v2847_v54 = vmax.f32 %v2845_v41, %v2846_v36  ;;  %v2860_v55 = vmax.f32 %v2858_v42, %v2859_v37  ;;  %v2876_v62 = vsel %vm2779_vm0, %v2688_v43, -inf  ;;  %v2878_v63 = vsel %vm2779_vm0, %v2720_v44, -inf  ;;  %v2690_v29 = vld [vmem:[%s4116_s23 + $0x638] sm:$0xff]  ;;  %v2595_v32 = vld [vmem:[%s4116_s23 + $0x340] sm:$0xff]  ;;  %v2500_v43 = vld [vmem:[%s4116_s23 + $0x48] sm:$0xff] }
 0x153   : > { %v2887_v1 = vsel %vm2779_vm0, %v2593_v46, -inf  ;;  %v2873_v4 = vmax.f32 %v2871_v56, %v2872_v50  ;;  %v2886_v6 = vmax.f32 %v2884_v58, %v2885_v52  ;;  %v2899_v8 = vsel %vm2779_vm0, %v2498_v53, -inf  ;;  %v2722_v30 = vld [vmem:[%s4116_s23 + $0x738] sm:$0xff]  ;;  %v2627_v36 = vld [vmem:[%s4116_s23 + $0x440] sm:$0xff]  ;;  %v2532_v44 = vld [vmem:[%s4116_s23 + $0x148] sm:$0xff] }
 0x154   : > { %3327 = vst.msk [vmem:[%s4201_s28 + $0x18] sm:$0xff] %vm2779_vm0, %v2847_v54  ;;  %v2862_v2 = vmax.f32 %v2860_v55, %v2861_v38  ;;  %v2880_v9 = vsel %vm2779_vm0, %v2752_v49, -inf  ;;  %v2889_v11 = vsel %vm2779_vm0, %v2625_v57, -inf  ;;  %v2900_v12 = vsel %vm2779_vm0, %v2530_v59, -inf  ;;  %v2564_v45 = vld [vmem:[%s4116_s23 + $0x248] sm:$0xff]  ;;  %v2754_v46 = vld [vmem:[%s4116_s23 + $0x838] sm:$0xff] }
 0x155   : > { %v2902_v13 = vsel %vm2779_vm0, %v2562_v60, -inf  ;;  %v2875_v16 = vmax.f32 %v2873_v4, %v2874_v61  ;;  %v2888_v17 = vmax.f32 %v2886_v6, %v2887_v1  ;;  %v2901_v19 = vmax.f32 %v2899_v8, %v2900_v12  ;;  %v2659_v54 = vld [vmem:[%s4116_s23 + $0x540] sm:$0xff]  ;;  %v2596_v57 = vld [vmem:[%s4116_s23 + $0x348] sm:$0xff]  ;;  %v2501_v4 = vld [vmem:[%s4116_s23 + $0x50] sm:$0xff] }
 0x156   : > { %v2864_v15 = vmax.f32 %v2862_v2, %v2863_v48  ;;  %v2891_v22 = vsel %vm2779_vm0, %v2657_v0, -inf  ;;  %v2893_v23 = vsel %vm2779_vm0, %v2689_v5, -inf  ;;  %v2895_v24 = vsel %vm2779_vm0, %v2721_v3, -inf  ;;  %v2691_v55 = vld [vmem:[%s4116_s23 + $0x640] sm:$0xff]  ;;  %v2628_v59 = vld [vmem:[%s4116_s23 + $0x448] sm:$0xff]  ;;  %v2533_v5 = vld [vmem:[%s4116_s23 + $0x150] sm:$0xff] }
 0x157   : > { %v2904_v26 = vsel %vm2779_vm0, %v2594_v7, -inf  ;;  %v2877_v27 = vmax.f32 %v2875_v16, %v2876_v62  ;;  %v2890_v28 = vmax.f32 %v2888_v17, %v2889_v11  ;;  %v2903_v31 = vmax.f32 %v2901_v19, %v2902_v13  ;;  %v2565_v3 = vld [vmem:[%s4116_s23 + $0x250] sm:$0xff]  ;;  %v2723_v7 = vld [vmem:[%s4116_s23 + $0x740] sm:$0xff] }
 0x158   : > { %3328 = vst.msk [vmem:[%s4201_s28 + $0x20] sm:$0xff] %vm2779_vm0, %v2864_v15  ;;  %v2916_v33 = vsel %vm2779_vm0, %v2499_v14, -inf  ;;  %v2897_v34 = vsel %vm2779_vm0, %v2753_v10, -inf  ;;  %v2906_v35 = vsel %vm2779_vm0, %v2626_v18, -inf  ;;  %v2917_v37 = vsel %vm2779_vm0, %v2531_v20, -inf  ;;  %v2755_v13 = vld [vmem:[%s4116_s23 + $0x840] sm:$0xff] }
 0x159   : > { %v2919_v38 = vsel %vm2779_vm0, %v2563_v21, -inf  ;;  %v2879_v39 = vmax.f32 %v2877_v27, %v2878_v63  ;;  %v2892_v40 = vmax.f32 %v2890_v28, %v2891_v22  ;;  %v2905_v41 = vmax.f32 %v2903_v31, %v2904_v26  ;;  %v2660_v15 = vld [vmem:[%s4116_s23 + $0x548] sm:$0xff]  ;;  %v2597_v17 = vld [vmem:[%s4116_s23 + $0x350] sm:$0xff]  ;;  %v2502_v28 = vld [vmem:[%s4116_s23 + $0x58] sm:$0xff] }
 0x15a   : > { %v2918_v42 = vmax.f32 %v2916_v33, %v2917_v37  ;;  %v2908_v47 = vsel %vm2779_vm0, %v2658_v25, -inf  ;;  %v2910_v48 = vsel %vm2779_vm0, %v2690_v29, -inf  ;;  %v2912_v49 = vsel %vm2779_vm0, %v2722_v30, -inf  ;;  %v2692_v18 = vld [vmem:[%s4116_s23 + $0x648] sm:$0xff]  ;;  %v2629_v26 = vld [vmem:[%s4116_s23 + $0x450] sm:$0xff]  ;;  %v2534_v29 = vld [vmem:[%s4116_s23 + $0x158] sm:$0xff] }
 0x15b   : > { %v2921_v50 = vsel %vm2779_vm0, %v2595_v32, -inf  ;;  %v2881_v51 = vmax.f32 %v2879_v39, %v2880_v9  ;;  %v2894_v52 = vmax.f32 %v2892_v40, %v2893_v23  ;;  %v2907_v53 = vmax.f32 %v2905_v41, %v2906_v35  ;;  %v2724_v32 = vld [vmem:[%s4116_s23 + $0x748] sm:$0xff]  ;;  %v2566_v40 = vld [vmem:[%s4116_s23 + $0x258] sm:$0xff] }
 0x15c   : > { %v2920_v56 = vmax.f32 %v2918_v42, %v2919_v38  ;;  %v2923_v58 = vsel %vm2779_vm0, %v2627_v36, -inf  ;;  %v2933_v60 = vsel %vm2779_vm0, %v2500_v43, -inf  ;;  %v2934_v61 = vsel %vm2779_vm0, %v2532_v44, -inf  ;;  %v2661_v38 = vld [vmem:[%s4116_s23 + $0x550] sm:$0xff]  ;;  %v2598_v41 = vld [vmem:[%s4116_s23 + $0x358] sm:$0xff]  ;;  %v2756_v42 = vld [vmem:[%s4116_s23 + $0x848] sm:$0xff] }
 0x15d   : > { %v2936_v62 = vsel %vm2779_vm0, %v2564_v45, -inf  ;;  %3329 = vst.msk [vmem:[%s4201_s28 + $0x28] sm:$0xff] %vm2779_vm0, %v2881_v51  ;;  %v2896_v63 = vmax.f32 %v2894_v52, %v2895_v24  ;;  %v2909_v0 = vmax.f32 %v2907_v53, %v2908_v47  ;;  %v2935_v2 = vmax.f32 %v2933_v60, %v2934_v61  ;;  %v2630_v51 = vld [vmem:[%s4116_s23 + $0x458] sm:$0xff]  ;;  %v2503_v53 = vld [vmem:[%s4116_s23 + $0x60] sm:$0xff]  ;;  %v2725_v61 = vld [vmem:[%s4116_s23 + $0x750] sm:$0xff] }
 0x15e   : > { %v2922_v1 = vmax.f32 %v2920_v56, %v2921_v50  ;;  %v2914_v6 = vsel %vm2779_vm0, %v2754_v46, -inf  ;;  %v2925_v8 = vsel %vm2779_vm0, %v2659_v54, -inf  ;;  %v2927_v9 = vsel %vm2779_vm0, %v2691_v55, -inf }
 0x15f   : > { %v2938_v10 = vsel %vm2779_vm0, %v2596_v57, -inf  ;;  %v2898_v11 = vmax.f32 %v2896_v63, %v2897_v34  ;;  %v2911_v12 = vmax.f32 %v2909_v0, %v2910_v48  ;;  %v2937_v16 = vmax.f32 %v2935_v2, %v2936_v62  ;;  %v2662_v63 = vld [vmem:[%s4116_s23 + $0x558] sm:$0xff] }
 0x160   : > { %v2924_v14 = vmax.f32 %v2922_v1, %v2923_v58  ;;  %v2940_v19 = vsel %vm2779_vm0, %v2628_v59, -inf  ;;  %v2950_v20 = vsel %vm2779_vm0, %v2501_v4, -inf  ;;  %v2951_v21 = vsel %vm2779_vm0, %v2533_v5, -inf  ;;  %v2535_v58 = vld [vmem:[%s4116_s23 + $0x160] sm:$0xff] }
 0x161   : > { %v2953_v22 = vsel %vm2779_vm0, %v2565_v3, -inf  ;;  %3330 = vst.msk [vmem:[%s4201_s28 + $0x30] sm:$0xff] %vm2779_vm0, %v2898_v11  ;;  %v2913_v23 = vmax.f32 %v2911_v12, %v2912_v49  ;;  %v2939_v25 = vmax.f32 %v2937_v16, %v2938_v10  ;;  %v2952_v27 = vmax.f32 %v2950_v20, %v2951_v21  ;;  %v2693_v49 = vld [vmem:[%s4116_s23 + $0x650] sm:$0xff]  ;;  %v2567_v1 = vld [vmem:[%s4116_s23 + $0x260] sm:$0xff]  ;;  %v2694_v10 = vld [vmem:[%s4116_s23 + $0x658] sm:$0xff] }
 0x162   : > { %v2926_v24 = vmax.f32 %v2924_v14, %v2925_v8  ;;  %v2929_v30 = vsel %vm2779_vm0, %v2723_v7, -inf  ;;  %v2931_v31 = vsel %vm2779_vm0, %v2755_v13, -inf  ;;  %v2942_v33 = vsel %vm2779_vm0, %v2660_v15, -inf  ;;  %v2599_v3 = vld [vmem:[%s4116_s23 + $0x360] sm:$0xff]  ;;  %v2757_v8 = vld [vmem:[%s4116_s23 + $0x850] sm:$0xff] }
 0x163   : > { %v2955_v34 = vsel %vm2779_vm0, %v2597_v17, -inf  ;;  %v2915_v35 = vmax.f32 %v2913_v23, %v2914_v6  ;;  %v2941_v37 = vmax.f32 %v2939_v25, %v2940_v19  ;;  %v2954_v39 = vmax.f32 %v2952_v27, %v2953_v22  ;;  %v2631_v12 = vld [vmem:[%s4116_s23 + $0x460] sm:$0xff]  ;;  %v2536_v19 = vld [vmem:[%s4116_s23 + $0x168] sm:$0xff]  ;;  %v2726_v22 = vld [vmem:[%s4116_s23 + $0x758] sm:$0xff] }
 0x164   : > { %v2928_v36 = vmax.f32 %v2926_v24, %v2927_v9  ;;  %v2944_v43 = vsel %vm2779_vm0, %v2692_v18, -inf  ;;  %v2957_v44 = vsel %vm2779_vm0, %v2629_v26, -inf  ;;  %v2967_v45 = vsel %vm2779_vm0, %v2502_v28, -inf  ;;  %v2504_v18 = vld [vmem:[%s4116_s23 + $0x68] sm:$0xff]  ;;  %v2663_v28 = vld [vmem:[%s4116_s23 + $0x560] sm:$0xff] }
 0x165   : > { %v2968_v46 = vsel %vm2779_vm0, %v2534_v29, -inf  ;;  %3331 = vst.msk [vmem:[%s4201_s28 + $0x38] sm:$0xff] %vm2779_vm0, %v2915_v35  ;;  %v2943_v48 = vmax.f32 %v2941_v37, %v2942_v33  ;;  %v2956_v50 = vmax.f32 %v2954_v39, %v2955_v34  ;;  %v2946_v54 = vsel %vm2779_vm0, %v2724_v32, -inf  ;;  %v2568_v25 = vld [vmem:[%s4116_s23 + $0x268] sm:$0xff]  ;;  %v2758_v33 = vld [vmem:[%s4116_s23 + $0x858] sm:$0xff]  ;;  %v2695_v35 = vld [vmem:[%s4116_s23 + $0x660] sm:$0xff] }
 0x166   : > { %v2930_v47 = vmax.f32 %v2928_v36, %v2929_v30  ;;  %v2969_v52 = vmax.f32 %v2967_v45, %v2968_v46  ;;  %v2959_v55 = vsel %vm2779_vm0, %v2661_v38, -inf  ;;  %v2970_v56 = vsel %vm2779_vm0, %v2566_v40, -inf  ;;  %v2632_v40 = vld [vmem:[%s4116_s23 + $0x468] sm:$0xff] }
 0x167   : > { %v2972_v57 = vsel %vm2779_vm0, %v2598_v41, -inf  ;;  %v2945_v60 = vmax.f32 %v2943_v48, %v2944_v43  ;;  %v2958_v62 = vmax.f32 %v2956_v50, %v2957_v44  ;;  %v2948_v2 = vsel %vm2779_vm0, %v2756_v42, -inf  ;;  %v2505_v43 = vld [vmem:[%s4116_s23 + $0x70] sm:$0xff] }
 0x168   : > { %v2932_v59 = vmax.f32 %v2930_v47, %v2931_v31  ;;  %v2971_v0 = vmax.f32 %v2969_v52, %v2970_v56  ;;  %v2961_v4 = vsel %vm2779_vm0, %v2693_v49, -inf  ;;  %v2974_v5 = vsel %vm2779_vm0, %v2630_v51, -inf  ;;  %v2600_v31 = vld [vmem:[%s4116_s23 + $0x368] sm:$0xff]  ;;  %v2537_v44 = vld [vmem:[%s4116_s23 + $0x170] sm:$0xff]  ;;  %v2727_v51 = vld [vmem:[%s4116_s23 + $0x760] sm:$0xff] }
 0x169   : > { %v2984_v6 = vsel %vm2779_vm0, %v2503_v53, -inf  ;;  %v2947_v7 = vmax.f32 %v2945_v60, %v2946_v54  ;;  %v2960_v9 = vmax.f32 %v2958_v62, %v2959_v55  ;;  %v2985_v13 = vsel %vm2779_vm0, %v2535_v58, -inf  ;;  %v2569_v49 = vld [vmem:[%s4116_s23 + $0x270] sm:$0xff]  ;;  %v2664_v54 = vld [vmem:[%s4116_s23 + $0x568] sm:$0xff]  ;;  %v2759_v58 = vld [vmem:[%s4116_s23 + $0x860] sm:$0xff] }
 0x16a   : > { %3332 = vst.msk [vmem:[%s4201_s28 + $0x40] sm:$0xff] %vm2779_vm0, %v2932_v59  ;;  %v2973_v11 = vmax.f32 %v2971_v0, %v2972_v57  ;;  %v2963_v14 = vsel %vm2779_vm0, %v2725_v61, -inf  ;;  %v2976_v15 = vsel %vm2779_vm0, %v2662_v63, -inf  ;;  %v2986_v16 = vmax.f32 %v2984_v6, %v2985_v13  ;;  %v2601_v56 = vld [vmem:[%s4116_s23 + $0x370] sm:$0xff]  ;;  %v2696_v59 = vld [vmem:[%s4116_s23 + $0x668] sm:$0xff] }
 0x16b   : > { %v2987_v17 = vsel %vm2779_vm0, %v2567_v1, -inf  ;;  %v2949_v20 = vmax.f32 %v2947_v7, %v2948_v2  ;;  %v2962_v21 = vmax.f32 %v2960_v9, %v2961_v4  ;;  %v2989_v24 = vsel %vm2779_vm0, %v2599_v3, -inf  ;;  %v2633_v1 = vld [vmem:[%s4116_s23 + $0x470] sm:$0xff]  ;;  %v2538_v3 = vld [vmem:[%s4116_s23 + $0x178] sm:$0xff] }
 0x16c   : > { %v2975_v23 = vmax.f32 %v2973_v11, %v2974_v5  ;;  %v2965_v26 = vsel %vm2779_vm0, %v2757_v8, -inf  ;;  %v2978_v27 = vsel %vm2779_vm0, %v2694_v10, -inf  ;;  %v2988_v29 = vmax.f32 %v2986_v16, %v2987_v17  ;;  %v2506_v5 = vld [vmem:[%s4116_s23 + $0x78] sm:$0xff]  ;;  %v2728_v8 = vld [vmem:[%s4116_s23 + $0x768] sm:$0xff] }
 0x16d   : > { %v2991_v30 = vsel %vm2779_vm0, %v2631_v12, -inf  ;;  %3333 = vst.msk [vmem:[%s4201_s28 + $0x48] sm:$0xff] %vm2779_vm0, %v2949_v20  ;;  %v2964_v32 = vmax.f32 %v2962_v21, %v2963_v14  ;;  %v3001_v36 = vsel %vm2779_vm0, %v2504_v18, -inf  ;;  %v3002_v37 = vsel %vm2779_vm0, %v2536_v19, -inf  ;;  %v2665_v14 = vld [vmem:[%s4116_s23 + $0x570] sm:$0xff]  ;;  %v2570_v16 = vld [vmem:[%s4116_s23 + $0x278] sm:$0xff] }
 0x16e   : > { %v2977_v34 = vmax.f32 %v2975_v23, %v2976_v15  ;;  %v2980_v38 = vsel %vm2779_vm0, %v2726_v22, -inf  ;;  %v2990_v39 = vmax.f32 %v2988_v29, %v2989_v24  ;;  %v3003_v41 = vmax.f32 %v3001_v36, %v3002_v37  ;;  %v2602_v17 = vld [vmem:[%s4116_s23 + $0x378] sm:$0xff]  ;;  %v2760_v18 = vld [vmem:[%s4116_s23 + $0x868] sm:$0xff]  ;;  %v2507_v29 = vld [vmem:[%s4116_s23 + $0x80] sm:$0xff] }
 0x16f   : > { %v3004_v42 = vsel %vm2779_vm0, %v2568_v25, -inf  ;;  %v2966_v45 = vmax.f32 %v2964_v32, %v2965_v26  ;;  %v2993_v47 = vsel %vm2779_vm0, %v2663_v28, -inf  ;;  %v3006_v48 = vsel %vm2779_vm0, %v2600_v31, -inf  ;;  %v2697_v25 = vld [vmem:[%s4116_s23 + $0x670] sm:$0xff] }
 0x170   : > { %v2979_v46 = vmax.f32 %v2977_v34, %v2978_v27  ;;  %v2982_v50 = vsel %vm2779_vm0, %v2758_v33, -inf  ;;  %v2992_v52 = vmax.f32 %v2990_v39, %v2991_v30  ;;  %v2995_v53 = vsel %vm2779_vm0, %v2695_v35, -inf  ;;  %v2634_v27 = vld [vmem:[%s4116_s23 + $0x478] sm:$0xff]  ;;  %v2539_v34 = vld [vmem:[%s4116_s23 + $0x180] sm:$0xff]  ;;  %v2729_v37 = vld [vmem:[%s4116_s23 + $0x770] sm:$0xff] }
 0x171   : > { %v3005_v55 = vmax.f32 %v3003_v41, %v3004_v42  ;;  %3334 = vst.msk [vmem:[%s4201_s28 + $0x50] sm:$0xff] %vm2779_vm0, %v2966_v45  ;;  %v3008_v60 = vsel %vm2779_vm0, %v2632_v40, -inf  ;;  %v3018_v61 = vsel %vm2779_vm0, %v2505_v43, -inf  ;;  %v3019_v62 = vsel %vm2779_vm0, %v2537_v44, -inf  ;;  %v2666_v39 = vld [vmem:[%s4116_s23 + $0x578] sm:$0xff]  ;;  %v2571_v41 = vld [vmem:[%s4116_s23 + $0x280] sm:$0xff] }
 0x172   : > { %v2981_v57 = vmax.f32 %v2979_v46, %v2980_v38  ;;  %v2994_v63 = vmax.f32 %v2992_v52, %v2993_v47  ;;  %v3020_v2 = vmax.f32 %v3018_v61, %v3019_v62  ;;  %v3021_v4 = vsel %vm2779_vm0, %v2569_v49, -inf  ;;  %v2603_v45 = vld [vmem:[%s4116_s23 + $0x380] sm:$0xff]  ;;  %v2730_v62 = vld [vmem:[%s4116_s23 + $0x778] sm:$0xff] }
 0x173   : > { %v3007_v0 = vmax.f32 %v3005_v55, %v3006_v48  ;;  %v2997_v7 = vsel %vm2779_vm0, %v2727_v51, -inf  ;;  %v3010_v9 = vsel %vm2779_vm0, %v2664_v54, -inf  ;;  %v3023_v10 = vsel %vm2779_vm0, %v2601_v56, -inf  ;;  %v2761_v48 = vld [vmem:[%s4116_s23 + $0x870] sm:$0xff]  ;;  %v2635_v52 = vld [vmem:[%s4116_s23 + $0x480] sm:$0xff] }
 0x174   : > { %v2983_v6 = vmax.f32 %v2981_v57, %v2982_v50  ;;  %v2996_v11 = vmax.f32 %v2994_v63, %v2995_v53  ;;  %v2999_v12 = vsel %vm2779_vm0, %v2759_v58, -inf  ;;  %v3022_v15 = vmax.f32 %v3020_v2, %v3021_v4  ;;  %v2698_v50 = vld [vmem:[%s4116_s23 + $0x678] sm:$0xff]  ;;  %v2508_v58 = vld [vmem:[%s4116_s23 + $0x88] sm:$0xff] }
 0x175   : > { %v3009_v13 = vmax.f32 %v3007_v0, %v3008_v60  ;;  %v3012_v19 = vsel %vm2779_vm0, %v2696_v59, -inf  ;;  %v3025_v20 = vsel %vm2779_vm0, %v2633_v1, -inf  ;;  %v3035_v21 = vsel %vm2779_vm0, %v2506_v5, -inf  ;;  %v2540_v59 = vld [vmem:[%s4116_s23 + $0x188] sm:$0xff]  ;;  %v2667_v5 = vld [vmem:[%s4116_s23 + $0x580] sm:$0xff] }
 0x176   : > { %3335 = vst.msk [vmem:[%s4201_s28 + $0x58] sm:$0xff] %vm2779_vm0, %v2983_v6  ;;  %v3036_v22 = vsel %vm2779_vm0, %v2538_v3, -inf  ;;  %v2998_v23 = vmax.f32 %v2996_v11, %v2997_v7  ;;  %v3024_v26 = vmax.f32 %v3022_v15, %v3023_v10  ;;  %v3014_v30 = vsel %vm2779_vm0, %v2728_v8, -inf  ;;  %v2572_v1 = vld [vmem:[%s4116_s23 + $0x288] sm:$0xff]  ;;  %v2699_v11 = vld [vmem:[%s4116_s23 + $0x680] sm:$0xff] }
 0x177   : > { %v3011_v24 = vmax.f32 %v3009_v13, %v3010_v9  ;;  %v3037_v28 = vmax.f32 %v3035_v21, %v3036_v22  ;;  %v3027_v31 = vsel %vm2779_vm0, %v2665_v14, -inf  ;;  %v3038_v32 = vsel %vm2779_vm0, %v2570_v16, -inf  ;;  %v2604_v7 = vld [vmem:[%s4116_s23 + $0x388] sm:$0xff]  ;;  %v2762_v9 = vld [vmem:[%s4116_s23 + $0x878] sm:$0xff] }
 0x178   : > { %v3040_v33 = vsel %vm2779_vm0, %v2602_v17, -inf  ;;  %v3000_v35 = vmax.f32 %v2998_v23, %v2999_v12  ;;  %v3026_v38 = vmax.f32 %v3024_v26, %v3025_v20  ;;  %v3016_v42 = vsel %vm2779_vm0, %v2760_v18, -inf  ;;  %v2636_v16 = vld [vmem:[%s4116_s23 + $0x488] sm:$0xff]  ;;  %v2541_v20 = vld [vmem:[%s4116_s23 + $0x190] sm:$0xff] }
 0x179   : > { %v3013_v36 = vmax.f32 %v3011_v24, %v3012_v19  ;;  %v3039_v40 = vmax.f32 %v3037_v28, %v3038_v32  ;;  %v3029_v43 = vsel %vm2779_vm0, %v2697_v25, -inf  ;;  %v3042_v44 = vsel %vm2779_vm0, %v2634_v27, -inf  ;;  %v2509_v19 = vld [vmem:[%s4116_s23 + $0x90] sm:$0xff]  ;;  %v2731_v27 = vld [vmem:[%s4116_s23 + $0x780] sm:$0xff] }
 0x17a   : > { %v3052_v46 = vsel %vm2779_vm0, %v2507_v29, -inf  ;;  %3336 = vst.msk [vmem:[%s4201_s28 + $0x60] sm:$0xff] %vm2779_vm0, %v3000_v35  ;;  %v3028_v49 = vmax.f32 %v3026_v38, %v3027_v31  ;;  %v3053_v53 = vsel %vm2779_vm0, %v2539_v34, -inf  ;;  %v3031_v54 = vsel %vm2779_vm0, %v2729_v37, -inf  ;;  %v2573_v25 = vld [vmem:[%s4116_s23 + $0x290] sm:$0xff]  ;;  %v2763_v34 = vld [vmem:[%s4116_s23 + $0x880] sm:$0xff] }
 0x17b   : > { %v3015_v47 = vmax.f32 %v3013_v36, %v3014_v30  ;;  %v3041_v51 = vmax.f32 %v3039_v40, %v3040_v33  ;;  %v3044_v55 = vsel %vm2779_vm0, %v2666_v39, -inf  ;;  %v3054_v56 = vmax.f32 %v3052_v46, %v3053_v53  ;;  %v2668_v30 = vld [vmem:[%s4116_s23 + $0x588] sm:$0xff]  ;;  %v2605_v32 = vld [vmem:[%s4116_s23 + $0x390] sm:$0xff] }
 0x17c   : > { %v3055_v57 = vsel %vm2779_vm0, %v2571_v41, -inf  ;;  %v3030_v61 = vmax.f32 %v3028_v49, %v3029_v43  ;;  %v3057_v0 = vsel %vm2779_vm0, %v2603_v45, -inf  ;;  %v3033_v2 = vsel %vm2779_vm0, %v2761_v48, -inf  ;;  %v2700_v35 = vld [vmem:[%s4116_s23 + $0x688] sm:$0xff]  ;;  %v2637_v41 = vld [vmem:[%s4116_s23 + $0x490] sm:$0xff]  ;;  %v2542_v45 = vld [vmem:[%s4116_s23 + $0x198] sm:$0xff] }
 0x17d   : > { %v3017_v60 = vmax.f32 %v3015_v47, %v3016_v42  ;;  %v3043_v63 = vmax.f32 %v3041_v51, %v3042_v44  ;;  %v3046_v4 = vsel %vm2779_vm0, %v2698_v50, -inf  ;;  %v3056_v3 = vmax.f32 %v3054_v56, %v3055_v57  ;;  %v2510_v44 = vld [vmem:[%s4116_s23 + $0x98] sm:$0xff]  ;;  %v2732_v48 = vld [vmem:[%s4116_s23 + $0x788] sm:$0xff] }
 0x17e   : > { %v3059_v6 = vsel %vm2779_vm0, %v2635_v52, -inf  ;;  %v3032_v8 = vmax.f32 %v3030_v61, %v3031_v54  ;;  %v3069_v12 = vsel %vm2779_vm0, %v2508_v58, -inf  ;;  %v3070_v13 = vsel %vm2779_vm0, %v2540_v59, -inf  ;;  %v2669_v54 = vld [vmem:[%s4116_s23 + $0x590] sm:$0xff]  ;;  %v2574_v56 = vld [vmem:[%s4116_s23 + $0x298] sm:$0xff]  ;;  %v2764_v58 = vld [vmem:[%s4116_s23 + $0x888] sm:$0xff] }
 0x17f   : > { %3337 = vst.msk [vmem:[%s4201_s28 + $0x68] sm:$0xff] %vm2779_vm0, %v3017_v60  ;;  %v3045_v10 = vmax.f32 %v3043_v63, %v3044_v55  ;;  %v3048_v14 = vsel %vm2779_vm0, %v2730_v62, -inf  ;;  %v3058_v15 = vmax.f32 %v3056_v3, %v3057_v0  ;;  %v3071_v17 = vmax.f32 %v3069_v12, %v3070_v13  ;;  %v2606_v57 = vld [vmem:[%s4116_s23 + $0x398] sm:$0xff]  ;;  %v2511_v3 = vld [vmem:[%s4116_s23 + $0xa0] sm:$0xff]  ;;  %v2733_v13 = vld [vmem:[%s4116_s23 + $0x790] sm:$0xff] }
 0x180   : > { %v3072_v18 = vsel %vm2779_vm0, %v2572_v1, -inf  ;;  %v3034_v21 = vmax.f32 %v3032_v8, %v3033_v2  ;;  %v3061_v23 = vsel %vm2779_vm0, %v2667_v5, -inf  ;;  %v3074_v24 = vsel %vm2779_vm0, %v2604_v7, -inf  ;;  %v2701_v1 = vld [vmem:[%s4116_s23 + $0x690] sm:$0xff] }
 0x181   : > { %v3047_v22 = vmax.f32 %v3045_v10, %v3046_v4  ;;  %v3050_v26 = vsel %vm2779_vm0, %v2762_v9, -inf  ;;  %v3060_v28 = vmax.f32 %v3058_v15, %v3059_v6  ;;  %v3063_v29 = vsel %vm2779_vm0, %v2699_v11, -inf  ;;  %v2638_v4 = vld [vmem:[%s4116_s23 + $0x498] sm:$0xff]  ;;  %v2543_v10 = vld [vmem:[%s4116_s23 + $0x1a0] sm:$0xff] }
 0x182   : > { %v3073_v31 = vmax.f32 %v3071_v17, %v3072_v18  ;;  %3338 = vst.msk [vmem:[%s4201_s28 + $0x70] sm:$0xff] %vm2779_vm0, %v3034_v21  ;;  %v3076_v36 = vsel %vm2779_vm0, %v2636_v16, -inf  ;;  %v3086_v37 = vsel %vm2779_vm0, %v2509_v19, -inf  ;;  %v3087_v38 = vsel %vm2779_vm0, %v2541_v20, -inf  ;;  %v2670_v15 = vld [vmem:[%s4116_s23 + $0x598] sm:$0xff]  ;;  %v2575_v17 = vld [vmem:[%s4116_s23 + $0x2a0] sm:$0xff] }
 0x183   : > { %v3049_v33 = vmax.f32 %v3047_v22, %v3048_v14  ;;  %v3062_v39 = vmax.f32 %v3060_v28, %v3061_v23  ;;  %v3088_v42 = vmax.f32 %v3086_v37, %v3087_v38  ;;  %v3089_v43 = vsel %vm2779_vm0, %v2573_v25, -inf  ;;  %v2607_v21 = vld [vmem:[%s4116_s23 + $0x3a0] sm:$0xff]  ;;  %v2734_v38 = vld [vmem:[%s4116_s23 + $0x798] sm:$0xff] }
 0x184   : > { %v3075_v40 = vmax.f32 %v3073_v31, %v3074_v24  ;;  %v3065_v47 = vsel %vm2779_vm0, %v2731_v27, -inf  ;;  %v3078_v49 = vsel %vm2779_vm0, %v2668_v30, -inf  ;;  %v3091_v50 = vsel %vm2779_vm0, %v2605_v32, -inf  ;;  %v2765_v24 = vld [vmem:[%s4116_s23 + $0x890] sm:$0xff]  ;;  %v2639_v28 = vld [vmem:[%s4116_s23 + $0x4a0] sm:$0xff] }
 0x185   : > { %v3051_v46 = vmax.f32 %v3049_v33, %v3050_v26  ;;  %v3064_v51 = vmax.f32 %v3062_v39, %v3063_v29  ;;  %v3067_v52 = vsel %vm2779_vm0, %v2763_v34, -inf  ;;  %v3090_v55 = vmax.f32 %v3088_v42, %v3089_v43  ;;  %v2702_v26 = vld [vmem:[%s4116_s23 + $0x698] sm:$0xff]  ;;  %v2512_v34 = vld [vmem:[%s4116_s23 + $0xa8] sm:$0xff] }
 0x186   : > { %v3077_v53 = vmax.f32 %v3075_v40, %v3076_v36  ;;  %v3080_v59 = vsel %vm2779_vm0, %v2700_v35, -inf  ;;  %v3093_v60 = vsel %vm2779_vm0, %v2637_v41, -inf  ;;  %v3103_v61 = vsel %vm2779_vm0, %v2510_v44, -inf  ;;  %v2544_v35 = vld [vmem:[%s4116_s23 + $0x1a8] sm:$0xff]  ;;  %v2671_v44 = vld [vmem:[%s4116_s23 + $0x5a0] sm:$0xff] }
 0x187   : > { %3339 = vst.msk [vmem:[%s4201_s28 + $0x78] sm:$0xff] %vm2779_vm0, %v3051_v46  ;;  %v3104_v62 = vsel %vm2779_vm0, %v2542_v45, -inf  ;;  %v3066_v63 = vmax.f32 %v3064_v51, %v3065_v47  ;;  %v3092_v2 = vmax.f32 %v3090_v55, %v3091_v50  ;;  %v3082_v6 = vsel %vm2779_vm0, %v2732_v48, -inf  ;;  %v2576_v41 = vld [vmem:[%s4116_s23 + $0x2a8] sm:$0xff]  ;;  %v2703_v51 = vld [vmem:[%s4116_s23 + $0x6a0] sm:$0xff] }
 0x188   : > { %v3079_v0 = vmax.f32 %v3077_v53, %v3078_v49  ;;  %v3105_v5 = vmax.f32 %v3103_v61, %v3104_v62  ;;  %v3095_v7 = vsel %vm2779_vm0, %v2669_v54, -inf  ;;  %v3106_v8 = vsel %vm2779_vm0, %v2574_v56, -inf  ;;  %v2608_v47 = vld [vmem:[%s4116_s23 + $0x3a8] sm:$0xff]  ;;  %v2766_v49 = vld [vmem:[%s4116_s23 + $0x898] sm:$0xff] }
 0x189   : > { %v3108_v9 = vsel %vm2779_vm0, %v2606_v57, -inf  ;;  %v3068_v11 = vmax.f32 %v3066_v63, %v3067_v52  ;;  %v3094_v14 = vmax.f32 %v3092_v2, %v3093_v60  ;;  %v3084_v18 = vsel %vm2779_vm0, %v2764_v58, -inf  ;;  %v2640_v56 = vld [vmem:[%s4116_s23 + $0x4a8] sm:$0xff]  ;;  %v2545_v60 = vld [vmem:[%s4116_s23 + $0x1b0] sm:$0xff] }
 0x18a   : > { %v3081_v12 = vmax.f32 %v3079_v0, %v3080_v59  ;;  %v3107_v16 = vmax.f32 %v3105_v5, %v3106_v8  ;;  %v3097_v19 = vsel %vm2779_vm0, %v2701_v1, -inf  ;;  %v3110_v20 = vsel %vm2779_vm0, %v2638_v4, -inf  ;;  %v2513_v59 = vld [vmem:[%s4116_s23 + $0xb0] sm:$0xff]  ;;  %v2735_v4 = vld [vmem:[%s4116_s23 + $0x7a0] sm:$0xff] }
 0x18b   : > { %v3120_v22 = vsel %vm2779_vm0, %v2511_v3, -inf  ;;  %3340 = vst.msk [vmem:[%s4201_s28 + $0x80] sm:$0xff] %vm2779_vm0, %v3068_v11  ;;  %v3096_v25 = vmax.f32 %v3094_v14, %v3095_v7  ;;  %v3121_v29 = vsel %vm2779_vm0, %v2543_v10, -inf  ;;  %v3099_v30 = vsel %vm2779_vm0, %v2733_v13, -inf  ;;  %v2577_v1 = vld [vmem:[%s4116_s23 + $0x2b0] sm:$0xff]  ;;  %v2767_v10 = vld [vmem:[%s4116_s23 + $0x8a0] sm:$0xff] }
 0x18c   : > { %v3083_v23 = vmax.f32 %v3081_v12, %v3082_v6  ;;  %v3109_v27 = vmax.f32 %v3107_v16, %v3108_v9  ;;  %v3112_v31 = vsel %vm2779_vm0, %v2670_v15, -inf  ;;  %v3122_v32 = vmax.f32 %v3120_v22, %v3121_v29  ;;  %v2672_v6 = vld [vmem:[%s4116_s23 + $0x5a8] sm:$0xff]  ;;  %v2609_v8 = vld [vmem:[%s4116_s23 + $0x3b0] sm:$0xff] }
 0x18d   : > { %v3123_v33 = vsel %vm2779_vm0, %v2575_v17, -inf  ;;  %v3098_v37 = vmax.f32 %v3096_v25, %v3097_v19  ;;  %v3125_v40 = vsel %vm2779_vm0, %v2607_v21, -inf  ;;  %v3101_v42 = vsel %vm2779_vm0, %v2765_v24, -inf  ;;  %v2704_v11 = vld [vmem:[%s4116_s23 + $0x6a8] sm:$0xff]  ;;  %v2641_v17 = vld [vmem:[%s4116_s23 + $0x4b0] sm:$0xff]  ;;  %v2546_v21 = vld [vmem:[%s4116_s23 + $0x1b8] sm:$0xff] }
 0x18e   : > { %v3085_v36 = vmax.f32 %v3083_v23, %v3084_v18  ;;  %v3111_v39 = vmax.f32 %v3109_v27, %v3110_v20  ;;  %v3114_v43 = vsel %vm2779_vm0, %v2702_v26, -inf  ;;  %v3124_v45 = vmax.f32 %v3122_v32, %v3123_v33  ;;  %v2514_v20 = vld [vmem:[%s4116_s23 + $0xb8] sm:$0xff]  ;;  %v2736_v24 = vld [vmem:[%s4116_s23 + $0x7a8] sm:$0xff] }
 0x18f   : > { %v3127_v46 = vsel %vm2779_vm0, %v2639_v28, -inf  ;;  %v3100_v48 = vmax.f32 %v3098_v37, %v3099_v30  ;;  %v3137_v52 = vsel %vm2779_vm0, %v2512_v34, -inf  ;;  %v3138_v53 = vsel %vm2779_vm0, %v2544_v35, -inf  ;;  %v2673_v30 = vld [vmem:[%s4116_s23 + $0x5b0] sm:$0xff]  ;;  %v2578_v32 = vld [vmem:[%s4116_s23 + $0x2b8] sm:$0xff]  ;;  %v2768_v34 = vld [vmem:[%s4116_s23 + $0x8a8] sm:$0xff] }
 0x190   : > { %3341 = vst.msk [vmem:[%s4201_s28 + $0x88] sm:$0xff] %vm2779_vm0, %v3085_v36  ;;  %v3113_v50 = vmax.f32 %v3111_v39, %v3112_v31  ;;  %v3116_v54 = vsel %vm2779_vm0, %v2734_v38, -inf  ;;  %v3126_v55 = vmax.f32 %v3124_v45, %v3125_v40  ;;  %v3139_v57 = vmax.f32 %v3137_v52, %v3138_v53  ;;  %v2610_v33 = vld [vmem:[%s4116_s23 + $0x3b8] sm:$0xff]  ;;  %v2515_v45 = vld [vmem:[%s4116_s23 + $0xc0] sm:$0xff]  ;;  %v2737_v53 = vld [vmem:[%s4116_s23 + $0x7b0] sm:$0xff] }
 0x191   : > { %v3140_v58 = vsel %vm2779_vm0, %v2576_v41, -inf  ;;  %v3102_v61 = vmax.f32 %v3100_v48, %v3101_v42  ;;  %v3129_v63 = vsel %vm2779_vm0, %v2671_v44, -inf  ;;  %v3142_v0 = vsel %vm2779_vm0, %v2608_v47, -inf  ;;  %v2705_v41 = vld [vmem:[%s4116_s23 + $0x6b0] sm:$0xff] }
 0x192   : > { %v3115_v62 = vmax.f32 %v3113_v50, %v3114_v43  ;;  %v3118_v2 = vsel %vm2779_vm0, %v2766_v49, -inf  ;;  %v3128_v5 = vmax.f32 %v3126_v55, %v3127_v46  ;;  %v3131_v3 = vsel %vm2779_vm0, %v2703_v51, -inf  ;;  %v2642_v43 = vld [vmem:[%s4116_s23 + $0x4b8] sm:$0xff]  ;;  %v2547_v50 = vld [vmem:[%s4116_s23 + $0x1c0] sm:$0xff] }
 0x193   : > { %v3141_v7 = vmax.f32 %v3139_v57, %v3140_v58  ;;  %3342 = vst.msk [vmem:[%s4201_s28 + $0x90] sm:$0xff] %vm2779_vm0, %v3102_v61  ;;  %v3144_v12 = vsel %vm2779_vm0, %v2640_v56, -inf  ;;  %v3154_v13 = vsel %vm2779_vm0, %v2513_v59, -inf  ;;  %v3155_v14 = vsel %vm2779_vm0, %v2545_v60, -inf  ;;  %v2674_v55 = vld [vmem:[%s4116_s23 + $0x5b8] sm:$0xff]  ;;  %v2579_v57 = vld [vmem:[%s4116_s23 + $0x2c0] sm:$0xff] }
 0x194   : > { %v3117_v9 = vmax.f32 %v3115_v62, %v3116_v54  ;;  %v3130_v15 = vmax.f32 %v3128_v5, %v3129_v63  ;;  %v3156_v18 = vmax.f32 %v3154_v13, %v3155_v14  ;;  %v3157_v19 = vsel %vm2779_vm0, %v2577_v1, -inf  ;;  %v2611_v61 = vld [vmem:[%s4116_s23 + $0x3c0] sm:$0xff]  ;;  %v2738_v14 = vld [vmem:[%s4116_s23 + $0x7b8] sm:$0xff] }
 0x195   : > { %v3143_v16 = vmax.f32 %v3141_v7, %v3142_v0  ;;  %v3133_v23 = vsel %vm2779_vm0, %v2735_v4, -inf  ;;  %v3146_v25 = vsel %vm2779_vm0, %v2672_v6, -inf  ;;  %v3159_v26 = vsel %vm2779_vm0, %v2609_v8, -inf  ;;  %v2769_v0 = vld [vmem:[%s4116_s23 + $0x8b0] sm:$0xff]  ;;  %v2643_v5 = vld [vmem:[%s4116_s23 + $0x4c0] sm:$0xff] }
 0x196   : > { %v3119_v22 = vmax.f32 %v3117_v9, %v3118_v2  ;;  %v3132_v27 = vmax.f32 %v3130_v15, %v3131_v3  ;;  %v3135_v28 = vsel %vm2779_vm0, %v2767_v10, -inf  ;;  %v3158_v31 = vmax.f32 %v3156_v18, %v3157_v19  ;;  %v2706_v2 = vld [vmem:[%s4116_s23 + $0x6b8] sm:$0xff]  ;;  %v2516_v10 = vld [vmem:[%s4116_s23 + $0xc8] sm:$0xff] }
 0x197   : > { %v3145_v29 = vmax.f32 %v3143_v16, %v3144_v12  ;;  %v3148_v35 = vsel %vm2779_vm0, %v2704_v11, -inf  ;;  %v3161_v36 = vsel %vm2779_vm0, %v2641_v17, -inf  ;;  %v3171_v37 = vsel %vm2779_vm0, %v2514_v20, -inf  ;;  %v2548_v11 = vld [vmem:[%s4116_s23 + $0x1c8] sm:$0xff]  ;;  %v2675_v20 = vld [vmem:[%s4116_s23 + $0x5c0] sm:$0xff] }
 0x198   : > { %3343 = vst.msk [vmem:[%s4201_s28 + $0x98] sm:$0xff] %vm2779_vm0, %v3119_v22  ;;  %v3172_v38 = vsel %vm2779_vm0, %v2546_v21, -inf  ;;  %v3134_v39 = vmax.f32 %v3132_v27, %v3133_v23  ;;  %v3160_v42 = vmax.f32 %v3158_v31, %v3159_v26  ;;  %v3150_v46 = vsel %vm2779_vm0, %v2736_v24, -inf  ;;  %v2580_v17 = vld [vmem:[%s4116_s23 + $0x2c8] sm:$0xff]  ;;  %v2707_v27 = vld [vmem:[%s4116_s23 + $0x6c0] sm:$0xff] }
 0x199   : > { %v3147_v40 = vmax.f32 %v3145_v29, %v3146_v25  ;;  %v3173_v44 = vmax.f32 %v3171_v37, %v3172_v38  ;;  %v3163_v47 = vsel %vm2779_vm0, %v2673_v30, -inf  ;;  %v3174_v48 = vsel %vm2779_vm0, %v2578_v32, -inf  ;;  %v2612_v23 = vld [vmem:[%s4116_s23 + $0x3c8] sm:$0xff]  ;;  %v2770_v25 = vld [vmem:[%s4116_s23 + $0x8b8] sm:$0xff] }
 0x19a   : > { %v3176_v49 = vsel %vm2779_vm0, %v2610_v33, -inf  ;;  %v3136_v51 = vmax.f32 %v3134_v39, %v3135_v28  ;;  %v3162_v54 = vmax.f32 %v3160_v42, %v3161_v36  ;;  %v3152_v58 = vsel %vm2779_vm0, %v2768_v34, -inf  ;;  %v2644_v32 = vld [vmem:[%s4116_s23 + $0x4c8] sm:$0xff]  ;;  %v2549_v36 = vld [vmem:[%s4116_s23 + $0x1d0] sm:$0xff] }
 0x19b   : > { %v3149_v52 = vmax.f32 %v3147_v40, %v3148_v35  ;;  %v3175_v56 = vmax.f32 %v3173_v44, %v3174_v48  ;;  %v3165_v59 = vsel %vm2779_vm0, %v2705_v41, -inf  ;;  %v3178_v60 = vsel %vm2779_vm0, %v2642_v43, -inf  ;;  %v2517_v35 = vld [vmem:[%s4116_s23 + $0xd0] sm:$0xff]  ;;  %v2739_v43 = vld [vmem:[%s4116_s23 + $0x7c0] sm:$0xff] }
 0x19c   : > { %v3188_v62 = vsel %vm2779_vm0, %v2515_v45, -inf  ;;  %3344 = vst.msk [vmem:[%s4201_s28 + $0xa0] sm:$0xff] %vm2779_vm0, %v3136_v51  ;;  %v3164_v1 = vmax.f32 %v3162_v54, %v3163_v47  ;;  %v3189_v3 = vsel %vm2779_vm0, %v2547_v50, -inf  ;;  %v3167_v6 = vsel %vm2779_vm0, %v2737_v53, -inf  ;;  %v2581_v41 = vld [vmem:[%s4116_s23 + $0x2d0] sm:$0xff]  ;;  %v2771_v50 = vld [vmem:[%s4116_s23 + $0x8c0] sm:$0xff] }
 0x19d   : > { %v3151_v63 = vmax.f32 %v3149_v52, %v3150_v46  ;;  %v3177_v4 = vmax.f32 %v3175_v56, %v3176_v49  ;;  %v3180_v7 = vsel %vm2779_vm0, %v2674_v55, -inf  ;;  %v3190_v8 = vmax.f32 %v3188_v62, %v3189_v3  ;;  %v2676_v46 = vld [vmem:[%s4116_s23 + $0x5c8] sm:$0xff]  ;;  %v2613_v48 = vld [vmem:[%s4116_s23 + $0x3d0] sm:$0xff] }
 0x19e   : > { %v3191_v9 = vsel %vm2779_vm0, %v2579_v57, -inf  ;;  %v3166_v13 = vmax.f32 %v3164_v1, %v3165_v59  ;;  %v3193_v16 = vsel %vm2779_vm0, %v2611_v61, -inf  ;;  %v3169_v18 = vsel %vm2779_vm0, %v2769_v0, -inf  ;;  %v2708_v51 = vld [vmem:[%s4116_s23 + $0x6c8] sm:$0xff]  ;;  %v2645_v57 = vld [vmem:[%s4116_s23 + $0x4d0] sm:$0xff]  ;;  %v2550_v61 = vld [vmem:[%s4116_s23 + $0x1d8] sm:$0xff] }
 0x19f   : > { %v3153_v12 = vmax.f32 %v3151_v63, %v3152_v58  ;;  %v3179_v15 = vmax.f32 %v3177_v4, %v3178_v60  ;;  %v3182_v19 = vsel %vm2779_vm0, %v2706_v2, -inf  ;;  %v3192_v21 = vmax.f32 %v3190_v8, %v3191_v9  ;;  %v2518_v60 = vld [vmem:[%s4116_s23 + $0xd8] sm:$0xff]  ;;  %v2740_v0 = vld [vmem:[%s4116_s23 + $0x7c8] sm:$0xff] }
 0x1a0   : > { %v3195_v22 = vsel %vm2779_vm0, %v2643_v5, -inf  ;;  %v3168_v24 = vmax.f32 %v3166_v13, %v3167_v6  ;;  %v3205_v28 = vsel %vm2779_vm0, %v2516_v10, -inf  ;;  %v3206_v29 = vsel %vm2779_vm0, %v2548_v11, -inf  ;;  %v2677_v6 = vld [vmem:[%s4116_s23 + $0x5d0] sm:$0xff]  ;;  %v2582_v8 = vld [vmem:[%s4116_s23 + $0x2d8] sm:$0xff]  ;;  %v2772_v10 = vld [vmem:[%s4116_s23 + $0x8c8] sm:$0xff] }
 0x1a1   : > { %3345 = vst.msk [vmem:[%s4201_s28 + $0xa8] sm:$0xff] %vm2779_vm0, %v3153_v12  ;;  %v3181_v26 = vmax.f32 %v3179_v15, %v3180_v7  ;;  %v3184_v30 = vsel %vm2779_vm0, %v2738_v14, -inf  ;;  %v3194_v31 = vmax.f32 %v3192_v21, %v3193_v16  ;;  %v3207_v33 = vmax.f32 %v3205_v28, %v3206_v29  ;;  %v2614_v9 = vld [vmem:[%s4116_s23 + $0x3d8] sm:$0xff]  ;;  %v2519_v21 = vld [vmem:[%s4116_s23 + $0xe0] sm:$0xff]  ;;  %v2741_v29 = vld [vmem:[%s4116_s23 + $0x7d0] sm:$0xff] }
 0x1a2   : > { %v3208_v34 = vsel %vm2779_vm0, %v2580_v17, -inf  ;;  %v3170_v37 = vmax.f32 %v3168_v24, %v3169_v18  ;;  %v3197_v39 = vsel %vm2779_vm0, %v2675_v20, -inf  ;;  %v3210_v40 = vsel %vm2779_vm0, %v2612_v23, -inf  ;;  %v2709_v17 = vld [vmem:[%s4116_s23 + $0x6d0] sm:$0xff] }
 0x1a3   : > { %v3183_v38 = vmax.f32 %v3181_v26, %v3182_v19  ;;  %v3186_v42 = vsel %vm2779_vm0, %v2770_v25, -inf  ;;  %v3196_v44 = vmax.f32 %v3194_v31, %v3195_v22  ;;  %v3199_v45 = vsel %vm2779_vm0, %v2707_v27, -inf  ;;  %v2646_v19 = vld [vmem:[%s4116_s23 + $0x4d8] sm:$0xff]  ;;  %v2551_v26 = vld [vmem:[%s4116_s23 + $0x1e0] sm:$0xff] }
 0x1a4   : > { %v3209_v47 = vmax.f32 %v3207_v33, %v3208_v34  ;;  %3346 = vst.msk [vmem:[%s4201_s28 + $0xb0] sm:$0xff] %vm2779_vm0, %v3170_v37  ;;  %v3212_v52 = vsel %vm2779_vm0, %v2644_v32, -inf  ;;  %v3222_v53 = vsel %vm2779_vm0, %v2517_v35, -inf  ;;  %v3223_v54 = vsel %vm2779_vm0, %v2549_v36, -inf  ;;  %v2678_v31 = vld [vmem:[%s4116_s23 + $0x5d8] sm:$0xff]  ;;  %v2583_v33 = vld [vmem:[%s4116_s23 + $0x2e0] sm:$0xff] }
 0x1a5   : > { %v3185_v49 = vmax.f32 %v3183_v38, %v3184_v30  ;;  %v3198_v55 = vmax.f32 %v3196_v44, %v3197_v39  ;;  %v3224_v58 = vmax.f32 %v3222_v53, %v3223_v54  ;;  %v3225_v59 = vsel %vm2779_vm0, %v2581_v41, -inf  ;;  %v2615_v37 = vld [vmem:[%s4116_s23 + $0x3e0] sm:$0xff]  ;;  %v2742_v54 = vld [vmem:[%s4116_s23 + $0x7d8] sm:$0xff] }
 0x1a6   : > { %v3211_v56 = vmax.f32 %v3209_v47, %v3210_v40  ;;  %v3201_v63 = vsel %vm2779_vm0, %v2739_v43, -inf  ;;  %v3214_v1 = vsel %vm2779_vm0, %v2676_v46, -inf  ;;  %v3227_v2 = vsel %vm2779_vm0, %v2613_v48, -inf  ;;  %v2773_v40 = vld [vmem:[%s4116_s23 + $0x8d0] sm:$0xff]  ;;  %v2647_v44 = vld [vmem:[%s4116_s23 + $0x4e0] sm:$0xff] }
 0x1a7   : > { %v3187_v62 = vmax.f32 %v3185_v49, %v3186_v42  ;;  %v3200_v4 = vmax.f32 %v3198_v55, %v3199_v45  ;;  %v3203_v5 = vsel %vm2779_vm0, %v2771_v50, -inf  ;;  %v3226_v7 = vmax.f32 %v3224_v58, %v3225_v59  ;;  %v2710_v42 = vld [vmem:[%s4116_s23 + $0x6d8] sm:$0xff]  ;;  %v2520_v50 = vld [vmem:[%s4116_s23 + $0xe8] sm:$0xff] }
 0x1a8   : > { %v3213_v3 = vmax.f32 %v3211_v56, %v3212_v52  ;;  %v3216_v11 = vsel %vm2779_vm0, %v2708_v51, -inf  ;;  %v3229_v12 = vsel %vm2779_vm0, %v2645_v57, -inf  ;;  %v3239_v13 = vsel %vm2779_vm0, %v2518_v60, -inf  ;;  %v2552_v51 = vld [vmem:[%s4116_s23 + $0x1e8] sm:$0xff]  ;;  %v2679_v60 = vld [vmem:[%s4116_s23 + $0x5e0] sm:$0xff] }
 0x1a9   : > { %3347 = vst.msk [vmem:[%s4201_s28 + $0xb8] sm:$0xff] %vm2779_vm0, %v3187_v62  ;;  %v3240_v14 = vsel %vm2779_vm0, %v2550_v61, -inf  ;;  %v3202_v15 = vmax.f32 %v3200_v4, %v3201_v63  ;;  %v3228_v18 = vmax.f32 %v3226_v7, %v3227_v2  ;;  %v3218_v22 = vsel %vm2779_vm0, %v2740_v0, -inf  ;;  %v2584_v57 = vld [vmem:[%s4116_s23 + $0x2e8] sm:$0xff]  ;;  %v2711_v4 = vld [vmem:[%s4116_s23 + $0x6e0] sm:$0xff] }
 0x1aa   : > { %v3215_v16 = vmax.f32 %v3213_v3, %v3214_v1  ;;  %v3241_v20 = vmax.f32 %v3239_v13, %v3240_v14  ;;  %v3231_v23 = vsel %vm2779_vm0, %v2677_v6, -inf  ;;  %v3242_v24 = vsel %vm2779_vm0, %v2582_v8, -inf  ;;  %v2616_v63 = vld [vmem:[%s4116_s23 + $0x3e8] sm:$0xff]  ;;  %v2774_v1 = vld [vmem:[%s4116_s23 + $0x8d8] sm:$0xff] }
 0x1ab   : > { %v3244_v25 = vsel %vm2779_vm0, %v2614_v9, -inf  ;;  %v3204_v27 = vmax.f32 %v3202_v15, %v3203_v5  ;;  %v3230_v30 = vmax.f32 %v3228_v18, %v3229_v12  ;;  %v3220_v34 = vsel %vm2779_vm0, %v2772_v10, -inf  ;;  %v2648_v8 = vld [vmem:[%s4116_s23 + $0x4e8] sm:$0xff]  ;;  %v2553_v12 = vld [vmem:[%s4116_s23 + $0x1f0] sm:$0xff] }
 0x1ac   : > { %v3217_v28 = vmax.f32 %v3215_v16, %v3216_v11  ;;  %v3243_v32 = vmax.f32 %v3241_v20, %v3242_v24  ;;  %v3233_v35 = vsel %vm2779_vm0, %v2709_v17, -inf  ;;  %v3246_v36 = vsel %vm2779_vm0, %v2646_v19, -inf  ;;  %v2521_v11 = vld [vmem:[%s4116_s23 + $0xf0] sm:$0xff]  ;;  %v2743_v19 = vld [vmem:[%s4116_s23 + $0x7e0] sm:$0xff] }
 0x1ad   : > { %v3256_v38 = vsel %vm2779_vm0, %v2519_v21, -inf  ;;  %3348 = vst.msk [vmem:[%s4201_s28 + $0xc0] sm:$0xff] %vm2779_vm0, %v3204_v27  ;;  %v3232_v41 = vmax.f32 %v3230_v30, %v3231_v23  ;;  %v3257_v45 = vsel %vm2779_vm0, %v2551_v26, -inf  ;;  %v3235_v46 = vsel %vm2779_vm0, %v2741_v29, -inf  ;;  %v2585_v17 = vld [vmem:[%s4116_s23 + $0x2f0] sm:$0xff]  ;;  %v2775_v26 = vld [vmem:[%s4116_s23 + $0x8e0] sm:$0xff] }
 0x1ae   : > { %v3219_v39 = vmax.f32 %v3217_v28, %v3218_v22  ;;  %v3245_v43 = vmax.f32 %v3243_v32, %v3244_v25  ;;  %v3248_v47 = vsel %vm2779_vm0, %v2678_v31, -inf  ;;  %v3258_v48 = vmax.f32 %v3256_v38, %v3257_v45  ;;  %v2680_v22 = vld [vmem:[%s4116_s23 + $0x5e8] sm:$0xff]  ;;  %v2617_v24 = vld [vmem:[%s4116_s23 + $0x3f0] sm:$0xff] }
 0x1af   : > { %v3259_v49 = vsel %vm2779_vm0, %v2583_v33, -inf  ;;  %v3234_v53 = vmax.f32 %v3232_v41, %v3233_v35  ;;  %v3261_v56 = vsel %vm2779_vm0, %v2615_v37, -inf  ;;  %v3237_v58 = vsel %vm2779_vm0, %v2773_v40, -inf  ;;  %v2712_v27 = vld [vmem:[%s4116_s23 + $0x6e8] sm:$0xff]  ;;  %v2649_v33 = vld [vmem:[%s4116_s23 + $0x4f0] sm:$0xff]  ;;  %v2554_v37 = vld [vmem:[%s4116_s23 + $0x1f8] sm:$0xff] }
 0x1b0   : > { %v3221_v52 = vmax.f32 %v3219_v39, %v3220_v34  ;;  %v3247_v55 = vmax.f32 %v3245_v43, %v3246_v36  ;;  %v3250_v59 = vsel %vm2779_vm0, %v2710_v42, -inf  ;;  %v3260_v61 = vmax.f32 %v3258_v48, %v3259_v49  ;;  %v2522_v36 = vld [vmem:[%s4116_s23 + $0xf8] sm:$0xff]  ;;  %v2744_v40 = vld [vmem:[%s4116_s23 + $0x7e8] sm:$0xff] }
 0x1b1   : > { %v3263_v62 = vsel %vm2779_vm0, %v2647_v44, -inf  ;;  %v3236_v0 = vmax.f32 %v3234_v53, %v3235_v46  ;;  %v3273_v5 = vsel %vm2779_vm0, %v2520_v50, -inf  ;;  %v3274_v3 = vsel %vm2779_vm0, %v2552_v51, -inf  ;;  %v2681_v46 = vld [vmem:[%s4116_s23 + $0x5f0] sm:$0xff]  ;;  %v2586_v48 = vld [vmem:[%s4116_s23 + $0x2f8] sm:$0xff] }
 0x1b2   : > { %3349 = vst.msk [vmem:[%s4201_s28 + $0xc8] sm:$0xff] %vm2779_vm0, %v3221_v52  ;;  %v3249_v2 = vmax.f32 %v3247_v55, %v3248_v47  ;;  %v3252_v6 = vsel %vm2779_vm0, %v2742_v54, -inf  ;;  %v3262_v7 = vmax.f32 %v3260_v61, %v3261_v56  ;;  %v3275_v9 = vmax.f32 %v3273_v5, %v3274_v3  ;;  %v2618_v49 = vld [vmem:[%s4116_s23 + $0x3f8] sm:$0xff]  ;;  %v2776_v55 = vld [vmem:[%s4116_s23 + $0x8e8] sm:$0xff] }
 0x1b3   : > { %v3276_v10 = vsel %vm2779_vm0, %v2584_v57, -inf  ;;  %v3238_v13 = vmax.f32 %v3236_v0, %v3237_v58  ;;  %v3265_v15 = vsel %vm2779_vm0, %v2679_v60, -inf  ;;  %v3278_v16 = vsel %vm2779_vm0, %v2616_v63, -inf  ;;  %v2713_v57 = vld [vmem:[%s4116_s23 + $0x6f0] sm:$0xff]  ;;  %v2682_v3 = vld [vmem:[%s4116_s23 + $0x5f8] sm:$0xff] }
 0x1b4   : > { %v3251_v14 = vmax.f32 %v3249_v2, %v3250_v59  ;;  %v3254_v18 = vsel %vm2779_vm0, %v2774_v1, -inf  ;;  %v3264_v20 = vmax.f32 %v3262_v7, %v3263_v62  ;;  %v3267_v21 = vsel %vm2779_vm0, %v2711_v4, -inf  ;;  %v2650_v59 = vld [vmem:[%s4116_s23 + $0x4f8] sm:$0xff]  ;;  %v2745_v4 = vld [vmem:[%s4116_s23 + $0x7f0] sm:$0xff] }
 0x1b5   : > { %v3277_v23 = vmax.f32 %v3275_v9, %v3276_v10  ;;  %3350 = vst.msk [vmem:[%s4201_s28 + $0xd0] sm:$0xff] %vm2779_vm0, %v3238_v13  ;;  %v3280_v28 = vsel %vm2779_vm0, %v2648_v8, -inf  ;;  %v3290_v29 = vsel %vm2779_vm0, %v2521_v11, -inf  ;;  %v3291_v30 = vsel %vm2779_vm0, %v2553_v12, -inf  ;;  %v2777_v11 = vld [vmem:[%s4116_s23 + $0x8f0] sm:$0xff]  ;;  %v2714_v13 = vld [vmem:[%s4116_s23 + $0x6f8] sm:$0xff] }
 0x1b6   : > { %v3253_v25 = vmax.f32 %v3251_v14, %v3252_v6  ;;  %v3266_v31 = vmax.f32 %v3264_v20, %v3265_v15  ;;  %v3292_v34 = vmax.f32 %v3290_v29, %v3291_v30  ;;  %v3293_v35 = vsel %vm2779_vm0, %v2585_v17, -inf }
 0x1b7   : > { %v3279_v32 = vmax.f32 %v3277_v23, %v3278_v16  ;;  %v3269_v39 = vsel %vm2779_vm0, %v2743_v19, -inf  ;;  %v3282_v41 = vsel %vm2779_vm0, %v2680_v22, -inf  ;;  %v3295_v42 = vsel %vm2779_vm0, %v2617_v24, -inf  ;;  %v2746_v19 = vld [vmem:[%s4116_s23 + $0x7f8] sm:$0xff] }
 0x1b8   : > { %v3255_v38 = vmax.f32 %v3253_v25, %v3254_v18  ;;  %v3268_v43 = vmax.f32 %v3266_v31, %v3267_v21  ;;  %v3271_v44 = vsel %vm2779_vm0, %v2775_v26, -inf  ;;  %v3294_v47 = vmax.f32 %v3292_v34, %v3293_v35  ;;  %v2778_v24 = vld [vmem:[%s4116_s23 + $0x8f8] sm:$0xff] }
 0x1b9   : > { %v3281_v45 = vmax.f32 %v3279_v32, %v3280_v28  ;;  %v3284_v50 = vsel %vm2779_vm0, %v2712_v27, -inf  ;;  %v3297_v51 = vsel %vm2779_vm0, %v2649_v33, -inf  ;;  %v3307_v52 = vsel %vm2779_vm0, %v2522_v36, -inf }
 0x1ba   : > { %3351 = vst.msk [vmem:[%s4201_s28 + $0xd8] sm:$0xff] %vm2779_vm0, %v3255_v38  ;;  %v3308_v53 = vsel %vm2779_vm0, %v2554_v37, -inf  ;;  %v3270_v54 = vmax.f32 %v3268_v43, %v3269_v39  ;;  %v3296_v58 = vmax.f32 %v3294_v47, %v3295_v42  ;;  %v3286_v61 = vsel %vm2779_vm0, %v2744_v40, -inf }
 0x1bb   : > { %v3283_v56 = vmax.f32 %v3281_v45, %v3282_v41  ;;  %v3309_v60 = vmax.f32 %v3307_v52, %v3308_v53  ;;  %v3299_v62 = vsel %vm2779_vm0, %v2681_v46, -inf  ;;  %v3310_v63 = vsel %vm2779_vm0, %v2586_v48, -inf }
 0x1bc   : > { %v3312_v0 = vsel %vm2779_vm0, %v2618_v49, -inf  ;;  %v3272_v1 = vmax.f32 %v3270_v54, %v3271_v44  ;;  %v3298_v5 = vmax.f32 %v3296_v58, %v3297_v51  ;;  %v3288_v7 = vsel %vm2779_vm0, %v2776_v55, -inf }
 0x1bd   : > { %v3285_v2 = vmax.f32 %v3283_v56, %v3284_v50  ;;  %v3311_v6 = vmax.f32 %v3309_v60, %v3310_v63  ;;  %v3301_v8 = vsel %vm2779_vm0, %v2713_v57, -inf  ;;  %v3314_v9 = vsel %vm2779_vm0, %v2650_v59, -inf }
 0x1be   : > { %3352 = vst.msk [vmem:[%s4201_s28 + $0xe0] sm:$0xff] %vm2779_vm0, %v3272_v1  ;;  %v3300_v12 = vmax.f32 %v3298_v5, %v3299_v62  ;;  %v3303_v15 = vsel %vm2779_vm0, %v2745_v4, -inf  ;;  %v3316_v16 = vsel %vm2779_vm0, %v2682_v3, -inf  ;;  %v3305_v21 = vsel %vm2779_vm0, %v2777_v11, -inf }
 0x1bf   : > { %v3287_v10 = vmax.f32 %v3285_v2, %v3286_v61  ;;  %v3313_v14 = vmax.f32 %v3311_v6, %v3312_v0  ;;  %v3318_v22 = vsel %vm2779_vm0, %v2714_v13, -inf  ;;  %v3320_v26 = vsel %vm2779_vm0, %v2746_v19, -inf }
 0x1c0   : > { %v3302_v18 = vmax.f32 %v3300_v12, %v3301_v8  ;;  %v3322_v29 = vsel %vm2779_vm0, %v2778_v24, -inf }
 0x1c1   : > { %v3289_v17 = vmax.f32 %v3287_v10, %v3288_v7  ;;  %v3315_v20 = vmax.f32 %v3313_v14, %v3314_v9 }
 0x1c2   : > { %v3304_v23 = vmax.f32 %v3302_v18, %v3303_v15 }
 0x1c3   : > { %3353 = vst.msk [vmem:[%s4201_s28 + $0xe8] sm:$0xff] %vm2779_vm0, %v3289_v17  ;;  %v3317_v25 = vmax.f32 %v3315_v20, %v3316_v16 }
 0x1c4   : > { %v3306_v27 = vmax.f32 %v3304_v23, %v3305_v21 }
 0x1c5   : > { %v3319_v28 = vmax.f32 %v3317_v25, %v3318_v22 }
 0x1c6   : > { %3354 = vst.msk [vmem:[%s4201_s28 + $0xf0] sm:$0xff] %vm2779_vm0, %v3306_v27 }
 0x1c7   : > { %v3321_v30 = vmax.f32 %v3319_v28, %v3320_v26 }
 0x1c9   : > { %v3323_v31 = vmax.f32 %v3321_v30, %v3322_v29 }
 0x1cb   : > { %3355 = vst.msk [vmem:[%s4201_s28 + $0xf8] sm:$0xff] %vm2779_vm0, %v3323_v31 }
 0x1cc PF: > { %p8_p9 = scmp.ge.s32.totalorder %s3516_s10, 4   ;;  %s4789_s6 = smov %s3483_s7 }
 0x1cd   : > { %s4790_s7 = smov %s3525_s13  ;;  %s4791_s8 = smov %s3516_s10 }
 0x1ce   :  { %10 = sbr.rel (!%p8_p9) target bundleno = 2 (0x2), region = 117 }

// kernel: _lambda_.16
= control target key start
LH: loop header
LB: loop body
LE: loop exit
PB: predicated region body
PF: predicated region fallthrough
CT: control target
= control target key end

     0   :  { %s1191_s15 = smov 0   ;;  %s1467_s0 = inlined_call_operand.vmem [shape: bf16[512,144], index: 0, kind: input, shape index: {}]   ;;  %s1468_s1 = inlined_call_operand.vmem [shape: bf16[144,16], index: 1, kind: input, shape index: {}]   ;;  %s1469_s2 = inlined_call_operand.vmem [shape: f32[1,16], index: 2, kind: input, shape index: {}]   ;;  %s1470_s3 = inlined_call_operand.vmem [shape: f32[1,16], index: 3, kind: input, shape index: {}]   ;;  %s1471_s4 = inlined_call_operand.vmem [shape: bf16[512,16], index: 4, kind: output, shape index: {}]  }
   0x1 LB: > { %s905_s16 = sadd.s32 4294967295, %s1164_s15   ;;  %p909_p0 = scmp.ge.s32.totalorder %s1164_s15, 1  ;;  %s1164_s15 = sphi %s1191_s15, %s14_s15  }
   0x2   : > { %p164_p1 = scmp.lt.s32.totalorder %s1164_s15, 3 }
   0x4   : > { %p165_p2 = pnand %p909_p0, %p164_p1 }
   0x5   : > { %s910_s21 = sshll.u32 (!%p165_p2), %s905_s16, 5 }
   0x6   : > { %168 = sbr.rel (%p165_p2) target bundleno = 306 (0x132), region = 36  ;;  %p192_p3 = scmp.lt.s32.totalorder (!%p165_p2), %s910_s21, 63 }
   0xb   : > { %v1137_v0 = vld [vmem:[%s1468_s1 + $0x38] sm:$0xff]  ;;  %v1138_v1 = vld [vmem:[%s1468_s1 + $0x40] sm:$0xff]  ;;  %v1136_v2 = vld [vmem:[%s1468_s1 + $0x30] sm:$0xff]  ;;  %s1473_s21 = smov (!%p192_p3, %s910_s21), 63  ;;  %vm453_vm0 = vcmask 130048   ;;  %vm816_vm1 = vcmask 125952  }
   0xc   : > { %502 = vmatpush.bf16.msra.mxu0 %v1137_v0  ;;  %1139 = vmatpush.bf16.msra.mxu2 %v1137_v0  ;;  %s1097_s24 = sshll.u32 %s1473_s21, 3  ;;  %v1135_v3 = vld [vmem:[%s1468_s1 + $0x28] sm:$0xff]  ;;  %v1134_v7 = vld [vmem:[%s1468_s1 + $0x20] sm:$0xff]  ;;  %v1133_v11 = vld [vmem:[%s1468_s1 + $0x18] sm:$0xff]  ;;  %s914_s19 = sshll.u32 %s1473_s21, 2 }
   0xd   : > { %598 = vmatpush.bf16.msra.mxu1 %v1138_v1  ;;  %1147 = vmatpush.bf16.msra.mxu3 %v1138_v1  ;;  %s1214_s27 = scalar_lea.vmem %s1467_s0, %s1097_s24  ;;  %v1132_v12 = vld [vmem:[%s1468_s1 + $0x10] sm:$0xff]  ;;  %v1131_v16 = vld [vmem:[%s1468_s1 + $0x8] sm:$0xff]  ;;  %v1130_v20 = vld [vmem:[%s1468_s1] sm:$0xff]  ;;  %s1332_s23 = scalar_lea.vmem %s1471_s4, %s914_s19 }
   0xe   : > { %v1098_v4 = vld [vmem:[%s1214_s27 + $0x4] sm:$0xf]  ;;  %v919_v5 = vld [vmem:[%s1214_s27 + $0x8] sm:$0xf0]  ;;  %v1116_v8 = vld [vmem:[%s1214_s27 + $0x94] sm:$0xf] }
   0xf   : > { %v922_v6 = vor.u32 %v1098_v4, %v919_v5  ;;  %v991_v9 = vld [vmem:[%s1214_s27 + $0x98] sm:$0xf0]  ;;  %v1100_v13 = vld [vmem:[%s1214_s27 + $0x14] sm:$0xf]  ;;  %v1118_v17 = vld [vmem:[%s1214_s27 + $0xa4] sm:$0xf] }
  0x10   : > { %503 = vmatpush.bf16.msra.mxu0 %v1136_v2  ;;  %1140 = vmatpush.bf16.msra.mxu2 %v1136_v2  ;;  %v994_v10 = vor.u32 %v1116_v8, %v991_v9  ;;  %v927_v14 = vld [vmem:[%s1214_s27 + $0x18] sm:$0xf0]  ;;  %v999_v18 = vld [vmem:[%s1214_s27 + $0xa8] sm:$0xf0]  ;;  %v917_v21 = vld [vmem:[%s1214_s27] sm:$0xf] }
  0x11   : > { %1079 = vmatmul.msk.bf16.vlgmr.msra.gmra.mxu1 %vm453_vm0, %v922_v6  ;;  %v930_v15 = vor.u32 %v1100_v13, %v927_v14  ;;  %v1002_v19 = vor.u32 %v1118_v17, %v999_v18  ;;  %v1099_v22 = vld [vmem:[%s1214_s27 + $0x4] sm:$0xf0]  ;;  %v981_v23 = vld [vmem:[%s1214_s27 + $0x80] sm:$0xf]  ;;  %v1102_v27 = vld [vmem:[%s1214_s27 + $0x24] sm:$0xf] }
  0x12   : > { %1088 = vmatmul.msk.bf16.vlgmr.msra.gmra.mxu3 %vm453_vm0, %v994_v10  ;;  %v1115_v24 = vld [vmem:[%s1214_s27 + $0x84] sm:$0xf0]  ;;  %v918_v25 = vor.u32 %v1099_v22, %v917_v21  ;;  %v935_v28 = vld [vmem:[%s1214_s27 + $0x28] sm:$0xf0]  ;;  %v1120_v30 = vld [vmem:[%s1214_s27 + $0xb4] sm:$0xf] }
  0x13   : > { %v982_v26 = vor.u32 %v1115_v24, %v981_v23  ;;  %v938_v29 = vor.u32 %v1102_v27, %v935_v28  ;;  %v1007_v31 = vld [vmem:[%s1214_s27 + $0xb8] sm:$0xf0]  ;;  %v925_v33 = vld [vmem:[%s1214_s27 + $0x10] sm:$0xf]  ;;  %v1101_v34 = vld [vmem:[%s1214_s27 + $0x14] sm:$0xf0] }
  0x14   : > { %504 = vmatpush.bf16.msra.mxu0 %v1135_v3  ;;  %1141 = vmatpush.bf16.msra.mxu2 %v1135_v3  ;;  %v1010_v32 = vor.u32 %v1120_v30, %v1007_v31  ;;  %v989_v35 = vld [vmem:[%s1214_s27 + $0x90] sm:$0xf]  ;;  %v1117_v36 = vld [vmem:[%s1214_s27 + $0x94] sm:$0xf0]  ;;  %v926_v37 = vor.u32 %v1101_v34, %v925_v33  ;;  %v1104_v39 = vld [vmem:[%s1214_s27 + $0x34] sm:$0xf] }
  0x15   : > { %v990_v38 = vor.u32 %v1117_v36, %v989_v35  ;;  %v943_v40 = vld [vmem:[%s1214_s27 + $0x38] sm:$0xf0]  ;;  %v1122_v42 = vld [vmem:[%s1214_s27 + $0xc4] sm:$0xf]  ;;  %v1015_v43 = vld [vmem:[%s1214_s27 + $0xc8] sm:$0xf0] }
  0x16   : > { %v946_v41 = vor.u32 %v1104_v39, %v943_v40  ;;  %v1018_v44 = vor.u32 %v1122_v42, %v1015_v43  ;;  %v933_v45 = vld [vmem:[%s1214_s27 + $0x20] sm:$0xf]  ;;  %v1103_v46 = vld [vmem:[%s1214_s27 + $0x24] sm:$0xf0]  ;;  %v1106_v51 = vld [vmem:[%s1214_s27 + $0x44] sm:$0xf] }
  0x17   : > { %v997_v47 = vld [vmem:[%s1214_s27 + $0xa0] sm:$0xf]  ;;  %v1119_v48 = vld [vmem:[%s1214_s27 + $0xa4] sm:$0xf0]  ;;  %v934_v49 = vor.u32 %v1103_v46, %v933_v45  ;;  %v951_v52 = vld [vmem:[%s1214_s27 + $0x48] sm:$0xf0] }
  0x18   : > { %505 = vmatpush.bf16.msra.mxu0 %v1134_v7  ;;  %1142 = vmatpush.bf16.msra.mxu2 %v1134_v7  ;;  %v998_v50 = vor.u32 %v1119_v48, %v997_v47  ;;  %v954_v53 = vor.u32 %v1106_v51, %v951_v52  ;;  %v1124_v54 = vld [vmem:[%s1214_s27 + $0xd4] sm:$0xf]  ;;  %v1023_v55 = vld [vmem:[%s1214_s27 + $0xd8] sm:$0xf0]  ;;  %v941_v57 = vld [vmem:[%s1214_s27 + $0x30] sm:$0xf] }
  0x19   : > { %v1026_v56 = vor.u32 %v1124_v54, %v1023_v55  ;;  %v1105_v58 = vld [vmem:[%s1214_s27 + $0x34] sm:$0xf0]  ;;  %v1005_v59 = vld [vmem:[%s1214_s27 + $0xb0] sm:$0xf]  ;;  %v1108_v63 = vld [vmem:[%s1214_s27 + $0x54] sm:$0xf] }
  0x1a   : > { %v1121_v60 = vld [vmem:[%s1214_s27 + $0xb4] sm:$0xf0]  ;;  %v942_v61 = vor.u32 %v1105_v58, %v941_v57  ;;  %v959_v0 = vld [vmem:[%s1214_s27 + $0x58] sm:$0xf0]  ;;  %v1126_v2 = vld [vmem:[%s1214_s27 + $0xe4] sm:$0xf] }
  0x1b   : > { %v1006_v62 = vor.u32 %v1121_v60, %v1005_v59  ;;  %v962_v1 = vor.u32 %v1108_v63, %v959_v0  ;;  %v1031_v3 = vld [vmem:[%s1214_s27 + $0xe8] sm:$0xf0]  ;;  %v949_v5 = vld [vmem:[%s1214_s27 + $0x40] sm:$0xf]  ;;  %v1107_v6 = vld [vmem:[%s1214_s27 + $0x44] sm:$0xf0] }
  0x1c   : > { %506 = vmatpush.bf16.msra.mxu0 %v1133_v11  ;;  %1143 = vmatpush.bf16.msra.mxu2 %v1133_v11  ;;  %v1034_v4 = vor.u32 %v1126_v2, %v1031_v3  ;;  %v1013_v7 = vld [vmem:[%s1214_s27 + $0xc0] sm:$0xf]  ;;  %v1123_v8 = vld [vmem:[%s1214_s27 + $0xc4] sm:$0xf0]  ;;  %v950_v9 = vor.u32 %v1107_v6, %v949_v5  ;;  %v1110_v11 = vld [vmem:[%s1214_s27 + $0x64] sm:$0xf] }
  0x1d   : > { %v1014_v10 = vor.u32 %v1123_v8, %v1013_v7  ;;  %v1128_v14 = vld [vmem:[%s1214_s27 + $0xf4] sm:$0xf]  ;;  %v957_v17 = vld [vmem:[%s1214_s27 + $0x50] sm:$0xf]  ;;  %v1109_v18 = vld [vmem:[%s1214_s27 + $0x54] sm:$0xf0] }
  0x1e   : > { %v958_v21 = vor.u32 %v1109_v18, %v957_v17  ;;  %v1112_v23 = vld [vmem:[%s1214_s27 + $0x74] sm:$0xf]  ;;  %v975_v24 = vld [vmem:[%s1214_s27 + $0x78] sm:$0xf0]  ;;  %v1111_v27 = vld [vmem:[%s1214_s27 + $0x64] sm:$0xf0] }
  0x1f   : > { %v1029_v28 = vld [vmem:[%s1214_s27 + $0xe0] sm:$0xf]  ;;  %v983_v33 = vld [vmem:[%s1214_s27 + $0x88] sm:$0xf0]  ;;  %v973_v36 = vld [vmem:[%s1214_s27 + $0x70] sm:$0xf] }
  0x20   : > { %507 = vmatpush.bf16.msra.mxu0 %v1132_v12  ;;  %1144 = vmatpush.bf16.msra.mxu2 %v1132_v12  ;;  %v967_v12 = vld [vmem:[%s1214_s27 + $0x68] sm:$0xf0]  ;;  %v1129_v39 = vld [vmem:[%s1214_s27 + $0xf4] sm:$0xf0]  ;;  %v1317_v45 = vld [vmem:[%s1469_s2] ss:$0 sm:$0xff] }
  0x21   : > { %1080 = vmatmul.msk.bf16.gmra.mxu1 %vm453_vm0, %v930_v15  ;;  %v970_v13 = vor.u32 %v1110_v11, %v967_v12  ;;  %v1039_v15 = vld [vmem:[%s1214_s27 + $0xf8] sm:$0xf0]  ;;  %v1322_v48 = vld [vmem:[%s1470_s3] ss:$0 sm:$0xff] }
  0x22   : > { %1089 = vmatmul.msk.bf16.gmra.mxu3 %vm453_vm0, %v1002_v19  ;;  %v1021_v19 = vld [vmem:[%s1214_s27 + $0xd0] sm:$0xf] }
  0x24   : > { %508 = vmatpush.bf16.msra.mxu0 %v1131_v16  ;;  %1145 = vmatpush.bf16.msra.mxu2 %v1131_v16  ;;  %v1042_v16 = vor.u32 %v1128_v14, %v1039_v15 }
  0x28   : > { %509 = vmatpush.bf16.msra.mxu0 %v1130_v20  ;;  %1146 = vmatpush.bf16.msra.mxu2 %v1130_v20  ;;  %v1125_v20 = vld [vmem:[%s1214_s27 + $0xd4] sm:$0xf0] }
  0x29   : > { %v1022_v22 = vor.u32 %v1125_v20, %v1021_v19 }
  0x2b   : > { %510 = vmatmul.bf16.vlgmr.msra.gmra.mxu0 %v918_v25  ;;  %550 = vmatmul.bf16.vlgmr.msra.gmra.mxu2 %v982_v26  ;;  %v978_v25 = vor.u32 %v1112_v23, %v975_v24  ;;  %v965_v26 = vld [vmem:[%s1214_s27 + $0x60] sm:$0xf] }
  0x2c   : > { %v966_v30 = vor.u32 %v1111_v27, %v965_v26 }
  0x31   : > { %1081 = vmatmul.msk.bf16.gmra.mxu1 %vm453_vm0, %v938_v29  ;;  %v1127_v29 = vld [vmem:[%s1214_s27 + $0xe4] sm:$0xf0] }
  0x32   : > { %1090 = vmatmul.msk.bf16.gmra.mxu3 %vm453_vm0, %v1010_v32  ;;  %v1030_v31 = vor.u32 %v1127_v29, %v1029_v28  ;;  %v1114_v32 = vld [vmem:[%s1214_s27 + $0x84] sm:$0xf] }
  0x33   : > { %v986_v34 = vor.u32 %v1114_v32, %v983_v33 }
  0x3b   : > { %515 = vmatmul.bf16.gmra.mxu0 %v926_v37  ;;  %555 = vmatmul.bf16.gmra.mxu2 %v990_v38  ;;  %v1113_v37 = vld [vmem:[%s1214_s27 + $0x74] sm:$0xf0]  ;;  %v1037_v38 = vld [vmem:[%s1214_s27 + $0xf0] sm:$0xf] }
  0x3c   : > { %v974_v40 = vor.u32 %v1113_v37, %v973_v36 }
  0x41   : > { %1082 = vmatmul.msk.bf16.gmra.mxu1 %vm453_vm0, %v946_v41  ;;  %v1038_v41 = vor.u32 %v1129_v39, %v1037_v38 }
  0x42   : > { %1091 = vmatmul.msk.bf16.gmra.mxu3 %vm453_vm0, %v1018_v44 }
  0x4b   : > { %520 = vmatmul.bf16.gmra.mxu0 %v934_v49  ;;  %560 = vmatmul.bf16.gmra.mxu2 %v998_v50 }
  0x51   : > { %1083 = vmatmul.msk.bf16.gmra.mxu1 %vm453_vm0, %v954_v53 }
  0x52   : > { %1092 = vmatmul.msk.bf16.gmra.mxu3 %vm453_vm0, %v1026_v56 }
  0x5b   : > { %525 = vmatmul.bf16.gmra.mxu0 %v942_v61  ;;  %565 = vmatmul.bf16.gmra.mxu2 %v1006_v62 }
  0x61   : > { %1084 = vmatmul.msk.bf16.gmra.mxu1 %vm453_vm0, %v962_v1 }
  0x62   : > { %1093 = vmatmul.msk.bf16.gmra.mxu3 %vm453_vm0, %v1034_v4 }
  0x6b   : > { %530 = vmatmul.bf16.gmra.mxu0 %v950_v9  ;;  %570 = vmatmul.bf16.gmra.mxu2 %v1014_v10 }
  0x71   : > { %1085 = vmatmul.msk.bf16.gmra.mxu1 %vm453_vm0, %v970_v13 }
  0x72   : > { %1094 = vmatmul.msk.bf16.gmra.mxu3 %vm453_vm0, %v1042_v16 }
  0x7b   : > { %535 = vmatmul.bf16.gmra.mxu0 %v958_v21  ;;  %575 = vmatmul.bf16.gmra.mxu2 %v1022_v22 }
  0x81   : > { %1086 = vmatmul.msk.bf16.gmra.mxu1 %vm453_vm0, %v978_v25 }
  0x8b   : > { %540 = vmatmul.bf16.gmra.mxu0 %v966_v30  ;;  %580 = vmatmul.bf16.gmra.mxu2 %v1030_v31 }
  0x8e   : > { %v600_v35 = vpop.f32.mrf.mxu1 }
  0x91   : > { %1087 = vmatmul.msk.bf16.gmra.mxu1 %vm453_vm0, %v986_v34 }
  0x95   : > { %v645_v44 = vpop.f32.mrf.mxu3 }
  0x96   : > { %v602_v42 = vpop.f32.mrf.mxu1 }
  0x9b   : > { %545 = vmatmul.bf16.gmra.mxu0 %v974_v40  ;;  %585 = vmatmul.bf16.gmra.mxu2 %v1038_v41 }
  0x9d   : > { %v647_v54 = vpop.f32.mrf.mxu3 }
  0x9e   : > { %v605_v43 = vpop.f32.mrf.mxu1 }
  0xa5   : > { %v650_v3 = vpop.f32.mrf.mxu3 }
  0xa6   : > { %v607_v49 = vpop.f32.mrf.mxu1 }
  0xa8   : > { %v511_v46 = vpop.f32.mrf.mxu0 }
  0xa9   : > { %v601_v47 = vadd.f32 %v600_v35, %v511_v46 }
  0xab   : > { %v684_v50 = vmul.f32 %v1317_v45, %v601_v47 }
  0xad   : > { %v720_v51 = vadd.f32 %v1322_v48, %v684_v50  ;;  %v652_v15 = vpop.f32.mrf.mxu3 }
  0xae   : > { %v1327_v53 = vpop.f32.mrf.mxu2  ;;  %v610_v58 = vpop.f32.mrf.mxu1 }
  0xaf   : > { %v752_v52 = vmax.f32 %v720_v51, 0.0 }
  0xb0   : > { %v513_v55 = vpop.f32.mrf.mxu0 }
  0xb1   : > { %v784_v56 = vpack.c.bf16 %v752_v52, %v752_v52  ;;  %v603_v57 = vadd.f32 %v602_v42, %v513_v55 }
  0xb3   : > { %817 = vst.msk [vmem:[%s1332_s23] sm:$0xf] %vm816_vm1, %v784_v56  ;;  %v685_v59 = vmul.f32 %v1317_v45, %v603_v57 }
  0xb5   : > { %v721_v60 = vadd.f32 %v1322_v48, %v685_v59  ;;  %v655_v31 = vpop.f32.mrf.mxu3 }
  0xb6   : > { %v1338_v62 = vpop.f32.mrf.mxu2  ;;  %v612_v2 = vpop.f32.mrf.mxu1 }
  0xb7   : > { %v753_v61 = vmax.f32 %v721_v60, 0.0 }
  0xb8   : > { %v516_v63 = vpop.f32.mrf.mxu0 }
  0xb9   : > { %v785_v0 = vpack.c.bf16 %v753_v61, %v753_v61  ;;  %v606_v1 = vadd.f32 %v605_v43, %v516_v63 }
  0xbb   : > { %818 = vst.msk [vmem:[%s1332_s23 + $0x4] sm:$0xf] %vm816_vm1, %v785_v0  ;;  %v686_v4 = vmul.f32 %v1317_v45, %v606_v1 }
  0xbd   : > { %v722_v5 = vadd.f32 %v1322_v48, %v686_v4  ;;  %v657_v50 = vpop.f32.mrf.mxu3 }
  0xbe   : > { %v556_v7 = vpop.f32.mrf.mxu2  ;;  %v615_v12 = vpop.f32.mrf.mxu1 }
  0xbf   : > { %v754_v6 = vmax.f32 %v722_v5, 0.0  ;;  %v646_v8 = vadd.f32 %v645_v44, %v556_v7 }
  0xc0   : > { %v518_v9 = vpop.f32.mrf.mxu0 }
  0xc1   : > { %v786_v10 = vpack.c.bf16 %v754_v6, %v754_v6  ;;  %v608_v11 = vadd.f32 %v607_v49, %v518_v9  ;;  %v702_v13 = vmul.f32 %v1317_v45, %v646_v8 }
  0xc3   : > { %819 = vst.msk [vmem:[%s1332_s23 + $0x8] sm:$0xf] %vm816_vm1, %v786_v10  ;;  %v687_v14 = vmul.f32 %v1317_v45, %v608_v11  ;;  %v738_v16 = vadd.f32 %v1322_v48, %v702_v13 }
  0xc5   : > { %v723_v17 = vadd.f32 %v1322_v48, %v687_v14  ;;  %v770_v18 = vmax.f32 %v738_v16, 0.0  ;;  %v660_v8 = vpop.f32.mrf.mxu3 }
  0xc6   : > { %v558_v20 = vpop.f32.mrf.mxu2  ;;  %v617_v26 = vpop.f32.mrf.mxu1 }
  0xc7   : > { %v755_v19 = vmax.f32 %v723_v17, 0.0  ;;  %v802_v21 = vpack.c.bf16 %v770_v18, %v770_v18  ;;  %v648_v22 = vadd.f32 %v647_v54, %v558_v20 }
  0xc8   : > { %v521_v23 = vpop.f32.mrf.mxu0 }
  0xc9   : > { %v787_v24 = vpack.c.bf16 %v755_v19, %v755_v19  ;;  %v611_v25 = vadd.f32 %v610_v58, %v521_v23  ;;  %835 = vst.msk [vmem:[%s1332_s23 + $0x48] sm:$0xf] %vm816_vm1, %v802_v21  ;;  %v703_v27 = vmul.f32 %v1317_v45, %v648_v22 }
  0xcb   : > { %820 = vst.msk [vmem:[%s1332_s23 + $0xc] sm:$0xf] %vm816_vm1, %v787_v24  ;;  %v688_v28 = vmul.f32 %v1317_v45, %v611_v25  ;;  %v739_v29 = vadd.f32 %v1322_v48, %v703_v27 }
  0xcd   : > { %v724_v30 = vadd.f32 %v1322_v48, %v688_v28  ;;  %v771_v32 = vmax.f32 %v739_v29, 0.0  ;;  %v662_v24 = vpop.f32.mrf.mxu3 }
  0xce   : > { %v561_v34 = vpop.f32.mrf.mxu2  ;;  %v620_v40 = vpop.f32.mrf.mxu1 }
  0xcf   : > { %v756_v33 = vmax.f32 %v724_v30, 0.0  ;;  %v803_v35 = vpack.c.bf16 %v771_v32, %v771_v32  ;;  %v651_v36 = vadd.f32 %v650_v3, %v561_v34 }
  0xd0   : > { %v523_v37 = vpop.f32.mrf.mxu0 }
  0xd1   : > { %v788_v38 = vpack.c.bf16 %v756_v33, %v756_v33  ;;  %v613_v39 = vadd.f32 %v612_v2, %v523_v37  ;;  %836 = vst.msk [vmem:[%s1332_s23 + $0x4c] sm:$0xf] %vm816_vm1, %v803_v35  ;;  %v704_v41 = vmul.f32 %v1317_v45, %v651_v36 }
  0xd3   : > { %821 = vst.msk [vmem:[%s1332_s23 + $0x10] sm:$0xf] %vm816_vm1, %v788_v38  ;;  %v689_v42 = vmul.f32 %v1317_v45, %v613_v39  ;;  %v740_v43 = vadd.f32 %v1322_v48, %v704_v41 }
  0xd5   : > { %v725_v44 = vadd.f32 %v1322_v48, %v689_v42  ;;  %v772_v46 = vmax.f32 %v740_v43, 0.0 }
  0xd6   : > { %v563_v49 = vpop.f32.mrf.mxu2  ;;  %v622_v57 = vpop.f32.mrf.mxu1 }
  0xd7   : > { %v757_v47 = vmax.f32 %v725_v44, 0.0  ;;  %v804_v51 = vpack.c.bf16 %v772_v46, %v772_v46  ;;  %v653_v52 = vadd.f32 %v652_v15, %v563_v49 }
  0xd8   : > { %v526_v54 = vpop.f32.mrf.mxu0 }
  0xd9   : > { %v789_v55 = vpack.c.bf16 %v757_v47, %v757_v47  ;;  %v616_v56 = vadd.f32 %v615_v12, %v526_v54  ;;  %837 = vst.msk [vmem:[%s1332_s23 + $0x50] sm:$0xf] %vm816_vm1, %v804_v51  ;;  %v705_v58 = vmul.f32 %v1317_v45, %v653_v52 }
  0xdb   : > { %822 = vst.msk [vmem:[%s1332_s23 + $0x14] sm:$0xf] %vm816_vm1, %v789_v55  ;;  %v690_v59 = vmul.f32 %v1317_v45, %v616_v56  ;;  %v741_v60 = vadd.f32 %v1322_v48, %v705_v58 }
  0xdd   : > { %v726_v61 = vadd.f32 %v1322_v48, %v690_v59  ;;  %v773_v63 = vmax.f32 %v741_v60, 0.0 }
  0xde   : > { %v566_v1 = vpop.f32.mrf.mxu2  ;;  %v625_v7 = vpop.f32.mrf.mxu1 }
  0xdf   : > { %v758_v0 = vmax.f32 %v726_v61, 0.0  ;;  %v805_v2 = vpack.c.bf16 %v773_v63, %v773_v63  ;;  %v656_v3 = vadd.f32 %v655_v31, %v566_v1 }
  0xe0   : > { %v528_v4 = vpop.f32.mrf.mxu0 }
  0xe1   : > { %v790_v5 = vpack.c.bf16 %v758_v0, %v758_v0  ;;  %v618_v6 = vadd.f32 %v617_v26, %v528_v4  ;;  %838 = vst.msk [vmem:[%s1332_s23 + $0x54] sm:$0xf] %vm816_vm1, %v805_v2  ;;  %v706_v9 = vmul.f32 %v1317_v45, %v656_v3 }
  0xe3   : > { %823 = vst.msk [vmem:[%s1332_s23 + $0x18] sm:$0xf] %vm816_vm1, %v790_v5  ;;  %v691_v10 = vmul.f32 %v1317_v45, %v618_v6  ;;  %v742_v11 = vadd.f32 %v1322_v48, %v706_v9 }
  0xe5   : > { %v727_v12 = vadd.f32 %v1322_v48, %v691_v10  ;;  %v774_v13 = vmax.f32 %v742_v11, 0.0 }
  0xe6   : > { %v568_v15 = vpop.f32.mrf.mxu2  ;;  %v627_v21 = vpop.f32.mrf.mxu1 }
  0xe7   : > { %v759_v14 = vmax.f32 %v727_v12, 0.0  ;;  %v806_v16 = vpack.c.bf16 %v774_v13, %v774_v13  ;;  %v658_v17 = vadd.f32 %v657_v50, %v568_v15 }
  0xe8   : > { %v531_v18 = vpop.f32.mrf.mxu0 }
  0xe9   : > { %v791_v19 = vpack.c.bf16 %v759_v14, %v759_v14  ;;  %v621_v20 = vadd.f32 %v620_v40, %v531_v18  ;;  %839 = vst.msk [vmem:[%s1332_s23 + $0x58] sm:$0xf] %vm816_vm1, %v806_v16  ;;  %v707_v22 = vmul.f32 %v1317_v45, %v658_v17  ;;  %v665_v40 = vpop.f32.mrf.mxu3 }
  0xeb   : > { %824 = vst.msk [vmem:[%s1332_s23 + $0x1c] sm:$0xf] %vm816_vm1, %v791_v19  ;;  %v692_v23 = vmul.f32 %v1317_v45, %v621_v20  ;;  %v743_v25 = vadd.f32 %v1322_v48, %v707_v22 }
  0xed   : > { %v728_v26 = vadd.f32 %v1322_v48, %v692_v23  ;;  %v775_v27 = vmax.f32 %v743_v25, 0.0 }
  0xee   : > { %v571_v29 = vpop.f32.mrf.mxu2  ;;  %v630_v35 = vpop.f32.mrf.mxu1 }
  0xef   : > { %v760_v28 = vmax.f32 %v728_v26, 0.0  ;;  %v807_v30 = vpack.c.bf16 %v775_v27, %v775_v27  ;;  %v661_v31 = vadd.f32 %v660_v8, %v571_v29 }
  0xf0   : > { %v533_v32 = vpop.f32.mrf.mxu0 }
  0xf1   : > { %v792_v33 = vpack.c.bf16 %v760_v28, %v760_v28  ;;  %v623_v34 = vadd.f32 %v622_v57, %v533_v32  ;;  %840 = vst.msk [vmem:[%s1332_s23 + $0x5c] sm:$0xf] %vm816_vm1, %v807_v30  ;;  %v708_v36 = vmul.f32 %v1317_v45, %v661_v31  ;;  %v667_v60 = vpop.f32.mrf.mxu3 }
  0xf3   : > { %825 = vst.msk [vmem:[%s1332_s23 + $0x20] sm:$0xf] %vm816_vm1, %v792_v33  ;;  %v693_v37 = vmul.f32 %v1317_v45, %v623_v34  ;;  %v744_v38 = vadd.f32 %v1322_v48, %v708_v36 }
  0xf5   : > { %v729_v39 = vadd.f32 %v1322_v48, %v693_v37  ;;  %v776_v41 = vmax.f32 %v744_v38, 0.0 }
  0xf6   : > { %v573_v43 = vpop.f32.mrf.mxu2  ;;  %v632_v51 = vpop.f32.mrf.mxu1 }
  0xf7   : > { %v761_v42 = vmax.f32 %v729_v39, 0.0  ;;  %v808_v44 = vpack.c.bf16 %v776_v41, %v776_v41  ;;  %v663_v46 = vadd.f32 %v662_v24, %v573_v43 }
  0xf8   : > { %v536_v47 = vpop.f32.mrf.mxu0 }
  0xf9   : > { %v793_v49 = vpack.c.bf16 %v761_v42, %v761_v42  ;;  %v626_v50 = vadd.f32 %v625_v7, %v536_v47  ;;  %841 = vst.msk [vmem:[%s1332_s23 + $0x60] sm:$0xf] %vm816_vm1, %v808_v44  ;;  %v709_v52 = vmul.f32 %v1317_v45, %v663_v46  ;;  %v670_v15 = vpop.f32.mrf.mxu3 }
  0xfb   : > { %826 = vst.msk [vmem:[%s1332_s23 + $0x24] sm:$0xf] %vm816_vm1, %v793_v49  ;;  %v694_v54 = vmul.f32 %v1317_v45, %v626_v50  ;;  %v745_v55 = vadd.f32 %v1322_v48, %v709_v52 }
  0xfd   : > { %v730_v56 = vadd.f32 %v1322_v48, %v694_v54  ;;  %v777_v57 = vmax.f32 %v745_v55, 0.0 }
  0xfe   : > { %v576_v59 = vpop.f32.mrf.mxu2  ;;  %v635_v3 = vpop.f32.mrf.mxu1 }
  0xff   : > { %v762_v58 = vmax.f32 %v730_v56, 0.0  ;;  %v809_v61 = vpack.c.bf16 %v777_v57, %v777_v57  ;;  %v666_v63 = vadd.f32 %v665_v40, %v576_v59 }
 0x100   : > { %v538_v0 = vpop.f32.mrf.mxu0 }
 0x101   : > { %v794_v1 = vpack.c.bf16 %v762_v58, %v762_v58  ;;  %v628_v2 = vadd.f32 %v627_v21, %v538_v0  ;;  %842 = vst.msk [vmem:[%s1332_s23 + $0x64] sm:$0xf] %vm816_vm1, %v809_v61  ;;  %v710_v4 = vmul.f32 %v1317_v45, %v666_v63  ;;  %v672_v33 = vpop.f32.mrf.mxu3 }
 0x103   : > { %827 = vst.msk [vmem:[%s1332_s23 + $0x28] sm:$0xf] %vm816_vm1, %v794_v1  ;;  %v695_v5 = vmul.f32 %v1317_v45, %v628_v2  ;;  %v746_v6 = vadd.f32 %v1322_v48, %v710_v4 }
 0x105   : > { %v731_v7 = vadd.f32 %v1322_v48, %v695_v5  ;;  %v778_v8 = vmax.f32 %v746_v6, 0.0 }
 0x106   : > { %v578_v10 = vpop.f32.mrf.mxu2  ;;  %v637_v17 = vpop.f32.mrf.mxu1 }
 0x107   : > { %v763_v9 = vmax.f32 %v731_v7, 0.0  ;;  %v810_v11 = vpack.c.bf16 %v778_v8, %v778_v8  ;;  %v668_v12 = vadd.f32 %v667_v60, %v578_v10 }
 0x108   : > { %v541_v13 = vpop.f32.mrf.mxu0 }
 0x109   : > { %v795_v14 = vpack.c.bf16 %v763_v9, %v763_v9  ;;  %v631_v16 = vadd.f32 %v630_v35, %v541_v13  ;;  %843 = vst.msk [vmem:[%s1332_s23 + $0x68] sm:$0xf] %vm816_vm1, %v810_v11  ;;  %v711_v18 = vmul.f32 %v1317_v45, %v668_v12  ;;  %v675_v57 = vpop.f32.mrf.mxu3 }
 0x10b   : > { %828 = vst.msk [vmem:[%s1332_s23 + $0x2c] sm:$0xf] %vm816_vm1, %v795_v14  ;;  %v696_v19 = vmul.f32 %v1317_v45, %v631_v16  ;;  %v747_v20 = vadd.f32 %v1322_v48, %v711_v18 }
 0x10d   : > { %v732_v21 = vadd.f32 %v1322_v48, %v696_v19  ;;  %v779_v22 = vmax.f32 %v747_v20, 0.0 }
 0x10e   : > { %v581_v24 = vpop.f32.mrf.mxu2  ;;  %v640_v30 = vpop.f32.mrf.mxu1 }
 0x10f   : > { %v764_v23 = vmax.f32 %v732_v21, 0.0  ;;  %v811_v25 = vpack.c.bf16 %v779_v22, %v779_v22  ;;  %v671_v26 = vadd.f32 %v670_v15, %v581_v24  ;;  %v641_v32 = vadd.f32 %v640_v30, %v1327_v53 }
 0x110   : > { %v543_v27 = vpop.f32.mrf.mxu0 }
 0x111   : > { %v796_v28 = vpack.c.bf16 %v764_v23, %v764_v23  ;;  %v633_v29 = vadd.f32 %v632_v51, %v543_v27  ;;  %844 = vst.msk [vmem:[%s1332_s23 + $0x6c] sm:$0xf] %vm816_vm1, %v811_v25  ;;  %v712_v31 = vmul.f32 %v1317_v45, %v671_v26  ;;  %v700_v36 = vmul.f32 %v1317_v45, %v641_v32  ;;  %v677_v11 = vpop.f32.mrf.mxu3 }
 0x113   : > { %829 = vst.msk [vmem:[%s1332_s23 + $0x30] sm:$0xf] %vm816_vm1, %v796_v28  ;;  %v697_v34 = vmul.f32 %v1317_v45, %v633_v29  ;;  %v748_v35 = vadd.f32 %v1322_v48, %v712_v31  ;;  %v736_v39 = vadd.f32 %v1322_v48, %v700_v36 }
 0x115   : > { %v733_v37 = vadd.f32 %v1322_v48, %v697_v34  ;;  %v780_v38 = vmax.f32 %v748_v35, 0.0  ;;  %v768_v42 = vmax.f32 %v736_v39, 0.0 }
 0x116   : > { %v583_v41 = vpop.f32.mrf.mxu2  ;;  %v642_v49 = vpop.f32.mrf.mxu1 }
 0x117   : > { %v765_v40 = vmax.f32 %v733_v37, 0.0  ;;  %v812_v53 = vpack.c.bf16 %v780_v38, %v780_v38  ;;  %v673_v43 = vadd.f32 %v672_v33, %v583_v41  ;;  %v800_v50 = vpack.c.bf16 %v768_v42, %v768_v42 }
 0x118   : > { %v546_v44 = vpop.f32.mrf.mxu0  ;;  %v643_v52 = vadd.f32 %v642_v49, %v1338_v62 }
 0x119   : > { %v797_v46 = vpack.c.bf16 %v765_v40, %v765_v40  ;;  %v636_v47 = vadd.f32 %v635_v3, %v546_v44  ;;  %845 = vst.msk [vmem:[%s1332_s23 + $0x70] sm:$0xf] %vm816_vm1, %v812_v53  ;;  %v713_v51 = vmul.f32 %v1317_v45, %v673_v43 }
 0x11a   : > { %833 = vst.msk [vmem:[%s1332_s23 + $0x40] sm:$0xf] %vm816_vm1, %v800_v50  ;;  %v701_v56 = vmul.f32 %v1317_v45, %v643_v52 }
 0x11b   : > { %830 = vst.msk [vmem:[%s1332_s23 + $0x34] sm:$0xf] %vm816_vm1, %v797_v46  ;;  %v698_v54 = vmul.f32 %v1317_v45, %v636_v47  ;;  %v749_v55 = vadd.f32 %v1322_v48, %v713_v51 }
 0x11c   : > { %v737_v60 = vadd.f32 %v1322_v48, %v701_v56 }
 0x11d   : > { %v734_v58 = vadd.f32 %v1322_v48, %v698_v54  ;;  %v781_v59 = vmax.f32 %v749_v55, 0.0 }
 0x11e   : > { %v586_v61 = vpop.f32.mrf.mxu2  ;;  %v769_v0 = vmax.f32 %v737_v60, 0.0 }
 0x11f   : > { %v766_v62 = vmax.f32 %v734_v58, 0.0  ;;  %v813_v63 = vpack.c.bf16 %v781_v59, %v781_v59  ;;  %v676_v1 = vadd.f32 %v675_v57, %v586_v61 }
 0x120   : > { %v548_v2 = vpop.f32.mrf.mxu0  ;;  %v801_v5 = vpack.c.bf16 %v769_v0, %v769_v0 }
 0x121   : > { %v798_v3 = vpack.c.bf16 %v766_v62, %v766_v62  ;;  %v638_v4 = vadd.f32 %v637_v17, %v548_v2  ;;  %846 = vst.msk [vmem:[%s1332_s23 + $0x74] sm:$0xf] %vm816_vm1, %v813_v63  ;;  %v714_v6 = vmul.f32 %v1317_v45, %v676_v1 }
 0x122   : > { %834 = vst.msk [vmem:[%s1332_s23 + $0x44] sm:$0xf] %vm816_vm1, %v801_v5 }
 0x123   : > { %831 = vst.msk [vmem:[%s1332_s23 + $0x38] sm:$0xf] %vm816_vm1, %v798_v3  ;;  %v699_v7 = vmul.f32 %v1317_v45, %v638_v4  ;;  %v750_v8 = vadd.f32 %v1322_v48, %v714_v6 }
 0x125   : > { %v735_v9 = vadd.f32 %v1322_v48, %v699_v7  ;;  %v782_v10 = vmax.f32 %v750_v8, 0.0 }
 0x126   : > { %v588_v13 = vpop.f32.mrf.mxu2 }
 0x127   : > { %v767_v12 = vmax.f32 %v735_v9, 0.0  ;;  %v814_v14 = vpack.c.bf16 %v782_v10, %v782_v10  ;;  %v678_v15 = vadd.f32 %v677_v11, %v588_v13 }
 0x129   : > { %v799_v16 = vpack.c.bf16 %v767_v12, %v767_v12  ;;  %847 = vst.msk [vmem:[%s1332_s23 + $0x78] sm:$0xf] %vm816_vm1, %v814_v14  ;;  %v715_v17 = vmul.f32 %v1317_v45, %v678_v15 }
 0x12b   : > { %832 = vst.msk [vmem:[%s1332_s23 + $0x3c] sm:$0xf] %vm816_vm1, %v799_v16  ;;  %v751_v18 = vadd.f32 %v1322_v48, %v715_v17 }
 0x12d   : > { %v783_v19 = vmax.f32 %v751_v18, 0.0 }
 0x12f   : > { %v815_v20 = vpack.c.bf16 %v783_v19, %v783_v19 }
 0x131   : > { %848 = vst.msk [vmem:[%s1332_s23 + $0x7c] sm:$0xf] %vm816_vm1, %v815_v20 }
 0x132 PF: > { %s14_s15 = sadd.s32 1, %s1164_s15  }
 0x133   : > { %p11_p4 = scmp.ge.s32.totalorder %s14_s15, 4  }
 0x135   :  { %13 = sbr.rel (!%p11_p4) target bundleno = 1 (0x1), region = 66 }

// kernel: _lambda_.17
= control target key start
LH: loop header
LB: loop body
LE: loop exit
PB: predicated region body
PF: predicated region fallthrough
CT: control target
= control target key end

     0   :  { %s1290_s18 = smov 0   ;;  %s1607_s0 = inlined_call_operand.vmem [shape: bf16[512,144], index: 0, kind: input, shape index: {}]   ;;  %s1608_s1 = inlined_call_operand.vmem [shape: bf16[144,16], index: 1, kind: input, shape index: {}]   ;;  %s1609_s2 = inlined_call_operand.vmem [shape: f32[1,16], index: 2, kind: input, shape index: {}]   ;;  %s1610_s3 = inlined_call_operand.vmem [shape: f32[1,16], index: 3, kind: input, shape index: {}]   ;;  %s1611_s4 = inlined_call_operand.vmem [shape: f32[512,16], index: 4, kind: input, shape index: {}]   ;;  %s1612_s5 = inlined_call_operand.vmem [shape: f32[512,16], index: 5, kind: output, shape index: {}]  }
   0x1 LB: > { %s997_s19 = sadd.s32 4294967295, %s1258_s18   ;;  %p1001_p0 = scmp.ge.s32.totalorder %s1258_s18, 1  ;;  %s1258_s18 = sphi %s1290_s18, %s15_s18  }
   0x2   : > { %p200_p1 = scmp.lt.s32.totalorder %s1258_s18, 3 }
   0x4   : > { %p201_p2 = pnand %p1001_p0, %p200_p1 }
   0x5   : > { %s1002_s24 = sshll.u32 (!%p201_p2), %s997_s19, 5 }
   0x6   : > { %204 = sbr.rel (%p201_p2) target bundleno = 306 (0x132), region = 40  ;;  %p235_p3 = scmp.lt.s32.totalorder (!%p201_p2), %s1002_s24, 63 }
   0xb   : > { %v1231_v0 = vld [vmem:[%s1608_s1 + $0x38] sm:$0xff]  ;;  %v1232_v1 = vld [vmem:[%s1608_s1 + $0x40] sm:$0xff]  ;;  %v1230_v2 = vld [vmem:[%s1608_s1 + $0x30] sm:$0xff]  ;;  %s1614_s24 = smov (!%p235_p3, %s1002_s24), 63  ;;  %vm502_vm0 = vcmask 130048  }
   0xc   : > { %551 = vmatpush.bf16.msra.mxu0 %v1231_v0  ;;  %1233 = vmatpush.bf16.msra.mxu2 %v1231_v0  ;;  %s1307_s27 = sshll.u32 %s1614_s24, 3  ;;  %v1229_v3 = vld [vmem:[%s1608_s1 + $0x28] sm:$0xff]  ;;  %v1228_v7 = vld [vmem:[%s1608_s1 + $0x20] sm:$0xff]  ;;  %v1227_v11 = vld [vmem:[%s1608_s1 + $0x18] sm:$0xff] }
   0xd   : > { %647 = vmatpush.bf16.msra.mxu1 %v1232_v1  ;;  %1241 = vmatpush.bf16.msra.mxu3 %v1232_v1  ;;  %s1313_s30 = scalar_lea.vmem %s1607_s0, %s1307_s27  ;;  %v1226_v12 = vld [vmem:[%s1608_s1 + $0x10] sm:$0xff]  ;;  %v1225_v16 = vld [vmem:[%s1608_s1 + $0x8] sm:$0xff]  ;;  %v1224_v20 = vld [vmem:[%s1608_s1] sm:$0xff]  ;;  %s1422_s23 = scalar_lea.vmem %s1611_s4, %s1307_s27 }
   0xe   : > { %v1192_v4 = vld [vmem:[%s1313_s30 + $0x4] sm:$0xf]  ;;  %v1013_v5 = vld [vmem:[%s1313_s30 + $0x8] sm:$0xf0]  ;;  %v1210_v8 = vld [vmem:[%s1313_s30 + $0x94] sm:$0xf]  ;;  %s1438_s29 = scalar_lea.vmem %s1612_s5, %s1307_s27 }
   0xf   : > { %v1016_v6 = vor.u32 %v1192_v4, %v1013_v5  ;;  %v1085_v9 = vld [vmem:[%s1313_s30 + $0x98] sm:$0xf0]  ;;  %v1194_v13 = vld [vmem:[%s1313_s30 + $0x14] sm:$0xf]  ;;  %v1212_v17 = vld [vmem:[%s1313_s30 + $0xa4] sm:$0xf] }
  0x10   : > { %552 = vmatpush.bf16.msra.mxu0 %v1230_v2  ;;  %1234 = vmatpush.bf16.msra.mxu2 %v1230_v2  ;;  %v1088_v10 = vor.u32 %v1210_v8, %v1085_v9  ;;  %v1021_v14 = vld [vmem:[%s1313_s30 + $0x18] sm:$0xf0]  ;;  %v1093_v18 = vld [vmem:[%s1313_s30 + $0xa8] sm:$0xf0]  ;;  %v1011_v21 = vld [vmem:[%s1313_s30] sm:$0xf] }
  0x11   : > { %1173 = vmatmul.msk.bf16.vlgmr.msra.gmra.mxu1 %vm502_vm0, %v1016_v6  ;;  %v1024_v15 = vor.u32 %v1194_v13, %v1021_v14  ;;  %v1096_v19 = vor.u32 %v1212_v17, %v1093_v18  ;;  %v1193_v22 = vld [vmem:[%s1313_s30 + $0x4] sm:$0xf0]  ;;  %v1075_v23 = vld [vmem:[%s1313_s30 + $0x80] sm:$0xf]  ;;  %v1196_v27 = vld [vmem:[%s1313_s30 + $0x24] sm:$0xf] }
  0x12   : > { %1182 = vmatmul.msk.bf16.vlgmr.msra.gmra.mxu3 %vm502_vm0, %v1088_v10  ;;  %v1209_v24 = vld [vmem:[%s1313_s30 + $0x84] sm:$0xf0]  ;;  %v1012_v25 = vor.u32 %v1193_v22, %v1011_v21  ;;  %v1029_v28 = vld [vmem:[%s1313_s30 + $0x28] sm:$0xf0]  ;;  %v1214_v30 = vld [vmem:[%s1313_s30 + $0xb4] sm:$0xf] }
  0x13   : > { %v1076_v26 = vor.u32 %v1209_v24, %v1075_v23  ;;  %v1032_v29 = vor.u32 %v1196_v27, %v1029_v28  ;;  %v1101_v31 = vld [vmem:[%s1313_s30 + $0xb8] sm:$0xf0]  ;;  %v1019_v33 = vld [vmem:[%s1313_s30 + $0x10] sm:$0xf]  ;;  %v1195_v34 = vld [vmem:[%s1313_s30 + $0x14] sm:$0xf0] }
  0x14   : > { %553 = vmatpush.bf16.msra.mxu0 %v1229_v3  ;;  %1235 = vmatpush.bf16.msra.mxu2 %v1229_v3  ;;  %v1104_v32 = vor.u32 %v1214_v30, %v1101_v31  ;;  %v1083_v35 = vld [vmem:[%s1313_s30 + $0x90] sm:$0xf]  ;;  %v1211_v36 = vld [vmem:[%s1313_s30 + $0x94] sm:$0xf0]  ;;  %v1020_v37 = vor.u32 %v1195_v34, %v1019_v33  ;;  %v1198_v39 = vld [vmem:[%s1313_s30 + $0x34] sm:$0xf] }
  0x15   : > { %v1084_v38 = vor.u32 %v1211_v36, %v1083_v35  ;;  %v1037_v40 = vld [vmem:[%s1313_s30 + $0x38] sm:$0xf0]  ;;  %v1216_v42 = vld [vmem:[%s1313_s30 + $0xc4] sm:$0xf]  ;;  %v1109_v43 = vld [vmem:[%s1313_s30 + $0xc8] sm:$0xf0] }
  0x16   : > { %v1040_v41 = vor.u32 %v1198_v39, %v1037_v40  ;;  %v1112_v44 = vor.u32 %v1216_v42, %v1109_v43  ;;  %v1027_v45 = vld [vmem:[%s1313_s30 + $0x20] sm:$0xf]  ;;  %v1197_v46 = vld [vmem:[%s1313_s30 + $0x24] sm:$0xf0]  ;;  %v1200_v51 = vld [vmem:[%s1313_s30 + $0x44] sm:$0xf] }
  0x17   : > { %v1091_v47 = vld [vmem:[%s1313_s30 + $0xa0] sm:$0xf]  ;;  %v1213_v48 = vld [vmem:[%s1313_s30 + $0xa4] sm:$0xf0]  ;;  %v1028_v49 = vor.u32 %v1197_v46, %v1027_v45  ;;  %v1045_v52 = vld [vmem:[%s1313_s30 + $0x48] sm:$0xf0] }
  0x18   : > { %554 = vmatpush.bf16.msra.mxu0 %v1228_v7  ;;  %1236 = vmatpush.bf16.msra.mxu2 %v1228_v7  ;;  %v1092_v50 = vor.u32 %v1213_v48, %v1091_v47  ;;  %v1048_v53 = vor.u32 %v1200_v51, %v1045_v52  ;;  %v1218_v54 = vld [vmem:[%s1313_s30 + $0xd4] sm:$0xf]  ;;  %v1117_v55 = vld [vmem:[%s1313_s30 + $0xd8] sm:$0xf0]  ;;  %v1035_v57 = vld [vmem:[%s1313_s30 + $0x30] sm:$0xf] }
  0x19   : > { %v1120_v56 = vor.u32 %v1218_v54, %v1117_v55  ;;  %v1199_v58 = vld [vmem:[%s1313_s30 + $0x34] sm:$0xf0]  ;;  %v1099_v59 = vld [vmem:[%s1313_s30 + $0xb0] sm:$0xf]  ;;  %v1202_v63 = vld [vmem:[%s1313_s30 + $0x54] sm:$0xf] }
  0x1a   : > { %v1215_v60 = vld [vmem:[%s1313_s30 + $0xb4] sm:$0xf0]  ;;  %v1036_v61 = vor.u32 %v1199_v58, %v1035_v57  ;;  %v1053_v0 = vld [vmem:[%s1313_s30 + $0x58] sm:$0xf0]  ;;  %v1220_v2 = vld [vmem:[%s1313_s30 + $0xe4] sm:$0xf] }
  0x1b   : > { %v1100_v62 = vor.u32 %v1215_v60, %v1099_v59  ;;  %v1056_v1 = vor.u32 %v1202_v63, %v1053_v0  ;;  %v1125_v3 = vld [vmem:[%s1313_s30 + $0xe8] sm:$0xf0]  ;;  %v1043_v5 = vld [vmem:[%s1313_s30 + $0x40] sm:$0xf]  ;;  %v1201_v6 = vld [vmem:[%s1313_s30 + $0x44] sm:$0xf0] }
  0x1c   : > { %555 = vmatpush.bf16.msra.mxu0 %v1227_v11  ;;  %1237 = vmatpush.bf16.msra.mxu2 %v1227_v11  ;;  %v1128_v4 = vor.u32 %v1220_v2, %v1125_v3  ;;  %v1107_v7 = vld [vmem:[%s1313_s30 + $0xc0] sm:$0xf]  ;;  %v1217_v8 = vld [vmem:[%s1313_s30 + $0xc4] sm:$0xf0]  ;;  %v1044_v9 = vor.u32 %v1201_v6, %v1043_v5  ;;  %v1204_v11 = vld [vmem:[%s1313_s30 + $0x64] sm:$0xf] }
  0x1d   : > { %v1108_v10 = vor.u32 %v1217_v8, %v1107_v7  ;;  %v1222_v14 = vld [vmem:[%s1313_s30 + $0xf4] sm:$0xf]  ;;  %v1051_v17 = vld [vmem:[%s1313_s30 + $0x50] sm:$0xf]  ;;  %v1203_v18 = vld [vmem:[%s1313_s30 + $0x54] sm:$0xf0] }
  0x1e   : > { %v1052_v21 = vor.u32 %v1203_v18, %v1051_v17  ;;  %v1206_v23 = vld [vmem:[%s1313_s30 + $0x74] sm:$0xf]  ;;  %v1069_v24 = vld [vmem:[%s1313_s30 + $0x78] sm:$0xf0]  ;;  %v1205_v27 = vld [vmem:[%s1313_s30 + $0x64] sm:$0xf0] }
  0x1f   : > { %v1123_v28 = vld [vmem:[%s1313_s30 + $0xe0] sm:$0xf]  ;;  %v1077_v33 = vld [vmem:[%s1313_s30 + $0x88] sm:$0xf0]  ;;  %v1067_v36 = vld [vmem:[%s1313_s30 + $0x70] sm:$0xf] }
  0x20   : > { %556 = vmatpush.bf16.msra.mxu0 %v1226_v12  ;;  %1238 = vmatpush.bf16.msra.mxu2 %v1226_v12  ;;  %v1061_v12 = vld [vmem:[%s1313_s30 + $0x68] sm:$0xf0]  ;;  %v1223_v39 = vld [vmem:[%s1313_s30 + $0xf4] sm:$0xf0]  ;;  %v1416_v45 = vld [vmem:[%s1609_s2] ss:$0 sm:$0xff] }
  0x21   : > { %1174 = vmatmul.msk.bf16.gmra.mxu1 %vm502_vm0, %v1024_v15  ;;  %v1064_v13 = vor.u32 %v1204_v11, %v1061_v12  ;;  %v1133_v15 = vld [vmem:[%s1313_s30 + $0xf8] sm:$0xf0]  ;;  %v1427_v48 = vld [vmem:[%s1610_s3] ss:$0 sm:$0xff]  ;;  %v803_v7 = vld [vmem:[%s1422_s23 + $0x10] sm:$0xff] }
  0x22   : > { %1183 = vmatmul.msk.bf16.gmra.mxu3 %vm502_vm0, %v1096_v19  ;;  %v1115_v19 = vld [vmem:[%s1313_s30 + $0xd0] sm:$0xf]  ;;  %v801_v51 = vld [vmem:[%s1422_s23] sm:$0xff] }
  0x23   : > { %v819_v17 = vld [vmem:[%s1422_s23 + $0x90] sm:$0xff] }
  0x24   : > { %557 = vmatpush.bf16.msra.mxu0 %v1225_v16  ;;  %1239 = vmatpush.bf16.msra.mxu2 %v1225_v16  ;;  %v1136_v16 = vor.u32 %v1222_v14, %v1133_v15 }
  0x28   : > { %558 = vmatpush.bf16.msra.mxu0 %v1224_v20  ;;  %1240 = vmatpush.bf16.msra.mxu2 %v1224_v20  ;;  %v1219_v20 = vld [vmem:[%s1313_s30 + $0xd4] sm:$0xf0] }
  0x29   : > { %v1116_v22 = vor.u32 %v1219_v20, %v1115_v19 }
  0x2b   : > { %559 = vmatmul.bf16.vlgmr.msra.gmra.mxu0 %v1012_v25  ;;  %599 = vmatmul.bf16.vlgmr.msra.gmra.mxu2 %v1076_v26  ;;  %v1072_v25 = vor.u32 %v1206_v23, %v1069_v24  ;;  %v1059_v26 = vld [vmem:[%s1313_s30 + $0x60] sm:$0xf] }
  0x2c   : > { %v1060_v30 = vor.u32 %v1205_v27, %v1059_v26 }
  0x31   : > { %1175 = vmatmul.msk.bf16.gmra.mxu1 %vm502_vm0, %v1032_v29  ;;  %v1221_v29 = vld [vmem:[%s1313_s30 + $0xe4] sm:$0xf0] }
  0x32   : > { %1184 = vmatmul.msk.bf16.gmra.mxu3 %vm502_vm0, %v1104_v32  ;;  %v1124_v31 = vor.u32 %v1221_v29, %v1123_v28  ;;  %v1208_v32 = vld [vmem:[%s1313_s30 + $0x84] sm:$0xf] }
  0x33   : > { %v1080_v34 = vor.u32 %v1208_v32, %v1077_v33  ;;  %v820_v33 = vld [vmem:[%s1422_s23 + $0x98] sm:$0xff] }
  0x3b   : > { %564 = vmatmul.bf16.gmra.mxu0 %v1020_v37  ;;  %604 = vmatmul.bf16.gmra.mxu2 %v1084_v38  ;;  %v1207_v37 = vld [vmem:[%s1313_s30 + $0x74] sm:$0xf0]  ;;  %v1131_v38 = vld [vmem:[%s1313_s30 + $0xf0] sm:$0xf] }
  0x3c   : > { %v1068_v40 = vor.u32 %v1207_v37, %v1067_v36  ;;  %v805_v36 = vld [vmem:[%s1422_s23 + $0x20] sm:$0xff] }
  0x41   : > { %1176 = vmatmul.msk.bf16.gmra.mxu1 %vm502_vm0, %v1040_v41  ;;  %v1132_v41 = vor.u32 %v1223_v39, %v1131_v38 }
  0x42   : > { %1185 = vmatmul.msk.bf16.gmra.mxu3 %vm502_vm0, %v1112_v44 }
  0x4b   : > { %569 = vmatmul.bf16.gmra.mxu0 %v1028_v49  ;;  %609 = vmatmul.bf16.gmra.mxu2 %v1092_v50 }
  0x51   : > { %1177 = vmatmul.msk.bf16.gmra.mxu1 %vm502_vm0, %v1048_v53 }
  0x52   : > { %1186 = vmatmul.msk.bf16.gmra.mxu3 %vm502_vm0, %v1120_v56 }
  0x5b   : > { %574 = vmatmul.bf16.gmra.mxu0 %v1036_v61  ;;  %614 = vmatmul.bf16.gmra.mxu2 %v1100_v62  ;;  %v802_v61 = vld [vmem:[%s1422_s23 + $0x8] sm:$0xff] }
  0x61   : > { %1178 = vmatmul.msk.bf16.gmra.mxu1 %vm502_vm0, %v1056_v1 }
  0x62   : > { %1187 = vmatmul.msk.bf16.gmra.mxu3 %vm502_vm0, %v1128_v4 }
  0x6b   : > { %579 = vmatmul.bf16.gmra.mxu0 %v1044_v9  ;;  %619 = vmatmul.bf16.gmra.mxu2 %v1108_v10 }
  0x71   : > { %1179 = vmatmul.msk.bf16.gmra.mxu1 %vm502_vm0, %v1064_v13 }
  0x72   : > { %1188 = vmatmul.msk.bf16.gmra.mxu3 %vm502_vm0, %v1136_v16 }
  0x7b   : > { %584 = vmatmul.bf16.gmra.mxu0 %v1052_v21  ;;  %624 = vmatmul.bf16.gmra.mxu2 %v1116_v22  ;;  %v804_v21 = vld [vmem:[%s1422_s23 + $0x18] sm:$0xff] }
  0x81   : > { %1180 = vmatmul.msk.bf16.gmra.mxu1 %vm502_vm0, %v1072_v25 }
  0x8b   : > { %589 = vmatmul.bf16.gmra.mxu0 %v1060_v30  ;;  %629 = vmatmul.bf16.gmra.mxu2 %v1124_v31 }
  0x8e   : > { %v649_v35 = vpop.f32.mrf.mxu1 }
  0x91   : > { %1181 = vmatmul.msk.bf16.gmra.mxu1 %vm502_vm0, %v1080_v34 }
  0x95   : > { %v694_v44 = vpop.f32.mrf.mxu3 }
  0x96   : > { %v651_v42 = vpop.f32.mrf.mxu1 }
  0x9b   : > { %594 = vmatmul.bf16.gmra.mxu0 %v1068_v40  ;;  %634 = vmatmul.bf16.gmra.mxu2 %v1132_v41 }
  0x9d   : > { %v696_v55 = vpop.f32.mrf.mxu3 }
  0x9e   : > { %v654_v43 = vpop.f32.mrf.mxu1 }
  0xa5   : > { %v699_v5 = vpop.f32.mrf.mxu3 }
  0xa6   : > { %v656_v49 = vpop.f32.mrf.mxu1 }
  0xa8   : > { %v560_v46 = vpop.f32.mrf.mxu0 }
  0xa9   : > { %v650_v47 = vadd.f32 %v649_v35, %v560_v46 }
  0xab   : > { %v733_v50 = vmul.f32 %v1416_v45, %v650_v47 }
  0xad   : > { %v769_v52 = vadd.f32 %v1427_v48, %v733_v50  ;;  %v701_v19 = vpop.f32.mrf.mxu3 }
  0xae   : > { %v1432_v54 = vpop.f32.mrf.mxu2  ;;  %v659_v59 = vpop.f32.mrf.mxu1 }
  0xaf   : > { %v833_v53 = vadd.f32 %v801_v51, %v769_v52  ;;  %v821_v51 = vld [vmem:[%s1422_s23 + $0xa0] sm:$0xff] }
  0xb0   : > { %v562_v56 = vpop.f32.mrf.mxu0 }
  0xb1   : > { %v865_v57 = vmax.f32 %v833_v53, 0.0  ;;  %v652_v58 = vadd.f32 %v651_v42, %v562_v56 }
  0xb3   : > { %897 = vst.msk [vmem:[%s1438_s29] sm:$0xff] %vm502_vm0, %v865_v57  ;;  %v734_v60 = vmul.f32 %v1416_v45, %v652_v58 }
  0xb5   : > { %v770_v62 = vadd.f32 %v1427_v48, %v734_v60  ;;  %v704_v38 = vpop.f32.mrf.mxu3 }
  0xb6   : > { %v1445_v0 = vpop.f32.mrf.mxu2  ;;  %v661_v4 = vpop.f32.mrf.mxu1 }
  0xb7   : > { %v834_v63 = vadd.f32 %v802_v61, %v770_v62 }
  0xb8   : > { %v565_v1 = vpop.f32.mrf.mxu0 }
  0xb9   : > { %v866_v2 = vmax.f32 %v834_v63, 0.0  ;;  %v655_v3 = vadd.f32 %v654_v43, %v565_v1 }
  0xbb   : > { %898 = vst.msk [vmem:[%s1438_s29 + $0x8] sm:$0xff] %vm502_vm0, %v866_v2  ;;  %v735_v6 = vmul.f32 %v1416_v45, %v655_v3 }
  0xbd   : > { %v771_v8 = vadd.f32 %v1427_v48, %v735_v6  ;;  %v706_v60 = vpop.f32.mrf.mxu3 }
  0xbe   : > { %v605_v10 = vpop.f32.mrf.mxu2  ;;  %v664_v15 = vpop.f32.mrf.mxu1 }
  0xbf   : > { %v835_v9 = vadd.f32 %v803_v7, %v771_v8  ;;  %v695_v11 = vadd.f32 %v694_v44, %v605_v10  ;;  %v807_v8 = vld [vmem:[%s1422_s23 + $0x30] sm:$0xff] }
  0xc0   : > { %v567_v12 = vpop.f32.mrf.mxu0 }
  0xc1   : > { %v867_v13 = vmax.f32 %v835_v9, 0.0  ;;  %v657_v14 = vadd.f32 %v656_v49, %v567_v12  ;;  %v751_v16 = vmul.f32 %v1416_v45, %v695_v11 }
  0xc3   : > { %899 = vst.msk [vmem:[%s1438_s29 + $0x10] sm:$0xff] %vm502_vm0, %v867_v13  ;;  %v736_v18 = vmul.f32 %v1416_v45, %v657_v14  ;;  %v787_v20 = vadd.f32 %v1427_v48, %v751_v16 }
  0xc5   : > { %v772_v22 = vadd.f32 %v1427_v48, %v736_v18  ;;  %v851_v23 = vadd.f32 %v819_v17, %v787_v20 }
  0xc6   : > { %v607_v25 = vpop.f32.mrf.mxu2  ;;  %v666_v31 = vpop.f32.mrf.mxu1 }
  0xc7   : > { %v836_v24 = vadd.f32 %v804_v21, %v772_v22  ;;  %v883_v26 = vmax.f32 %v851_v23, 0.0  ;;  %v697_v27 = vadd.f32 %v696_v55, %v607_v25  ;;  %v806_v55 = vld [vmem:[%s1422_s23 + $0x28] sm:$0xff]  ;;  %v823_v21 = vld [vmem:[%s1422_s23 + $0xb0] sm:$0xff] }
  0xc8   : > { %v570_v28 = vpop.f32.mrf.mxu0 }
  0xc9   : > { %v868_v29 = vmax.f32 %v836_v24, 0.0  ;;  %v660_v30 = vadd.f32 %v659_v59, %v570_v28  ;;  %915 = vst.msk [vmem:[%s1438_s29 + $0x90] sm:$0xff] %vm502_vm0, %v883_v26  ;;  %v752_v32 = vmul.f32 %v1416_v45, %v697_v27  ;;  %v808_v24 = vld [vmem:[%s1422_s23 + $0x38] sm:$0xff] }
  0xcb   : > { %900 = vst.msk [vmem:[%s1438_s29 + $0x18] sm:$0xff] %vm502_vm0, %v868_v29  ;;  %v737_v34 = vmul.f32 %v1416_v45, %v660_v30  ;;  %v788_v35 = vadd.f32 %v1427_v48, %v752_v32 }
  0xcd   : > { %v773_v37 = vadd.f32 %v1427_v48, %v737_v34  ;;  %v852_v39 = vadd.f32 %v820_v33, %v788_v35 }
  0xce   : > { %v610_v41 = vpop.f32.mrf.mxu2  ;;  %v669_v49 = vpop.f32.mrf.mxu1 }
  0xcf   : > { %v837_v40 = vadd.f32 %v805_v36, %v773_v37  ;;  %v884_v42 = vmax.f32 %v852_v39, 0.0  ;;  %v700_v43 = vadd.f32 %v699_v5, %v610_v41  ;;  %v822_v5 = vld [vmem:[%s1422_s23 + $0xa8] sm:$0xff]  ;;  %v824_v36 = vld [vmem:[%s1422_s23 + $0xb8] sm:$0xff] }
  0xd0   : > { %v572_v44 = vpop.f32.mrf.mxu0 }
  0xd1   : > { %v869_v46 = vmax.f32 %v837_v40, 0.0  ;;  %v662_v47 = vadd.f32 %v661_v4, %v572_v44  ;;  %916 = vst.msk [vmem:[%s1438_s29 + $0x98] sm:$0xff] %vm502_vm0, %v884_v42  ;;  %v753_v50 = vmul.f32 %v1416_v45, %v700_v43  ;;  %v809_v40 = vld [vmem:[%s1422_s23 + $0x40] sm:$0xff] }
  0xd3   : > { %901 = vst.msk [vmem:[%s1438_s29 + $0x20] sm:$0xff] %vm502_vm0, %v869_v46  ;;  %v738_v52 = vmul.f32 %v1416_v45, %v662_v47  ;;  %v789_v53 = vadd.f32 %v1427_v48, %v753_v50 }
  0xd5   : > { %v774_v56 = vadd.f32 %v1427_v48, %v738_v52  ;;  %v853_v57 = vadd.f32 %v821_v51, %v789_v53 }
  0xd6   : > { %v612_v59 = vpop.f32.mrf.mxu2  ;;  %v671_v3 = vpop.f32.mrf.mxu1 }
  0xd7   : > { %v838_v58 = vadd.f32 %v806_v55, %v774_v56  ;;  %v885_v61 = vmax.f32 %v853_v57, 0.0  ;;  %v702_v62 = vadd.f32 %v701_v19, %v612_v59  ;;  %v709_v19 = vpop.f32.mrf.mxu3  ;;  %v825_v55 = vld [vmem:[%s1422_s23 + $0xc0] sm:$0xff] }
  0xd8   : > { %v575_v63 = vpop.f32.mrf.mxu0 }
  0xd9   : > { %v870_v1 = vmax.f32 %v838_v58, 0.0  ;;  %v665_v2 = vadd.f32 %v664_v15, %v575_v63  ;;  %917 = vst.msk [vmem:[%s1438_s29 + $0xa0] sm:$0xff] %vm502_vm0, %v885_v61  ;;  %v754_v4 = vmul.f32 %v1416_v45, %v702_v62  ;;  %v810_v58 = vld [vmem:[%s1422_s23 + $0x48] sm:$0xff] }
  0xdb   : > { %902 = vst.msk [vmem:[%s1438_s29 + $0x28] sm:$0xff] %vm502_vm0, %v870_v1  ;;  %v739_v6 = vmul.f32 %v1416_v45, %v665_v2  ;;  %v790_v7 = vadd.f32 %v1427_v48, %v754_v4 }
  0xdd   : > { %v775_v9 = vadd.f32 %v1427_v48, %v739_v6  ;;  %v854_v10 = vadd.f32 %v822_v5, %v790_v7 }
  0xde   : > { %v615_v12 = vpop.f32.mrf.mxu2  ;;  %v674_v18 = vpop.f32.mrf.mxu1 }
  0xdf   : > { %v839_v11 = vadd.f32 %v807_v8, %v775_v9  ;;  %v886_v13 = vmax.f32 %v854_v10, 0.0  ;;  %v705_v14 = vadd.f32 %v704_v38, %v615_v12  ;;  %v711_v38 = vpop.f32.mrf.mxu3  ;;  %v826_v8 = vld [vmem:[%s1422_s23 + $0xc8] sm:$0xff] }
  0xe0   : > { %v577_v15 = vpop.f32.mrf.mxu0 }
  0xe1   : > { %v871_v16 = vmax.f32 %v839_v11, 0.0  ;;  %v667_v17 = vadd.f32 %v666_v31, %v577_v15  ;;  %918 = vst.msk [vmem:[%s1438_s29 + $0xa8] sm:$0xff] %vm502_vm0, %v886_v13  ;;  %v755_v20 = vmul.f32 %v1416_v45, %v705_v14  ;;  %v811_v11 = vld [vmem:[%s1422_s23 + $0x50] sm:$0xff] }
  0xe3   : > { %903 = vst.msk [vmem:[%s1438_s29 + $0x30] sm:$0xff] %vm502_vm0, %v871_v16  ;;  %v740_v22 = vmul.f32 %v1416_v45, %v667_v17  ;;  %v791_v23 = vadd.f32 %v1427_v48, %v755_v20 }
  0xe5   : > { %v776_v25 = vadd.f32 %v1427_v48, %v740_v22  ;;  %v855_v26 = vadd.f32 %v823_v21, %v791_v23 }
  0xe6   : > { %v617_v28 = vpop.f32.mrf.mxu2  ;;  %v676_v34 = vpop.f32.mrf.mxu1 }
  0xe7   : > { %v840_v27 = vadd.f32 %v808_v24, %v776_v25  ;;  %v887_v29 = vmax.f32 %v855_v26, 0.0  ;;  %v707_v30 = vadd.f32 %v706_v60, %v617_v28  ;;  %v714_v60 = vpop.f32.mrf.mxu3  ;;  %v827_v24 = vld [vmem:[%s1422_s23 + $0xd0] sm:$0xff] }
  0xe8   : > { %v580_v31 = vpop.f32.mrf.mxu0 }
  0xe9   : > { %v872_v32 = vmax.f32 %v840_v27, 0.0  ;;  %v670_v33 = vadd.f32 %v669_v49, %v580_v31  ;;  %919 = vst.msk [vmem:[%s1438_s29 + $0xb0] sm:$0xff] %vm502_vm0, %v887_v29  ;;  %v756_v35 = vmul.f32 %v1416_v45, %v707_v30  ;;  %v812_v27 = vld [vmem:[%s1422_s23 + $0x58] sm:$0xff] }
  0xeb   : > { %904 = vst.msk [vmem:[%s1438_s29 + $0x38] sm:$0xff] %vm502_vm0, %v872_v32  ;;  %v741_v37 = vmul.f32 %v1416_v45, %v670_v33  ;;  %v792_v39 = vadd.f32 %v1427_v48, %v756_v35 }
  0xed   : > { %v777_v41 = vadd.f32 %v1427_v48, %v741_v37  ;;  %v856_v42 = vadd.f32 %v824_v36, %v792_v39 }
  0xee   : > { %v620_v44 = vpop.f32.mrf.mxu2  ;;  %v679_v52 = vpop.f32.mrf.mxu1 }
  0xef   : > { %v841_v43 = vadd.f32 %v809_v40, %v777_v41  ;;  %v888_v46 = vmax.f32 %v856_v42, 0.0  ;;  %v710_v47 = vadd.f32 %v709_v19, %v620_v44  ;;  %v716_v16 = vpop.f32.mrf.mxu3  ;;  %v828_v40 = vld [vmem:[%s1422_s23 + $0xd8] sm:$0xff] }
  0xf0   : > { %v582_v49 = vpop.f32.mrf.mxu0 }
  0xf1   : > { %v873_v50 = vmax.f32 %v841_v43, 0.0  ;;  %v672_v51 = vadd.f32 %v671_v3, %v582_v49  ;;  %920 = vst.msk [vmem:[%s1438_s29 + $0xb8] sm:$0xff] %vm502_vm0, %v888_v46  ;;  %v757_v53 = vmul.f32 %v1416_v45, %v710_v47  ;;  %v813_v43 = vld [vmem:[%s1422_s23 + $0x60] sm:$0xff] }
  0xf3   : > { %905 = vst.msk [vmem:[%s1438_s29 + $0x40] sm:$0xff] %vm502_vm0, %v873_v50  ;;  %v742_v56 = vmul.f32 %v1416_v45, %v672_v51  ;;  %v793_v57 = vadd.f32 %v1427_v48, %v757_v53 }
  0xf5   : > { %v778_v59 = vadd.f32 %v1427_v48, %v742_v56  ;;  %v857_v61 = vadd.f32 %v825_v55, %v793_v57 }
  0xf6   : > { %v622_v63 = vpop.f32.mrf.mxu2  ;;  %v681_v6 = vpop.f32.mrf.mxu1 }
  0xf7   : > { %v842_v62 = vadd.f32 %v810_v58, %v778_v59  ;;  %v889_v1 = vmax.f32 %v857_v61, 0.0  ;;  %v712_v2 = vadd.f32 %v711_v38, %v622_v63  ;;  %v719_v36 = vpop.f32.mrf.mxu3  ;;  %v829_v59 = vld [vmem:[%s1422_s23 + $0xe0] sm:$0xff]  ;;  %v814_v63 = vld [vmem:[%s1422_s23 + $0x68] sm:$0xff] }
  0xf8   : > { %v585_v3 = vpop.f32.mrf.mxu0 }
  0xf9   : > { %v874_v4 = vmax.f32 %v842_v62, 0.0  ;;  %v675_v5 = vadd.f32 %v674_v18, %v585_v3  ;;  %921 = vst.msk [vmem:[%s1438_s29 + $0xc0] sm:$0xff] %vm502_vm0, %v889_v1  ;;  %v758_v7 = vmul.f32 %v1416_v45, %v712_v2  ;;  %v817_v3 = vld [vmem:[%s1422_s23 + $0x80] sm:$0xff] }
  0xfb   : > { %906 = vst.msk [vmem:[%s1438_s29 + $0x48] sm:$0xff] %vm502_vm0, %v874_v4  ;;  %v743_v9 = vmul.f32 %v1416_v45, %v675_v5  ;;  %v794_v10 = vadd.f32 %v1427_v48, %v758_v7 }
  0xfd   : > { %v779_v12 = vadd.f32 %v1427_v48, %v743_v9  ;;  %v858_v13 = vadd.f32 %v826_v8, %v794_v10 }
  0xfe   : > { %v625_v15 = vpop.f32.mrf.mxu2  ;;  %v684_v22 = vpop.f32.mrf.mxu1 }
  0xff   : > { %v843_v14 = vadd.f32 %v811_v11, %v779_v12  ;;  %v890_v17 = vmax.f32 %v858_v13, 0.0  ;;  %v715_v18 = vadd.f32 %v714_v60, %v625_v15  ;;  %v721_v60 = vpop.f32.mrf.mxu3 }
 0x100   : > { %v587_v19 = vpop.f32.mrf.mxu0 }
 0x101   : > { %v875_v20 = vmax.f32 %v843_v14, 0.0  ;;  %v677_v21 = vadd.f32 %v676_v34, %v587_v19  ;;  %922 = vst.msk [vmem:[%s1438_s29 + $0xc8] sm:$0xff] %vm502_vm0, %v890_v17  ;;  %v759_v23 = vmul.f32 %v1416_v45, %v715_v18  ;;  %v830_v17 = vld [vmem:[%s1422_s23 + $0xe8] sm:$0xff] }
 0x103   : > { %907 = vst.msk [vmem:[%s1438_s29 + $0x50] sm:$0xff] %vm502_vm0, %v875_v20  ;;  %v744_v25 = vmul.f32 %v1416_v45, %v677_v21  ;;  %v795_v26 = vadd.f32 %v1427_v48, %v759_v23  ;;  %v815_v20 = vld [vmem:[%s1422_s23 + $0x70] sm:$0xff] }
 0x105   : > { %v780_v28 = vadd.f32 %v1427_v48, %v744_v25  ;;  %v859_v29 = vadd.f32 %v827_v24, %v795_v26  ;;  %v818_v24 = vld [vmem:[%s1422_s23 + $0x88] sm:$0xff] }
 0x106   : > { %v627_v31 = vpop.f32.mrf.mxu2  ;;  %v1540_v38 = vpop.f32.mrf.mxu1 }
 0x107   : > { %v844_v30 = vadd.f32 %v812_v27, %v780_v28  ;;  %v891_v32 = vmax.f32 %v859_v29, 0.0  ;;  %v717_v33 = vadd.f32 %v716_v16, %v627_v31 }
 0x108   : > { %v590_v34 = vpop.f32.mrf.mxu0 }
 0x109   : > { %v876_v35 = vmax.f32 %v844_v30, 0.0  ;;  %v680_v37 = vadd.f32 %v679_v52, %v590_v34  ;;  %923 = vst.msk [vmem:[%s1438_s29 + $0xd0] sm:$0xff] %vm502_vm0, %v891_v32  ;;  %v760_v39 = vmul.f32 %v1416_v45, %v717_v33 }
 0x10b   : > { %908 = vst.msk [vmem:[%s1438_s29 + $0x58] sm:$0xff] %vm502_vm0, %v876_v35  ;;  %v745_v41 = vmul.f32 %v1416_v45, %v680_v37  ;;  %v796_v42 = vadd.f32 %v1427_v48, %v760_v39 }
 0x10d   : > { %v781_v44 = vadd.f32 %v1427_v48, %v745_v41  ;;  %v860_v46 = vadd.f32 %v828_v40, %v796_v42  ;;  %v816_v40 = vld [vmem:[%s1422_s23 + $0x78] sm:$0xff] }
 0x10e   : > { %v630_v49 = vpop.f32.mrf.mxu2  ;;  %v689_v56 = vpop.f32.mrf.mxu1 }
 0x10f   : > { %v845_v47 = vadd.f32 %v813_v43, %v781_v44  ;;  %v892_v50 = vmax.f32 %v860_v46, 0.0  ;;  %v720_v51 = vadd.f32 %v719_v36, %v630_v49  ;;  %v690_v58 = vadd.f32 %v689_v56, %v1432_v54  ;;  %v831_v36 = vld [vmem:[%s1422_s23 + $0xf0] sm:$0xff] }
 0x110   : > { %v592_v52 = vpop.f32.mrf.mxu0 }
 0x111   : > { %v877_v53 = vmax.f32 %v845_v47, 0.0  ;;  %v682_v55 = vadd.f32 %v681_v6, %v592_v52  ;;  %924 = vst.msk [vmem:[%s1438_s29 + $0xd8] sm:$0xff] %vm502_vm0, %v892_v50  ;;  %v761_v57 = vmul.f32 %v1416_v45, %v720_v51  ;;  %v749_v1 = vmul.f32 %v1416_v45, %v690_v58  ;;  %v832_v51 = vld [vmem:[%s1422_s23 + $0xf8] sm:$0xff] }
 0x113   : > { %909 = vst.msk [vmem:[%s1438_s29 + $0x60] sm:$0xff] %vm502_vm0, %v877_v53  ;;  %v746_v61 = vmul.f32 %v1416_v45, %v682_v55  ;;  %v797_v62 = vadd.f32 %v1427_v48, %v761_v57  ;;  %v785_v54 = vadd.f32 %v1427_v48, %v749_v1 }
 0x115   : > { %v782_v2 = vadd.f32 %v1427_v48, %v746_v61  ;;  %v861_v4 = vadd.f32 %v829_v59, %v797_v62  ;;  %v849_v8 = vadd.f32 %v817_v3, %v785_v54 }
 0x116   : > { %v632_v6 = vpop.f32.mrf.mxu2  ;;  %v691_v13 = vpop.f32.mrf.mxu1 }
 0x117   : > { %v846_v5 = vadd.f32 %v814_v63, %v782_v2  ;;  %v893_v7 = vmax.f32 %v861_v4, 0.0  ;;  %v722_v9 = vadd.f32 %v721_v60, %v632_v6  ;;  %v881_v14 = vmax.f32 %v849_v8, 0.0 }
 0x118   : > { %v595_v10 = vpop.f32.mrf.mxu0  ;;  %v692_v16 = vadd.f32 %v691_v13, %v1445_v0 }
 0x119   : > { %v878_v11 = vmax.f32 %v846_v5, 0.0  ;;  %v685_v12 = vadd.f32 %v684_v22, %v595_v10  ;;  %925 = vst.msk [vmem:[%s1438_s29 + $0xe0] sm:$0xff] %vm502_vm0, %v893_v7  ;;  %v762_v15 = vmul.f32 %v1416_v45, %v722_v9  ;;  %v724_v22 = vpop.f32.mrf.mxu3 }
 0x11a   : > { %913 = vst.msk [vmem:[%s1438_s29 + $0x80] sm:$0xff] %vm502_vm0, %v881_v14  ;;  %v750_v21 = vmul.f32 %v1416_v45, %v692_v16 }
 0x11b   : > { %910 = vst.msk [vmem:[%s1438_s29 + $0x68] sm:$0xff] %vm502_vm0, %v878_v11  ;;  %v747_v18 = vmul.f32 %v1416_v45, %v685_v12  ;;  %v798_v19 = vadd.f32 %v1427_v48, %v762_v15 }
 0x11c   : > { %v786_v25 = vadd.f32 %v1427_v48, %v750_v21 }
 0x11d   : > { %v783_v23 = vadd.f32 %v1427_v48, %v747_v18  ;;  %v862_v0 = vadd.f32 %v830_v17, %v798_v19 }
 0x11e   : > { %v635_v27 = vpop.f32.mrf.mxu2  ;;  %v850_v29 = vadd.f32 %v818_v24, %v786_v25 }
 0x11f   : > { %v847_v26 = vadd.f32 %v815_v20, %v783_v23  ;;  %v894_v28 = vmax.f32 %v862_v0, 0.0  ;;  %v725_v30 = vadd.f32 %v724_v22, %v635_v27 }
 0x120   : > { %v597_v31 = vpop.f32.mrf.mxu0  ;;  %v882_v34 = vmax.f32 %v850_v29, 0.0 }
 0x121   : > { %v879_v32 = vmax.f32 %v847_v26, 0.0  ;;  %v687_v33 = vadd.f32 %v1540_v38, %v597_v31  ;;  %926 = vst.msk [vmem:[%s1438_s29 + $0xe8] sm:$0xff] %vm502_vm0, %v894_v28  ;;  %v763_v35 = vmul.f32 %v1416_v45, %v725_v30  ;;  %v726_v42 = vpop.f32.mrf.mxu3 }
 0x122   : > { %914 = vst.msk [vmem:[%s1438_s29 + $0x88] sm:$0xff] %vm502_vm0, %v882_v34 }
 0x123   : > { %911 = vst.msk [vmem:[%s1438_s29 + $0x70] sm:$0xff] %vm502_vm0, %v879_v32  ;;  %v748_v37 = vmul.f32 %v1416_v45, %v687_v33  ;;  %v799_v39 = vadd.f32 %v1427_v48, %v763_v35 }
 0x125   : > { %v784_v38 = vadd.f32 %v1427_v48, %v748_v37  ;;  %v863_v41 = vadd.f32 %v831_v36, %v799_v39 }
 0x126   : > { %v637_v44 = vpop.f32.mrf.mxu2 }
 0x127   : > { %v848_v43 = vadd.f32 %v816_v40, %v784_v38  ;;  %v895_v46 = vmax.f32 %v863_v41, 0.0  ;;  %v727_v47 = vadd.f32 %v726_v42, %v637_v44 }
 0x129   : > { %v880_v49 = vmax.f32 %v848_v43, 0.0  ;;  %927 = vst.msk [vmem:[%s1438_s29 + $0xf0] sm:$0xff] %vm502_vm0, %v895_v46  ;;  %v764_v50 = vmul.f32 %v1416_v45, %v727_v47 }
 0x12b   : > { %912 = vst.msk [vmem:[%s1438_s29 + $0x78] sm:$0xff] %vm502_vm0, %v880_v49  ;;  %v800_v52 = vadd.f32 %v1427_v48, %v764_v50 }
 0x12d   : > { %v864_v53 = vadd.f32 %v832_v51, %v800_v52 }
 0x12f   : > { %v896_v55 = vmax.f32 %v864_v53, 0.0 }
 0x131   : > { %928 = vst.msk [vmem:[%s1438_s29 + $0xf8] sm:$0xff] %vm502_vm0, %v896_v55 }
 0x132 PF: > { %s15_s18 = sadd.s32 1, %s1258_s18  }
 0x133   : > { %p12_p4 = scmp.ge.s32.totalorder %s15_s18, 4  }
 0x135   :  { %14 = sbr.rel (!%p12_p4) target bundleno = 1 (0x1), region = 73 }

// kernel: _lambda_.18
= control target key start
LH: loop header
LB: loop body
LE: loop exit
PB: predicated region body
PF: predicated region fallthrough
CT: control target
= control target key end

     0   :  { %vm178_vm0 = vcmask 130048   ;;  %vm373_vm1 = vcmask 257024   ;;  %s803_s1 = inlined_call_operand.vmem [shape: bf16[144,32], index: 1, kind: input, shape index: {}]   ;;  %s804_s0 = inlined_call_operand.vmem [shape: bf16[128,144], index: 0, kind: input, shape index: {}]   ;;  %s805_s2 = inlined_call_operand.vmem [shape: f32[1,32], index: 2, kind: input, shape index: {}]   ;;  %s806_s3 = inlined_call_operand.vmem [shape: f32[1,32], index: 3, kind: input, shape index: {}]   ;;  %s807_s4 = inlined_call_operand.vmem [shape: bf16[128,32], index: 4, kind: output, shape index: {}]  }
   0x1   :  { %v525_v0 = vld [vmem:[%s803_s1 + $0x38] sm:$0xff]  ;;  %v526_v1 = vld [vmem:[%s803_s1 + $0x40] sm:$0xff]  ;;  %v398_v3 = vld [vmem:[%s804_s0 + $0x8] sm:$0xf0] }
   0x2   :  { %v502_v2 = vld [vmem:[%s804_s0 + $0x4] sm:$0xf]  ;;  %203 = vmatpush.bf16.msra.mxu0 %v525_v0  ;;  %527 = vmatpush.bf16.msra.mxu2 %v525_v0  ;;  %v524_v5 = vld [vmem:[%s803_s1 + $0x30] sm:$0xff]  ;;  %v523_v6 = vld [vmem:[%s803_s1 + $0x28] sm:$0xff] }
   0x3   :  { %v401_v4 = vor.u32 %v502_v2, %v398_v3  ;;  %259 = vmatpush.bf16.msra.mxu1 %v526_v1  ;;  %535 = vmatpush.bf16.msra.mxu3 %v526_v1  ;;  %v512_v7 = vld [vmem:[%s804_s0 + $0x54] sm:$0xf]  ;;  %v438_v8 = vld [vmem:[%s804_s0 + $0x58] sm:$0xf0]  ;;  %v522_v10 = vld [vmem:[%s803_s1 + $0x20] sm:$0xff] }
   0x4   :  { %v441_v9 = vor.u32 %v512_v7, %v438_v8  ;;  %v521_v11 = vld [vmem:[%s803_s1 + $0x18] sm:$0xff]  ;;  %v504_v12 = vld [vmem:[%s804_s0 + $0x14] sm:$0xf]  ;;  %v519_v16 = vld [vmem:[%s803_s1 + $0x8] sm:$0xff] }
   0x5   :  { %v406_v13 = vld [vmem:[%s804_s0 + $0x18] sm:$0xf0]  ;;  %v520_v15 = vld [vmem:[%s803_s1 + $0x10] sm:$0xff]  ;;  %v514_v17 = vld [vmem:[%s804_s0 + $0x64] sm:$0xf] }
   0x6   :  { %494 = vmatmul.msk.bf16.vlgmr.msra.gmra.mxu1 %vm178_vm0, %v401_v4  ;;  %204 = vmatpush.bf16.msra.mxu0 %v524_v5  ;;  %v409_v14 = vor.u32 %v504_v12, %v406_v13  ;;  %v446_v18 = vld [vmem:[%s804_s0 + $0x68] sm:$0xf0]  ;;  %v518_v20 = vld [vmem:[%s803_s1] sm:$0xff]  ;;  %v503_v22 = vld [vmem:[%s804_s0 + $0x4] sm:$0xf0] }
   0x7   :  { %528 = vmatpush.bf16.msra.mxu2 %v524_v5  ;;  %499 = vmatmul.msk.bf16.vlgmr.msra.gmra.mxu3 %vm178_vm0, %v441_v9  ;;  %v449_v19 = vor.u32 %v514_v17, %v446_v18  ;;  %v396_v21 = vld [vmem:[%s804_s0] sm:$0xf]  ;;  %v511_v24 = vld [vmem:[%s804_s0 + $0x44] sm:$0xf0]  ;;  %v506_v27 = vld [vmem:[%s804_s0 + $0x24] sm:$0xf] }
   0x8   :  { %v428_v23 = vld [vmem:[%s804_s0 + $0x40] sm:$0xf]  ;;  %v397_v25 = vor.u32 %v503_v22, %v396_v21  ;;  %v414_v28 = vld [vmem:[%s804_s0 + $0x28] sm:$0xf0]  ;;  %v516_v30 = vld [vmem:[%s804_s0 + $0x74] sm:$0xf] }
   0x9   :  { %v429_v26 = vor.u32 %v511_v24, %v428_v23  ;;  %v417_v29 = vor.u32 %v506_v27, %v414_v28  ;;  %v454_v31 = vld [vmem:[%s804_s0 + $0x78] sm:$0xf0]  ;;  %v404_v33 = vld [vmem:[%s804_s0 + $0x10] sm:$0xf]  ;;  %v505_v34 = vld [vmem:[%s804_s0 + $0x14] sm:$0xf0] }
   0xa   :  { %205 = vmatpush.bf16.msra.mxu0 %v523_v6  ;;  %v457_v32 = vor.u32 %v516_v30, %v454_v31  ;;  %v436_v35 = vld [vmem:[%s804_s0 + $0x50] sm:$0xf]  ;;  %v513_v36 = vld [vmem:[%s804_s0 + $0x54] sm:$0xf0]  ;;  %v405_v37 = vor.u32 %v505_v34, %v404_v33  ;;  %v508_v39 = vld [vmem:[%s804_s0 + $0x34] sm:$0xf] }
   0xb   :  { %529 = vmatpush.bf16.msra.mxu2 %v523_v6  ;;  %v437_v38 = vor.u32 %v513_v36, %v436_v35  ;;  %v422_v40 = vld [vmem:[%s804_s0 + $0x38] sm:$0xf0]  ;;  %v412_v42 = vld [vmem:[%s804_s0 + $0x20] sm:$0xf]  ;;  %v507_v43 = vld [vmem:[%s804_s0 + $0x24] sm:$0xf0] }
   0xc   :  { %v425_v41 = vor.u32 %v508_v39, %v422_v40  ;;  %v444_v44 = vld [vmem:[%s804_s0 + $0x60] sm:$0xf]  ;;  %v515_v45 = vld [vmem:[%s804_s0 + $0x64] sm:$0xf0]  ;;  %v413_v46 = vor.u32 %v507_v43, %v412_v42  ;;  %v510_v48 = vld [vmem:[%s804_s0 + $0x44] sm:$0xf] }
   0xd   :  { %v445_v47 = vor.u32 %v515_v45, %v444_v44  ;;  %v430_v49 = vld [vmem:[%s804_s0 + $0x48] sm:$0xf0]  ;;  %v420_v51 = vld [vmem:[%s804_s0 + $0x30] sm:$0xf]  ;;  %v509_v52 = vld [vmem:[%s804_s0 + $0x34] sm:$0xf0] }
   0xe   :  { %206 = vmatpush.bf16.msra.mxu0 %v522_v10  ;;  %v433_v50 = vor.u32 %v510_v48, %v430_v49  ;;  %v452_v53 = vld [vmem:[%s804_s0 + $0x70] sm:$0xf]  ;;  %v517_v54 = vld [vmem:[%s804_s0 + $0x74] sm:$0xf0]  ;;  %v421_v55 = vor.u32 %v509_v52, %v420_v51  ;;  %v697_v61 = vld [vmem:[%s805_s2] ss:$0 sm:$0xff] }
   0xf   :  { %530 = vmatpush.bf16.msra.mxu2 %v522_v10  ;;  %v453_v56 = vor.u32 %v517_v54, %v452_v53  ;;  %v702_v0 = vld [vmem:[%s806_s3] ss:$0 sm:$0xff] }
  0x12   :  { %207 = vmatpush.bf16.msra.mxu0 %v521_v11 }
  0x13   :  { %531 = vmatpush.bf16.msra.mxu2 %v521_v11 }
  0x16   :  { %495 = vmatmul.msk.bf16.gmra.mxu1 %vm178_vm0, %v409_v14  ;;  %208 = vmatpush.bf16.msra.mxu0 %v520_v15 }
  0x17   :  { %532 = vmatpush.bf16.msra.mxu2 %v520_v15  ;;  %500 = vmatmul.msk.bf16.gmra.mxu3 %vm178_vm0, %v449_v19 }
  0x1a   :  { %209 = vmatpush.bf16.msra.mxu0 %v519_v16 }
  0x1b   :  { %533 = vmatpush.bf16.msra.mxu2 %v519_v16 }
  0x1e   :  { %210 = vmatpush.bf16.msra.mxu0 %v518_v20 }
  0x1f   :  { %534 = vmatpush.bf16.msra.mxu2 %v518_v20 }
  0x21   :  { %211 = vmatmul.bf16.vlgmr.msra.gmra.mxu0 %v397_v25 }
  0x22   :  { %231 = vmatmul.bf16.vlgmr.msra.gmra.mxu2 %v429_v26 }
  0x26   :  { %496 = vmatmul.msk.bf16.gmra.mxu1 %vm178_vm0, %v417_v29 }
  0x27   :  { %501 = vmatmul.msk.bf16.gmra.mxu3 %vm178_vm0, %v457_v32 }
  0x31   :  { %216 = vmatmul.bf16.gmra.mxu0 %v405_v37 }
  0x32   :  { %236 = vmatmul.bf16.gmra.mxu2 %v437_v38 }
  0x36   :  { %497 = vmatmul.msk.bf16.gmra.mxu1 %vm178_vm0, %v425_v41 }
  0x41   :  { %221 = vmatmul.bf16.gmra.mxu0 %v413_v46 }
  0x42   :  { %241 = vmatmul.bf16.gmra.mxu2 %v445_v47 }
  0x46   :  { %498 = vmatmul.msk.bf16.gmra.mxu1 %vm178_vm0, %v433_v50 }
  0x51   :  { %226 = vmatmul.bf16.gmra.mxu0 %v421_v55 }
  0x52   :  { %246 = vmatmul.bf16.gmra.mxu2 %v453_v56 }
  0x83   :  { %v261_v57 = vpop.f32.mrf.mxu1 }
  0x8a   :  { %v286_v12 = vpop.f32.mrf.mxu3 }
  0x8b   :  { %v263_v58 = vpop.f32.mrf.mxu1 }
  0x92   :  { %v288_v23 = vpop.f32.mrf.mxu3 }
  0x93   :  { %v266_v59 = vpop.f32.mrf.mxu1 }
  0x9a   :  { %v291_v40 = vpop.f32.mrf.mxu3 }
  0x9b   :  { %v268_v60 = vpop.f32.mrf.mxu1 }
  0x9e   :  { %v212_v62 = vpop.f32.mrf.mxu0 }
  0x9f   :  { %v262_v63 = vadd.f32 %v261_v57, %v212_v62 }
  0xa1   :  { %v305_v1 = vmul.f32 %v697_v61, %v262_v63 }
  0xa3   :  { %v325_v2 = vadd.f32 %v702_v0, %v305_v1  ;;  %v271_v3 = vpop.f32.mrf.mxu1 }
  0xa5   :  { %v341_v4 = vmax.f32 %v325_v2, 0.0  ;;  %v232_v5 = vpop.f32.mrf.mxu2 }
  0xa6   :  { %v214_v6 = vpop.f32.mrf.mxu0 }
  0xa7   :  { %v357_v7 = vpack.c.bf16 %v341_v4, %v341_v4  ;;  %v264_v8 = vadd.f32 %v263_v58, %v214_v6 }
  0xa9   :  { %374 = vst.msk [vmem:[%s807_s4] sm:$0xf] %vm373_vm1, %v357_v7  ;;  %v306_v9 = vmul.f32 %v697_v61, %v264_v8 }
  0xab   :  { %v326_v10 = vadd.f32 %v702_v0, %v306_v9  ;;  %v273_v11 = vpop.f32.mrf.mxu1 }
  0xad   :  { %v342_v13 = vmax.f32 %v326_v10, 0.0  ;;  %v234_v14 = vpop.f32.mrf.mxu2 }
  0xae   :  { %v217_v15 = vpop.f32.mrf.mxu0 }
  0xaf   :  { %v358_v16 = vpack.c.bf16 %v342_v13, %v342_v13  ;;  %v267_v17 = vadd.f32 %v266_v59, %v217_v15  ;;  %v293_v59 = vpop.f32.mrf.mxu3 }
  0xb1   :  { %375 = vst.msk [vmem:[%s807_s4 + $0x4] sm:$0xf] %vm373_vm1, %v358_v16  ;;  %v307_v18 = vmul.f32 %v697_v61, %v267_v17 }
  0xb3   :  { %v327_v19 = vadd.f32 %v702_v0, %v307_v18  ;;  %v276_v20 = vpop.f32.mrf.mxu1 }
  0xb5   :  { %v343_v21 = vmax.f32 %v327_v19, 0.0  ;;  %v237_v22 = vpop.f32.mrf.mxu2 }
  0xb6   :  { %v287_v24 = vadd.f32 %v286_v12, %v237_v22  ;;  %v219_v25 = vpop.f32.mrf.mxu0 }
  0xb7   :  { %v359_v26 = vpack.c.bf16 %v343_v21, %v343_v21  ;;  %v269_v27 = vadd.f32 %v268_v60, %v219_v25  ;;  %v296_v19 = vpop.f32.mrf.mxu3 }
  0xb8   :  { %v315_v28 = vmul.f32 %v697_v61, %v287_v24 }
  0xb9   :  { %376 = vst.msk [vmem:[%s807_s4 + $0x8] sm:$0xf] %vm373_vm1, %v359_v26  ;;  %v308_v29 = vmul.f32 %v697_v61, %v269_v27 }
  0xba   :  { %v335_v30 = vadd.f32 %v702_v0, %v315_v28 }
  0xbb   :  { %v328_v31 = vadd.f32 %v702_v0, %v308_v29  ;;  %v726_v32 = vpop.f32.mrf.mxu1 }
  0xbc   :  { %v351_v33 = vmax.f32 %v335_v30, 0.0 }
  0xbd   :  { %v344_v34 = vmax.f32 %v328_v31, 0.0  ;;  %v239_v35 = vpop.f32.mrf.mxu2 }
  0xbe   :  { %v367_v36 = vpack.c.bf16 %v351_v33, %v351_v33  ;;  %v289_v37 = vadd.f32 %v288_v23, %v239_v35  ;;  %v222_v38 = vpop.f32.mrf.mxu0 }
  0xbf   :  { %v360_v39 = vpack.c.bf16 %v344_v34, %v344_v34  ;;  %v272_v41 = vadd.f32 %v271_v3, %v222_v38 }
  0xc0   :  { %384 = vst.msk [vmem:[%s807_s4 + $0x28] sm:$0xf] %vm373_vm1, %v367_v36  ;;  %v316_v42 = vmul.f32 %v697_v61, %v289_v37 }
  0xc1   :  { %377 = vst.msk [vmem:[%s807_s4 + $0xc] sm:$0xf] %vm373_vm1, %v360_v39  ;;  %v309_v43 = vmul.f32 %v697_v61, %v272_v41 }
  0xc2   :  { %v336_v44 = vadd.f32 %v702_v0, %v316_v42 }
  0xc3   :  { %v329_v45 = vadd.f32 %v702_v0, %v309_v43  ;;  %v281_v46 = vpop.f32.mrf.mxu1 }
  0xc4   :  { %v352_v47 = vmax.f32 %v336_v44, 0.0  ;;  %v282_v48 = vadd.f32 %v281_v46, %v232_v5 }
  0xc5   :  { %v345_v49 = vmax.f32 %v329_v45, 0.0  ;;  %v242_v50 = vpop.f32.mrf.mxu2 }
  0xc6   :  { %v368_v51 = vpack.c.bf16 %v352_v47, %v352_v47  ;;  %v313_v52 = vmul.f32 %v697_v61, %v282_v48  ;;  %v292_v53 = vadd.f32 %v291_v40, %v242_v50  ;;  %v224_v54 = vpop.f32.mrf.mxu0 }
  0xc7   :  { %v361_v55 = vpack.c.bf16 %v345_v49, %v345_v49  ;;  %v274_v56 = vadd.f32 %v273_v11, %v224_v54 }
  0xc8   :  { %385 = vst.msk [vmem:[%s807_s4 + $0x2c] sm:$0xf] %vm373_vm1, %v368_v51  ;;  %v333_v57 = vadd.f32 %v702_v0, %v313_v52  ;;  %v317_v58 = vmul.f32 %v697_v61, %v292_v53 }
  0xc9   :  { %378 = vst.msk [vmem:[%s807_s4 + $0x10] sm:$0xf] %vm373_vm1, %v361_v55  ;;  %v310_v60 = vmul.f32 %v697_v61, %v274_v56 }
  0xca   :  { %v349_v62 = vmax.f32 %v333_v57, 0.0  ;;  %v337_v63 = vadd.f32 %v702_v0, %v317_v58 }
  0xcb   :  { %v330_v1 = vadd.f32 %v702_v0, %v310_v60  ;;  %v283_v2 = vpop.f32.mrf.mxu1 }
  0xcc   :  { %v365_v3 = vpack.c.bf16 %v349_v62, %v349_v62  ;;  %v353_v4 = vmax.f32 %v337_v63, 0.0  ;;  %v284_v5 = vadd.f32 %v283_v2, %v234_v14 }
  0xcd   :  { %v346_v6 = vmax.f32 %v330_v1, 0.0  ;;  %v244_v7 = vpop.f32.mrf.mxu2 }
  0xce   :  { %382 = vst.msk [vmem:[%s807_s4 + $0x20] sm:$0xf] %vm373_vm1, %v365_v3  ;;  %v369_v8 = vpack.c.bf16 %v353_v4, %v353_v4  ;;  %v314_v9 = vmul.f32 %v697_v61, %v284_v5  ;;  %v294_v10 = vadd.f32 %v293_v59, %v244_v7  ;;  %v227_v11 = vpop.f32.mrf.mxu0 }
  0xcf   :  { %v362_v12 = vpack.c.bf16 %v346_v6, %v346_v6  ;;  %v277_v13 = vadd.f32 %v276_v20, %v227_v11 }
  0xd0   :  { %386 = vst.msk [vmem:[%s807_s4 + $0x30] sm:$0xf] %vm373_vm1, %v369_v8  ;;  %v334_v14 = vadd.f32 %v702_v0, %v314_v9  ;;  %v318_v15 = vmul.f32 %v697_v61, %v294_v10 }
  0xd1   :  { %379 = vst.msk [vmem:[%s807_s4 + $0x14] sm:$0xf] %vm373_vm1, %v362_v12  ;;  %v311_v16 = vmul.f32 %v697_v61, %v277_v13 }
  0xd2   :  { %v350_v17 = vmax.f32 %v334_v14, 0.0  ;;  %v338_v18 = vadd.f32 %v702_v0, %v318_v15 }
  0xd3   :  { %v331_v20 = vadd.f32 %v702_v0, %v311_v16 }
  0xd4   :  { %v366_v21 = vpack.c.bf16 %v350_v17, %v350_v17  ;;  %v354_v22 = vmax.f32 %v338_v18, 0.0 }
  0xd5   :  { %v347_v23 = vmax.f32 %v331_v20, 0.0  ;;  %v247_v24 = vpop.f32.mrf.mxu2 }
  0xd6   :  { %383 = vst.msk [vmem:[%s807_s4 + $0x24] sm:$0xf] %vm373_vm1, %v366_v21  ;;  %v370_v25 = vpack.c.bf16 %v354_v22, %v354_v22  ;;  %v297_v26 = vadd.f32 %v296_v19, %v247_v24  ;;  %v229_v27 = vpop.f32.mrf.mxu0 }
  0xd7   :  { %v363_v28 = vpack.c.bf16 %v347_v23, %v347_v23  ;;  %v279_v29 = vadd.f32 %v726_v32, %v229_v27  ;;  %v298_v32 = vpop.f32.mrf.mxu3 }
  0xd8   :  { %387 = vst.msk [vmem:[%s807_s4 + $0x34] sm:$0xf] %vm373_vm1, %v370_v25  ;;  %v319_v30 = vmul.f32 %v697_v61, %v297_v26 }
  0xd9   :  { %380 = vst.msk [vmem:[%s807_s4 + $0x18] sm:$0xf] %vm373_vm1, %v363_v28  ;;  %v312_v31 = vmul.f32 %v697_v61, %v279_v29 }
  0xda   :  { %v339_v33 = vadd.f32 %v702_v0, %v319_v30 }
  0xdb   :  { %v332_v34 = vadd.f32 %v702_v0, %v312_v31 }
  0xdc   :  { %v355_v35 = vmax.f32 %v339_v33, 0.0 }
  0xdd   :  { %v348_v36 = vmax.f32 %v332_v34, 0.0  ;;  %v249_v37 = vpop.f32.mrf.mxu2 }
  0xde   :  { %v371_v38 = vpack.c.bf16 %v355_v35, %v355_v35  ;;  %v299_v39 = vadd.f32 %v298_v32, %v249_v37 }
  0xdf   :  { %v364_v40 = vpack.c.bf16 %v348_v36, %v348_v36 }
  0xe0   :  { %388 = vst.msk [vmem:[%s807_s4 + $0x38] sm:$0xf] %vm373_vm1, %v371_v38  ;;  %v320_v41 = vmul.f32 %v697_v61, %v299_v39 }
  0xe1   :  { %381 = vst.msk [vmem:[%s807_s4 + $0x1c] sm:$0xf] %vm373_vm1, %v364_v40 }
  0xe2   :  { %v340_v42 = vadd.f32 %v702_v0, %v320_v41 }
  0xe4   :  { %v356_v43 = vmax.f32 %v340_v42, 0.0 }
  0xe6   :  { %v372_v44 = vpack.c.bf16 %v356_v43, %v356_v43 }
  0xe8   :  { %389 = vst.msk [vmem:[%s807_s4 + $0x3c] sm:$0xf] %vm373_vm1, %v372_v44 }

// kernel: _lambda_.20
= control target key start
LH: loop header
LB: loop body
LE: loop exit
PB: predicated region body
PF: predicated region fallthrough
CT: control target
= control target key end

     0   :  { %vm314_vm0 = vcmask 261120   ;;  %vm558_vm1 = vcmask 519168   ;;  %s1172_s1 = inlined_call_operand.vmem [shape: bf16[288,64], index: 1, kind: input, shape index: {}]   ;;  %s1173_s0 = inlined_call_operand.vmem [shape: bf16[128,288], index: 0, kind: input, shape index: {}]   ;;  %s1174_s2 = inlined_call_operand.vmem [shape: f32[1,64], index: 2, kind: input, shape index: {}]   ;;  %s1175_s3 = inlined_call_operand.vmem [shape: f32[1,64], index: 3, kind: input, shape index: {}]   ;;  %s1176_s4 = inlined_call_operand.vmem [shape: bf16[128,64], index: 4, kind: output, shape index: {}]  }
   0x1   :  { %v786_v0 = vld [vmem:[%s1172_s1 + $0x38] sm:$0xff]  ;;  %v796_v2 = vld [vmem:[%s1172_s1 + $0x88] sm:$0xff]  ;;  %v785_v3 = vld [vmem:[%s1172_s1 + $0x30] sm:$0xff] }
   0x2   :  { %v846_v1 = vld [vmem:[%s1172_s1 + $0x78] sm:$0xff]  ;;  %339 = vmatpush.bf16.msra.mxu0 %v786_v0  ;;  %797 = vmatpush.bf16.msra.mxu3 %v786_v0  ;;  %v857_v4 = vld [vmem:[%s1172_s1 + $0x70] sm:$0xff]  ;;  %v795_v5 = vld [vmem:[%s1172_s1 + $0x80] sm:$0xff] }
   0x3   :  { %388 = vmatpush.bf16.msra.mxu1 %v846_v1  ;;  %443 = vmatpush.bf16.msra.mxu2 %v796_v2  ;;  %v589_v6 = vld [vmem:[%s1173_s0 + $0x8] sm:$0xf]  ;;  %v757_v7 = vld [vmem:[%s1173_s0 + $0x10] sm:$0xf0]  ;;  %v783_v11 = vld [vmem:[%s1172_s1 + $0x20] sm:$0xff] }
   0x4   :  { %v590_v8 = vor.u32 %v757_v7, %v589_v6  ;;  %v784_v9 = vld [vmem:[%s1172_s1 + $0x28] sm:$0xff]  ;;  %v791_v12 = vld [vmem:[%s1172_s1 + $0x60] sm:$0xff]  ;;  %v782_v13 = vld [vmem:[%s1172_s1 + $0x18] sm:$0xff] }
   0x5   :  { %v792_v10 = vld [vmem:[%s1172_s1 + $0x68] sm:$0xff]  ;;  %v790_v14 = vld [vmem:[%s1172_s1 + $0x58] sm:$0xff]  ;;  %v781_v15 = vld [vmem:[%s1172_s1 + $0x10] sm:$0xff] }
   0x6   :  { %340 = vmatpush.bf16.msra.mxu0 %v785_v3  ;;  %798 = vmatpush.bf16.msra.mxu3 %v785_v3  ;;  %v789_v16 = vld [vmem:[%s1172_s1 + $0x50] sm:$0xff]  ;;  %v601_v17 = vld [vmem:[%s1173_s0 + $0x20] sm:$0xf]  ;;  %v760_v18 = vld [vmem:[%s1173_s0 + $0x28] sm:$0xf0] }
   0x7   :  { %389 = vmatpush.bf16.msra.mxu1 %v857_v4  ;;  %444 = vmatpush.bf16.msra.mxu2 %v795_v5  ;;  %v602_v19 = vor.u32 %v760_v18, %v601_v17  ;;  %v780_v20 = vld [vmem:[%s1172_s1 + $0x8] sm:$0xff]  ;;  %v779_v22 = vld [vmem:[%s1172_s1] sm:$0xff]  ;;  %v653_v26 = vld [vmem:[%s1173_s0 + $0x90] sm:$0xf] }
   0x8   :  { %v788_v21 = vld [vmem:[%s1172_s1 + $0x48] sm:$0xff]  ;;  %v787_v23 = vld [vmem:[%s1172_s1 + $0x40] sm:$0xff]  ;;  %v774_v27 = vld [vmem:[%s1173_s0 + $0x98] sm:$0xf0] }
   0x9   :  { %v581_v24 = vld [vmem:[%s1173_s0] sm:$0xf]  ;;  %v756_v25 = vld [vmem:[%s1173_s0 + $0x8] sm:$0xf0]  ;;  %v755_v28 = vld [vmem:[%s1173_s0 + $0x4] sm:$0xf]  ;;  %v654_v31 = vor.u32 %v774_v27, %v653_v26 }
   0xa   :  { %747 = vmatmul.msk.bf16.vlgmr.msra.gmra.mxu2 %vm314_vm0, %v590_v8  ;;  %341 = vmatpush.bf16.msra.mxu0 %v784_v9  ;;  %v583_v29 = vld [vmem:[%s1173_s0 + $0xc] sm:$0xf0]  ;;  %v582_v30 = vor.u32 %v756_v25, %v581_v24  ;;  %v613_v33 = vld [vmem:[%s1173_s0 + $0x38] sm:$0xf]  ;;  %v763_v34 = vld [vmem:[%s1173_s0 + $0x40] sm:$0xf0] }
   0xb   :  { %799 = vmatpush.bf16.msra.mxu3 %v784_v9  ;;  %390 = vmatpush.bf16.msra.mxu1 %v792_v10  ;;  %v586_v32 = vor.u32 %v755_v28, %v583_v29  ;;  %v614_v35 = vor.u32 %v763_v34, %v613_v33  ;;  %v593_v36 = vld [vmem:[%s1173_s0 + $0x18] sm:$0xf]  ;;  %v759_v37 = vld [vmem:[%s1173_s0 + $0x20] sm:$0xf0]  ;;  %v665_v38 = vld [vmem:[%s1173_s0 + $0xa8] sm:$0xf] }
   0xc   :  { %v777_v39 = vld [vmem:[%s1173_s0 + $0xb0] sm:$0xf0]  ;;  %v758_v40 = vld [vmem:[%s1173_s0 + $0x1c] sm:$0xf]  ;;  %v595_v41 = vld [vmem:[%s1173_s0 + $0x24] sm:$0xf0]  ;;  %v594_v42 = vor.u32 %v759_v37, %v593_v36 }
   0xd   :  { %v666_v43 = vor.u32 %v777_v39, %v665_v38  ;;  %v598_v44 = vor.u32 %v758_v40, %v595_v41  ;;  %v625_v45 = vld [vmem:[%s1173_s0 + $0x50] sm:$0xf]  ;;  %v766_v46 = vld [vmem:[%s1173_s0 + $0x58] sm:$0xf0]  ;;  %v761_v50 = vld [vmem:[%s1173_s0 + $0x34] sm:$0xf] }
   0xe   :  { %342 = vmatpush.bf16.msra.mxu0 %v783_v11  ;;  %v626_v47 = vor.u32 %v766_v46, %v625_v45  ;;  %v605_v48 = vld [vmem:[%s1173_s0 + $0x30] sm:$0xf]  ;;  %v762_v49 = vld [vmem:[%s1173_s0 + $0x38] sm:$0xf0]  ;;  %v607_v51 = vld [vmem:[%s1173_s0 + $0x3c] sm:$0xf0] }
   0xf   :  { %800 = vmatpush.bf16.msra.mxu3 %v783_v11  ;;  %391 = vmatpush.bf16.msra.mxu1 %v791_v12  ;;  %v773_v52 = vld [vmem:[%s1173_s0 + $0x94] sm:$0xf]  ;;  %v655_v53 = vld [vmem:[%s1173_s0 + $0x9c] sm:$0xf0]  ;;  %v606_v54 = vor.u32 %v762_v49, %v605_v48  ;;  %v610_v55 = vor.u32 %v761_v50, %v607_v51  ;;  %v637_v57 = vld [vmem:[%s1173_s0 + $0x68] sm:$0xf] }
  0x10   :  { %v658_v56 = vor.u32 %v773_v52, %v655_v53  ;;  %v769_v58 = vld [vmem:[%s1173_s0 + $0x70] sm:$0xf0]  ;;  %v617_v60 = vld [vmem:[%s1173_s0 + $0x48] sm:$0xf]  ;;  %v764_v62 = vld [vmem:[%s1173_s0 + $0x4c] sm:$0xf] }
  0x11   :  { %v638_v59 = vor.u32 %v769_v58, %v637_v57  ;;  %v765_v61 = vld [vmem:[%s1173_s0 + $0x50] sm:$0xf0]  ;;  %v619_v63 = vld [vmem:[%s1173_s0 + $0x54] sm:$0xf0]  ;;  %v776_v0 = vld [vmem:[%s1173_s0 + $0xac] sm:$0xf] }
  0x12   :  { %343 = vmatpush.bf16.msra.mxu0 %v782_v13  ;;  %v618_v2 = vor.u32 %v765_v61, %v617_v60  ;;  %v622_v3 = vor.u32 %v764_v62, %v619_v63  ;;  %v649_v5 = vld [vmem:[%s1173_s0 + $0x80] sm:$0xf]  ;;  %v772_v6 = vld [vmem:[%s1173_s0 + $0x88] sm:$0xf0]  ;;  %v631_v11 = vld [vmem:[%s1173_s0 + $0x6c] sm:$0xf0] }
  0x13   :  { %801 = vmatpush.bf16.msra.mxu3 %v782_v13  ;;  %392 = vmatpush.bf16.msra.mxu1 %v790_v14  ;;  %v650_v7 = vor.u32 %v772_v6, %v649_v5  ;;  %v629_v8 = vld [vmem:[%s1173_s0 + $0x60] sm:$0xf]  ;;  %v768_v9 = vld [vmem:[%s1173_s0 + $0x68] sm:$0xf0]  ;;  %v641_v17 = vld [vmem:[%s1173_s0 + $0x78] sm:$0xf] }
  0x14   :  { %v771_v18 = vld [vmem:[%s1173_s0 + $0x80] sm:$0xf0]  ;;  %v778_v24 = vld [vmem:[%s1173_s0 + $0xb8] sm:$0xf0]  ;;  %v1062_v34 = vld [vmem:[%s1175_s3] ss:$0 sm:$0xff] }
  0x16   :  { %344 = vmatpush.bf16.msra.mxu0 %v781_v15 }
  0x17   :  { %802 = vmatpush.bf16.msra.mxu3 %v781_v15  ;;  %393 = vmatpush.bf16.msra.mxu1 %v789_v16  ;;  %v775_v15 = vld [vmem:[%s1173_s0 + $0xa0] sm:$0xf0] }
  0x1a   :  { %748 = vmatmul.msk.bf16.gmra.mxu2 %vm314_vm0, %v602_v19  ;;  %345 = vmatpush.bf16.msra.mxu0 %v780_v20  ;;  %v770_v19 = vld [vmem:[%s1173_s0 + $0x7c] sm:$0xf] }
  0x1b   :  { %803 = vmatpush.bf16.msra.mxu3 %v780_v20  ;;  %394 = vmatpush.bf16.msra.mxu1 %v788_v21  ;;  %v643_v20 = vld [vmem:[%s1173_s0 + $0x84] sm:$0xf0] }
  0x1e   :  { %346 = vmatpush.bf16.msra.mxu0 %v779_v22 }
  0x1f   :  { %804 = vmatpush.bf16.msra.mxu3 %v779_v22  ;;  %395 = vmatpush.bf16.msra.mxu1 %v787_v23  ;;  %v646_v22 = vor.u32 %v770_v19, %v643_v20 }
  0x21   :  { %347 = vmatmul.bf16.vlgmr.msra.gmra.mxu0 %v582_v30 }
  0x22   :  { %377 = vmatmul.bf16.vlgmr.msra.gmra.mxu3 %v654_v31  ;;  %396 = vmatmul.bf16.vlgmr.msra.gmra.mxu1 %v586_v32  ;;  %v1057_v32 = vld [vmem:[%s1174_s2] ss:$0 sm:$0xff] }
  0x23   :  { %805 = vmatpush.bf16.msrb.mxu3 %v846_v1  ;;  %v667_v1 = vld [vmem:[%s1173_s0 + $0xb4] sm:$0xf0] }
  0x27   :  { %806 = vmatpush.bf16.msrb.mxu3 %v857_v4  ;;  %v670_v4 = vor.u32 %v776_v0, %v667_v1 }
  0x2a   :  { %749 = vmatmul.msk.bf16.gmra.mxu2 %vm314_vm0, %v614_v35 }
  0x2b   :  { %807 = vmatpush.bf16.msrb.mxu3 %v792_v10  ;;  %v767_v10 = vld [vmem:[%s1173_s0 + $0x64] sm:$0xf] }
  0x2c   :  { %v634_v13 = vor.u32 %v767_v10, %v631_v11 }
  0x2f   :  { %808 = vmatpush.bf16.msrb.mxu3 %v791_v12  ;;  %v630_v12 = vor.u32 %v768_v9, %v629_v8 }
  0x31   :  { %352 = vmatmul.bf16.gmra.mxu0 %v594_v42 }
  0x32   :  { %382 = vmatmul.bf16.gmra.mxu3 %v666_v43  ;;  %401 = vmatmul.bf16.gmra.mxu1 %v598_v44 }
  0x33   :  { %809 = vmatpush.bf16.msrb.mxu3 %v790_v14  ;;  %v661_v14 = vld [vmem:[%s1173_s0 + $0x98] sm:$0xf] }
  0x37   :  { %810 = vmatpush.bf16.msrb.mxu3 %v789_v16  ;;  %v662_v16 = vor.u32 %v775_v15, %v661_v14 }
  0x3a   :  { %750 = vmatmul.msk.bf16.gmra.mxu2 %vm314_vm0, %v626_v47 }
  0x3b   :  { %811 = vmatpush.bf16.msrb.mxu3 %v788_v21  ;;  %v642_v21 = vor.u32 %v771_v18, %v641_v17 }
  0x3f   :  { %812 = vmatpush.bf16.msrb.mxu3 %v787_v23  ;;  %v673_v23 = vld [vmem:[%s1173_s0 + $0xb0] sm:$0xf] }
  0x40   :  { %v674_v25 = vor.u32 %v778_v24, %v673_v23 }
  0x41   :  { %357 = vmatmul.bf16.gmra.mxu0 %v606_v54 }
  0x42   :  { %406 = vmatmul.bf16.gmra.mxu1 %v610_v55  ;;  %426 = vmatmul.bf16.vlgmr.msrb.gmra.mxu3 %v658_v56 }
  0x4a   :  { %751 = vmatmul.msk.bf16.gmra.mxu2 %vm314_vm0, %v638_v59 }
  0x51   :  { %362 = vmatmul.bf16.gmra.mxu0 %v618_v2 }
  0x52   :  { %411 = vmatmul.bf16.gmra.mxu1 %v622_v3  ;;  %431 = vmatmul.bf16.gmra.mxu3 %v670_v4 }
  0x5a   :  { %752 = vmatmul.msk.bf16.gmra.mxu2 %vm314_vm0, %v650_v7 }
  0x61   :  { %367 = vmatmul.bf16.gmra.mxu0 %v630_v12 }
  0x62   :  { %416 = vmatmul.bf16.gmra.mxu1 %v634_v13 }
  0x6a   :  { %753 = vmatmul.msk.bf16.gmra.mxu2 %vm314_vm0, %v662_v16 }
  0x71   :  { %372 = vmatmul.bf16.gmra.mxu0 %v642_v21 }
  0x72   :  { %421 = vmatmul.bf16.gmra.mxu1 %v646_v22 }
  0x7a   :  { %754 = vmatmul.msk.bf16.gmra.mxu2 %vm314_vm0, %v674_v25 }
  0x8d   :  { %v446_v26 = vpop.f32.mrf.mxu2 }
  0x95   :  { %v448_v27 = vpop.f32.mrf.mxu2 }
  0x9d   :  { %v451_v28 = vpop.f32.mrf.mxu2 }
  0x9e   :  { %v348_v29 = vpop.f32.mrf.mxu0 }
  0x9f   :  { %v397_v30 = vpop.f32.mrf.mxu1 }
  0xa0   :  { %v398_v31 = vadd.f32 %v397_v30, %v348_v29 }
  0xa2   :  { %v447_v33 = vadd.f32 %v446_v26, %v398_v31 }
  0xa4   :  { %v490_v35 = vmul.f32 %v1057_v32, %v447_v33 }
  0xa5   :  { %v453_v36 = vpop.f32.mrf.mxu2  ;;  %v1078_v62 = vpop.f32.mrf.mxu3 }
  0xa6   :  { %v510_v37 = vadd.f32 %v1062_v34, %v490_v35  ;;  %v350_v38 = vpop.f32.mrf.mxu0 }
  0xa7   :  { %v399_v39 = vpop.f32.mrf.mxu1 }
  0xa8   :  { %v526_v40 = vmax.f32 %v510_v37, 0.0  ;;  %v400_v41 = vadd.f32 %v399_v39, %v350_v38 }
  0xaa   :  { %v542_v42 = vpack.c.bf16 %v526_v40, %v526_v40  ;;  %v449_v43 = vadd.f32 %v448_v27, %v400_v41 }
  0xac   :  { %559 = vst.msk [vmem:[%s1176_s4] sm:$0xf] %vm558_vm1, %v542_v42  ;;  %v491_v44 = vmul.f32 %v1057_v32, %v449_v43 }
  0xad   :  { %v456_v45 = vpop.f32.mrf.mxu2  ;;  %v1091_v9 = vpop.f32.mrf.mxu3 }
  0xae   :  { %v511_v46 = vadd.f32 %v1062_v34, %v491_v44  ;;  %v353_v47 = vpop.f32.mrf.mxu0 }
  0xaf   :  { %v402_v48 = vpop.f32.mrf.mxu1 }
  0xb0   :  { %v527_v49 = vmax.f32 %v511_v46, 0.0  ;;  %v403_v50 = vadd.f32 %v402_v48, %v353_v47 }
  0xb2   :  { %v543_v51 = vpack.c.bf16 %v527_v49, %v527_v49  ;;  %v452_v52 = vadd.f32 %v451_v28, %v403_v50 }
  0xb4   :  { %560 = vst.msk [vmem:[%s1176_s4 + $0x4] sm:$0xf] %vm558_vm1, %v543_v51  ;;  %v492_v53 = vmul.f32 %v1057_v32, %v452_v52 }
  0xb5   :  { %v458_v54 = vpop.f32.mrf.mxu2  ;;  %v1100_v22 = vpop.f32.mrf.mxu3 }
  0xb6   :  { %v512_v55 = vadd.f32 %v1062_v34, %v492_v53  ;;  %v355_v56 = vpop.f32.mrf.mxu0 }
  0xb7   :  { %v404_v57 = vpop.f32.mrf.mxu1 }
  0xb8   :  { %v528_v58 = vmax.f32 %v512_v55, 0.0  ;;  %v405_v59 = vadd.f32 %v404_v57, %v355_v56 }
  0xba   :  { %v544_v60 = vpack.c.bf16 %v528_v58, %v528_v58  ;;  %v454_v61 = vadd.f32 %v453_v36, %v405_v59 }
  0xbc   :  { %561 = vst.msk [vmem:[%s1176_s4 + $0x8] sm:$0xf] %vm558_vm1, %v544_v60  ;;  %v493_v63 = vmul.f32 %v1057_v32, %v454_v61 }
  0xbd   :  { %v461_v0 = vpop.f32.mrf.mxu2  ;;  %v1108_v37 = vpop.f32.mrf.mxu3 }
  0xbe   :  { %v513_v1 = vadd.f32 %v1062_v34, %v493_v63  ;;  %v358_v2 = vpop.f32.mrf.mxu0 }
  0xbf   :  { %v407_v3 = vpop.f32.mrf.mxu1 }
  0xc0   :  { %v529_v4 = vmax.f32 %v513_v1, 0.0  ;;  %v408_v5 = vadd.f32 %v407_v3, %v358_v2 }
  0xc2   :  { %v545_v6 = vpack.c.bf16 %v529_v4, %v529_v4  ;;  %v457_v7 = vadd.f32 %v456_v45, %v408_v5 }
  0xc4   :  { %562 = vst.msk [vmem:[%s1176_s4 + $0xc] sm:$0xf] %vm558_vm1, %v545_v6  ;;  %v494_v8 = vmul.f32 %v1057_v32, %v457_v7 }
  0xc5   :  { %v463_v10 = vpop.f32.mrf.mxu2  ;;  %v427_v49 = vpop.f32.mrf.mxu3 }
  0xc6   :  { %v514_v11 = vadd.f32 %v1062_v34, %v494_v8  ;;  %v360_v12 = vpop.f32.mrf.mxu0  ;;  %v428_v59 = vadd.f32 %v427_v49, %v1078_v62 }
  0xc7   :  { %v409_v13 = vpop.f32.mrf.mxu1 }
  0xc8   :  { %v530_v14 = vmax.f32 %v514_v11, 0.0  ;;  %v410_v15 = vadd.f32 %v409_v13, %v360_v12 }
  0xca   :  { %v546_v16 = vpack.c.bf16 %v530_v14, %v530_v14  ;;  %v459_v17 = vadd.f32 %v458_v54, %v410_v15 }
  0xcc   :  { %563 = vst.msk [vmem:[%s1176_s4 + $0x10] sm:$0xf] %vm558_vm1, %v546_v16  ;;  %v495_v18 = vmul.f32 %v1057_v32, %v459_v17 }
  0xcd   :  { %v466_v19 = vpop.f32.mrf.mxu2  ;;  %v429_v61 = vpop.f32.mrf.mxu3 }
  0xce   :  { %v515_v20 = vadd.f32 %v1062_v34, %v495_v18  ;;  %v363_v21 = vpop.f32.mrf.mxu0 }
  0xcf   :  { %v412_v23 = vpop.f32.mrf.mxu1 }
  0xd0   :  { %v531_v24 = vmax.f32 %v515_v20, 0.0  ;;  %v413_v25 = vadd.f32 %v412_v23, %v363_v21 }
  0xd2   :  { %v547_v26 = vpack.c.bf16 %v531_v24, %v531_v24  ;;  %v462_v27 = vadd.f32 %v461_v0, %v413_v25 }
  0xd4   :  { %564 = vst.msk [vmem:[%s1176_s4 + $0x14] sm:$0xf] %vm558_vm1, %v547_v26  ;;  %v496_v28 = vmul.f32 %v1057_v32, %v462_v27 }
  0xd5   :  { %v468_v29 = vpop.f32.mrf.mxu2  ;;  %v432_v18 = vpop.f32.mrf.mxu3 }
  0xd6   :  { %v516_v30 = vadd.f32 %v1062_v34, %v496_v28  ;;  %v365_v31 = vpop.f32.mrf.mxu0  ;;  %v433_v26 = vadd.f32 %v432_v18, %v1100_v22 }
  0xd7   :  { %v414_v33 = vpop.f32.mrf.mxu1 }
  0xd8   :  { %v532_v35 = vmax.f32 %v516_v30, 0.0  ;;  %v415_v36 = vadd.f32 %v414_v33, %v365_v31 }
  0xda   :  { %v548_v38 = vpack.c.bf16 %v532_v35, %v532_v35  ;;  %v464_v39 = vadd.f32 %v463_v10, %v415_v36  ;;  %v430_v10 = vadd.f32 %v429_v61, %v1091_v9 }
  0xdc   :  { %565 = vst.msk [vmem:[%s1176_s4 + $0x18] sm:$0xf] %vm558_vm1, %v548_v38  ;;  %v497_v40 = vmul.f32 %v1057_v32, %v464_v39 }
  0xdd   :  { %v471_v41 = vpop.f32.mrf.mxu2  ;;  %v434_v36 = vpop.f32.mrf.mxu3 }
  0xde   :  { %v517_v42 = vadd.f32 %v1062_v34, %v497_v40  ;;  %v368_v43 = vpop.f32.mrf.mxu0  ;;  %v435_v40 = vadd.f32 %v434_v36, %v1108_v37 }
  0xdf   :  { %v417_v44 = vpop.f32.mrf.mxu1 }
  0xe0   :  { %v533_v45 = vmax.f32 %v517_v42, 0.0  ;;  %v418_v46 = vadd.f32 %v417_v44, %v368_v43 }
  0xe2   :  { %v549_v47 = vpack.c.bf16 %v533_v45, %v533_v45  ;;  %v467_v48 = vadd.f32 %v466_v19, %v418_v46 }
  0xe4   :  { %566 = vst.msk [vmem:[%s1176_s4 + $0x1c] sm:$0xf] %vm558_vm1, %v549_v47  ;;  %v498_v50 = vmul.f32 %v1057_v32, %v467_v48 }
  0xe5   :  { %v473_v51 = vpop.f32.mrf.mxu2 }
  0xe6   :  { %v518_v52 = vadd.f32 %v1062_v34, %v498_v50  ;;  %v370_v53 = vpop.f32.mrf.mxu0 }
  0xe7   :  { %v419_v54 = vpop.f32.mrf.mxu1 }
  0xe8   :  { %v534_v55 = vmax.f32 %v518_v52, 0.0  ;;  %v420_v56 = vadd.f32 %v419_v54, %v370_v53 }
  0xea   :  { %v550_v57 = vpack.c.bf16 %v534_v55, %v534_v55  ;;  %v469_v58 = vadd.f32 %v468_v29, %v420_v56 }
  0xec   :  { %567 = vst.msk [vmem:[%s1176_s4 + $0x20] sm:$0xf] %vm558_vm1, %v550_v57  ;;  %v499_v60 = vmul.f32 %v1057_v32, %v469_v58 }
  0xed   :  { %v476_v63 = vpop.f32.mrf.mxu2 }
  0xee   :  { %v519_v0 = vadd.f32 %v1062_v34, %v499_v60  ;;  %v477_v1 = vadd.f32 %v476_v63, %v428_v59  ;;  %v373_v2 = vpop.f32.mrf.mxu0 }
  0xef   :  { %v422_v3 = vpop.f32.mrf.mxu1 }
  0xf0   :  { %v535_v4 = vmax.f32 %v519_v0, 0.0  ;;  %v502_v5 = vmul.f32 %v1057_v32, %v477_v1  ;;  %v423_v6 = vadd.f32 %v422_v3, %v373_v2 }
  0xf2   :  { %v551_v7 = vpack.c.bf16 %v535_v4, %v535_v4  ;;  %v522_v62 = vadd.f32 %v1062_v34, %v502_v5  ;;  %v472_v8 = vadd.f32 %v471_v41, %v423_v6 }
  0xf4   :  { %568 = vst.msk [vmem:[%s1176_s4 + $0x24] sm:$0xf] %vm558_vm1, %v551_v7  ;;  %v538_v11 = vmax.f32 %v522_v62, 0.0  ;;  %v500_v12 = vmul.f32 %v1057_v32, %v472_v8 }
  0xf5   :  { %v478_v13 = vpop.f32.mrf.mxu2 }
  0xf6   :  { %v554_v14 = vpack.c.bf16 %v538_v11, %v538_v11  ;;  %v520_v15 = vadd.f32 %v1062_v34, %v500_v12  ;;  %v479_v16 = vadd.f32 %v478_v13, %v430_v10  ;;  %v375_v17 = vpop.f32.mrf.mxu0 }
  0xf7   :  { %v424_v19 = vpop.f32.mrf.mxu1 }
  0xf8   :  { %571 = vst.msk [vmem:[%s1176_s4 + $0x30] sm:$0xf] %vm558_vm1, %v554_v14  ;;  %v536_v9 = vmax.f32 %v520_v15, 0.0  ;;  %v503_v20 = vmul.f32 %v1057_v32, %v479_v16  ;;  %v425_v21 = vadd.f32 %v424_v19, %v375_v17 }
  0xfa   :  { %v552_v23 = vpack.c.bf16 %v536_v9, %v536_v9  ;;  %v523_v24 = vadd.f32 %v1062_v34, %v503_v20  ;;  %v474_v25 = vadd.f32 %v473_v51, %v425_v21 }
  0xfc   :  { %569 = vst.msk [vmem:[%s1176_s4 + $0x28] sm:$0xf] %vm558_vm1, %v552_v23  ;;  %v539_v27 = vmax.f32 %v523_v24, 0.0  ;;  %v501_v28 = vmul.f32 %v1057_v32, %v474_v25 }
  0xfd   :  { %v481_v29 = vpop.f32.mrf.mxu2 }
  0xfe   :  { %v555_v30 = vpack.c.bf16 %v539_v27, %v539_v27  ;;  %v521_v31 = vadd.f32 %v1062_v34, %v501_v28  ;;  %v482_v33 = vadd.f32 %v481_v29, %v433_v26 }
 0x100   :  { %572 = vst.msk [vmem:[%s1176_s4 + $0x34] sm:$0xf] %vm558_vm1, %v555_v30  ;;  %v537_v35 = vmax.f32 %v521_v31, 0.0  ;;  %v504_v22 = vmul.f32 %v1057_v32, %v482_v33 }
 0x102   :  { %v553_v38 = vpack.c.bf16 %v537_v35, %v537_v35  ;;  %v524_v39 = vadd.f32 %v1062_v34, %v504_v22 }
 0x104   :  { %570 = vst.msk [vmem:[%s1176_s4 + $0x2c] sm:$0xf] %vm558_vm1, %v553_v38  ;;  %v540_v41 = vmax.f32 %v524_v39, 0.0 }
 0x105   :  { %v483_v42 = vpop.f32.mrf.mxu2 }
 0x106   :  { %v556_v43 = vpack.c.bf16 %v540_v41, %v540_v41  ;;  %v484_v44 = vadd.f32 %v483_v42, %v435_v40 }
 0x108   :  { %573 = vst.msk [vmem:[%s1176_s4 + $0x38] sm:$0xf] %vm558_vm1, %v556_v43  ;;  %v505_v45 = vmul.f32 %v1057_v32, %v484_v44 }
 0x10a   :  { %v525_v46 = vadd.f32 %v1062_v34, %v505_v45 }
 0x10c   :  { %v541_v47 = vmax.f32 %v525_v46, 0.0 }
 0x10e   :  { %v557_v37 = vpack.c.bf16 %v541_v47, %v541_v47 }
 0x110   :  { %574 = vst.msk [vmem:[%s1176_s4 + $0x3c] sm:$0xf] %vm558_vm1, %v557_v37 }

// kernel: _lambda_.19
= control target key start
LH: loop header
LB: loop body
LE: loop exit
PB: predicated region body
PF: predicated region fallthrough
CT: control target
= control target key end

     0   :  { %vm326_vm0 = vcmask 261120   ;;  %vm602_vm1 = vcmask 130048   ;;  %s1477_s1 = inlined_call_operand.vmem [shape: bf16[288,32], index: 1, kind: input, shape index: {}]   ;;  %s1478_s5 = inlined_call_operand.vmem [shape: bf16[16,32], index: 5, kind: input, shape index: {}]   ;;  %s1479_s0 = inlined_call_operand.vmem [shape: bf16[128,288], index: 0, kind: input, shape index: {}]   ;;  %s1480_s4 = inlined_call_operand.vmem [shape: bf16[128,16], index: 4, kind: input, shape index: {}]   ;;  %s1481_s6 = inlined_call_operand.vmem [shape: f32[1,32], index: 6, kind: input, shape index: {}]   ;;  %s1482_s7 = inlined_call_operand.vmem [shape: f32[1,32], index: 7, kind: input, shape index: {}]   ;;  %s1483_s2 = inlined_call_operand.vmem [shape: f32[1,32], index: 2, kind: input, shape index: {}]   ;;  %s1484_s3 = inlined_call_operand.vmem [shape: f32[1,32], index: 3, kind: input, shape index: {}]   ;;  %s1485_s8 = inlined_call_operand.vmem [shape: f32[128,32], index: 8, kind: output, shape index: {}]  }
   0x1   :  { %v1019_v0 = vld [vmem:[%s1477_s1 + $0x38] sm:$0xff]  ;;  %v1018_v2 = vld [vmem:[%s1477_s1 + $0x30] sm:$0xff]  ;;  %v1029_v4 = vld [vmem:[%s1477_s1 + $0x88] sm:$0xff] }
   0x2   :  { %v1027_v1 = vld [vmem:[%s1477_s1 + $0x78] sm:$0xff]  ;;  %351 = vmatpush.bf16.msra.mxu0 %v1019_v0  ;;  %v1026_v3 = vld [vmem:[%s1477_s1 + $0x70] sm:$0xff]  ;;  %v1028_v5 = vld [vmem:[%s1477_s1 + $0x80] sm:$0xff]  ;;  %455 = vmatpush.bf16.msra.mxu2 %v1029_v4 }
   0x3   :  { %400 = vmatpush.bf16.msra.mxu1 %v1027_v1  ;;  %v1038_v6 = vld [vmem:[%s1478_s5] sm:$0xff]  ;;  %v778_v7 = vld [vmem:[%s1479_s0 + $0x8] sm:$0xf]  ;;  %v990_v8 = vld [vmem:[%s1479_s0 + $0x10] sm:$0xf0] }
   0x4   :  { %v1017_v9 = vld [vmem:[%s1477_s1 + $0x28] sm:$0xff]  ;;  %634 = vmatpush.bf16.msra.mxu3 %v1038_v6  ;;  %v779_v11 = vor.u32 %v990_v8, %v778_v7  ;;  %v1030_v12 = vld [vmem:[%s1480_s4] sm:$0xff]  ;;  %v1015_v15 = vld [vmem:[%s1477_s1 + $0x18] sm:$0xff] }
   0x5   :  { %v1025_v10 = vld [vmem:[%s1477_s1 + $0x68] sm:$0xff]  ;;  %v1016_v13 = vld [vmem:[%s1477_s1 + $0x20] sm:$0xff]  ;;  %v1023_v16 = vld [vmem:[%s1477_s1 + $0x58] sm:$0xff] }
   0x6   :  { %352 = vmatpush.bf16.msra.mxu0 %v1018_v2  ;;  %456 = vmatpush.bf16.msra.mxu2 %v1028_v5  ;;  %v1024_v14 = vld [vmem:[%s1477_s1 + $0x60] sm:$0xff]  ;;  %v1014_v17 = vld [vmem:[%s1477_s1 + $0x10] sm:$0xff]  ;;  %v993_v20 = vld [vmem:[%s1479_s0 + $0x28] sm:$0xf0] }
   0x7   :  { %401 = vmatpush.bf16.msra.mxu1 %v1026_v3  ;;  %980 = vmatmul.msk.bf16.vlgmr.msra.gmra.mxu3 %vm602_vm1, %v1030_v12  ;;  %v1022_v18 = vld [vmem:[%s1477_s1 + $0x50] sm:$0xff]  ;;  %v790_v19 = vld [vmem:[%s1479_s0 + $0x20] sm:$0xf]  ;;  %v1013_v21 = vld [vmem:[%s1477_s1 + $0x8] sm:$0xff] }
   0x8   :  { %v1021_v22 = vld [vmem:[%s1477_s1 + $0x48] sm:$0xff]  ;;  %v791_v23 = vor.u32 %v993_v20, %v790_v19  ;;  %v1012_v25 = vld [vmem:[%s1477_s1] sm:$0xff]  ;;  %v772_v30 = vld [vmem:[%s1479_s0 + $0xc] sm:$0xf0] }
   0x9   :  { %936 = vmatmul.msk.bf16.vlgmr.msra.gmra.mxu2 %vm326_vm0, %v779_v11  ;;  %v1031_v24 = vld [vmem:[%s1480_s4 + $0x8] sm:$0xff]  ;;  %v1020_v26 = vld [vmem:[%s1477_s1 + $0x40] sm:$0xff]  ;;  %v802_v33 = vld [vmem:[%s1479_s0 + $0x38] sm:$0xf] }
   0xa   :  { %353 = vmatpush.bf16.msra.mxu0 %v1017_v9  ;;  %v770_v27 = vld [vmem:[%s1479_s0] sm:$0xf]  ;;  %v989_v28 = vld [vmem:[%s1479_s0 + $0x8] sm:$0xf0]  ;;  %v988_v29 = vld [vmem:[%s1479_s0 + $0x4] sm:$0xf] }
   0xb   :  { %402 = vmatpush.bf16.msra.mxu1 %v1025_v10  ;;  %v771_v31 = vor.u32 %v989_v28, %v770_v27  ;;  %v775_v32 = vor.u32 %v988_v29, %v772_v30  ;;  %v996_v34 = vld [vmem:[%s1479_s0 + $0x40] sm:$0xf0]  ;;  %v1032_v36 = vld [vmem:[%s1480_s4 + $0x10] sm:$0xff]  ;;  %v782_v37 = vld [vmem:[%s1479_s0 + $0x18] sm:$0xf] }
   0xc   :  { %v803_v35 = vor.u32 %v996_v34, %v802_v33  ;;  %v992_v38 = vld [vmem:[%s1479_s0 + $0x20] sm:$0xf0]  ;;  %v991_v39 = vld [vmem:[%s1479_s0 + $0x1c] sm:$0xf]  ;;  %v784_v40 = vld [vmem:[%s1479_s0 + $0x24] sm:$0xf0] }
   0xd   :  { %v783_v41 = vor.u32 %v992_v38, %v782_v37  ;;  %v787_v42 = vor.u32 %v991_v39, %v784_v40  ;;  %v814_v43 = vld [vmem:[%s1479_s0 + $0x50] sm:$0xf]  ;;  %v999_v44 = vld [vmem:[%s1479_s0 + $0x58] sm:$0xf0]  ;;  %v994_v49 = vld [vmem:[%s1479_s0 + $0x34] sm:$0xf] }
   0xe   :  { %354 = vmatpush.bf16.msra.mxu0 %v1016_v13  ;;  %v815_v45 = vor.u32 %v999_v44, %v814_v43  ;;  %v1033_v46 = vld [vmem:[%s1480_s4 + $0x18] sm:$0xff]  ;;  %v794_v47 = vld [vmem:[%s1479_s0 + $0x30] sm:$0xf]  ;;  %v796_v50 = vld [vmem:[%s1479_s0 + $0x3c] sm:$0xf0] }
   0xf   :  { %403 = vmatpush.bf16.msra.mxu1 %v1024_v14  ;;  %v995_v48 = vld [vmem:[%s1479_s0 + $0x38] sm:$0xf0]  ;;  %v799_v52 = vor.u32 %v994_v49, %v796_v50  ;;  %v826_v53 = vld [vmem:[%s1479_s0 + $0x68] sm:$0xf]  ;;  %v1002_v54 = vld [vmem:[%s1479_s0 + $0x70] sm:$0xf0] }
  0x10   :  { %v795_v51 = vor.u32 %v995_v48, %v794_v47  ;;  %v827_v55 = vor.u32 %v1002_v54, %v826_v53  ;;  %v1034_v56 = vld [vmem:[%s1480_s4 + $0x20] sm:$0xff]  ;;  %v806_v57 = vld [vmem:[%s1479_s0 + $0x48] sm:$0xf]  ;;  %v998_v58 = vld [vmem:[%s1479_s0 + $0x50] sm:$0xf0] }
  0x11   :  { %v997_v59 = vld [vmem:[%s1479_s0 + $0x4c] sm:$0xf]  ;;  %v808_v60 = vld [vmem:[%s1479_s0 + $0x54] sm:$0xf0]  ;;  %v807_v61 = vor.u32 %v998_v58, %v806_v57  ;;  %v838_v63 = vld [vmem:[%s1479_s0 + $0x80] sm:$0xf] }
  0x12   :  { %355 = vmatpush.bf16.msra.mxu0 %v1015_v15  ;;  %v811_v62 = vor.u32 %v997_v59, %v808_v60  ;;  %v1005_v0 = vld [vmem:[%s1479_s0 + $0x88] sm:$0xf0]  ;;  %v818_v3 = vld [vmem:[%s1479_s0 + $0x60] sm:$0xf]  ;;  %v1000_v5 = vld [vmem:[%s1479_s0 + $0x64] sm:$0xf] }
  0x13   :  { %404 = vmatpush.bf16.msra.mxu1 %v1023_v16  ;;  %v839_v1 = vor.u32 %v1005_v0, %v838_v63  ;;  %v1035_v2 = vld [vmem:[%s1480_s4 + $0x28] sm:$0xff]  ;;  %v820_v6 = vld [vmem:[%s1479_s0 + $0x6c] sm:$0xf0]  ;;  %v850_v9 = vld [vmem:[%s1479_s0 + $0x98] sm:$0xf] }
  0x14   :  { %v1001_v4 = vld [vmem:[%s1479_s0 + $0x68] sm:$0xf0]  ;;  %v823_v8 = vor.u32 %v1000_v5, %v820_v6  ;;  %v1008_v10 = vld [vmem:[%s1479_s0 + $0xa0] sm:$0xf0]  ;;  %v1036_v12 = vld [vmem:[%s1480_s4 + $0x30] sm:$0xff] }
  0x15   :  { %v819_v7 = vor.u32 %v1001_v4, %v818_v3  ;;  %v851_v11 = vor.u32 %v1008_v10, %v850_v9  ;;  %v830_v13 = vld [vmem:[%s1479_s0 + $0x78] sm:$0xf]  ;;  %v1004_v14 = vld [vmem:[%s1479_s0 + $0x80] sm:$0xf0]  ;;  %v1003_v15 = vld [vmem:[%s1479_s0 + $0x7c] sm:$0xf] }
  0x16   :  { %356 = vmatpush.bf16.msra.mxu0 %v1014_v17  ;;  %v832_v16 = vld [vmem:[%s1479_s0 + $0x84] sm:$0xf0]  ;;  %v831_v17 = vor.u32 %v1004_v14, %v830_v13  ;;  %v862_v19 = vld [vmem:[%s1479_s0 + $0xb0] sm:$0xf]  ;;  %v1011_v20 = vld [vmem:[%s1479_s0 + $0xb8] sm:$0xf0] }
  0x17   :  { %405 = vmatpush.bf16.msra.mxu1 %v1022_v18  ;;  %981 = vmatmul.msk.bf16.gmra.mxu3 %vm602_vm1, %v1031_v24  ;;  %v835_v18 = vor.u32 %v1003_v15, %v832_v16  ;;  %v1007_v24 = vld [vmem:[%s1479_s0 + $0x98] sm:$0xf0]  ;;  %v854_v29 = vld [vmem:[%s1479_s0 + $0xa8] sm:$0xf]  ;;  %v1010_v30 = vld [vmem:[%s1479_s0 + $0xb0] sm:$0xf0] }
  0x18   :  { %v855_v33 = vor.u32 %v1010_v30, %v854_v29  ;;  %v1332_v39 = vld [vmem:[%s1481_s6] ss:$0 sm:$0xff] }
  0x19   :  { %937 = vmatmul.msk.bf16.gmra.mxu2 %vm326_vm0, %v791_v23  ;;  %v842_v23 = vld [vmem:[%s1479_s0 + $0x90] sm:$0xf]  ;;  %v1338_v43 = vld [vmem:[%s1482_s7] ss:$0 sm:$0xff] }
  0x1a   :  { %357 = vmatpush.bf16.msra.mxu0 %v1013_v21  ;;  %v863_v21 = vor.u32 %v1011_v20, %v862_v19  ;;  %v843_v27 = vor.u32 %v1007_v24, %v842_v23  ;;  %v1348_v49 = vld [vmem:[%s1484_s3] ss:$0 sm:$0xff] }
  0x1b   :  { %406 = vmatpush.bf16.msra.mxu1 %v1021_v22  ;;  %v1037_v22 = vld [vmem:[%s1480_s4 + $0x38] sm:$0xff] }
  0x1e   :  { %358 = vmatpush.bf16.msra.mxu0 %v1012_v25  ;;  %v1006_v25 = vld [vmem:[%s1479_s0 + $0x94] sm:$0xf] }
  0x1f   :  { %407 = vmatpush.bf16.msra.mxu1 %v1020_v26  ;;  %v844_v26 = vld [vmem:[%s1479_s0 + $0x9c] sm:$0xf0] }
  0x20   :  { %v847_v28 = vor.u32 %v1006_v25, %v844_v26 }
  0x21   :  { %359 = vmatmul.bf16.vlgmr.msra.gmra.mxu0 %v771_v31  ;;  %v1009_v31 = vld [vmem:[%s1479_s0 + $0xac] sm:$0xf] }
  0x22   :  { %408 = vmatmul.bf16.vlgmr.msra.gmra.mxu1 %v775_v32  ;;  %v856_v32 = vld [vmem:[%s1479_s0 + $0xb4] sm:$0xf0] }
  0x23   :  { %v859_v34 = vor.u32 %v1009_v31, %v856_v32 }
  0x27   :  { %982 = vmatmul.msk.bf16.gmra.mxu3 %vm602_vm1, %v1032_v36 }
  0x29   :  { %938 = vmatmul.msk.bf16.gmra.mxu2 %vm326_vm0, %v803_v35 }
  0x31   :  { %364 = vmatmul.bf16.gmra.mxu0 %v783_v41 }
  0x32   :  { %413 = vmatmul.bf16.gmra.mxu1 %v787_v42 }
  0x37   :  { %983 = vmatmul.msk.bf16.gmra.mxu3 %vm602_vm1, %v1033_v46 }
  0x39   :  { %939 = vmatmul.msk.bf16.gmra.mxu2 %vm326_vm0, %v815_v45  ;;  %v1343_v45 = vld [vmem:[%s1483_s2] ss:$0 sm:$0xff] }
  0x41   :  { %369 = vmatmul.bf16.gmra.mxu0 %v795_v51 }
  0x42   :  { %418 = vmatmul.bf16.gmra.mxu1 %v799_v52 }
  0x47   :  { %984 = vmatmul.msk.bf16.gmra.mxu3 %vm602_vm1, %v1034_v56 }
  0x49   :  { %940 = vmatmul.msk.bf16.gmra.mxu2 %vm326_vm0, %v827_v55 }
  0x51   :  { %374 = vmatmul.bf16.gmra.mxu0 %v807_v61 }
  0x52   :  { %423 = vmatmul.bf16.gmra.mxu1 %v811_v62 }
  0x57   :  { %985 = vmatmul.msk.bf16.gmra.mxu3 %vm602_vm1, %v1035_v2 }
  0x59   :  { %941 = vmatmul.msk.bf16.gmra.mxu2 %vm326_vm0, %v839_v1 }
  0x61   :  { %379 = vmatmul.bf16.gmra.mxu0 %v819_v7 }
  0x62   :  { %428 = vmatmul.bf16.gmra.mxu1 %v823_v8 }
  0x67   :  { %986 = vmatmul.msk.bf16.gmra.mxu3 %vm602_vm1, %v1036_v12 }
  0x69   :  { %942 = vmatmul.msk.bf16.gmra.mxu2 %vm326_vm0, %v851_v11 }
  0x71   :  { %384 = vmatmul.bf16.gmra.mxu0 %v831_v17 }
  0x72   :  { %433 = vmatmul.bf16.gmra.mxu1 %v835_v18 }
  0x77   :  { %987 = vmatmul.msk.bf16.gmra.mxu3 %vm602_vm1, %v1037_v22 }
  0x79   :  { %943 = vmatmul.msk.bf16.gmra.mxu2 %vm326_vm0, %v863_v21 }
  0x81   :  { %389 = vmatmul.bf16.gmra.mxu0 %v843_v27 }
  0x82   :  { %438 = vmatmul.bf16.gmra.mxu1 %v847_v28 }
  0x8a   :  { %v636_v36 = vpop.f32.mrf.mxu3 }
  0x8b   :  { %v680_v42 = vmul.f32 %v1332_v39, %v636_v36 }
  0x8c   :  { %v458_v35 = vpop.f32.mrf.mxu2 }
  0x8d   :  { %v700_v50 = vadd.f32 %v1338_v43, %v680_v42 }
  0x91   :  { %394 = vmatmul.bf16.gmra.mxu0 %v855_v33 }
  0x92   :  { %443 = vmatmul.bf16.gmra.mxu1 %v859_v34  ;;  %v638_v38 = vpop.f32.mrf.mxu3 }
  0x93   :  { %v681_v60 = vmul.f32 %v1332_v39, %v638_v38 }
  0x94   :  { %v460_v37 = vpop.f32.mrf.mxu2 }
  0x95   :  { %v701_v63 = vadd.f32 %v1338_v43, %v681_v60 }
  0x9a   :  { %v641_v47 = vpop.f32.mrf.mxu3 }
  0x9b   :  { %v682_v4 = vmul.f32 %v1332_v39, %v641_v47 }
  0x9c   :  { %v463_v46 = vpop.f32.mrf.mxu2 }
  0x9d   :  { %v702_v10 = vadd.f32 %v1338_v43, %v682_v4 }
  0x9e   :  { %v360_v40 = vpop.f32.mrf.mxu0 }
  0x9f   :  { %v409_v41 = vpop.f32.mrf.mxu1 }
  0xa0   :  { %v410_v44 = vadd.f32 %v409_v41, %v360_v40 }
  0xa2   :  { %v459_v48 = vadd.f32 %v458_v35, %v410_v44  ;;  %v643_v58 = vpop.f32.mrf.mxu3 }
  0xa3   :  { %v683_v20 = vmul.f32 %v1332_v39, %v643_v58 }
  0xa4   :  { %v502_v51 = vmul.f32 %v1343_v45, %v459_v48  ;;  %v465_v57 = vpop.f32.mrf.mxu2 }
  0xa5   :  { %v703_v23 = vadd.f32 %v1338_v43, %v683_v20 }
  0xa6   :  { %v522_v52 = vadd.f32 %v1348_v49, %v502_v51  ;;  %v362_v53 = vpop.f32.mrf.mxu0 }
  0xa7   :  { %v411_v54 = vpop.f32.mrf.mxu1 }
  0xa8   :  { %v716_v55 = vadd.f32 %v700_v50, %v522_v52  ;;  %v412_v56 = vadd.f32 %v411_v54, %v362_v53 }
  0xaa   :  { %v732_v59 = vmax.f32 %v716_v55, 0.0  ;;  %v461_v61 = vadd.f32 %v460_v37, %v412_v56  ;;  %v646_v7 = vpop.f32.mrf.mxu3 }
  0xab   :  { %v684_v28 = vmul.f32 %v1332_v39, %v646_v7 }
  0xac   :  { %748 = vst.msk [vmem:[%s1485_s8] sm:$0xff] %vm326_vm0, %v732_v59  ;;  %v503_v62 = vmul.f32 %v1343_v45, %v461_v61  ;;  %v468_v6 = vpop.f32.mrf.mxu2 }
  0xad   :  { %v704_v34 = vadd.f32 %v1338_v43, %v684_v28 }
  0xae   :  { %v523_v0 = vadd.f32 %v1348_v49, %v503_v62  ;;  %v365_v1 = vpop.f32.mrf.mxu0 }
  0xaf   :  { %v414_v2 = vpop.f32.mrf.mxu1 }
  0xb0   :  { %v717_v3 = vadd.f32 %v701_v63, %v523_v0  ;;  %v415_v5 = vadd.f32 %v414_v2, %v365_v1 }
  0xb2   :  { %v733_v8 = vmax.f32 %v717_v3, 0.0  ;;  %v464_v9 = vadd.f32 %v463_v46, %v415_v5  ;;  %v648_v18 = vpop.f32.mrf.mxu3 }
  0xb3   :  { %v685_v47 = vmul.f32 %v1332_v39, %v648_v18 }
  0xb4   :  { %749 = vst.msk [vmem:[%s1485_s8 + $0x8] sm:$0xff] %vm326_vm0, %v733_v8  ;;  %v504_v11 = vmul.f32 %v1343_v45, %v464_v9  ;;  %v470_v17 = vpop.f32.mrf.mxu2 }
  0xb5   :  { %v705_v51 = vadd.f32 %v1338_v43, %v685_v47 }
  0xb6   :  { %v524_v12 = vadd.f32 %v1348_v49, %v504_v11  ;;  %v367_v13 = vpop.f32.mrf.mxu0 }
  0xb7   :  { %v416_v14 = vpop.f32.mrf.mxu1 }
  0xb8   :  { %v718_v15 = vadd.f32 %v702_v10, %v524_v12  ;;  %v417_v16 = vadd.f32 %v416_v14, %v367_v13 }
  0xba   :  { %v734_v19 = vmax.f32 %v718_v15, 0.0  ;;  %v466_v21 = vadd.f32 %v465_v57, %v417_v16  ;;  %v651_v31 = vpop.f32.mrf.mxu3 }
  0xbb   :  { %v686_v56 = vmul.f32 %v1332_v39, %v651_v31 }
  0xbc   :  { %750 = vst.msk [vmem:[%s1485_s8 + $0x10] sm:$0xff] %vm326_vm0, %v734_v19  ;;  %v505_v22 = vmul.f32 %v1343_v45, %v466_v21  ;;  %v473_v30 = vpop.f32.mrf.mxu2 }
  0xbd   :  { %v706_v62 = vadd.f32 %v1338_v43, %v686_v56 }
  0xbe   :  { %v525_v24 = vadd.f32 %v1348_v49, %v505_v22  ;;  %v370_v25 = vpop.f32.mrf.mxu0 }
  0xbf   :  { %v419_v26 = vpop.f32.mrf.mxu1 }
  0xc0   :  { %v719_v27 = vadd.f32 %v703_v23, %v525_v24  ;;  %v420_v29 = vadd.f32 %v419_v26, %v370_v25 }
  0xc2   :  { %v735_v32 = vmax.f32 %v719_v27, 0.0  ;;  %v469_v33 = vadd.f32 %v468_v6, %v420_v29  ;;  %v653_v44 = vpop.f32.mrf.mxu3 }
  0xc3   :  { %v687_v6 = vmul.f32 %v1332_v39, %v653_v44 }
  0xc4   :  { %751 = vst.msk [vmem:[%s1485_s8 + $0x18] sm:$0xff] %vm326_vm0, %v735_v32  ;;  %v506_v35 = vmul.f32 %v1343_v45, %v469_v33  ;;  %v475_v42 = vpop.f32.mrf.mxu2 }
  0xc5   :  { %v707_v11 = vadd.f32 %v1338_v43, %v687_v6 }
  0xc6   :  { %v526_v36 = vadd.f32 %v1348_v49, %v506_v35  ;;  %v372_v37 = vpop.f32.mrf.mxu0 }
  0xc7   :  { %v421_v38 = vpop.f32.mrf.mxu1 }
  0xc8   :  { %v720_v40 = vadd.f32 %v704_v34, %v526_v36  ;;  %v422_v41 = vadd.f32 %v421_v38, %v372_v37 }
  0xca   :  { %v736_v46 = vmax.f32 %v720_v40, 0.0  ;;  %v471_v48 = vadd.f32 %v470_v17, %v422_v41  ;;  %v656_v58 = vpop.f32.mrf.mxu3 }
  0xcb   :  { %v688_v16 = vmul.f32 %v1332_v39, %v656_v58 }
  0xcc   :  { %752 = vst.msk [vmem:[%s1485_s8 + $0x20] sm:$0xff] %vm326_vm0, %v736_v46  ;;  %v507_v50 = vmul.f32 %v1343_v45, %v471_v48  ;;  %v478_v61 = vpop.f32.mrf.mxu2 }
  0xcd   :  { %v708_v20 = vadd.f32 %v1338_v43, %v688_v16 }
  0xce   :  { %v527_v52 = vadd.f32 %v1348_v49, %v507_v50  ;;  %v375_v53 = vpop.f32.mrf.mxu0 }
  0xcf   :  { %v424_v54 = vpop.f32.mrf.mxu1 }
  0xd0   :  { %v721_v55 = vadd.f32 %v705_v51, %v527_v52  ;;  %v425_v57 = vadd.f32 %v424_v54, %v375_v53 }
  0xd2   :  { %v737_v59 = vmax.f32 %v721_v55, 0.0  ;;  %v474_v60 = vadd.f32 %v473_v30, %v425_v57  ;;  %v658_v8 = vpop.f32.mrf.mxu3 }
  0xd3   :  { %v689_v30 = vmul.f32 %v1332_v39, %v658_v8 }
  0xd4   :  { %753 = vst.msk [vmem:[%s1485_s8 + $0x28] sm:$0xff] %vm326_vm0, %v737_v59  ;;  %v508_v63 = vmul.f32 %v1343_v45, %v474_v60  ;;  %v480_v10 = vpop.f32.mrf.mxu2 }
  0xd5   :  { %v709_v33 = vadd.f32 %v1338_v43, %v689_v30 }
  0xd6   :  { %v528_v0 = vadd.f32 %v1348_v49, %v508_v63  ;;  %v377_v1 = vpop.f32.mrf.mxu0 }
  0xd7   :  { %v426_v2 = vpop.f32.mrf.mxu1 }
  0xd8   :  { %v722_v3 = vadd.f32 %v706_v62, %v528_v0  ;;  %v427_v4 = vadd.f32 %v426_v2, %v377_v1 }
  0xda   :  { %v738_v5 = vmax.f32 %v722_v3, 0.0  ;;  %v476_v7 = vadd.f32 %v475_v42, %v427_v4  ;;  %v661_v22 = vpop.f32.mrf.mxu3 }
  0xdb   :  { %v690_v40 = vmul.f32 %v1332_v39, %v661_v22 }
  0xdc   :  { %754 = vst.msk [vmem:[%s1485_s8 + $0x30] sm:$0xff] %vm326_vm0, %v738_v5  ;;  %v509_v9 = vmul.f32 %v1343_v45, %v476_v7  ;;  %v483_v24 = vpop.f32.mrf.mxu2 }
  0xdd   :  { %v710_v47 = vadd.f32 %v1338_v43, %v690_v40 }
  0xde   :  { %v529_v12 = vadd.f32 %v1348_v49, %v509_v9  ;;  %v380_v13 = vpop.f32.mrf.mxu0 }
  0xdf   :  { %v429_v14 = vpop.f32.mrf.mxu1 }
  0xe0   :  { %v723_v15 = vadd.f32 %v707_v11, %v529_v12  ;;  %v430_v17 = vadd.f32 %v429_v14, %v380_v13 }
  0xe2   :  { %v739_v18 = vmax.f32 %v723_v15, 0.0  ;;  %v479_v19 = vadd.f32 %v478_v61, %v430_v17  ;;  %v663_v35 = vpop.f32.mrf.mxu3 }
  0xe3   :  { %v691_v57 = vmul.f32 %v1332_v39, %v663_v35 }
  0xe4   :  { %755 = vst.msk [vmem:[%s1485_s8 + $0x38] sm:$0xff] %vm326_vm0, %v739_v18  ;;  %v510_v21 = vmul.f32 %v1343_v45, %v479_v19  ;;  %v485_v42 = vpop.f32.mrf.mxu2 }
  0xe5   :  { %v711_v61 = vadd.f32 %v1338_v43, %v691_v57 }
  0xe6   :  { %v530_v23 = vadd.f32 %v1348_v49, %v510_v21  ;;  %v382_v25 = vpop.f32.mrf.mxu0 }
  0xe7   :  { %v431_v26 = vpop.f32.mrf.mxu1 }
  0xe8   :  { %v724_v27 = vadd.f32 %v708_v20, %v530_v23  ;;  %v432_v28 = vadd.f32 %v431_v26, %v382_v25 }
  0xea   :  { %v740_v29 = vmax.f32 %v724_v27, 0.0  ;;  %v481_v31 = vadd.f32 %v480_v10, %v432_v28  ;;  %v666_v55 = vpop.f32.mrf.mxu3 }
  0xeb   :  { %v692_v2 = vmul.f32 %v1332_v39, %v666_v55 }
  0xec   :  { %756 = vst.msk [vmem:[%s1485_s8 + $0x40] sm:$0xff] %vm326_vm0, %v740_v29  ;;  %v511_v32 = vmul.f32 %v1343_v45, %v481_v31  ;;  %v488_v59 = vpop.f32.mrf.mxu2 }
  0xed   :  { %v712_v7 = vadd.f32 %v1338_v43, %v692_v2 }
  0xee   :  { %v531_v34 = vadd.f32 %v1348_v49, %v511_v32  ;;  %v385_v36 = vpop.f32.mrf.mxu0 }
  0xef   :  { %v434_v37 = vpop.f32.mrf.mxu1 }
  0xf0   :  { %v725_v38 = vadd.f32 %v709_v33, %v531_v34  ;;  %v435_v41 = vadd.f32 %v434_v37, %v385_v36 }
  0xf2   :  { %v741_v44 = vmax.f32 %v725_v38, 0.0  ;;  %v484_v46 = vadd.f32 %v483_v24, %v435_v41  ;;  %v668_v6 = vpop.f32.mrf.mxu3 }
  0xf3   :  { %v693_v16 = vmul.f32 %v1332_v39, %v668_v6 }
  0xf4   :  { %757 = vst.msk [vmem:[%s1485_s8 + $0x48] sm:$0xff] %vm326_vm0, %v741_v44  ;;  %v512_v48 = vmul.f32 %v1343_v45, %v484_v46  ;;  %v490_v9 = vpop.f32.mrf.mxu2 }
  0xf5   :  { %v713_v20 = vadd.f32 %v1338_v43, %v693_v16 }
  0xf6   :  { %v532_v50 = vadd.f32 %v1348_v49, %v512_v48  ;;  %v387_v51 = vpop.f32.mrf.mxu0 }
  0xf7   :  { %v436_v52 = vpop.f32.mrf.mxu1 }
  0xf8   :  { %v726_v53 = vadd.f32 %v710_v47, %v532_v50  ;;  %v437_v54 = vadd.f32 %v436_v52, %v387_v51 }
  0xfa   :  { %v742_v56 = vmax.f32 %v726_v53, 0.0  ;;  %v486_v58 = vadd.f32 %v485_v42, %v437_v54  ;;  %v671_v19 = vpop.f32.mrf.mxu3 }
  0xfb   :  { %v694_v26 = vmul.f32 %v1332_v39, %v671_v19 }
  0xfc   :  { %758 = vst.msk [vmem:[%s1485_s8 + $0x50] sm:$0xff] %vm326_vm0, %v742_v56  ;;  %v513_v60 = vmul.f32 %v1343_v45, %v486_v58  ;;  %v493_v22 = vpop.f32.mrf.mxu2 }
  0xfd   :  { %v714_v30 = vadd.f32 %v1338_v43, %v694_v26 }
  0xfe   :  { %v533_v62 = vadd.f32 %v1348_v49, %v513_v60  ;;  %v390_v63 = vpop.f32.mrf.mxu0 }
  0xff   :  { %v439_v0 = vpop.f32.mrf.mxu1 }
 0x100   :  { %v727_v1 = vadd.f32 %v711_v61, %v533_v62  ;;  %v440_v3 = vadd.f32 %v439_v0, %v390_v63 }
 0x102   :  { %v743_v4 = vmax.f32 %v727_v1, 0.0  ;;  %v489_v5 = vadd.f32 %v488_v59, %v440_v3  ;;  %v673_v33 = vpop.f32.mrf.mxu3 }
 0x103   :  { %v695_v41 = vmul.f32 %v1332_v39, %v673_v33 }
 0x104   :  { %759 = vst.msk [vmem:[%s1485_s8 + $0x58] sm:$0xff] %vm326_vm0, %v743_v4  ;;  %v514_v8 = vmul.f32 %v1343_v45, %v489_v5  ;;  %v495_v38 = vpop.f32.mrf.mxu2 }
 0x105   :  { %v715_v46 = vadd.f32 %v1338_v43, %v695_v41 }
 0x106   :  { %v534_v10 = vadd.f32 %v1348_v49, %v514_v8  ;;  %v392_v11 = vpop.f32.mrf.mxu0 }
 0x107   :  { %v441_v12 = vpop.f32.mrf.mxu1 }
 0x108   :  { %v728_v13 = vadd.f32 %v712_v7, %v534_v10  ;;  %v442_v14 = vadd.f32 %v441_v12, %v392_v11 }
 0x10a   :  { %v744_v15 = vmax.f32 %v728_v13, 0.0  ;;  %v491_v17 = vadd.f32 %v490_v9, %v442_v14 }
 0x10c   :  { %760 = vst.msk [vmem:[%s1485_s8 + $0x60] sm:$0xff] %vm326_vm0, %v744_v15  ;;  %v515_v18 = vmul.f32 %v1343_v45, %v491_v17 }
 0x10e   :  { %v535_v21 = vadd.f32 %v1348_v49, %v515_v18  ;;  %v395_v23 = vpop.f32.mrf.mxu0 }
 0x10f   :  { %v444_v24 = vpop.f32.mrf.mxu1 }
 0x110   :  { %v729_v25 = vadd.f32 %v713_v20, %v535_v21  ;;  %v445_v27 = vadd.f32 %v444_v24, %v395_v23 }
 0x112   :  { %v745_v28 = vmax.f32 %v729_v25, 0.0  ;;  %v494_v29 = vadd.f32 %v493_v22, %v445_v27 }
 0x114   :  { %761 = vst.msk [vmem:[%s1485_s8 + $0x68] sm:$0xff] %vm326_vm0, %v745_v28  ;;  %v516_v31 = vmul.f32 %v1343_v45, %v494_v29 }
 0x116   :  { %v536_v32 = vadd.f32 %v1348_v49, %v516_v31  ;;  %v397_v34 = vpop.f32.mrf.mxu0 }
 0x117   :  { %v446_v35 = vpop.f32.mrf.mxu1 }
 0x118   :  { %v730_v36 = vadd.f32 %v714_v30, %v536_v32  ;;  %v447_v37 = vadd.f32 %v446_v35, %v397_v34 }
 0x11a   :  { %v746_v40 = vmax.f32 %v730_v36, 0.0  ;;  %v496_v42 = vadd.f32 %v495_v38, %v447_v37 }
 0x11c   :  { %762 = vst.msk [vmem:[%s1485_s8 + $0x70] sm:$0xff] %vm326_vm0, %v746_v40  ;;  %v517_v44 = vmul.f32 %v1343_v45, %v496_v42 }
 0x11e   :  { %v537_v47 = vadd.f32 %v1348_v49, %v517_v44 }
 0x120   :  { %v731_v48 = vadd.f32 %v715_v46, %v537_v47 }
 0x122   :  { %v747_v50 = vmax.f32 %v731_v48, 0.0 }
 0x124   :  { %763 = vst.msk [vmem:[%s1485_s8 + $0x78] sm:$0xff] %vm326_vm0, %v747_v50 }

// kernel: _lambda_.21
= control target key start
LH: loop header
LB: loop body
LE: loop exit
PB: predicated region body
PF: predicated region fallthrough
CT: control target
= control target key end

     0   :  { %vm566_vm0 = vcmask 523264   ;;  %vm948_vm1 = vcmask 261120   ;;  %s2239_s1 = inlined_call_operand.vmem [shape: bf16[576,64], index: 1, kind: input, shape index: {}]   ;;  %s2240_s0 = inlined_call_operand.vmem [shape: bf16[128,576], index: 0, kind: input, shape index: {}]   ;;  %s2241_s5 = inlined_call_operand.vmem [shape: bf16[32,64], index: 5, kind: input, shape index: {}]   ;;  %s2242_s4 = inlined_call_operand.vmem [shape: bf16[128,32], index: 4, kind: input, shape index: {}]   ;;  %s2243_s6 = inlined_call_operand.vmem [shape: f32[1,64], index: 6, kind: input, shape index: {}]   ;;  %s2244_s7 = inlined_call_operand.vmem [shape: f32[1,64], index: 7, kind: input, shape index: {}]   ;;  %s2245_s2 = inlined_call_operand.vmem [shape: f32[1,64], index: 2, kind: input, shape index: {}]   ;;  %s2246_s3 = inlined_call_operand.vmem [shape: f32[1,64], index: 3, kind: input, shape index: {}]   ;;  %s2247_s8 = inlined_call_operand.vmem [shape: f32[128,64], index: 8, kind: output, shape index: {}]  }
   0x1   :  { %v1521_v0 = vld [vmem:[%s2239_s1 + $0x38] sm:$0xff]  ;;  %v1520_v2 = vld [vmem:[%s2239_s1 + $0x30] sm:$0xff]  ;;  %v1519_v4 = vld [vmem:[%s2239_s1 + $0x28] sm:$0xff] }
   0x2   :  { %v1529_v1 = vld [vmem:[%s2239_s1 + $0x78] sm:$0xff]  ;;  %1560 = vmatpush.bf16.msra.mxu2 %v1521_v0  ;;  %v1528_v3 = vld [vmem:[%s2239_s1 + $0x70] sm:$0xff]  ;;  %591 = vmatpush.bf16.msra.mxu0 %v1521_v0  ;;  %v1527_v5 = vld [vmem:[%s2239_s1 + $0x68] sm:$0xff] }
   0x3   :  { %1568 = vmatpush.bf16.msra.mxu3 %v1529_v1  ;;  %640 = vmatpush.bf16.msra.mxu1 %v1529_v1  ;;  %v1518_v6 = vld [vmem:[%s2239_s1 + $0x20] sm:$0xff]  ;;  %v1517_v8 = vld [vmem:[%s2239_s1 + $0x18] sm:$0xff]  ;;  %v1516_v10 = vld [vmem:[%s2239_s1 + $0x10] sm:$0xff] }
   0x4   :  { %v1526_v7 = vld [vmem:[%s2239_s1 + $0x60] sm:$0xff]  ;;  %v1525_v9 = vld [vmem:[%s2239_s1 + $0x58] sm:$0xff]  ;;  %v1524_v11 = vld [vmem:[%s2239_s1 + $0x50] sm:$0xff] }
   0x5   :  { %v1515_v12 = vld [vmem:[%s2239_s1 + $0x8] sm:$0xff]  ;;  %v1514_v14 = vld [vmem:[%s2239_s1] sm:$0xff]  ;;  %v1496_v17 = vld [vmem:[%s2240_s0 + $0xb0] sm:$0xf0] }
   0x6   :  { %1561 = vmatpush.bf16.msra.mxu2 %v1520_v2  ;;  %592 = vmatpush.bf16.msra.mxu0 %v1520_v2  ;;  %v1523_v13 = vld [vmem:[%s2239_s1 + $0x48] sm:$0xff]  ;;  %v1522_v15 = vld [vmem:[%s2239_s1 + $0x40] sm:$0xff]  ;;  %v1198_v19 = vld [vmem:[%s2240_s0 + $0xb4] sm:$0xf0] }
   0x7   :  { %1569 = vmatpush.bf16.msra.mxu3 %v1528_v3  ;;  %641 = vmatpush.bf16.msra.mxu1 %v1528_v3  ;;  %v1196_v16 = vld [vmem:[%s2240_s0 + $0xa0] sm:$0xf]  ;;  %v1494_v18 = vld [vmem:[%s2240_s0 + $0xa4] sm:$0xf]  ;;  %v1476_v21 = vld [vmem:[%s2240_s0 + $0x10] sm:$0xf0] }
   0x8   :  { %v1116_v20 = vld [vmem:[%s2240_s0] sm:$0xf]  ;;  %v1474_v22 = vld [vmem:[%s2240_s0 + $0x4] sm:$0xf]  ;;  %v1118_v23 = vld [vmem:[%s2240_s0 + $0x14] sm:$0xf0]  ;;  %v1197_v26 = vor.u32 %v1496_v17, %v1196_v16  ;;  %v1201_v27 = vor.u32 %v1494_v18, %v1198_v19 }
   0x9   :  { %v1537_v24 = vld [vmem:[%s2239_s1 + $0xb8] sm:$0xff]  ;;  %v1117_v28 = vor.u32 %v1476_v21, %v1116_v20  ;;  %v1121_v29 = vor.u32 %v1474_v22, %v1118_v23  ;;  %v1559_v31 = vld [vmem:[%s2241_s5 + $0x8] sm:$0xff]  ;;  %v1536_v32 = vld [vmem:[%s2239_s1 + $0xb0] sm:$0xff] }
   0xa   :  { %1562 = vmatpush.bf16.msra.mxu2 %v1519_v4  ;;  %593 = vmatpush.bf16.msra.mxu0 %v1519_v4  ;;  %v1545_v25 = vld [vmem:[%s2239_s1 + $0xf8] sm:$0xff]  ;;  %v1544_v33 = vld [vmem:[%s2239_s1 + $0xf0] sm:$0xff]  ;;  %v1558_v35 = vld [vmem:[%s2241_s5] sm:$0xff] }
   0xb   :  { %1570 = vmatpush.bf16.msra.mxu3 %v1527_v5  ;;  %642 = vmatpush.bf16.msra.mxu1 %v1527_v5  ;;  %v1549_v30 = vld [vmem:[%s2239_s1 + $0x118] sm:$0xff]  ;;  %v1548_v34 = vld [vmem:[%s2239_s1 + $0x110] sm:$0xff]  ;;  %v1535_v36 = vld [vmem:[%s2239_s1 + $0xa8] sm:$0xff] }
   0xc   :  { %v1543_v37 = vld [vmem:[%s2239_s1 + $0xe8] sm:$0xff]  ;;  %v1534_v39 = vld [vmem:[%s2239_s1 + $0xa0] sm:$0xff]  ;;  %v1501_v42 = vld [vmem:[%s2240_s0 + $0xd8] sm:$0xf0] }
   0xd   :  { %v1547_v38 = vld [vmem:[%s2239_s1 + $0x108] sm:$0xff]  ;;  %v1542_v40 = vld [vmem:[%s2239_s1 + $0xe0] sm:$0xff]  ;;  %v1481_v46 = vld [vmem:[%s2240_s0 + $0x38] sm:$0xf0] }
   0xe   :  { %1563 = vmatpush.bf16.msra.mxu2 %v1518_v6  ;;  %594 = vmatpush.bf16.msra.mxu0 %v1518_v6  ;;  %v1216_v41 = vld [vmem:[%s2240_s0 + $0xc8] sm:$0xf]  ;;  %v1499_v43 = vld [vmem:[%s2240_s0 + $0xcc] sm:$0xf]  ;;  %v1218_v44 = vld [vmem:[%s2240_s0 + $0xdc] sm:$0xf0] }
   0xf   :  { %1571 = vmatpush.bf16.msra.mxu3 %v1526_v7  ;;  %643 = vmatpush.bf16.msra.mxu1 %v1526_v7  ;;  %v1136_v45 = vld [vmem:[%s2240_s0 + $0x28] sm:$0xf]  ;;  %v1479_v47 = vld [vmem:[%s2240_s0 + $0x2c] sm:$0xf]  ;;  %v1138_v48 = vld [vmem:[%s2240_s0 + $0x3c] sm:$0xf0]  ;;  %v1217_v51 = vor.u32 %v1501_v42, %v1216_v41  ;;  %v1221_v52 = vor.u32 %v1499_v43, %v1218_v44 }
  0x10   :  { %v1533_v49 = vld [vmem:[%s2239_s1 + $0x98] sm:$0xff]  ;;  %v1137_v53 = vor.u32 %v1481_v46, %v1136_v45  ;;  %v1141_v54 = vor.u32 %v1479_v47, %v1138_v48  ;;  %v1532_v55 = vld [vmem:[%s2239_s1 + $0x90] sm:$0xff]  ;;  %v1546_v57 = vld [vmem:[%s2239_s1 + $0x100] sm:$0xff] }
  0x11   :  { %v1541_v50 = vld [vmem:[%s2239_s1 + $0xd8] sm:$0xff]  ;;  %v1540_v56 = vld [vmem:[%s2239_s1 + $0xd0] sm:$0xff]  ;;  %v1531_v58 = vld [vmem:[%s2239_s1 + $0x88] sm:$0xff] }
  0x12   :  { %1564 = vmatpush.bf16.msra.mxu2 %v1517_v8  ;;  %595 = vmatpush.bf16.msra.mxu0 %v1517_v8  ;;  %v1539_v59 = vld [vmem:[%s2239_s1 + $0xc8] sm:$0xff]  ;;  %v1530_v60 = vld [vmem:[%s2239_s1 + $0x80] sm:$0xff]  ;;  %v1236_v62 = vld [vmem:[%s2240_s0 + $0xf0] sm:$0xf] }
  0x13   :  { %1572 = vmatpush.bf16.msra.mxu3 %v1525_v9  ;;  %644 = vmatpush.bf16.msra.mxu1 %v1525_v9  ;;  %v1538_v61 = vld [vmem:[%s2239_s1 + $0xc0] sm:$0xff]  ;;  %v1504_v0 = vld [vmem:[%s2240_s0 + $0xf4] sm:$0xf]  ;;  %v1238_v1 = vld [vmem:[%s2240_s0 + $0x104] sm:$0xf0] }
  0x14   :  { %v1506_v63 = vld [vmem:[%s2240_s0 + $0x100] sm:$0xf0]  ;;  %v1156_v2 = vld [vmem:[%s2240_s0 + $0x50] sm:$0xf]  ;;  %v1484_v4 = vld [vmem:[%s2240_s0 + $0x54] sm:$0xf]  ;;  %v1241_v7 = vor.u32 %v1504_v0, %v1238_v1 }
  0x15   :  { %v1486_v3 = vld [vmem:[%s2240_s0 + $0x60] sm:$0xf0]  ;;  %v1158_v5 = vld [vmem:[%s2240_s0 + $0x64] sm:$0xf0]  ;;  %v1237_v6 = vor.u32 %v1506_v63, %v1236_v62  ;;  %v1489_v16 = vld [vmem:[%s2240_s0 + $0x7c] sm:$0xf] }
  0x16   :  { %1565 = vmatpush.bf16.msra.mxu2 %v1516_v10  ;;  %596 = vmatpush.bf16.msra.mxu0 %v1516_v10  ;;  %v1157_v8 = vor.u32 %v1486_v3, %v1156_v2  ;;  %v1161_v9 = vor.u32 %v1484_v4, %v1158_v5  ;;  %v1256_v10 = vld [vmem:[%s2240_s0 + $0x118] sm:$0xf]  ;;  %v1178_v17 = vld [vmem:[%s2240_s0 + $0x8c] sm:$0xf0]  ;;  %v1124_v22 = vld [vmem:[%s2240_s0 + $0x8] sm:$0xf] }
  0x17   :  { %1573 = vmatpush.bf16.msra.mxu3 %v1524_v11  ;;  %645 = vmatpush.bf16.msra.mxu1 %v1524_v11  ;;  %v1511_v11 = vld [vmem:[%s2240_s0 + $0x128] sm:$0xf0]  ;;  %v1181_v21 = vor.u32 %v1489_v16, %v1178_v17  ;;  %v1477_v23 = vld [vmem:[%s2240_s0 + $0x18] sm:$0xf0]  ;;  %v1164_v42 = vld [vmem:[%s2240_s0 + $0x58] sm:$0xf] }
  0x18   :  { %v1257_v18 = vor.u32 %v1511_v11, %v1256_v10  ;;  %v1551_v41 = vld [vmem:[%s2242_s4 + $0x8] sm:$0xff]  ;;  %v1485_v44 = vld [vmem:[%s2240_s0 + $0x5c] sm:$0xf]  ;;  %v1166_v45 = vld [vmem:[%s2240_s0 + $0x6c] sm:$0xf0] }
  0x19   :  { %v1487_v43 = vld [vmem:[%s2240_s0 + $0x68] sm:$0xf0]  ;;  %v1172_v46 = vld [vmem:[%s2240_s0 + $0x60] sm:$0xf]  ;;  %v1488_v47 = vld [vmem:[%s2240_s0 + $0x70] sm:$0xf0] }
  0x1a   :  { %1566 = vmatpush.bf16.msra.mxu2 %v1515_v12  ;;  %597 = vmatpush.bf16.msra.mxu0 %v1515_v12  ;;  %v1509_v12 = vld [vmem:[%s2240_s0 + $0x11c] sm:$0xf]  ;;  %v1165_v48 = vor.u32 %v1487_v43, %v1164_v42  ;;  %v1204_v62 = vld [vmem:[%s2240_s0 + $0xa8] sm:$0xf]  ;;  %v1495_v0 = vld [vmem:[%s2240_s0 + $0xac] sm:$0xf] }
  0x1b   :  { %1574 = vmatpush.bf16.msra.mxu3 %v1523_v13  ;;  %646 = vmatpush.bf16.msra.mxu1 %v1523_v13  ;;  %v1258_v13 = vld [vmem:[%s2240_s0 + $0x12c] sm:$0xf0]  ;;  %v1497_v63 = vld [vmem:[%s2240_s0 + $0xb8] sm:$0xf0]  ;;  %v1206_v1 = vld [vmem:[%s2240_s0 + $0xbc] sm:$0xf0] }
  0x1c   :  { %v1261_v19 = vor.u32 %v1509_v12, %v1258_v13  ;;  %v1212_v2 = vld [vmem:[%s2240_s0 + $0xb0] sm:$0xf]  ;;  %v1498_v3 = vld [vmem:[%s2240_s0 + $0xc0] sm:$0xf0]  ;;  %v1205_v4 = vor.u32 %v1497_v63, %v1204_v62  ;;  %v1209_v5 = vor.u32 %v1495_v0, %v1206_v1  ;;  %v1500_v17 = vld [vmem:[%s2240_s0 + $0xd4] sm:$0xf] }
  0x1d   :  { %v1502_v16 = vld [vmem:[%s2240_s0 + $0xe0] sm:$0xf0] }
  0x1e   :  { %1567 = vmatpush.bf16.msra.mxu2 %v1514_v14  ;;  %598 = vmatpush.bf16.msra.mxu0 %v1514_v14  ;;  %v1176_v14 = vld [vmem:[%s2240_s0 + $0x78] sm:$0xf] }
  0x1f   :  { %1575 = vmatpush.bf16.msra.mxu3 %v1522_v15  ;;  %647 = vmatpush.bf16.msra.mxu1 %v1522_v15  ;;  %v1491_v15 = vld [vmem:[%s2240_s0 + $0x88] sm:$0xf0] }
  0x20   :  { %v1177_v20 = vor.u32 %v1491_v15, %v1176_v14  ;;  %v1224_v15 = vld [vmem:[%s2240_s0 + $0xd0] sm:$0xf] }
  0x21   :  { %619 = vmatmul.bf16.vlgmr.msra.gmra.mxu2 %v1197_v26  ;;  %599 = vmatmul.bf16.vlgmr.msra.gmra.mxu0 %v1117_v28  ;;  %v1132_v26 = vld [vmem:[%s2240_s0 + $0x10] sm:$0xf]  ;;  %v1125_v28 = vor.u32 %v1477_v23, %v1124_v22 }
  0x22   :  { %689 = vmatpush.bf16.msrb.mxu2 %v1537_v24  ;;  %668 = vmatmul.bf16.vlgmr.msra.gmra.mxu3 %v1201_v27  ;;  %v1475_v24 = vld [vmem:[%s2240_s0 + $0xc] sm:$0xf]  ;;  %v1478_v27 = vld [vmem:[%s2240_s0 + $0x20] sm:$0xf0] }
  0x23   :  { %738 = vmatpush.bf16.msrb.mxu3 %v1545_v25  ;;  %648 = vmatmul.bf16.vlgmr.msra.gmra.mxu1 %v1121_v29  ;;  %v1126_v25 = vld [vmem:[%s2240_s0 + $0x1c] sm:$0xf0] }
  0x24   :  { %791 = vmatpush.bf16.msrb.mxu0 %v1549_v30  ;;  %979 = vmatpush.bf16.msrb.mxu1 %v1559_v31  ;;  %v1129_v29 = vor.u32 %v1475_v24, %v1126_v25  ;;  %v1133_v30 = vor.u32 %v1478_v27, %v1132_v26  ;;  %v1550_v31 = vld [vmem:[%s2242_s4] sm:$0xff]  ;;  %v1225_v24 = vor.u32 %v1502_v16, %v1224_v15  ;;  %v1555_v27 = vld [vmem:[%s2242_s4 + $0x28] sm:$0xff] }
  0x26   :  { %690 = vmatpush.bf16.msrb.mxu2 %v1536_v32  ;;  %v1144_v32 = vld [vmem:[%s2240_s0 + $0x30] sm:$0xf] }
  0x27   :  { %739 = vmatpush.bf16.msrb.mxu3 %v1544_v33  ;;  %v1482_v33 = vld [vmem:[%s2240_s0 + $0x40] sm:$0xf0] }
  0x28   :  { %792 = vmatpush.bf16.msrb.mxu0 %v1548_v34  ;;  %980 = vmatpush.bf16.msrb.mxu1 %v1558_v35  ;;  %v1480_v34 = vld [vmem:[%s2240_s0 + $0x34] sm:$0xf]  ;;  %v1146_v35 = vld [vmem:[%s2240_s0 + $0x44] sm:$0xf0] }
  0x2a   :  { %691 = vmatpush.bf16.msrb.mxu2 %v1535_v36  ;;  %v1152_v36 = vld [vmem:[%s2240_s0 + $0x38] sm:$0xf] }
  0x2b   :  { %740 = vmatpush.bf16.msrb.mxu3 %v1543_v37  ;;  %v1483_v37 = vld [vmem:[%s2240_s0 + $0x48] sm:$0xf0] }
  0x2c   :  { %793 = vmatpush.bf16.msrb.mxu0 %v1547_v38  ;;  %v1145_v38 = vor.u32 %v1482_v33, %v1144_v32 }
  0x2e   :  { %692 = vmatpush.bf16.msrb.mxu2 %v1534_v39  ;;  %v1149_v39 = vor.u32 %v1480_v34, %v1146_v35  ;;  %v1244_v35 = vld [vmem:[%s2240_s0 + $0xf8] sm:$0xf] }
  0x2f   :  { %741 = vmatpush.bf16.msrb.mxu3 %v1542_v40  ;;  %v1153_v40 = vor.u32 %v1483_v37, %v1152_v36  ;;  %v1507_v36 = vld [vmem:[%s2240_s0 + $0x108] sm:$0xf0]  ;;  %v1505_v37 = vld [vmem:[%s2240_s0 + $0xfc] sm:$0xf] }
  0x30   :  { %794 = vmatpush.bf16.msrb.mxu0 %v1546_v57  ;;  %v1493_v57 = vld [vmem:[%s2240_s0 + $0x98] sm:$0xf0] }
  0x31   :  { %624 = vmatmul.bf16.gmra.mxu2 %v1217_v51  ;;  %604 = vmatmul.bf16.gmra.mxu0 %v1137_v53  ;;  %v1552_v51 = vld [vmem:[%s2242_s4 + $0x10] sm:$0xff] }
  0x32   :  { %693 = vmatpush.bf16.msrb.mxu2 %v1533_v49  ;;  %673 = vmatmul.bf16.gmra.mxu3 %v1221_v52  ;;  %v1169_v49 = vor.u32 %v1485_v44, %v1166_v45  ;;  %v1184_v52 = vld [vmem:[%s2240_s0 + $0x80] sm:$0xf]  ;;  %v1492_v53 = vld [vmem:[%s2240_s0 + $0x90] sm:$0xf0]  ;;  %v1245_v44 = vor.u32 %v1507_v36, %v1244_v35 }
  0x33   :  { %742 = vmatpush.bf16.msrb.mxu3 %v1541_v50  ;;  %653 = vmatmul.bf16.gmra.mxu1 %v1141_v54  ;;  %v1173_v50 = vor.u32 %v1488_v47, %v1172_v46  ;;  %v1490_v54 = vld [vmem:[%s2240_s0 + $0x84] sm:$0xf]  ;;  %v1556_v47 = vld [vmem:[%s2242_s4 + $0x30] sm:$0xff] }
  0x36   :  { %694 = vmatpush.bf16.msrb.mxu2 %v1532_v55  ;;  %v1186_v55 = vld [vmem:[%s2240_s0 + $0x94] sm:$0xf0] }
  0x37   :  { %743 = vmatpush.bf16.msrb.mxu3 %v1540_v56  ;;  %v1192_v56 = vld [vmem:[%s2240_s0 + $0x88] sm:$0xf] }
  0x3a   :  { %695 = vmatpush.bf16.msrb.mxu2 %v1531_v58  ;;  %v1185_v58 = vor.u32 %v1492_v53, %v1184_v52 }
  0x3b   :  { %744 = vmatpush.bf16.msrb.mxu3 %v1539_v59  ;;  %v1189_v59 = vor.u32 %v1490_v54, %v1186_v55  ;;  %v1264_v55 = vld [vmem:[%s2240_s0 + $0x120] sm:$0xf] }
  0x3e   :  { %696 = vmatpush.bf16.msrb.mxu2 %v1530_v60  ;;  %v1193_v60 = vor.u32 %v1493_v57, %v1192_v56  ;;  %v1512_v56 = vld [vmem:[%s2240_s0 + $0x130] sm:$0xf0]  ;;  %v1510_v57 = vld [vmem:[%s2240_s0 + $0x124] sm:$0xf] }
  0x3f   :  { %745 = vmatpush.bf16.msrb.mxu3 %v1538_v61  ;;  %v1553_v61 = vld [vmem:[%s2242_s4 + $0x18] sm:$0xff]  ;;  %v1265_v0 = vor.u32 %v1512_v56, %v1264_v55 }
  0x41   :  { %629 = vmatmul.bf16.gmra.mxu2 %v1237_v6  ;;  %609 = vmatmul.bf16.gmra.mxu0 %v1157_v8  ;;  %v1213_v6 = vor.u32 %v1498_v3, %v1212_v2  ;;  %v1557_v3 = vld [vmem:[%s2242_s4 + $0x38] sm:$0xff] }
  0x42   :  { %678 = vmatmul.bf16.gmra.mxu3 %v1241_v7  ;;  %v1554_v7 = vld [vmem:[%s2242_s4 + $0x20] sm:$0xff] }
  0x43   :  { %658 = vmatmul.bf16.gmra.mxu1 %v1161_v9 }
  0x51   :  { %634 = vmatmul.bf16.gmra.mxu2 %v1257_v18  ;;  %614 = vmatmul.bf16.gmra.mxu0 %v1177_v20  ;;  %v1226_v18 = vld [vmem:[%s2240_s0 + $0xe4] sm:$0xf0]  ;;  %v1503_v20 = vld [vmem:[%s2240_s0 + $0xe8] sm:$0xf0] }
  0x52   :  { %683 = vmatmul.bf16.gmra.mxu3 %v1261_v19  ;;  %v1232_v19 = vld [vmem:[%s2240_s0 + $0xd8] sm:$0xf]  ;;  %v1229_v25 = vor.u32 %v1500_v17, %v1226_v18 }
  0x53   :  { %663 = vmatmul.bf16.gmra.mxu1 %v1181_v21  ;;  %v1233_v26 = vor.u32 %v1503_v20, %v1232_v19 }
  0x61   :  { %697 = vmatmul.bf16.vlgmr.msrb.gmra.mxu2 %v1125_v28  ;;  %1418 = vmatmul.msk.bf16.vlgmr.msrb.gmra.mxu0 %vm566_vm0, %v1133_v30 }
  0x62   :  { %746 = vmatmul.bf16.vlgmr.msrb.gmra.mxu3 %v1129_v29 }
  0x63   :  { %1466 = vmatmul.msk.bf16.vlgmr.msrb.gmra.mxu1 %vm948_vm1, %v1550_v31 }
  0x71   :  { %702 = vmatmul.bf16.gmra.mxu2 %v1145_v38  ;;  %1419 = vmatmul.msk.bf16.gmra.mxu0 %vm566_vm0, %v1153_v40  ;;  %v1246_v38 = vld [vmem:[%s2240_s0 + $0x10c] sm:$0xf0]  ;;  %v1508_v40 = vld [vmem:[%s2240_s0 + $0x110] sm:$0xf0] }
  0x72   :  { %751 = vmatmul.bf16.gmra.mxu3 %v1149_v39  ;;  %v1252_v39 = vld [vmem:[%s2240_s0 + $0x100] sm:$0xf]  ;;  %v1249_v45 = vor.u32 %v1505_v37, %v1246_v38 }
  0x73   :  { %1467 = vmatmul.msk.bf16.gmra.mxu1 %vm948_vm1, %v1551_v41  ;;  %v1253_v46 = vor.u32 %v1508_v40, %v1252_v39  ;;  %v2088_v37 = vld [vmem:[%s2246_s3] ss:$0 sm:$0xff] }
  0x81   :  { %707 = vmatmul.bf16.gmra.mxu2 %v1165_v48  ;;  %1420 = vmatmul.msk.bf16.gmra.mxu0 %vm566_vm0, %v1173_v50 }
  0x82   :  { %756 = vmatmul.bf16.gmra.mxu3 %v1169_v49 }
  0x83   :  { %1468 = vmatmul.msk.bf16.gmra.mxu1 %vm948_vm1, %v1552_v51 }
  0x91   :  { %712 = vmatmul.bf16.gmra.mxu2 %v1185_v58  ;;  %1421 = vmatmul.msk.bf16.gmra.mxu0 %vm566_vm0, %v1193_v60  ;;  %v1266_v58 = vld [vmem:[%s2240_s0 + $0x134] sm:$0xf0]  ;;  %v1513_v60 = vld [vmem:[%s2240_s0 + $0x138] sm:$0xf0] }
  0x92   :  { %761 = vmatmul.bf16.gmra.mxu3 %v1189_v59  ;;  %v1272_v59 = vld [vmem:[%s2240_s0 + $0x128] sm:$0xf]  ;;  %v1269_v1 = vor.u32 %v1510_v57, %v1266_v58 }
  0x93   :  { %1469 = vmatmul.msk.bf16.gmra.mxu1 %vm948_vm1, %v1553_v61  ;;  %v1273_v2 = vor.u32 %v1513_v60, %v1272_v59 }
  0x9e   :  { %v1948_v8 = vpop.f32.mrf.mxu0 }
  0xa0   :  { %v1950_v9 = vpop.f32.mrf.mxu1 }
  0xa1   :  { %717 = vmatmul.bf16.gmra.mxu2 %v1205_v4  ;;  %1422 = vmatmul.msk.bf16.gmra.mxu0 %vm566_vm0, %v1213_v6 }
  0xa2   :  { %766 = vmatmul.bf16.gmra.mxu3 %v1209_v5 }
  0xa3   :  { %1470 = vmatmul.msk.bf16.gmra.mxu1 %vm948_vm1, %v1554_v7 }
  0xa4   :  { %v620_v10 = vpop.f32.mrf.mxu2 }
  0xa5   :  { %v669_v11 = vpop.f32.mrf.mxu3 }
  0xa6   :  { %v1954_v12 = vadd.f32 %v669_v11, %v620_v10  ;;  %v1956_v13 = vpop.f32.mrf.mxu0 }
  0xa8   :  { %v1958_v14 = vpop.f32.mrf.mxu1 }
  0xa9   :  { %v652_v38 = vadd.f32 %v1958_v14, %v1956_v13 }
  0xac   :  { %v622_v21 = vpop.f32.mrf.mxu2 }
  0xad   :  { %v671_v22 = vpop.f32.mrf.mxu3 }
  0xae   :  { %v1978_v23 = vadd.f32 %v671_v22, %v622_v21  ;;  %v1983_v28 = vpop.f32.mrf.mxu0  ;;  %v650_v21 = vadd.f32 %v1950_v9, %v1948_v8  ;;  %v2072_v22 = vld [vmem:[%s2243_s6] ss:$0 sm:$0xff] }
  0xaf   :  { %v2083_v8 = vld [vmem:[%s2245_s2] ss:$0 sm:$0xff] }
  0xb0   :  { %v1985_v29 = vpop.f32.mrf.mxu1 }
  0xb1   :  { %722 = vmatmul.bf16.gmra.mxu2 %v1225_v24  ;;  %1423 = vmatmul.msk.bf16.gmra.mxu0 %vm566_vm0, %v1233_v26  ;;  %v655_v13 = vadd.f32 %v1985_v29, %v1983_v28 }
  0xb2   :  { %771 = vmatmul.bf16.gmra.mxu3 %v1229_v25 }
  0xb3   :  { %1471 = vmatmul.msk.bf16.gmra.mxu1 %vm948_vm1, %v1555_v27 }
  0xb4   :  { %v625_v30 = vpop.f32.mrf.mxu2 }
  0xb5   :  { %v674_v31 = vpop.f32.mrf.mxu3 }
  0xb6   :  { %v1989_v32 = vadd.f32 %v674_v31, %v625_v30  ;;  %v1991_v33 = vpop.f32.mrf.mxu0  ;;  %v2078_v30 = vld [vmem:[%s2244_s7] ss:$0 sm:$0xff] }
  0xb8   :  { %v1993_v34 = vpop.f32.mrf.mxu1 }
  0xbc   :  { %v627_v41 = vpop.f32.mrf.mxu2 }
  0xbd   :  { %v676_v42 = vpop.f32.mrf.mxu3 }
  0xbe   :  { %v2013_v43 = vadd.f32 %v676_v42, %v627_v41  ;;  %v2018_v48 = vpop.f32.mrf.mxu0 }
  0xc0   :  { %v2020_v49 = vpop.f32.mrf.mxu1 }
  0xc1   :  { %727 = vmatmul.bf16.gmra.mxu2 %v1245_v44  ;;  %1424 = vmatmul.msk.bf16.gmra.mxu0 %vm566_vm0, %v1253_v46 }
  0xc2   :  { %776 = vmatmul.bf16.gmra.mxu3 %v1249_v45 }
  0xc3   :  { %1472 = vmatmul.msk.bf16.gmra.mxu1 %vm948_vm1, %v1556_v47 }
  0xc4   :  { %v630_v50 = vpop.f32.mrf.mxu2 }
  0xc5   :  { %v679_v51 = vpop.f32.mrf.mxu3 }
  0xc6   :  { %v2024_v52 = vadd.f32 %v679_v51, %v630_v50  ;;  %v2026_v53 = vpop.f32.mrf.mxu0 }
  0xc8   :  { %v2028_v54 = vpop.f32.mrf.mxu1 }
  0xcc   :  { %v632_v61 = vpop.f32.mrf.mxu2 }
  0xcd   :  { %v681_v62 = vpop.f32.mrf.mxu3 }
  0xce   :  { %v2048_v63 = vadd.f32 %v681_v62, %v632_v61  ;;  %v2053_v4 = vpop.f32.mrf.mxu0 }
  0xd0   :  { %v2055_v5 = vpop.f32.mrf.mxu1 }
  0xd1   :  { %732 = vmatmul.bf16.gmra.mxu2 %v1265_v0  ;;  %1425 = vmatmul.msk.bf16.gmra.mxu0 %vm566_vm0, %v1273_v2 }
  0xd2   :  { %781 = vmatmul.bf16.gmra.mxu3 %v1269_v1 }
  0xd3   :  { %1473 = vmatmul.msk.bf16.gmra.mxu1 %vm948_vm1, %v1557_v3 }
  0xd4   :  { %v635_v6 = vpop.f32.mrf.mxu2 }
  0xd5   :  { %v684_v7 = vpop.f32.mrf.mxu3 }
  0xd6   :  { %v2059_v10 = vadd.f32 %v684_v7, %v635_v6  ;;  %v2061_v11 = vpop.f32.mrf.mxu0  ;;  %v657_v7 = vadd.f32 %v1993_v34, %v1991_v33 }
  0xd8   :  { %v2063_v15 = vpop.f32.mrf.mxu1 }
  0xdc   :  { %v637_v16 = vpop.f32.mrf.mxu2 }
  0xdd   :  { %v686_v17 = vpop.f32.mrf.mxu3 }
  0xde   :  { %v2065_v18 = vadd.f32 %v686_v17, %v637_v16  ;;  %v796_v19 = vpop.f32.mrf.mxu0 }
  0xe0   :  { %v982_v20 = vpop.f32.mrf.mxu1 }
  0xe1   :  { %v1026_v27 = vmul.f32 %v2072_v22, %v982_v20 }
  0xe3   :  { %v1046_v39 = vadd.f32 %v2078_v30, %v1026_v27 }
  0xe4   :  { %v698_v24 = vpop.f32.mrf.mxu2 }
  0xe5   :  { %v747_v25 = vpop.f32.mrf.mxu3  ;;  %v699_v26 = vadd.f32 %v698_v24, %v650_v21 }
  0xe6   :  { %v798_v9 = vpop.f32.mrf.mxu0 }
  0xe7   :  { %v748_v31 = vadd.f32 %v747_v25, %v699_v26 }
  0xe8   :  { %v984_v35 = vpop.f32.mrf.mxu1 }
  0xe9   :  { %v797_v36 = vadd.f32 %v796_v19, %v748_v31  ;;  %v1027_v56 = vmul.f32 %v2072_v22, %v984_v35  ;;  %v660_v35 = vadd.f32 %v2020_v49, %v2018_v48 }
  0xeb   :  { %v840_v40 = vmul.f32 %v2083_v8, %v797_v36  ;;  %v1047_v60 = vadd.f32 %v2078_v30, %v1027_v56 }
  0xec   :  { %v700_v41 = vpop.f32.mrf.mxu2 }
  0xed   :  { %v749_v42 = vpop.f32.mrf.mxu3  ;;  %v860_v44 = vadd.f32 %v2088_v37, %v840_v40  ;;  %v701_v45 = vadd.f32 %v700_v41, %v652_v38 }
  0xee   :  { %v801_v50 = vpop.f32.mrf.mxu0 }
  0xef   :  { %v1062_v46 = vadd.f32 %v1046_v39, %v860_v44  ;;  %v750_v47 = vadd.f32 %v749_v42, %v701_v45 }
  0xf0   :  { %v987_v51 = vpop.f32.mrf.mxu1 }
  0xf1   :  { %v1078_v55 = vmax.f32 %v1062_v46, 0.0  ;;  %v799_v57 = vadd.f32 %v798_v9, %v750_v47  ;;  %v1028_v1 = vmul.f32 %v2072_v22, %v987_v51  ;;  %v662_v51 = vadd.f32 %v2028_v54, %v2026_v53 }
  0xf3   :  { %1094 = vst.msk [vmem:[%s2247_s8] sm:$0xff] %vm566_vm0, %v1078_v55  ;;  %v841_v14 = vmul.f32 %v2083_v8, %v799_v57  ;;  %v1048_v16 = vadd.f32 %v2078_v30, %v1028_v1  ;;  %v665_v1 = vadd.f32 %v2055_v5, %v2053_v4 }
  0xf4   :  { %v703_v58 = vpop.f32.mrf.mxu2 }
  0xf5   :  { %v752_v59 = vpop.f32.mrf.mxu3  ;;  %v861_v61 = vadd.f32 %v2088_v37, %v841_v14  ;;  %v704_v62 = vadd.f32 %v703_v58, %v655_v13 }
  0xf6   :  { %v803_v3 = vpop.f32.mrf.mxu0 }
  0xf7   :  { %v1063_v0 = vadd.f32 %v1047_v60, %v861_v61  ;;  %v753_v2 = vadd.f32 %v752_v59, %v704_v62 }
  0xf8   :  { %v989_v28 = vpop.f32.mrf.mxu1 }
  0xf9   :  { %v1079_v29 = vmax.f32 %v1063_v0, 0.0  ;;  %v802_v6 = vadd.f32 %v801_v50, %v753_v2  ;;  %v1029_v33 = vmul.f32 %v2072_v22, %v989_v28 }
  0xfb   :  { %1095 = vst.msk [vmem:[%s2247_s8 + $0x8] sm:$0xff] %vm566_vm0, %v1079_v29  ;;  %v842_v17 = vmul.f32 %v2083_v8, %v802_v6  ;;  %v1049_v40 = vadd.f32 %v2078_v30, %v1029_v33 }
  0xfc   :  { %v705_v19 = vpop.f32.mrf.mxu2 }
  0xfd   :  { %v754_v20 = vpop.f32.mrf.mxu3  ;;  %v862_v21 = vadd.f32 %v2088_v37, %v842_v17  ;;  %v706_v24 = vadd.f32 %v705_v19, %v657_v7 }
  0xfe   :  { %v806_v27 = vpop.f32.mrf.mxu0 }
  0xff   :  { %v1064_v25 = vadd.f32 %v1048_v16, %v862_v21  ;;  %v755_v26 = vadd.f32 %v754_v20, %v706_v24  ;;  %v667_v24 = vadd.f32 %v2063_v15, %v2061_v11 }
 0x100   :  { %v992_v31 = vpop.f32.mrf.mxu1 }
 0x101   :  { %v1080_v9 = vmax.f32 %v1064_v25, 0.0  ;;  %v804_v34 = vadd.f32 %v803_v3, %v755_v26  ;;  %v1030_v45 = vmul.f32 %v2072_v22, %v992_v31 }
 0x103   :  { %1096 = vst.msk [vmem:[%s2247_s8 + $0x10] sm:$0xff] %vm566_vm0, %v1080_v9  ;;  %v843_v36 = vmul.f32 %v2083_v8, %v804_v34  ;;  %v1050_v55 = vadd.f32 %v2078_v30, %v1030_v45 }
 0x104   :  { %v708_v38 = vpop.f32.mrf.mxu2 }
 0x105   :  { %v757_v39 = vpop.f32.mrf.mxu3  ;;  %v863_v41 = vadd.f32 %v2088_v37, %v843_v36  ;;  %v709_v42 = vadd.f32 %v708_v38, %v660_v35 }
 0x106   :  { %v808_v47 = vpop.f32.mrf.mxu0 }
 0x107   :  { %v1065_v44 = vadd.f32 %v1049_v40, %v863_v41  ;;  %v758_v46 = vadd.f32 %v757_v39, %v709_v42 }
 0x108   :  { %v994_v48 = vpop.f32.mrf.mxu1 }
 0x109   :  { %v1081_v49 = vmax.f32 %v1065_v44, 0.0  ;;  %v807_v50 = vadd.f32 %v806_v27, %v758_v46  ;;  %v1031_v53 = vmul.f32 %v2072_v22, %v994_v48 }
 0x10b   :  { %1097 = vst.msk [vmem:[%s2247_s8 + $0x18] sm:$0xff] %vm566_vm0, %v1081_v49  ;;  %v844_v56 = vmul.f32 %v2083_v8, %v807_v50  ;;  %v1051_v29 = vadd.f32 %v2078_v30, %v1031_v53 }
 0x10c   :  { %v710_v57 = vpop.f32.mrf.mxu2 }
 0x10d   :  { %v759_v13 = vpop.f32.mrf.mxu3  ;;  %v864_v14 = vadd.f32 %v2088_v37, %v844_v56  ;;  %v711_v58 = vadd.f32 %v710_v57, %v662_v51 }
 0x10e   :  { %v811_v61 = vpop.f32.mrf.mxu0 }
 0x10f   :  { %v1066_v59 = vadd.f32 %v1050_v55, %v864_v14  ;;  %v760_v60 = vadd.f32 %v759_v13, %v711_v58 }
 0x110   :  { %v997_v62 = vpop.f32.mrf.mxu1 }
 0x111   :  { %v1082_v0 = vmax.f32 %v1066_v59, 0.0  ;;  %v809_v54 = vadd.f32 %v808_v47, %v760_v60  ;;  %v1032_v17 = vmul.f32 %v2072_v22, %v997_v62 }
 0x113   :  { %1098 = vst.msk [vmem:[%s2247_s8 + $0x20] sm:$0xff] %vm566_vm0, %v1082_v0  ;;  %v845_v2 = vmul.f32 %v2083_v8, %v809_v54  ;;  %v1052_v25 = vadd.f32 %v2078_v30, %v1032_v17 }
 0x114   :  { %v713_v3 = vpop.f32.mrf.mxu2 }
 0x115   :  { %v762_v28 = vpop.f32.mrf.mxu3  ;;  %v865_v6 = vadd.f32 %v2088_v37, %v845_v2  ;;  %v714_v7 = vadd.f32 %v713_v3, %v665_v1 }
 0x116   :  { %v813_v20 = vpop.f32.mrf.mxu0 }
 0x117   :  { %v1067_v16 = vadd.f32 %v1051_v29, %v865_v6  ;;  %v763_v19 = vadd.f32 %v762_v28, %v714_v7 }
 0x118   :  { %v999_v4 = vpop.f32.mrf.mxu1 }
 0x119   :  { %v1083_v5 = vmax.f32 %v1067_v16, 0.0  ;;  %v812_v21 = vadd.f32 %v811_v61, %v763_v19  ;;  %v1033_v11 = vmul.f32 %v2072_v22, %v999_v4 }
 0x11b   :  { %1099 = vst.msk [vmem:[%s2247_s8 + $0x28] sm:$0xff] %vm566_vm0, %v1083_v5  ;;  %v846_v26 = vmul.f32 %v2083_v8, %v812_v21  ;;  %v1053_v44 = vadd.f32 %v2078_v30, %v1033_v11 }
 0x11c   :  { %v715_v27 = vpop.f32.mrf.mxu2 }
 0x11d   :  { %v764_v31 = vpop.f32.mrf.mxu3  ;;  %v866_v9 = vadd.f32 %v2088_v37, %v846_v26  ;;  %v716_v33 = vadd.f32 %v715_v27, %v667_v24 }
 0x11e   :  { %v816_v36 = vpop.f32.mrf.mxu0 }
 0x11f   :  { %v1068_v34 = vadd.f32 %v1052_v25, %v866_v9  ;;  %v765_v35 = vadd.f32 %v764_v31, %v716_v33 }
 0x120   :  { %v1002_v38 = vpop.f32.mrf.mxu1 }
 0x121   :  { %v1084_v39 = vmax.f32 %v1068_v34, 0.0  ;;  %v814_v15 = vadd.f32 %v813_v20, %v765_v35  ;;  %v1034_v48 = vmul.f32 %v2072_v22, %v1002_v38 }
 0x123   :  { %1100 = vst.msk [vmem:[%s2247_s8 + $0x30] sm:$0xff] %vm566_vm0, %v1084_v39  ;;  %v847_v40 = vmul.f32 %v2083_v8, %v814_v15  ;;  %v1054_v57 = vadd.f32 %v2078_v30, %v1034_v48 }
 0x124   :  { %v718_v41 = vpop.f32.mrf.mxu2 }
 0x125   :  { %v767_v42 = vpop.f32.mrf.mxu3  ;;  %v867_v45 = vadd.f32 %v2088_v37, %v847_v40  ;;  %v719_v46 = vadd.f32 %v718_v41, %v1954_v12 }
 0x126   :  { %v818_v50 = vpop.f32.mrf.mxu0 }
 0x127   :  { %v1069_v47 = vadd.f32 %v1053_v44, %v867_v45  ;;  %v768_v49 = vadd.f32 %v767_v42, %v719_v46 }
 0x128   :  { %v1004_v51 = vpop.f32.mrf.mxu1 }
 0x129   :  { %v1085_v55 = vmax.f32 %v1069_v47, 0.0  ;;  %v817_v56 = vadd.f32 %v816_v36, %v768_v49  ;;  %v1035_v54 = vmul.f32 %v2072_v22, %v1004_v51 }
 0x12b   :  { %1101 = vst.msk [vmem:[%s2247_s8 + $0x38] sm:$0xff] %vm566_vm0, %v1085_v55  ;;  %v848_v13 = vmul.f32 %v2083_v8, %v817_v56  ;;  %v1055_v29 = vadd.f32 %v2078_v30, %v1035_v54 }
 0x12c   :  { %v720_v14 = vpop.f32.mrf.mxu2 }
 0x12d   :  { %v769_v58 = vpop.f32.mrf.mxu3  ;;  %v868_v12 = vadd.f32 %v2088_v37, %v848_v13  ;;  %v721_v59 = vadd.f32 %v720_v14, %v1978_v23 }
 0x12e   :  { %v821_v62 = vpop.f32.mrf.mxu0 }
 0x12f   :  { %v1070_v60 = vadd.f32 %v1054_v57, %v868_v12  ;;  %v770_v61 = vadd.f32 %v769_v58, %v721_v59 }
 0x130   :  { %v1007_v0 = vpop.f32.mrf.mxu1 }
 0x131   :  { %v1086_v53 = vmax.f32 %v1070_v60, 0.0  ;;  %v819_v1 = vadd.f32 %v818_v50, %v770_v61  ;;  %v1036_v16 = vmul.f32 %v2072_v22, %v1007_v0 }
 0x133   :  { %1102 = vst.msk [vmem:[%s2247_s8 + $0x40] sm:$0xff] %vm566_vm0, %v1086_v53  ;;  %v849_v2 = vmul.f32 %v2083_v8, %v819_v1  ;;  %v1056_v21 = vadd.f32 %v2078_v30, %v1036_v16 }
 0x134   :  { %v723_v3 = vpop.f32.mrf.mxu2 }
 0x135   :  { %v772_v28 = vpop.f32.mrf.mxu3  ;;  %v869_v23 = vadd.f32 %v2088_v37, %v849_v2  ;;  %v724_v6 = vadd.f32 %v723_v3, %v1989_v32 }
 0x136   :  { %v823_v19 = vpop.f32.mrf.mxu0 }
 0x137   :  { %v1071_v7 = vadd.f32 %v1055_v29, %v869_v23  ;;  %v773_v17 = vadd.f32 %v772_v28, %v724_v6 }
 0x138   :  { %v1009_v20 = vpop.f32.mrf.mxu1 }
 0x139   :  { %v1087_v4 = vmax.f32 %v1071_v7, 0.0  ;;  %v822_v5 = vadd.f32 %v821_v62, %v773_v17  ;;  %v1037_v35 = vmul.f32 %v2072_v22, %v1009_v20 }
 0x13b   :  { %1103 = vst.msk [vmem:[%s2247_s8 + $0x48] sm:$0xff] %vm566_vm0, %v1087_v4  ;;  %v850_v24 = vmul.f32 %v2083_v8, %v822_v5  ;;  %v1057_v40 = vadd.f32 %v2078_v30, %v1037_v35 }
 0x13c   :  { %v725_v25 = vpop.f32.mrf.mxu2 }
 0x13d   :  { %v774_v26 = vpop.f32.mrf.mxu3  ;;  %v870_v32 = vadd.f32 %v2088_v37, %v850_v24  ;;  %v726_v27 = vadd.f32 %v725_v25, %v2013_v43 }
 0x13e   :  { %v826_v38 = vpop.f32.mrf.mxu0 }
 0x13f   :  { %v1072_v31 = vadd.f32 %v1056_v21, %v870_v32  ;;  %v775_v9 = vadd.f32 %v774_v26, %v726_v27 }
 0x140   :  { %v1012_v33 = vpop.f32.mrf.mxu1 }
 0x141   :  { %v1088_v34 = vmax.f32 %v1072_v31, 0.0  ;;  %v824_v36 = vadd.f32 %v823_v19, %v775_v9  ;;  %v1038_v44 = vmul.f32 %v2072_v22, %v1012_v33 }
 0x143   :  { %1104 = vst.msk [vmem:[%s2247_s8 + $0x50] sm:$0xff] %vm566_vm0, %v1088_v34  ;;  %v851_v39 = vmul.f32 %v2083_v8, %v824_v36  ;;  %v1058_v49 = vadd.f32 %v2078_v30, %v1038_v44 }
 0x144   :  { %v728_v11 = vpop.f32.mrf.mxu2 }
 0x145   :  { %v777_v15 = vpop.f32.mrf.mxu3  ;;  %v871_v43 = vadd.f32 %v2088_v37, %v851_v39  ;;  %v729_v41 = vadd.f32 %v728_v11, %v2024_v52 }
 0x146   :  { %v828_v51 = vpop.f32.mrf.mxu0 }
 0x147   :  { %v1073_v42 = vadd.f32 %v1057_v40, %v871_v43  ;;  %v778_v45 = vadd.f32 %v777_v15, %v729_v41 }
 0x148   :  { %v1014_v48 = vpop.f32.mrf.mxu1 }
 0x149   :  { %v1089_v46 = vmax.f32 %v1073_v42, 0.0  ;;  %v827_v47 = vadd.f32 %v826_v38, %v778_v45  ;;  %v1039_v12 = vmul.f32 %v2072_v22, %v1014_v48 }
 0x14b   :  { %1105 = vst.msk [vmem:[%s2247_s8 + $0x58] sm:$0xff] %vm566_vm0, %v1089_v46  ;;  %v852_v50 = vmul.f32 %v2083_v8, %v827_v47  ;;  %v1059_v53 = vadd.f32 %v2078_v30, %v1039_v12 }
 0x14c   :  { %v730_v55 = vpop.f32.mrf.mxu2 }
 0x14d   :  { %v779_v56 = vpop.f32.mrf.mxu3  ;;  %v872_v52 = vadd.f32 %v2088_v37, %v852_v50  ;;  %v731_v57 = vadd.f32 %v730_v55, %v2048_v63 }
 0x14e   :  { %v831_v1 = vpop.f32.mrf.mxu0 }
 0x14f   :  { %v1074_v13 = vadd.f32 %v1058_v49, %v872_v52  ;;  %v780_v14 = vadd.f32 %v779_v56, %v731_v57 }
 0x150   :  { %v1017_v61 = vpop.f32.mrf.mxu1 }
 0x151   :  { %v1090_v58 = vmax.f32 %v1074_v13, 0.0  ;;  %v829_v59 = vadd.f32 %v828_v51, %v780_v14  ;;  %v1040_v3 = vmul.f32 %v2072_v22, %v1017_v61 }
 0x153   :  { %1106 = vst.msk [vmem:[%s2247_s8 + $0x60] sm:$0xff] %vm566_vm0, %v1090_v58  ;;  %v853_v60 = vmul.f32 %v2083_v8, %v829_v59  ;;  %v1060_v6 = vadd.f32 %v2078_v30, %v1040_v3 }
 0x154   :  { %v733_v62 = vpop.f32.mrf.mxu2 }
 0x155   :  { %v782_v0 = vpop.f32.mrf.mxu3  ;;  %v873_v63 = vadd.f32 %v2088_v37, %v853_v60  ;;  %v734_v54 = vadd.f32 %v733_v62, %v2059_v10 }
 0x156   :  { %v833_v21 = vpop.f32.mrf.mxu0 }
 0x157   :  { %v1075_v2 = vadd.f32 %v1059_v53, %v873_v63  ;;  %v783_v28 = vadd.f32 %v782_v0, %v734_v54 }
 0x158   :  { %v1019_v19 = vpop.f32.mrf.mxu1 }
 0x159   :  { %v1091_v29 = vmax.f32 %v1075_v2, 0.0  ;;  %v832_v23 = vadd.f32 %v831_v1, %v783_v28  ;;  %v1041_v25 = vmul.f32 %v2072_v22, %v1019_v19 }
 0x15b   :  { %1107 = vst.msk [vmem:[%s2247_s8 + $0x68] sm:$0xff] %vm566_vm0, %v1091_v29  ;;  %v854_v7 = vmul.f32 %v2083_v8, %v832_v23  ;;  %v1061_v27 = vadd.f32 %v2078_v30, %v1041_v25 }
 0x15c   :  { %v735_v16 = vpop.f32.mrf.mxu2 }
 0x15d   :  { %v874_v17 = vadd.f32 %v2088_v37, %v854_v7  ;;  %v736_v10 = vadd.f32 %v735_v16, %v2065_v18  ;;  %v784_v20 = vpop.f32.mrf.mxu3 }
 0x15f   :  { %v1076_v4 = vadd.f32 %v1060_v6, %v874_v17  ;;  %v785_v5 = vadd.f32 %v784_v20, %v736_v10 }
 0x161   :  { %v1092_v24 = vmax.f32 %v1076_v4, 0.0  ;;  %v834_v26 = vadd.f32 %v833_v21, %v785_v5 }
 0x163   :  { %1108 = vst.msk [vmem:[%s2247_s8 + $0x70] sm:$0xff] %vm566_vm0, %v1092_v24  ;;  %v855_v32 = vmul.f32 %v2083_v8, %v834_v26 }
 0x165   :  { %v875_v18 = vadd.f32 %v2088_v37, %v855_v32 }
 0x167   :  { %v1077_v31 = vadd.f32 %v1061_v27, %v875_v18 }
 0x169   :  { %v1093_v9 = vmax.f32 %v1077_v31, 0.0 }
 0x16b   :  { %1109 = vst.msk [vmem:[%s2247_s8 + $0x78] sm:$0xff] %vm566_vm0, %v1093_v9 }

// kernel: _lambda_.22
= control target key start
LH: loop header
LB: loop body
LE: loop exit
PB: predicated region body
PF: predicated region fallthrough
CT: control target
= control target key end

     0   :  { %vm554_vm0 = vcmask 523264   ;;  %s1860_s1 = inlined_call_operand.vmem [shape: bf16[576,128], index: 1, kind: input, shape index: {}]   ;;  %s1861_s0 = inlined_call_operand.vmem [shape: bf16[128,576], index: 0, kind: input, shape index: {}]   ;;  %s1862_s2 = inlined_call_operand.vmem [shape: f32[1,128], index: 2, kind: input, shape index: {}]   ;;  %s1863_s3 = inlined_call_operand.vmem [shape: f32[1,128], index: 3, kind: input, shape index: {}]   ;;  %s1864_s4 = inlined_call_operand.vmem [shape: bf16[128,128], index: 4, kind: output, shape index: {}]  }
   0x1   :  { %v1275_v0 = vld [vmem:[%s1860_s1 + $0x38] sm:$0xff]  ;;  %v1274_v1 = vld [vmem:[%s1860_s1 + $0x30] sm:$0xff]  ;;  %v1273_v2 = vld [vmem:[%s1860_s1 + $0x28] sm:$0xff] }
   0x2   :  { %1351 = vmatpush.bf16.msra.mxu1 %v1275_v0  ;;  %1352 = vmatpush.bf16.msra.mxu2 %v1275_v0  ;;  %v1272_v3 = vld [vmem:[%s1860_s1 + $0x20] sm:$0xff]  ;;  %v1271_v4 = vld [vmem:[%s1860_s1 + $0x18] sm:$0xff]  ;;  %v1270_v5 = vld [vmem:[%s1860_s1 + $0x10] sm:$0xff] }
   0x3   :  { %1353 = vmatpush.bf16.msra.mxu3 %v1275_v0  ;;  %579 = vmatpush.bf16.msra.mxu0 %v1275_v0  ;;  %v1269_v6 = vld [vmem:[%s1860_s1 + $0x8] sm:$0xff]  ;;  %v1268_v7 = vld [vmem:[%s1860_s1] sm:$0xff]  ;;  %v958_v8 = vld [vmem:[%s1861_s0 + $0x50] sm:$0xf] }
   0x4   :  { %v1240_v9 = vld [vmem:[%s1861_s0 + $0x60] sm:$0xf0]  ;;  %v998_v10 = vld [vmem:[%s1861_s0 + $0xa0] sm:$0xf]  ;;  %v1250_v11 = vld [vmem:[%s1861_s0 + $0xb0] sm:$0xf0] }
   0x5   :  { %v1038_v12 = vld [vmem:[%s1861_s0 + $0xf0] sm:$0xf]  ;;  %v1260_v13 = vld [vmem:[%s1861_s0 + $0x100] sm:$0xf0]  ;;  %v918_v14 = vld [vmem:[%s1861_s0] sm:$0xf]  ;;  %v959_v18 = vor.u32 %v1240_v9, %v958_v8  ;;  %v999_v19 = vor.u32 %v1250_v11, %v998_v10 }
   0x6   :  { %1354 = vmatpush.bf16.msra.mxu1 %v1274_v1  ;;  %1355 = vmatpush.bf16.msra.mxu2 %v1274_v1  ;;  %v1230_v15 = vld [vmem:[%s1861_s0 + $0x10] sm:$0xf0]  ;;  %v1291_v16 = vld [vmem:[%s1860_s1 + $0xb8] sm:$0xff]  ;;  %v1039_v20 = vor.u32 %v1260_v13, %v1038_v12  ;;  %v1289_v28 = vld [vmem:[%s1860_s1 + $0xa8] sm:$0xff] }
   0x7   :  { %1356 = vmatpush.bf16.msra.mxu3 %v1274_v1  ;;  %580 = vmatpush.bf16.msra.mxu0 %v1274_v1  ;;  %v1283_v17 = vld [vmem:[%s1860_s1 + $0x78] sm:$0xff]  ;;  %v919_v21 = vor.u32 %v1230_v15, %v918_v14  ;;  %v1290_v24 = vld [vmem:[%s1860_s1 + $0xb0] sm:$0xff]  ;;  %v1281_v29 = vld [vmem:[%s1860_s1 + $0x68] sm:$0xff] }
   0x8   :  { %v1299_v22 = vld [vmem:[%s1860_s1 + $0xf8] sm:$0xff]  ;;  %v1282_v25 = vld [vmem:[%s1860_s1 + $0x70] sm:$0xff]  ;;  %v1297_v30 = vld [vmem:[%s1860_s1 + $0xe8] sm:$0xff] }
   0x9   :  { %v1303_v23 = vld [vmem:[%s1860_s1 + $0x118] sm:$0xff]  ;;  %v1298_v26 = vld [vmem:[%s1860_s1 + $0xf0] sm:$0xff]  ;;  %v1301_v31 = vld [vmem:[%s1860_s1 + $0x108] sm:$0xff] }
   0xa   :  { %1357 = vmatpush.bf16.msra.mxu1 %v1273_v2  ;;  %1358 = vmatpush.bf16.msra.mxu2 %v1273_v2  ;;  %v1302_v27 = vld [vmem:[%s1860_s1 + $0x110] sm:$0xff]  ;;  %v1288_v32 = vld [vmem:[%s1860_s1 + $0xa0] sm:$0xff]  ;;  %v978_v35 = vld [vmem:[%s1861_s0 + $0x78] sm:$0xf] }
   0xb   :  { %1359 = vmatpush.bf16.msra.mxu3 %v1273_v2  ;;  %581 = vmatpush.bf16.msra.mxu0 %v1273_v2  ;;  %v1280_v33 = vld [vmem:[%s1860_s1 + $0x60] sm:$0xff]  ;;  %v1245_v36 = vld [vmem:[%s1861_s0 + $0x88] sm:$0xf0]  ;;  %v1018_v37 = vld [vmem:[%s1861_s0 + $0xc8] sm:$0xf] }
   0xc   :  { %v1296_v34 = vld [vmem:[%s1860_s1 + $0xe0] sm:$0xff]  ;;  %v1255_v38 = vld [vmem:[%s1861_s0 + $0xd8] sm:$0xf0]  ;;  %v1058_v39 = vld [vmem:[%s1861_s0 + $0x118] sm:$0xf]  ;;  %v979_v46 = vor.u32 %v1245_v36, %v978_v35 }
   0xd   :  { %v1265_v40 = vld [vmem:[%s1861_s0 + $0x128] sm:$0xf0]  ;;  %v938_v41 = vld [vmem:[%s1861_s0 + $0x28] sm:$0xf]  ;;  %v1235_v42 = vld [vmem:[%s1861_s0 + $0x38] sm:$0xf0]  ;;  %v1019_v47 = vor.u32 %v1255_v38, %v1018_v37 }
   0xe   :  { %1360 = vmatpush.bf16.msra.mxu1 %v1272_v3  ;;  %1361 = vmatpush.bf16.msra.mxu2 %v1272_v3  ;;  %v1300_v43 = vld [vmem:[%s1860_s1 + $0x100] sm:$0xff]  ;;  %v1287_v44 = vld [vmem:[%s1860_s1 + $0x98] sm:$0xff]  ;;  %v1059_v48 = vor.u32 %v1265_v40, %v1058_v39  ;;  %v939_v49 = vor.u32 %v1235_v42, %v938_v41  ;;  %v1286_v51 = vld [vmem:[%s1860_s1 + $0x90] sm:$0xff] }
   0xf   :  { %1362 = vmatpush.bf16.msra.mxu3 %v1272_v3  ;;  %582 = vmatpush.bf16.msra.mxu0 %v1272_v3  ;;  %v1279_v45 = vld [vmem:[%s1860_s1 + $0x58] sm:$0xff]  ;;  %v1278_v52 = vld [vmem:[%s1860_s1 + $0x50] sm:$0xff]  ;;  %v1285_v54 = vld [vmem:[%s1860_s1 + $0x88] sm:$0xff] }
  0x10   :  { %v1295_v50 = vld [vmem:[%s1860_s1 + $0xd8] sm:$0xff]  ;;  %v1294_v53 = vld [vmem:[%s1860_s1 + $0xd0] sm:$0xff]  ;;  %v1277_v55 = vld [vmem:[%s1860_s1 + $0x48] sm:$0xff] }
  0x11   :  { %v1293_v56 = vld [vmem:[%s1860_s1 + $0xc8] sm:$0xff]  ;;  %v1284_v57 = vld [vmem:[%s1860_s1 + $0x80] sm:$0xff]  ;;  %v920_v61 = vld [vmem:[%s1861_s0 + $0x14] sm:$0xf0] }
  0x12   :  { %1363 = vmatpush.bf16.msra.mxu1 %v1271_v4  ;;  %1364 = vmatpush.bf16.msra.mxu2 %v1271_v4  ;;  %v1276_v58 = vld [vmem:[%s1860_s1 + $0x40] sm:$0xff]  ;;  %v926_v62 = vld [vmem:[%s1861_s0 + $0x8] sm:$0xf]  ;;  %v1231_v63 = vld [vmem:[%s1861_s0 + $0x18] sm:$0xf0] }
  0x13   :  { %1365 = vmatpush.bf16.msra.mxu3 %v1271_v4  ;;  %583 = vmatpush.bf16.msra.mxu0 %v1271_v4  ;;  %v1292_v59 = vld [vmem:[%s1860_s1 + $0xc0] sm:$0xff]  ;;  %v1229_v0 = vld [vmem:[%s1861_s0 + $0xc] sm:$0xf]  ;;  %v934_v2 = vld [vmem:[%s1861_s0 + $0x10] sm:$0xf] }
  0x14   :  { %v1228_v60 = vld [vmem:[%s1861_s0 + $0x4] sm:$0xf]  ;;  %v928_v1 = vld [vmem:[%s1861_s0 + $0x1c] sm:$0xf0]  ;;  %v1233_v8 = vld [vmem:[%s1861_s0 + $0x2c] sm:$0xf] }
  0x15   :  { %v1232_v3 = vld [vmem:[%s1861_s0 + $0x20] sm:$0xf0]  ;;  %v923_v4 = vor.u32 %v1228_v60, %v920_v61  ;;  %v940_v9 = vld [vmem:[%s1861_s0 + $0x3c] sm:$0xf0]  ;;  %v946_v10 = vld [vmem:[%s1861_s0 + $0x30] sm:$0xf] }
  0x16   :  { %1366 = vmatpush.bf16.msra.mxu1 %v1270_v5  ;;  %1367 = vmatpush.bf16.msra.mxu2 %v1270_v5  ;;  %v1236_v11 = vld [vmem:[%s1861_s0 + $0x40] sm:$0xf0]  ;;  %v1234_v12 = vld [vmem:[%s1861_s0 + $0x34] sm:$0xf]  ;;  %v948_v13 = vld [vmem:[%s1861_s0 + $0x44] sm:$0xf0] }
  0x17   :  { %1368 = vmatpush.bf16.msra.mxu3 %v1270_v5  ;;  %584 = vmatpush.bf16.msra.mxu0 %v1270_v5  ;;  %v927_v5 = vor.u32 %v1231_v63, %v926_v62  ;;  %v954_v14 = vld [vmem:[%s1861_s0 + $0x38] sm:$0xf]  ;;  %v1237_v15 = vld [vmem:[%s1861_s0 + $0x48] sm:$0xf0]  ;;  %v1246_v35 = vld [vmem:[%s1861_s0 + $0x90] sm:$0xf0] }
  0x18   :  { %v1244_v36 = vld [vmem:[%s1861_s0 + $0x84] sm:$0xf]  ;;  %v988_v37 = vld [vmem:[%s1861_s0 + $0x94] sm:$0xf0]  ;;  %v994_v38 = vld [vmem:[%s1861_s0 + $0x88] sm:$0xf] }
  0x19   :  { %v1247_v39 = vld [vmem:[%s1861_s0 + $0x98] sm:$0xf0]  ;;  %v991_v42 = vor.u32 %v1244_v36, %v988_v37  ;;  %v1254_v60 = vld [vmem:[%s1861_s0 + $0xd4] sm:$0xf]  ;;  %v1028_v61 = vld [vmem:[%s1861_s0 + $0xe4] sm:$0xf0] }
  0x1a   :  { %1369 = vmatpush.bf16.msra.mxu1 %v1269_v6  ;;  %1370 = vmatpush.bf16.msra.mxu2 %v1269_v6  ;;  %v1034_v62 = vld [vmem:[%s1861_s0 + $0xd8] sm:$0xf]  ;;  %v1257_v63 = vld [vmem:[%s1861_s0 + $0xe8] sm:$0xf0] }
  0x1b   :  { %1371 = vmatpush.bf16.msra.mxu3 %v1269_v6  ;;  %585 = vmatpush.bf16.msra.mxu0 %v1269_v6  ;;  %v931_v6 = vor.u32 %v1229_v0, %v928_v1 }
  0x1e   :  { %1372 = vmatpush.bf16.msra.mxu1 %v1268_v7  ;;  %1373 = vmatpush.bf16.msra.mxu2 %v1268_v7 }
  0x1f   :  { %1374 = vmatpush.bf16.msra.mxu3 %v1268_v7  ;;  %586 = vmatpush.bf16.msra.mxu0 %v1268_v7  ;;  %v935_v7 = vor.u32 %v1232_v3, %v934_v2  ;;  %v1031_v2 = vor.u32 %v1254_v60, %v1028_v61  ;;  %v1035_v3 = vor.u32 %v1257_v63, %v1034_v62  ;;  %v1791_v61 = vld [vmem:[%s1863_s3] ss:$0 sm:$0xff] }
  0x21   :  { %597 = vmatmul.bf16.vlgmr.msra.gmra.mxu1 %v959_v18  ;;  %607 = vmatmul.bf16.vlgmr.msra.gmra.mxu2 %v999_v19  ;;  %v951_v18 = vor.u32 %v1234_v12, %v948_v13  ;;  %v955_v19 = vor.u32 %v1237_v15, %v954_v14 }
  0x22   :  { %677 = vmatpush.bf16.msrb.mxu2 %v1291_v16  ;;  %628 = vmatpush.bf16.msrb.mxu1 %v1283_v17  ;;  %v943_v16 = vor.u32 %v1233_v8, %v940_v9  ;;  %v947_v17 = vor.u32 %v1236_v11, %v946_v10  ;;  %v1259_v8 = vld [vmem:[%s1861_s0 + $0xfc] sm:$0xf]  ;;  %v1048_v9 = vld [vmem:[%s1861_s0 + $0x10c] sm:$0xf0]  ;;  %v1054_v10 = vld [vmem:[%s1861_s0 + $0x100] sm:$0xf] }
  0x23   :  { %617 = vmatmul.bf16.vlgmr.msra.gmra.mxu3 %v1039_v20  ;;  %587 = vmatmul.bf16.vlgmr.msra.gmra.mxu0 %v919_v21  ;;  %v1238_v20 = vld [vmem:[%s1861_s0 + $0x54] sm:$0xf]  ;;  %v960_v21 = vld [vmem:[%s1861_s0 + $0x64] sm:$0xf0]  ;;  %v1051_v15 = vor.u32 %v1259_v8, %v1048_v9 }
  0x24   :  { %726 = vmatpush.bf16.msrb.mxu3 %v1299_v22  ;;  %779 = vmatpush.bf16.msrb.mxu0 %v1303_v23  ;;  %v966_v22 = vld [vmem:[%s1861_s0 + $0x58] sm:$0xf]  ;;  %v1241_v23 = vld [vmem:[%s1861_s0 + $0x68] sm:$0xf0]  ;;  %v1262_v11 = vld [vmem:[%s1861_s0 + $0x110] sm:$0xf0] }
  0x26   :  { %678 = vmatpush.bf16.msrb.mxu2 %v1290_v24  ;;  %629 = vmatpush.bf16.msrb.mxu1 %v1282_v25  ;;  %v1239_v24 = vld [vmem:[%s1861_s0 + $0x5c] sm:$0xf]  ;;  %v968_v25 = vld [vmem:[%s1861_s0 + $0x6c] sm:$0xf0] }
  0x28   :  { %727 = vmatpush.bf16.msrb.mxu3 %v1298_v26  ;;  %780 = vmatpush.bf16.msrb.mxu0 %v1302_v27  ;;  %v974_v26 = vld [vmem:[%s1861_s0 + $0x60] sm:$0xf]  ;;  %v1242_v27 = vld [vmem:[%s1861_s0 + $0x70] sm:$0xf0] }
  0x2a   :  { %679 = vmatpush.bf16.msrb.mxu2 %v1289_v28  ;;  %630 = vmatpush.bf16.msrb.mxu1 %v1281_v29  ;;  %v963_v28 = vor.u32 %v1238_v20, %v960_v21  ;;  %v967_v29 = vor.u32 %v1241_v23, %v966_v22  ;;  %v1263_v22 = vld [vmem:[%s1861_s0 + $0x11c] sm:$0xf]  ;;  %v1060_v23 = vld [vmem:[%s1861_s0 + $0x12c] sm:$0xf0] }
  0x2c   :  { %728 = vmatpush.bf16.msrb.mxu3 %v1297_v30  ;;  %781 = vmatpush.bf16.msrb.mxu0 %v1301_v31  ;;  %v971_v30 = vor.u32 %v1239_v24, %v968_v25  ;;  %v975_v31 = vor.u32 %v1242_v27, %v974_v26  ;;  %v1066_v24 = vld [vmem:[%s1861_s0 + $0x120] sm:$0xf]  ;;  %v1266_v25 = vld [vmem:[%s1861_s0 + $0x130] sm:$0xf0]  ;;  %v1264_v26 = vld [vmem:[%s1861_s0 + $0x124] sm:$0xf] }
  0x2d   :  { %v1068_v27 = vld [vmem:[%s1861_s0 + $0x134] sm:$0xf0] }
  0x2e   :  { %680 = vmatpush.bf16.msrb.mxu2 %v1288_v32  ;;  %631 = vmatpush.bf16.msrb.mxu1 %v1280_v33  ;;  %v1243_v32 = vld [vmem:[%s1861_s0 + $0x7c] sm:$0xf]  ;;  %v980_v33 = vld [vmem:[%s1861_s0 + $0x8c] sm:$0xf0] }
  0x2f   :  { %v983_v40 = vor.u32 %v1243_v32, %v980_v33  ;;  %v1063_v32 = vor.u32 %v1263_v22, %v1060_v23  ;;  %v1067_v33 = vor.u32 %v1266_v25, %v1066_v24 }
  0x30   :  { %729 = vmatpush.bf16.msrb.mxu3 %v1296_v34  ;;  %782 = vmatpush.bf16.msrb.mxu0 %v1300_v43  ;;  %v986_v34 = vld [vmem:[%s1861_s0 + $0x80] sm:$0xf]  ;;  %v995_v43 = vor.u32 %v1247_v39, %v994_v38 }
  0x31   :  { %602 = vmatmul.bf16.gmra.mxu1 %v979_v46  ;;  %612 = vmatmul.bf16.gmra.mxu2 %v1019_v47  ;;  %v987_v41 = vor.u32 %v1246_v35, %v986_v34  ;;  %v1006_v46 = vld [vmem:[%s1861_s0 + $0xa8] sm:$0xf]  ;;  %v1251_v47 = vld [vmem:[%s1861_s0 + $0xb8] sm:$0xf0]  ;;  %v1071_v35 = vor.u32 %v1264_v26, %v1068_v27 }
  0x32   :  { %681 = vmatpush.bf16.msrb.mxu2 %v1287_v44  ;;  %632 = vmatpush.bf16.msrb.mxu1 %v1279_v45  ;;  %v1248_v44 = vld [vmem:[%s1861_s0 + $0xa4] sm:$0xf]  ;;  %v1000_v45 = vld [vmem:[%s1861_s0 + $0xb4] sm:$0xf0] }
  0x33   :  { %622 = vmatmul.bf16.gmra.mxu3 %v1059_v48  ;;  %592 = vmatmul.bf16.gmra.mxu0 %v939_v49  ;;  %v1249_v48 = vld [vmem:[%s1861_s0 + $0xac] sm:$0xf]  ;;  %v1008_v49 = vld [vmem:[%s1861_s0 + $0xbc] sm:$0xf0] }
  0x34   :  { %730 = vmatpush.bf16.msrb.mxu3 %v1295_v50  ;;  %v1014_v50 = vld [vmem:[%s1861_s0 + $0xb0] sm:$0xf] }
  0x36   :  { %682 = vmatpush.bf16.msrb.mxu2 %v1286_v51  ;;  %633 = vmatpush.bf16.msrb.mxu1 %v1278_v52  ;;  %v1252_v51 = vld [vmem:[%s1861_s0 + $0xc0] sm:$0xf0]  ;;  %v1003_v52 = vor.u32 %v1248_v44, %v1000_v45 }
  0x38   :  { %731 = vmatpush.bf16.msrb.mxu3 %v1294_v53  ;;  %v1007_v53 = vor.u32 %v1251_v47, %v1006_v46 }
  0x3a   :  { %683 = vmatpush.bf16.msrb.mxu2 %v1285_v54  ;;  %634 = vmatpush.bf16.msrb.mxu1 %v1277_v55  ;;  %v1011_v54 = vor.u32 %v1249_v48, %v1008_v49  ;;  %v1015_v55 = vor.u32 %v1252_v51, %v1014_v50 }
  0x3c   :  { %732 = vmatpush.bf16.msrb.mxu3 %v1293_v56  ;;  %v1253_v56 = vld [vmem:[%s1861_s0 + $0xcc] sm:$0xf] }
  0x3e   :  { %684 = vmatpush.bf16.msrb.mxu2 %v1284_v57  ;;  %635 = vmatpush.bf16.msrb.mxu1 %v1276_v58  ;;  %v1020_v57 = vld [vmem:[%s1861_s0 + $0xdc] sm:$0xf0]  ;;  %v1026_v58 = vld [vmem:[%s1861_s0 + $0xd0] sm:$0xf] }
  0x3f   :  { %v1023_v0 = vor.u32 %v1253_v56, %v1020_v57 }
  0x40   :  { %733 = vmatpush.bf16.msrb.mxu3 %v1292_v59  ;;  %v1256_v59 = vld [vmem:[%s1861_s0 + $0xe0] sm:$0xf0] }
  0x41   :  { %636 = vmatmul.bf16.vlgmr.msrb.gmra.mxu1 %v923_v4  ;;  %685 = vmatmul.bf16.vlgmr.msrb.gmra.mxu2 %v927_v5  ;;  %v1027_v1 = vor.u32 %v1256_v59, %v1026_v58  ;;  %v1258_v4 = vld [vmem:[%s1861_s0 + $0xf4] sm:$0xf]  ;;  %v1040_v5 = vld [vmem:[%s1861_s0 + $0x104] sm:$0xf0] }
  0x42   :  { %v1043_v12 = vor.u32 %v1258_v4, %v1040_v5 }
  0x43   :  { %734 = vmatmul.bf16.vlgmr.msrb.gmra.mxu3 %v931_v6  ;;  %1220 = vmatmul.msk.bf16.vlgmr.msrb.gmra.mxu0 %vm554_vm0, %v935_v7  ;;  %v1046_v6 = vld [vmem:[%s1861_s0 + $0xf8] sm:$0xf]  ;;  %v1261_v7 = vld [vmem:[%s1861_s0 + $0x108] sm:$0xf0] }
  0x44   :  { %v1047_v13 = vor.u32 %v1261_v7, %v1046_v6 }
  0x51   :  { %641 = vmatmul.bf16.gmra.mxu1 %v943_v16  ;;  %690 = vmatmul.bf16.gmra.mxu2 %v947_v17  ;;  %v1055_v16 = vor.u32 %v1262_v11, %v1054_v10 }
  0x53   :  { %739 = vmatmul.bf16.gmra.mxu3 %v951_v18  ;;  %1221 = vmatmul.msk.bf16.gmra.mxu0 %vm554_vm0, %v955_v19 }
  0x61   :  { %646 = vmatmul.bf16.gmra.mxu1 %v963_v28  ;;  %695 = vmatmul.bf16.gmra.mxu2 %v967_v29  ;;  %v1074_v28 = vld [vmem:[%s1861_s0 + $0x128] sm:$0xf]  ;;  %v1267_v29 = vld [vmem:[%s1861_s0 + $0x138] sm:$0xf0] }
  0x62   :  { %v1075_v36 = vor.u32 %v1267_v29, %v1074_v28 }
  0x63   :  { %744 = vmatmul.bf16.gmra.mxu3 %v971_v30  ;;  %1222 = vmatmul.msk.bf16.gmra.mxu0 %vm554_vm0, %v975_v31 }
  0x71   :  { %651 = vmatmul.bf16.gmra.mxu1 %v983_v40  ;;  %700 = vmatmul.bf16.gmra.mxu2 %v987_v41 }
  0x73   :  { %749 = vmatmul.bf16.gmra.mxu3 %v991_v42  ;;  %1223 = vmatmul.msk.bf16.gmra.mxu0 %vm554_vm0, %v995_v43 }
  0x81   :  { %656 = vmatmul.bf16.gmra.mxu1 %v1003_v52  ;;  %705 = vmatmul.bf16.gmra.mxu2 %v1007_v53 }
  0x83   :  { %754 = vmatmul.bf16.gmra.mxu3 %v1011_v54  ;;  %1224 = vmatmul.msk.bf16.gmra.mxu0 %vm554_vm0, %v1015_v55  ;;  %v1785_v54 = vld [vmem:[%s1862_s2] ss:$0 sm:$0xff] }
  0x91   :  { %661 = vmatmul.bf16.gmra.mxu1 %v1023_v0  ;;  %710 = vmatmul.bf16.gmra.mxu2 %v1027_v1 }
  0x93   :  { %759 = vmatmul.bf16.gmra.mxu3 %v1031_v2  ;;  %1225 = vmatmul.msk.bf16.gmra.mxu0 %vm554_vm0, %v1035_v3 }
  0x9e   :  { %v1732_v14 = vpop.f32.mrf.mxu1 }
  0xa0   :  { %v588_v17 = vpop.f32.mrf.mxu0 }
  0xa1   :  { %666 = vmatmul.bf16.gmra.mxu1 %v1043_v12  ;;  %715 = vmatmul.bf16.gmra.mxu2 %v1047_v13 }
  0xa3   :  { %764 = vmatmul.bf16.gmra.mxu3 %v1051_v15  ;;  %1226 = vmatmul.msk.bf16.gmra.mxu0 %vm554_vm0, %v1055_v16 }
  0xa4   :  { %v1735_v18 = vpop.f32.mrf.mxu2 }
  0xa6   :  { %v1737_v19 = vpop.f32.mrf.mxu3  ;;  %v1739_v20 = vpop.f32.mrf.mxu1 }
  0xa8   :  { %v590_v21 = vpop.f32.mrf.mxu0 }
  0xac   :  { %v1765_v30 = vpop.f32.mrf.mxu2 }
  0xae   :  { %v1767_v31 = vpop.f32.mrf.mxu3  ;;  %v1769_v34 = vpop.f32.mrf.mxu1 }
  0xb0   :  { %v593_v37 = vpop.f32.mrf.mxu0 }
  0xb1   :  { %671 = vmatmul.bf16.gmra.mxu1 %v1063_v32  ;;  %720 = vmatmul.bf16.gmra.mxu2 %v1067_v33 }
  0xb3   :  { %769 = vmatmul.bf16.gmra.mxu3 %v1071_v35  ;;  %1227 = vmatmul.msk.bf16.gmra.mxu0 %vm554_vm0, %v1075_v36 }
  0xb4   :  { %v1772_v38 = vpop.f32.mrf.mxu2 }
  0xb6   :  { %v1774_v39 = vpop.f32.mrf.mxu3  ;;  %v1776_v40 = vpop.f32.mrf.mxu1 }
  0xb8   :  { %v595_v41 = vpop.f32.mrf.mxu0 }
  0xbc   :  { %v1778_v42 = vpop.f32.mrf.mxu2 }
  0xbe   :  { %v1780_v43 = vpop.f32.mrf.mxu3  ;;  %v637_v44 = vpop.f32.mrf.mxu1 }
  0xbf   :  { %v638_v46 = vadd.f32 %v637_v44, %v588_v17 }
  0xc0   :  { %v784_v45 = vpop.f32.mrf.mxu0 }
  0xc4   :  { %v686_v47 = vpop.f32.mrf.mxu2 }
  0xc5   :  { %v687_v48 = vadd.f32 %v686_v47, %v638_v46 }
  0xc6   :  { %v735_v49 = vpop.f32.mrf.mxu3  ;;  %v639_v50 = vpop.f32.mrf.mxu1 }
  0xc7   :  { %v736_v51 = vadd.f32 %v735_v49, %v687_v48  ;;  %v640_v55 = vadd.f32 %v639_v50, %v590_v21 }
  0xc8   :  { %v786_v52 = vpop.f32.mrf.mxu0 }
  0xc9   :  { %v785_v53 = vadd.f32 %v784_v45, %v736_v51 }
  0xcb   :  { %v828_v60 = vmul.f32 %v1785_v54, %v785_v53 }
  0xcc   :  { %v688_v56 = vpop.f32.mrf.mxu2 }
  0xcd   :  { %v689_v57 = vadd.f32 %v688_v56, %v640_v55  ;;  %v848_v1 = vadd.f32 %v1791_v61, %v828_v60 }
  0xce   :  { %v737_v58 = vpop.f32.mrf.mxu3  ;;  %v642_v59 = vpop.f32.mrf.mxu1 }
  0xcf   :  { %v738_v62 = vadd.f32 %v737_v58, %v689_v57  ;;  %v643_v3 = vadd.f32 %v642_v59, %v593_v37  ;;  %v864_v9 = vmax.f32 %v848_v1, 0.0 }
  0xd0   :  { %v789_v63 = vpop.f32.mrf.mxu0 }
  0xd1   :  { %v787_v0 = vadd.f32 %v786_v52, %v738_v62 }
  0xd3   :  { %v829_v2 = vmul.f32 %v1785_v54, %v787_v0 }
  0xd4   :  { %v691_v4 = vpop.f32.mrf.mxu2 }
  0xd5   :  { %v849_v5 = vadd.f32 %v1791_v61, %v829_v2  ;;  %v692_v6 = vadd.f32 %v691_v4, %v643_v3 }
  0xd6   :  { %v740_v7 = vpop.f32.mrf.mxu3  ;;  %v644_v8 = vpop.f32.mrf.mxu1 }
  0xd7   :  { %v865_v10 = vmax.f32 %v849_v5, 0.0  ;;  %v741_v11 = vadd.f32 %v740_v7, %v692_v6  ;;  %v645_v16 = vadd.f32 %v644_v8, %v595_v41 }
  0xd8   :  { %v791_v12 = vpop.f32.mrf.mxu0 }
  0xd9   :  { %v1307_v13 = vpack.c.bf16 %v865_v10, %v864_v9  ;;  %v790_v15 = vadd.f32 %v789_v63, %v741_v11 }
  0xdb   :  { %1308 = vst [vmem:[%s1864_s4] sm:$0xff] %v1307_v13   ;;  %v830_v24 = vmul.f32 %v1785_v54, %v790_v15 }
  0xdc   :  { %v693_v17 = vpop.f32.mrf.mxu2 }
  0xdd   :  { %v694_v21 = vadd.f32 %v693_v17, %v645_v16  ;;  %v850_v28 = vadd.f32 %v1791_v61, %v830_v24 }
  0xde   :  { %v742_v22 = vpop.f32.mrf.mxu3  ;;  %v647_v23 = vpop.f32.mrf.mxu1 }
  0xdf   :  { %v743_v25 = vadd.f32 %v742_v22, %v694_v21  ;;  %v648_v32 = vadd.f32 %v647_v23, %v1732_v14  ;;  %v866_v44 = vmax.f32 %v850_v28, 0.0 }
  0xe0   :  { %v794_v26 = vpop.f32.mrf.mxu0 }
  0xe1   :  { %v792_v27 = vadd.f32 %v791_v12, %v743_v25 }
  0xe3   :  { %v831_v29 = vmul.f32 %v1785_v54, %v792_v27 }
  0xe4   :  { %v696_v33 = vpop.f32.mrf.mxu2 }
  0xe5   :  { %v851_v35 = vadd.f32 %v1791_v61, %v831_v29  ;;  %v697_v36 = vadd.f32 %v696_v33, %v648_v32 }
  0xe6   :  { %v745_v37 = vpop.f32.mrf.mxu3  ;;  %v649_v41 = vpop.f32.mrf.mxu1 }
  0xe7   :  { %v867_v45 = vmax.f32 %v851_v35, 0.0  ;;  %v746_v46 = vadd.f32 %v745_v37, %v697_v36  ;;  %v650_v50 = vadd.f32 %v649_v41, %v1739_v20 }
  0xe8   :  { %v796_v47 = vpop.f32.mrf.mxu0 }
  0xe9   :  { %v1312_v48 = vpack.c.bf16 %v867_v45, %v866_v44  ;;  %v795_v49 = vadd.f32 %v794_v26, %v746_v46 }
  0xeb   :  { %1344 = vst [vmem:[%s1864_s4 + $0x8] sm:$0xff] %v1312_v48   ;;  %v832_v55 = vmul.f32 %v1785_v54, %v795_v49 }
  0xec   :  { %v698_v51 = vpop.f32.mrf.mxu2 }
  0xed   :  { %v699_v14 = vadd.f32 %v698_v51, %v650_v50  ;;  %v852_v59 = vadd.f32 %v1791_v61, %v832_v55 }
  0xee   :  { %v747_v52 = vpop.f32.mrf.mxu3  ;;  %v652_v53 = vpop.f32.mrf.mxu1 }
  0xef   :  { %v748_v56 = vadd.f32 %v747_v52, %v699_v14  ;;  %v653_v62 = vadd.f32 %v652_v53, %v1769_v34  ;;  %v868_v3 = vmax.f32 %v852_v59, 0.0 }
  0xf0   :  { %v799_v57 = vpop.f32.mrf.mxu0 }
  0xf1   :  { %v797_v58 = vadd.f32 %v796_v47, %v748_v56 }
  0xf3   :  { %v833_v60 = vmul.f32 %v1785_v54, %v797_v58 }
  0xf4   :  { %v701_v63 = vpop.f32.mrf.mxu2 }
  0xf5   :  { %v853_v0 = vadd.f32 %v1791_v61, %v833_v60  ;;  %v702_v1 = vadd.f32 %v701_v63, %v653_v62 }
  0xf6   :  { %v750_v20 = vpop.f32.mrf.mxu3  ;;  %v654_v2 = vpop.f32.mrf.mxu1 }
  0xf7   :  { %v869_v4 = vmax.f32 %v853_v0, 0.0  ;;  %v751_v5 = vadd.f32 %v750_v20, %v702_v1  ;;  %v655_v9 = vadd.f32 %v654_v2, %v1776_v40 }
  0xf8   :  { %v801_v6 = vpop.f32.mrf.mxu0 }
  0xf9   :  { %v1317_v7 = vpack.c.bf16 %v869_v4, %v868_v3  ;;  %v800_v8 = vadd.f32 %v799_v57, %v751_v5 }
  0xfb   :  { %1345 = vst [vmem:[%s1864_s4 + $0x10] sm:$0xff] %v1317_v7   ;;  %v834_v13 = vmul.f32 %v1785_v54, %v800_v8 }
  0xfc   :  { %v703_v10 = vpop.f32.mrf.mxu2 }
  0xfd   :  { %v704_v34 = vadd.f32 %v703_v10, %v655_v9  ;;  %v854_v21 = vadd.f32 %v1791_v61, %v834_v13 }
  0xfe   :  { %v752_v11 = vpop.f32.mrf.mxu3  ;;  %v657_v12 = vpop.f32.mrf.mxu1 }
  0xff   :  { %v753_v15 = vadd.f32 %v752_v11, %v704_v34  ;;  %v658_v23 = vadd.f32 %v657_v12, %v1735_v18  ;;  %v870_v28 = vmax.f32 %v854_v21, 0.0 }
 0x100   :  { %v804_v16 = vpop.f32.mrf.mxu0 }
 0x101   :  { %v802_v17 = vadd.f32 %v801_v6, %v753_v15 }
 0x103   :  { %v835_v22 = vmul.f32 %v1785_v54, %v802_v17 }
 0x104   :  { %v706_v24 = vpop.f32.mrf.mxu2 }
 0x105   :  { %v855_v25 = vadd.f32 %v1791_v61, %v835_v22  ;;  %v707_v26 = vadd.f32 %v706_v24, %v658_v23 }
 0x106   :  { %v755_v40 = vpop.f32.mrf.mxu3  ;;  %v659_v27 = vpop.f32.mrf.mxu1 }
 0x107   :  { %v871_v29 = vmax.f32 %v855_v25, 0.0  ;;  %v756_v32 = vadd.f32 %v755_v40, %v707_v26  ;;  %v660_v37 = vadd.f32 %v659_v27, %v1765_v30 }
 0x108   :  { %v806_v33 = vpop.f32.mrf.mxu0 }
 0x109   :  { %v1322_v35 = vpack.c.bf16 %v871_v29, %v870_v28  ;;  %v805_v36 = vadd.f32 %v804_v16, %v756_v32 }
 0x10b   :  { %1346 = vst [vmem:[%s1864_s4 + $0x18] sm:$0xff] %v1322_v35   ;;  %v836_v46 = vmul.f32 %v1785_v54, %v805_v36 }
 0x10c   :  { %v708_v41 = vpop.f32.mrf.mxu2 }
 0x10d   :  { %v709_v18 = vadd.f32 %v708_v41, %v660_v37  ;;  %v856_v50 = vadd.f32 %v1791_v61, %v836_v46 }
 0x10e   :  { %v757_v44 = vpop.f32.mrf.mxu3  ;;  %v662_v45 = vpop.f32.mrf.mxu1 }
 0x10f   :  { %v758_v47 = vadd.f32 %v757_v44, %v709_v18  ;;  %v663_v14 = vadd.f32 %v662_v45, %v1772_v38  ;;  %v872_v57 = vmax.f32 %v856_v50, 0.0 }
 0x110   :  { %v809_v48 = vpop.f32.mrf.mxu0 }
 0x111   :  { %v807_v49 = vadd.f32 %v806_v33, %v758_v47 }
 0x113   :  { %v837_v51 = vmul.f32 %v1785_v54, %v807_v49 }
 0x114   :  { %v711_v52 = vpop.f32.mrf.mxu2 }
 0x115   :  { %v857_v53 = vadd.f32 %v1791_v61, %v837_v51  ;;  %v712_v55 = vadd.f32 %v711_v52, %v663_v14 }
 0x116   :  { %v760_v30 = vpop.f32.mrf.mxu3  ;;  %v664_v56 = vpop.f32.mrf.mxu1 }
 0x117   :  { %v873_v58 = vmax.f32 %v857_v53, 0.0  ;;  %v761_v59 = vadd.f32 %v760_v30, %v712_v55  ;;  %v665_v0 = vadd.f32 %v664_v56, %v1778_v42 }
 0x118   :  { %v811_v60 = vpop.f32.mrf.mxu0 }
 0x119   :  { %v1327_v62 = vpack.c.bf16 %v873_v58, %v872_v57  ;;  %v810_v63 = vadd.f32 %v809_v48, %v761_v59 }
 0x11b   :  { %1347 = vst [vmem:[%s1864_s4 + $0x20] sm:$0xff] %v1327_v62   ;;  %v838_v3 = vmul.f32 %v1785_v54, %v810_v63 }
 0x11c   :  { %v713_v1 = vpop.f32.mrf.mxu2 }
 0x11d   :  { %v714_v38 = vadd.f32 %v713_v1, %v665_v0  ;;  %v858_v7 = vadd.f32 %v1791_v61, %v838_v3 }
 0x11e   :  { %v762_v20 = vpop.f32.mrf.mxu3  ;;  %v667_v2 = vpop.f32.mrf.mxu1 }
 0x11f   :  { %v763_v4 = vadd.f32 %v762_v20, %v714_v38  ;;  %v668_v9 = vadd.f32 %v667_v2, %v1737_v19  ;;  %v874_v13 = vmax.f32 %v858_v7, 0.0 }
 0x120   :  { %v814_v6 = vpop.f32.mrf.mxu0 }
 0x121   :  { %v812_v5 = vadd.f32 %v811_v60, %v763_v4 }
 0x123   :  { %v839_v8 = vmul.f32 %v1785_v54, %v812_v5 }
 0x124   :  { %v716_v10 = vpop.f32.mrf.mxu2 }
 0x125   :  { %v859_v34 = vadd.f32 %v1791_v61, %v839_v8  ;;  %v717_v11 = vadd.f32 %v716_v10, %v668_v9 }
 0x126   :  { %v765_v42 = vpop.f32.mrf.mxu3  ;;  %v669_v12 = vpop.f32.mrf.mxu1 }
 0x127   :  { %v875_v15 = vmax.f32 %v859_v34, 0.0  ;;  %v766_v16 = vadd.f32 %v765_v42, %v717_v11  ;;  %v670_v22 = vadd.f32 %v669_v12, %v1767_v31 }
 0x128   :  { %v816_v23 = vpop.f32.mrf.mxu0 }
 0x129   :  { %v1332_v17 = vpack.c.bf16 %v875_v15, %v874_v13  ;;  %v815_v21 = vadd.f32 %v814_v6, %v766_v16 }
 0x12b   :  { %1348 = vst [vmem:[%s1864_s4 + $0x28] sm:$0xff] %v1332_v17   ;;  %v840_v40 = vmul.f32 %v1785_v54, %v815_v21 }
 0x12c   :  { %v718_v24 = vpop.f32.mrf.mxu2 }
 0x12d   :  { %v719_v19 = vadd.f32 %v718_v24, %v670_v22  ;;  %v860_v29 = vadd.f32 %v1791_v61, %v840_v40 }
 0x12e   :  { %v767_v25 = vpop.f32.mrf.mxu3  ;;  %v672_v26 = vpop.f32.mrf.mxu1 }
 0x12f   :  { %v768_v27 = vadd.f32 %v767_v25, %v719_v19  ;;  %v673_v33 = vadd.f32 %v672_v26, %v1774_v39  ;;  %v876_v18 = vmax.f32 %v860_v29, 0.0 }
 0x130   :  { %v819_v41 = vpop.f32.mrf.mxu0 }
 0x131   :  { %v817_v28 = vadd.f32 %v816_v23, %v768_v27 }
 0x133   :  { %v841_v32 = vmul.f32 %v1785_v54, %v817_v28 }
 0x134   :  { %v721_v35 = vpop.f32.mrf.mxu2 }
 0x135   :  { %v861_v36 = vadd.f32 %v1791_v61, %v841_v32  ;;  %v722_v37 = vadd.f32 %v721_v35, %v673_v33 }
 0x136   :  { %v770_v31 = vpop.f32.mrf.mxu3  ;;  %v674_v46 = vpop.f32.mrf.mxu1 }
 0x137   :  { %v877_v44 = vmax.f32 %v861_v36, 0.0  ;;  %v771_v45 = vadd.f32 %v770_v31, %v722_v37  ;;  %v675_v49 = vadd.f32 %v674_v46, %v1780_v43 }
 0x138   :  { %v821_v53 = vpop.f32.mrf.mxu0 }
 0x139   :  { %v1337_v47 = vpack.c.bf16 %v877_v44, %v876_v18  ;;  %v820_v48 = vadd.f32 %v819_v41, %v771_v45 }
 0x13b   :  { %1349 = vst [vmem:[%s1864_s4 + $0x30] sm:$0xff] %v1337_v47   ;;  %v842_v14 = vmul.f32 %v1785_v54, %v820_v48 }
 0x13c   :  { %v723_v50 = vpop.f32.mrf.mxu2 }
 0x13d   :  { %v724_v39 = vadd.f32 %v723_v50, %v675_v49  ;;  %v862_v30 = vadd.f32 %v1791_v61, %v842_v14 }
 0x13e   :  { %v772_v51 = vpop.f32.mrf.mxu3 }
 0x13f   :  { %v773_v52 = vadd.f32 %v772_v51, %v724_v39  ;;  %v878_v58 = vmax.f32 %v862_v30, 0.0 }
 0x141   :  { %v822_v55 = vadd.f32 %v821_v53, %v773_v52 }
 0x143   :  { %v843_v56 = vmul.f32 %v1785_v54, %v822_v55 }
 0x145   :  { %v863_v57 = vadd.f32 %v1791_v61, %v843_v56 }
 0x147   :  { %v879_v59 = vmax.f32 %v863_v57, 0.0 }
 0x149   :  { %v1342_v60 = vpack.c.bf16 %v879_v59, %v878_v58 }
 0x14b   :  { %1350 = vst [vmem:[%s1864_s4 + $0x38] sm:$0xff] %v1342_v60  }

// kernel: _lambda_.23
= control target key start
LH: loop header
LB: loop body
LE: loop exit
PB: predicated region body
PF: predicated region fallthrough
CT: control target
= control target key end

     0   :  { %s3564_s0 = inlined_call_operand.vmem [shape: bf16[128,1152], index: 0, kind: input, shape index: {}]   ;;  %s3565_s1 = inlined_call_operand.vmem [shape: bf16[1152,128], index: 1, kind: input, shape index: {}]   ;;  %s3566_s2 = inlined_call_operand.vmem [shape: f32[1,128], index: 2, kind: input, shape index: {}]   ;;  %s3567_s3 = inlined_call_operand.vmem [shape: f32[1,128], index: 3, kind: input, shape index: {}]   ;;  %s3568_s4 = inlined_call_operand.vmem [shape: bf16[128,64], index: 4, kind: input, shape index: {}]   ;;  %s3569_s5 = inlined_call_operand.vmem [shape: bf16[64,128], index: 5, kind: input, shape index: {}]   ;;  %s3570_s6 = inlined_call_operand.vmem [shape: f32[1,128], index: 6, kind: input, shape index: {}]   ;;  %s3571_s7 = inlined_call_operand.vmem [shape: f32[1,128], index: 7, kind: input, shape index: {}]   ;;  %s3572_s8 = inlined_call_operand.hbm [shape: f32[128,128], index: 8, kind: output, shape index: {}]  }
   0x1   :  { %v2515_v0 = vld [vmem:[%s3565_s1 + $0x38] sm:$0xff]  ;;  %v2514_v2 = vld [vmem:[%s3565_s1 + $0x30] sm:$0xff]  ;;  %v2513_v4 = vld [vmem:[%s3565_s1 + $0x28] sm:$0xff] }
   0x2   :  { %v2523_v1 = vld [vmem:[%s3565_s1 + $0x78] sm:$0xff]  ;;  %2592 = vmatpush.bf16.msra.mxu2 %v2515_v0  ;;  %v2522_v3 = vld [vmem:[%s3565_s1 + $0x70] sm:$0xff]  ;;  %1055 = vmatpush.bf16.msra.mxu0 %v2515_v0  ;;  %v2521_v5 = vld [vmem:[%s3565_s1 + $0x68] sm:$0xff] }
   0x3   :  { %2600 = vmatpush.bf16.msra.mxu3 %v2523_v1  ;;  %1104 = vmatpush.bf16.msra.mxu1 %v2523_v1  ;;  %v2512_v6 = vld [vmem:[%s3565_s1 + $0x20] sm:$0xff] }
   0x4   :  { %v2520_v7 = vld [vmem:[%s3565_s1 + $0x60] sm:$0xff] }
   0x6   :  { %2593 = vmatpush.bf16.msra.mxu2 %v2514_v2  ;;  %1056 = vmatpush.bf16.msra.mxu0 %v2514_v2 }
   0x7   :  { %2601 = vmatpush.bf16.msra.mxu3 %v2522_v3  ;;  %1105 = vmatpush.bf16.msra.mxu1 %v2522_v3 }
   0xa   :  { %2594 = vmatpush.bf16.msra.mxu2 %v2513_v4  ;;  %1057 = vmatpush.bf16.msra.mxu0 %v2513_v4 }
   0xb   :  { %2602 = vmatpush.bf16.msra.mxu3 %v2521_v5  ;;  %1106 = vmatpush.bf16.msra.mxu1 %v2521_v5 }
   0xc   :  { %13 = vsyncpa [#allocation3], 0  ;;  %v2511_v8 = vld [vmem:[%s3565_s1 + $0x18] sm:$0xff]  ;;  %v2510_v10 = vld [vmem:[%s3565_s1 + $0x10] sm:$0xff]  ;;  %vm1624_vm0 = vcmask 523264   ;;  %s1792_s14 = sshll.u32 %s3572_s8, 4  ;;  %s1793_s14 = int_to_ptr.hbm [resolvable:$true] %s1792_s14 }
   0xd   :  { %v2519_v9 = vld [vmem:[%s3565_s1 + $0x58] sm:$0xff]  ;;  %v2518_v11 = vld [vmem:[%s3565_s1 + $0x50] sm:$0xff]  ;;  %v2509_v12 = vld [vmem:[%s3565_s1 + $0x8] sm:$0xff]  ;;  %s2642_s15 = smov 128   ;;  %s2643_s16 = smov 8  }
   0xe   :  { %2595 = vmatpush.bf16.msra.mxu2 %v2512_v6  ;;  %1058 = vmatpush.bf16.msra.mxu0 %v2512_v6  ;;  %v2517_v13 = vld [vmem:[%s3565_s1 + $0x48] sm:$0xff]  ;;  %v2508_v14 = vld [vmem:[%s3565_s1] sm:$0xff]  ;;  %v2531_v24 = vld [vmem:[%s3565_s1 + $0xb8] sm:$0xff] }
   0xf   :  { %2603 = vmatpush.bf16.msra.mxu3 %v2520_v7  ;;  %1107 = vmatpush.bf16.msra.mxu1 %v2520_v7  ;;  %v2516_v15 = vld [vmem:[%s3565_s1 + $0x40] sm:$0xff]  ;;  %v1952_v19 = vld [vmem:[%s3564_s0 + $0x144] sm:$0xf0]  ;;  %v2539_v25 = vld [vmem:[%s3565_s1 + $0xf8] sm:$0xff] }
  0x10   :  { %v1950_v16 = vld [vmem:[%s3564_s0 + $0x120] sm:$0xf]  ;;  %v2476_v17 = vld [vmem:[%s3564_s0 + $0x140] sm:$0xf0]  ;;  %v1808_v23 = vld [vmem:[%s3564_s0 + $0x24] sm:$0xf0] }
  0x11   :  { %v2472_v18 = vld [vmem:[%s3564_s0 + $0x124] sm:$0xf]  ;;  %v1806_v20 = vld [vmem:[%s3564_s0] sm:$0xf]  ;;  %v1951_v26 = vor.u32 %v2476_v17, %v1950_v16  ;;  %v2547_v30 = vld [vmem:[%s3565_s1 + $0x138] sm:$0xff] }
  0x12   :  { %2596 = vmatpush.bf16.msra.mxu2 %v2511_v8  ;;  %1059 = vmatpush.bf16.msra.mxu0 %v2511_v8  ;;  %v2440_v21 = vld [vmem:[%s3564_s0 + $0x20] sm:$0xf0]  ;;  %v1955_v27 = vor.u32 %v2472_v18, %v1952_v19  ;;  %v2555_v31 = vld [vmem:[%s3565_s1 + $0x178] sm:$0xff]  ;;  %v2530_v32 = vld [vmem:[%s3565_s1 + $0xb0] sm:$0xff] }
  0x13   :  { %2604 = vmatpush.bf16.msra.mxu3 %v2519_v9  ;;  %1108 = vmatpush.bf16.msra.mxu1 %v2519_v9  ;;  %v2436_v22 = vld [vmem:[%s3564_s0 + $0x4] sm:$0xf]  ;;  %v1807_v28 = vor.u32 %v2440_v21, %v1806_v20  ;;  %v2538_v33 = vld [vmem:[%s3565_s1 + $0xf0] sm:$0xff]  ;;  %v2529_v36 = vld [vmem:[%s3565_s1 + $0xa8] sm:$0xff] }
  0x14   :  { %v1811_v29 = vor.u32 %v2436_v22, %v1808_v23  ;;  %v2546_v34 = vld [vmem:[%s3565_s1 + $0x130] sm:$0xff]  ;;  %v2537_v37 = vld [vmem:[%s3565_s1 + $0xe8] sm:$0xff]  ;;  %v2528_v41 = vld [vmem:[%s3565_s1 + $0xa0] sm:$0xff] }
  0x15   :  { %v2554_v35 = vld [vmem:[%s3565_s1 + $0x170] sm:$0xff]  ;;  %v2545_v38 = vld [vmem:[%s3565_s1 + $0x128] sm:$0xff]  ;;  %v2536_v42 = vld [vmem:[%s3565_s1 + $0xe0] sm:$0xff] }
  0x16   :  { %2597 = vmatpush.bf16.msra.mxu2 %v2510_v10  ;;  %1060 = vmatpush.bf16.msra.mxu0 %v2510_v10  ;;  %v2553_v39 = vld [vmem:[%s3565_s1 + $0x168] sm:$0xff]  ;;  %v1988_v45 = vld [vmem:[%s3564_s0 + $0x18c] sm:$0xf0]  ;;  %v2544_v50 = vld [vmem:[%s3565_s1 + $0x120] sm:$0xff] }
  0x17   :  { %2605 = vmatpush.bf16.msra.mxu3 %v2518_v11  ;;  %1109 = vmatpush.bf16.msra.mxu1 %v2518_v11  ;;  %v1986_v40 = vld [vmem:[%s3564_s0 + $0x168] sm:$0xf]  ;;  %v2485_v43 = vld [vmem:[%s3564_s0 + $0x188] sm:$0xf0]  ;;  %v1844_v49 = vld [vmem:[%s3564_s0 + $0x6c] sm:$0xf0] }
  0x18   :  { %v2481_v44 = vld [vmem:[%s3564_s0 + $0x16c] sm:$0xf]  ;;  %v1842_v46 = vld [vmem:[%s3564_s0 + $0x48] sm:$0xf]  ;;  %v2552_v51 = vld [vmem:[%s3565_s1 + $0x160] sm:$0xff]  ;;  %v1987_v54 = vor.u32 %v2485_v43, %v1986_v40 }
  0x19   :  { %v2449_v47 = vld [vmem:[%s3564_s0 + $0x68] sm:$0xf0]  ;;  %v2527_v52 = vld [vmem:[%s3565_s1 + $0x98] sm:$0xff]  ;;  %v1991_v55 = vor.u32 %v2481_v44, %v1988_v45  ;;  %v2526_v60 = vld [vmem:[%s3565_s1 + $0x90] sm:$0xff] }
  0x1a   :  { %2598 = vmatpush.bf16.msra.mxu2 %v2509_v12  ;;  %1061 = vmatpush.bf16.msra.mxu0 %v2509_v12  ;;  %v2445_v48 = vld [vmem:[%s3564_s0 + $0x4c] sm:$0xf]  ;;  %v2535_v53 = vld [vmem:[%s3565_s1 + $0xd8] sm:$0xff]  ;;  %v1843_v56 = vor.u32 %v2449_v47, %v1842_v46  ;;  %v2534_v61 = vld [vmem:[%s3565_s1 + $0xd0] sm:$0xff] }
  0x1b   :  { %2606 = vmatpush.bf16.msra.mxu3 %v2517_v13  ;;  %1110 = vmatpush.bf16.msra.mxu1 %v2517_v13  ;;  %v1847_v57 = vor.u32 %v2445_v48, %v1844_v49  ;;  %v2543_v58 = vld [vmem:[%s3565_s1 + $0x118] sm:$0xff]  ;;  %v2542_v62 = vld [vmem:[%s3565_s1 + $0x110] sm:$0xff]  ;;  %v2525_v0 = vld [vmem:[%s3565_s1 + $0x88] sm:$0xff] }
  0x1c   :  { %v2551_v59 = vld [vmem:[%s3565_s1 + $0x158] sm:$0xff]  ;;  %v2550_v63 = vld [vmem:[%s3565_s1 + $0x150] sm:$0xff]  ;;  %v2533_v1 = vld [vmem:[%s3565_s1 + $0xc8] sm:$0xff] }
  0x1d   :  { %v2541_v2 = vld [vmem:[%s3565_s1 + $0x108] sm:$0xff]  ;;  %v2524_v4 = vld [vmem:[%s3565_s1 + $0x80] sm:$0xff]  ;;  %v2022_v6 = vld [vmem:[%s3564_s0 + $0x1b0] sm:$0xf] }
  0x1e   :  { %2599 = vmatpush.bf16.msra.mxu2 %v2508_v14  ;;  %1062 = vmatpush.bf16.msra.mxu0 %v2508_v14  ;;  %v2549_v3 = vld [vmem:[%s3565_s1 + $0x148] sm:$0xff]  ;;  %v2532_v5 = vld [vmem:[%s3565_s1 + $0xc0] sm:$0xff]  ;;  %v2494_v7 = vld [vmem:[%s3564_s0 + $0x1d0] sm:$0xf0] }
  0x1f   :  { %2607 = vmatpush.bf16.msra.mxu3 %v2516_v15  ;;  %1111 = vmatpush.bf16.msra.mxu1 %v2516_v15  ;;  %v2490_v8 = vld [vmem:[%s3564_s0 + $0x1b4] sm:$0xf]  ;;  %v2024_v9 = vld [vmem:[%s3564_s0 + $0x1d4] sm:$0xf0]  ;;  %v1878_v10 = vld [vmem:[%s3564_s0 + $0x90] sm:$0xf]  ;;  %v2023_v15 = vor.u32 %v2494_v7, %v2022_v6 }
  0x20   :  { %v2458_v11 = vld [vmem:[%s3564_s0 + $0xb0] sm:$0xf0]  ;;  %v1880_v13 = vld [vmem:[%s3564_s0 + $0xb4] sm:$0xf0]  ;;  %v2540_v14 = vld [vmem:[%s3565_s1 + $0x100] sm:$0xff]  ;;  %v2027_v16 = vor.u32 %v2490_v8, %v2024_v9 }
  0x21   :  { %1083 = vmatmul.bf16.vlgmr.msra.gmra.mxu2 %v1951_v26  ;;  %1063 = vmatmul.bf16.vlgmr.msra.gmra.mxu0 %v1807_v28  ;;  %v2454_v12 = vld [vmem:[%s3564_s0 + $0x94] sm:$0xf]  ;;  %v1879_v17 = vor.u32 %v2458_v11, %v1878_v10  ;;  %v2548_v19 = vld [vmem:[%s3565_s1 + $0x140] sm:$0xff]  ;;  %v2563_v20 = vld [vmem:[%s3565_s1 + $0x1b8] sm:$0xff] }
  0x22   :  { %1153 = vmatpush.bf16.msrb.mxu2 %v2531_v24  ;;  %1132 = vmatmul.bf16.vlgmr.msra.gmra.mxu3 %v1955_v27  ;;  %v1883_v18 = vor.u32 %v2454_v12, %v1880_v13  ;;  %v2571_v21 = vld [vmem:[%s3565_s1 + $0x1f8] sm:$0xff]  ;;  %v2060_v27 = vld [vmem:[%s3564_s0 + $0x21c] sm:$0xf0]  ;;  %v2441_v40 = vld [vmem:[%s3564_s0 + $0x28] sm:$0xf0] }
  0x23   :  { %1202 = vmatpush.bf16.msrb.mxu3 %v2539_v25  ;;  %1112 = vmatmul.bf16.vlgmr.msra.gmra.mxu1 %v1811_v29  ;;  %v2579_v22 = vld [vmem:[%s3565_s1 + $0x238] sm:$0xff]  ;;  %v1822_v43 = vld [vmem:[%s3564_s0 + $0x10] sm:$0xf]  ;;  %v2442_v44 = vld [vmem:[%s3564_s0 + $0x30] sm:$0xf0] }
  0x24   :  { %1251 = vmatpush.bf16.msrb.mxu0 %v2547_v30  ;;  %1300 = vmatpush.bf16.msrb.mxu1 %v2555_v31  ;;  %v2591_v23 = vld [vmem:[%s3569_s5 + $0x18] sm:$0xff]  ;;  %v1916_v31 = vld [vmem:[%s3564_s0 + $0xfc] sm:$0xf0]  ;;  %v2438_v45 = vld [vmem:[%s3564_s0 + $0x14] sm:$0xf]  ;;  %v1823_v49 = vor.u32 %v2442_v44, %v1822_v43 }
  0x25   :  { %v2058_v24 = vld [vmem:[%s3564_s0 + $0x1f8] sm:$0xf]  ;;  %v2503_v25 = vld [vmem:[%s3564_s0 + $0x218] sm:$0xf0]  ;;  %v1888_v9 = vld [vmem:[%s3564_s0 + $0xbc] sm:$0xf0] }
  0x26   :  { %1154 = vmatpush.bf16.msrb.mxu2 %v2530_v32  ;;  %v2499_v26 = vld [vmem:[%s3564_s0 + $0x1fc] sm:$0xf]  ;;  %v1914_v28 = vld [vmem:[%s3564_s0 + $0xd8] sm:$0xf]  ;;  %v2059_v32 = vor.u32 %v2503_v25, %v2058_v24  ;;  %v1894_v10 = vld [vmem:[%s3564_s0 + $0xa0] sm:$0xf] }
  0x27   :  { %1203 = vmatpush.bf16.msrb.mxu3 %v2538_v33  ;;  %v2467_v29 = vld [vmem:[%s3564_s0 + $0xf8] sm:$0xf0]  ;;  %v2063_v33 = vor.u32 %v2499_v26, %v2060_v27  ;;  %v1824_v46 = vld [vmem:[%s3564_s0 + $0x34] sm:$0xf0]  ;;  %v2460_v11 = vld [vmem:[%s3564_s0 + $0xc0] sm:$0xf0] }
  0x28   :  { %1252 = vmatpush.bf16.msrb.mxu0 %v2546_v34  ;;  %1301 = vmatpush.bf16.msrb.mxu1 %v2554_v35  ;;  %v2463_v30 = vld [vmem:[%s3564_s0 + $0xdc] sm:$0xf]  ;;  %v1915_v34 = vor.u32 %v2467_v29, %v1914_v28  ;;  %v1886_v6 = vld [vmem:[%s3564_s0 + $0x98] sm:$0xf]  ;;  %v2456_v12 = vld [vmem:[%s3564_s0 + $0xa4] sm:$0xf] }
  0x29   :  { %v1919_v35 = vor.u32 %v2463_v30, %v1916_v31  ;;  %v2459_v7 = vld [vmem:[%s3564_s0 + $0xb8] sm:$0xf0]  ;;  %v1896_v13 = vld [vmem:[%s3564_s0 + $0xc4] sm:$0xf0]  ;;  %v2469_v26 = vld [vmem:[%s3564_s0 + $0x108] sm:$0xf0] }
  0x2a   :  { %1155 = vmatpush.bf16.msrb.mxu2 %v2529_v36  ;;  %v2562_v36 = vld [vmem:[%s3565_s1 + $0x1b0] sm:$0xff]  ;;  %v2455_v8 = vld [vmem:[%s3564_s0 + $0x9c] sm:$0xf]  ;;  %v1924_v24 = vld [vmem:[%s3564_s0 + $0x104] sm:$0xf0] }
  0x2b   :  { %1204 = vmatpush.bf16.msrb.mxu3 %v2537_v37  ;;  %v2570_v37 = vld [vmem:[%s3565_s1 + $0x1f0] sm:$0xff]  ;;  %v1930_v25 = vld [vmem:[%s3564_s0 + $0xe8] sm:$0xf]  ;;  %v2465_v27 = vld [vmem:[%s3564_s0 + $0xec] sm:$0xf] }
  0x2c   :  { %1253 = vmatpush.bf16.msrb.mxu0 %v2545_v38  ;;  %1302 = vmatpush.bf16.msrb.mxu1 %v2553_v39  ;;  %v2578_v38 = vld [vmem:[%s3565_s1 + $0x230] sm:$0xff]  ;;  %v1814_v39 = vld [vmem:[%s3564_s0 + $0x8] sm:$0xf]  ;;  %v1968_v44 = vld [vmem:[%s3564_s0 + $0x154] sm:$0xf0] }
  0x2d   :  { %v1815_v47 = vor.u32 %v2441_v40, %v1814_v39  ;;  %v1932_v28 = vld [vmem:[%s3564_s0 + $0x10c] sm:$0xf0]  ;;  %v2589_v31 = vld [vmem:[%s3569_s5 + $0x8] sm:$0xff]  ;;  %v2474_v43 = vld [vmem:[%s3564_s0 + $0x134] sm:$0xf] }
  0x2e   :  { %1156 = vmatpush.bf16.msrb.mxu2 %v2528_v41  ;;  %v2437_v41 = vld [vmem:[%s3564_s0 + $0xc] sm:$0xf]  ;;  %v1960_v40 = vld [vmem:[%s3564_s0 + $0x14c] sm:$0xf0] }
  0x2f   :  { %1205 = vmatpush.bf16.msrb.mxu3 %v2536_v42  ;;  %v1816_v42 = vld [vmem:[%s3564_s0 + $0x2c] sm:$0xf0]  ;;  %v2473_v39 = vld [vmem:[%s3564_s0 + $0x12c] sm:$0xf] }
  0x30   :  { %1254 = vmatpush.bf16.msrb.mxu0 %v2544_v50  ;;  %1303 = vmatpush.bf16.msrb.mxu1 %v2552_v51  ;;  %v1819_v48 = vor.u32 %v2437_v41, %v1816_v42  ;;  %v1827_v50 = vor.u32 %v2438_v45, %v1824_v46  ;;  %v2561_v51 = vld [vmem:[%s3565_s1 + $0x1a8] sm:$0xff]  ;;  %v1966_v41 = vld [vmem:[%s3564_s0 + $0x130] sm:$0xf]  ;;  %v2478_v42 = vld [vmem:[%s3564_s0 + $0x150] sm:$0xf0]  ;;  %v1963_v46 = vor.u32 %v2473_v39, %v1960_v40 }
  0x31   :  { %1088 = vmatmul.bf16.gmra.mxu2 %v1987_v54  ;;  %1068 = vmatmul.bf16.gmra.mxu0 %v1843_v56  ;;  %v2590_v54 = vld [vmem:[%s3569_s5 + $0x10] sm:$0xff] }
  0x32   :  { %1157 = vmatpush.bf16.msrb.mxu2 %v2527_v52  ;;  %1137 = vmatmul.bf16.gmra.mxu3 %v1991_v55  ;;  %v2569_v52 = vld [vmem:[%s3565_s1 + $0x1e8] sm:$0xff]  ;;  %v1850_v55 = vld [vmem:[%s3564_s0 + $0x50] sm:$0xf]  ;;  %v2450_v56 = vld [vmem:[%s3564_s0 + $0x70] sm:$0xf0] }
  0x33   :  { %1206 = vmatpush.bf16.msrb.mxu3 %v2535_v53  ;;  %1117 = vmatmul.bf16.gmra.mxu1 %v1847_v57  ;;  %v2577_v53 = vld [vmem:[%s3565_s1 + $0x228] sm:$0xff]  ;;  %v2446_v57 = vld [vmem:[%s3564_s0 + $0x54] sm:$0xf] }
  0x34   :  { %1255 = vmatpush.bf16.msrb.mxu0 %v2543_v58  ;;  %1304 = vmatpush.bf16.msrb.mxu1 %v2551_v59  ;;  %v1852_v58 = vld [vmem:[%s3564_s0 + $0x74] sm:$0xf0] }
  0x35   :  { %v1858_v59 = vld [vmem:[%s3564_s0 + $0x58] sm:$0xf] }
  0x36   :  { %1158 = vmatpush.bf16.msrb.mxu2 %v2526_v60  ;;  %v2451_v60 = vld [vmem:[%s3564_s0 + $0x78] sm:$0xf0] }
  0x37   :  { %1207 = vmatpush.bf16.msrb.mxu3 %v2534_v61  ;;  %v2447_v61 = vld [vmem:[%s3564_s0 + $0x5c] sm:$0xf] }
  0x38   :  { %1256 = vmatpush.bf16.msrb.mxu0 %v2542_v62  ;;  %1305 = vmatpush.bf16.msrb.mxu1 %v2550_v63  ;;  %v1860_v62 = vld [vmem:[%s3564_s0 + $0x7c] sm:$0xf0]  ;;  %v1851_v63 = vor.u32 %v2450_v56, %v1850_v55 }
  0x3a   :  { %1159 = vmatpush.bf16.msrb.mxu2 %v2525_v0  ;;  %v1855_v0 = vor.u32 %v2446_v57, %v1852_v58 }
  0x3b   :  { %1208 = vmatpush.bf16.msrb.mxu3 %v2533_v1  ;;  %v1859_v1 = vor.u32 %v2451_v60, %v1858_v59  ;;  %v2573_v60 = vld [vmem:[%s3565_s1 + $0x208] sm:$0xff] }
  0x3c   :  { %1257 = vmatpush.bf16.msrb.mxu0 %v2541_v2  ;;  %1306 = vmatpush.bf16.msrb.mxu1 %v2549_v3  ;;  %v1863_v2 = vor.u32 %v2447_v61, %v1860_v62  ;;  %v2560_v3 = vld [vmem:[%s3565_s1 + $0x1a0] sm:$0xff]  ;;  %v1994_v61 = vld [vmem:[%s3564_s0 + $0x170] sm:$0xf]  ;;  %v2486_v62 = vld [vmem:[%s3564_s0 + $0x190] sm:$0xf0] }
  0x3e   :  { %1160 = vmatpush.bf16.msrb.mxu2 %v2524_v4  ;;  %v2568_v4 = vld [vmem:[%s3565_s1 + $0x1e0] sm:$0xff] }
  0x3f   :  { %1209 = vmatpush.bf16.msrb.mxu3 %v2532_v5  ;;  %v2576_v5 = vld [vmem:[%s3565_s1 + $0x220] sm:$0xff] }
  0x40   :  { %1258 = vmatpush.bf16.msrb.mxu0 %v2540_v14  ;;  %1307 = vmatpush.bf16.msrb.mxu1 %v2548_v19  ;;  %v1887_v14 = vor.u32 %v2459_v7, %v1886_v6  ;;  %v2567_v19 = vld [vmem:[%s3565_s1 + $0x1d8] sm:$0xff] }
  0x41   :  { %1093 = vmatmul.bf16.gmra.mxu2 %v2023_v15  ;;  %1073 = vmatmul.bf16.gmra.mxu0 %v1879_v17  ;;  %v1891_v15 = vor.u32 %v2455_v8, %v1888_v9  ;;  %v1899_v17 = vor.u32 %v2456_v12, %v1896_v13  ;;  %v1995_v8 = vor.u32 %v2486_v62, %v1994_v61 }
  0x42   :  { %1142 = vmatmul.bf16.gmra.mxu3 %v2027_v16  ;;  %1349 = vmatpush.bf16.msra.mxu2 %v2563_v20  ;;  %v1895_v16 = vor.u32 %v2460_v11, %v1894_v10  ;;  %v2575_v20 = vld [vmem:[%s3565_s1 + $0x218] sm:$0xff]  ;;  %v2588_v10 = vld [vmem:[%s3569_s5] sm:$0xff] }
  0x43   :  { %1122 = vmatmul.bf16.gmra.mxu1 %v1883_v18  ;;  %1398 = vmatpush.bf16.msra.mxu3 %v2571_v21  ;;  %v2559_v18 = vld [vmem:[%s3565_s1 + $0x198] sm:$0xff]  ;;  %v1922_v21 = vld [vmem:[%s3564_s0 + $0xe0] sm:$0xf] }
  0x44   :  { %1447 = vmatpush.bf16.msra.mxu0 %v2579_v22  ;;  %1653 = vmatpush.bf16.msra.mxu1 %v2591_v23  ;;  %v2468_v22 = vld [vmem:[%s3564_s0 + $0x100] sm:$0xf0] }
  0x45   :  { %v2464_v23 = vld [vmem:[%s3564_s0 + $0xe4] sm:$0xf]  ;;  %v1923_v29 = vor.u32 %v2468_v22, %v1922_v21 }
  0x46   :  { %1350 = vmatpush.bf16.msra.mxu2 %v2562_v36  ;;  %v1927_v30 = vor.u32 %v2464_v23, %v1924_v24  ;;  %v2574_v36 = vld [vmem:[%s3565_s1 + $0x210] sm:$0xff]  ;;  %v2572_v24 = vld [vmem:[%s3565_s1 + $0x200] sm:$0xff] }
  0x47   :  { %1399 = vmatpush.bf16.msra.mxu3 %v2570_v37  ;;  %v1958_v37 = vld [vmem:[%s3564_s0 + $0x128] sm:$0xf] }
  0x48   :  { %1448 = vmatpush.bf16.msra.mxu0 %v2578_v38  ;;  %1654 = vmatpush.bf16.msra.mxu1 %v2590_v54  ;;  %v2477_v38 = vld [vmem:[%s3564_s0 + $0x148] sm:$0xf0] }
  0x49   :  { %v1959_v45 = vor.u32 %v2477_v38, %v1958_v37 }
  0x4a   :  { %1351 = vmatpush.bf16.msra.mxu2 %v2561_v51 }
  0x4b   :  { %1400 = vmatpush.bf16.msra.mxu3 %v2569_v52  ;;  %v2557_v52 = vld [vmem:[%s3565_s1 + $0x188] sm:$0xff] }
  0x4c   :  { %1449 = vmatpush.bf16.msra.mxu0 %v2577_v53  ;;  %1655 = vmatpush.bf16.msra.mxu1 %v2589_v31  ;;  %v2565_v53 = vld [vmem:[%s3565_s1 + $0x1c8] sm:$0xff]  ;;  %v2492_v31 = vld [vmem:[%s3564_s0 + $0x1c4] sm:$0xf] }
  0x4e   :  { %1352 = vmatpush.bf16.msra.mxu2 %v2560_v3  ;;  %v2483_v3 = vld [vmem:[%s3564_s0 + $0x17c] sm:$0xf] }
  0x4f   :  { %1401 = vmatpush.bf16.msra.mxu3 %v2568_v4  ;;  %v2004_v4 = vld [vmem:[%s3564_s0 + $0x19c] sm:$0xf0] }
  0x50   :  { %1450 = vmatpush.bf16.msra.mxu0 %v2576_v5  ;;  %v2007_v12 = vor.u32 %v2483_v3, %v2004_v4  ;;  %1656 = vmatpush.bf16.msra.mxu1 %v2588_v10 }
  0x51   :  { %1098 = vmatmul.bf16.gmra.mxu2 %v2059_v32  ;;  %1078 = vmatmul.bf16.gmra.mxu0 %v1915_v34  ;;  %v1931_v32 = vor.u32 %v2469_v26, %v1930_v25  ;;  %v2558_v34 = vld [vmem:[%s3565_s1 + $0x190] sm:$0xff]  ;;  %v2030_v25 = vld [vmem:[%s3564_s0 + $0x1b8] sm:$0xf]  ;;  %v2495_v26 = vld [vmem:[%s3564_s0 + $0x1d8] sm:$0xf0] }
  0x52   :  { %1147 = vmatmul.bf16.gmra.mxu3 %v2063_v33  ;;  %1353 = vmatpush.bf16.msra.mxu2 %v2559_v18  ;;  %v1935_v33 = vor.u32 %v2465_v27, %v1932_v28  ;;  %v2491_v27 = vld [vmem:[%s3564_s0 + $0x1bc] sm:$0xf]  ;;  %v2032_v28 = vld [vmem:[%s3564_s0 + $0x1dc] sm:$0xf0] }
  0x53   :  { %1127 = vmatmul.bf16.gmra.mxu1 %v1919_v35  ;;  %1402 = vmatpush.bf16.msra.mxu3 %v2567_v19  ;;  %v2566_v35 = vld [vmem:[%s3565_s1 + $0x1d0] sm:$0xff]  ;;  %v2035_v37 = vor.u32 %v2491_v27, %v2032_v28  ;;  %v2580_v28 = vld [vmem:[%s3568_s4] sm:$0xff] }
  0x54   :  { %1451 = vmatpush.bf16.msra.mxu0 %v2575_v20 }
  0x56   :  { %1354 = vmatpush.bf16.msra.mxu2 %v2558_v34 }
  0x57   :  { %1403 = vmatpush.bf16.msra.mxu3 %v2566_v35 }
  0x58   :  { %1452 = vmatpush.bf16.msra.mxu0 %v2574_v36  ;;  %v2031_v36 = vor.u32 %v2495_v26, %v2030_v25 }
  0x5a   :  { %1355 = vmatpush.bf16.msra.mxu2 %v2557_v52  ;;  %v2500_v52 = vld [vmem:[%s3564_s0 + $0x204] sm:$0xf] }
  0x5b   :  { %1404 = vmatpush.bf16.msra.mxu3 %v2565_v53  ;;  %v2068_v53 = vld [vmem:[%s3564_s0 + $0x224] sm:$0xf0] }
  0x5c   :  { %1453 = vmatpush.bf16.msra.mxu0 %v2573_v60 }
  0x60   :  { %1454 = vmatpush.bf16.msra.mxu0 %v2572_v24 }
  0x61   :  { %1161 = vmatmul.bf16.vlgmr.msrb.gmra.mxu2 %v1815_v47  ;;  %1259 = vmatmul.bf16.vlgmr.msrb.gmra.mxu0 %v1823_v49  ;;  %v1967_v47 = vor.u32 %v2478_v42, %v1966_v41 }
  0x62   :  { %1210 = vmatmul.bf16.vlgmr.msrb.gmra.mxu3 %v1819_v48  ;;  %v1971_v48 = vor.u32 %v2474_v43, %v1968_v44 }
  0x63   :  { %1308 = vmatmul.bf16.vlgmr.msrb.gmra.mxu1 %v1827_v50 }
  0x71   :  { %1166 = vmatmul.bf16.gmra.mxu2 %v1851_v63  ;;  %1264 = vmatmul.bf16.gmra.mxu0 %v1859_v1  ;;  %v2482_v63 = vld [vmem:[%s3564_s0 + $0x174] sm:$0xf]  ;;  %v2002_v1 = vld [vmem:[%s3564_s0 + $0x178] sm:$0xf] }
  0x72   :  { %1215 = vmatmul.bf16.gmra.mxu3 %v1855_v0  ;;  %v1996_v0 = vld [vmem:[%s3564_s0 + $0x194] sm:$0xf0] }
  0x73   :  { %1313 = vmatmul.bf16.gmra.mxu1 %v1863_v2  ;;  %v2487_v2 = vld [vmem:[%s3564_s0 + $0x198] sm:$0xf0]  ;;  %v1999_v9 = vor.u32 %v2482_v63, %v1996_v0  ;;  %v2071_v0 = vor.u32 %v2500_v52, %v2068_v53 }
  0x74   :  { %v2003_v11 = vor.u32 %v2487_v2, %v2002_v1 }
  0x81   :  { %1171 = vmatmul.bf16.gmra.mxu2 %v1887_v14  ;;  %1269 = vmatmul.bf16.gmra.mxu0 %v1895_v16  ;;  %v2556_v16 = vld [vmem:[%s3565_s1 + $0x180] sm:$0xff] }
  0x82   :  { %1220 = vmatmul.bf16.gmra.mxu3 %v1891_v15  ;;  %1356 = vmatpush.bf16.msra.mxu2 %v2556_v16  ;;  %v2439_v16 = vld [vmem:[%s3564_s0 + $0x1c] sm:$0xf] }
  0x83   :  { %1318 = vmatmul.bf16.gmra.mxu1 %v1899_v17  ;;  %v2564_v17 = vld [vmem:[%s3565_s1 + $0x1c0] sm:$0xff] }
  0x84   :  { %1405 = vmatpush.bf16.msra.mxu3 %v2564_v17  ;;  %v1832_v17 = vld [vmem:[%s3564_s0 + $0x3c] sm:$0xf0] }
  0x85   :  { %v1835_v26 = vor.u32 %v2439_v16, %v1832_v17 }
  0x91   :  { %1176 = vmatmul.bf16.gmra.mxu2 %v1923_v29  ;;  %1274 = vmatmul.bf16.gmra.mxu0 %v1931_v32  ;;  %v2038_v29 = vld [vmem:[%s3564_s0 + $0x1c0] sm:$0xf]  ;;  %v2040_v32 = vld [vmem:[%s3564_s0 + $0x1e4] sm:$0xf0] }
  0x92   :  { %1225 = vmatmul.bf16.gmra.mxu3 %v1927_v30  ;;  %v2496_v30 = vld [vmem:[%s3564_s0 + $0x1e0] sm:$0xf0]  ;;  %v2043_v39 = vor.u32 %v2492_v31, %v2040_v32 }
  0x93   :  { %1323 = vmatmul.bf16.gmra.mxu1 %v1935_v33  ;;  %v2039_v38 = vor.u32 %v2496_v30, %v2038_v29 }
  0x9e   :  { %v1064_v49 = vpop.f32.mrf.mxu0 }
  0xa0   :  { %v1113_v50 = vpop.f32.mrf.mxu1 }
  0xa1   :  { %v3112_v51 = vadd.f32 %v1113_v50, %v1064_v49  ;;  %1181 = vmatmul.bf16.gmra.mxu2 %v1959_v45  ;;  %1279 = vmatmul.bf16.gmra.mxu0 %v1967_v47  ;;  %v2066_v49 = vld [vmem:[%s3564_s0 + $0x200] sm:$0xf]  ;;  %v2504_v50 = vld [vmem:[%s3564_s0 + $0x220] sm:$0xf0] }
  0xa2   :  { %1230 = vmatmul.bf16.gmra.mxu3 %v1963_v46  ;;  %v2067_v63 = vor.u32 %v2504_v50, %v2066_v49 }
  0xa3   :  { %1328 = vmatmul.bf16.gmra.mxu1 %v1971_v48 }
  0xa4   :  { %v1084_v54 = vpop.f32.mrf.mxu2 }
  0xa5   :  { %v1133_v55 = vpop.f32.mrf.mxu3 }
  0xa6   :  { %v3120_v56 = vadd.f32 %v1133_v55, %v1084_v54  ;;  %v1066_v57 = vpop.f32.mrf.mxu0  ;;  %v2074_v54 = vld [vmem:[%s3564_s0 + $0x208] sm:$0xf]  ;;  %v2505_v55 = vld [vmem:[%s3564_s0 + $0x228] sm:$0xf0] }
  0xa7   :  { %v2075_v1 = vor.u32 %v2505_v55, %v2074_v54  ;;  %v2581_v55 = vld [vmem:[%s3568_s4 + $0x8] sm:$0xff] }
  0xa8   :  { %v1115_v58 = vpop.f32.mrf.mxu1 }
  0xa9   :  { %v3122_v59 = vadd.f32 %v1115_v58, %v1066_v57  ;;  %v2501_v57 = vld [vmem:[%s3564_s0 + $0x20c] sm:$0xf]  ;;  %v2076_v58 = vld [vmem:[%s3564_s0 + $0x22c] sm:$0xf0] }
  0xaa   :  { %v2079_v2 = vor.u32 %v2501_v57, %v2076_v58 }
  0xac   :  { %v1086_v5 = vpop.f32.mrf.mxu2 }
  0xad   :  { %v1135_v6 = vpop.f32.mrf.mxu3 }
  0xae   :  { %v3151_v7 = vadd.f32 %v1135_v6, %v1086_v5  ;;  %v1069_v13 = vpop.f32.mrf.mxu0 }
  0xb0   :  { %v1118_v14 = vpop.f32.mrf.mxu1 }
  0xb1   :  { %v3156_v15 = vadd.f32 %v1118_v14, %v1069_v13  ;;  %1186 = vmatmul.bf16.gmra.mxu2 %v1995_v8  ;;  %1284 = vmatmul.bf16.gmra.mxu0 %v2003_v11  ;;  %v1830_v13 = vld [vmem:[%s3564_s0 + $0x18] sm:$0xf]  ;;  %v2443_v14 = vld [vmem:[%s3564_s0 + $0x38] sm:$0xf0] }
  0xb2   :  { %1235 = vmatmul.bf16.gmra.mxu3 %v1999_v9  ;;  %v1831_v25 = vor.u32 %v2443_v14, %v1830_v13  ;;  %v1910_v13 = vld [vmem:[%s3564_s0 + $0xb0] sm:$0xf]  ;;  %v2462_v14 = vld [vmem:[%s3564_s0 + $0xd0] sm:$0xf0] }
  0xb3   :  { %1333 = vmatmul.bf16.gmra.mxu1 %v2007_v12 }
  0xb4   :  { %v1089_v18 = vpop.f32.mrf.mxu2 }
  0xb5   :  { %v1138_v19 = vpop.f32.mrf.mxu3 }
  0xb6   :  { %v3164_v20 = vadd.f32 %v1138_v19, %v1089_v18  ;;  %v1071_v21 = vpop.f32.mrf.mxu0  ;;  %v1838_v18 = vld [vmem:[%s3564_s0 + $0x20] sm:$0xf]  ;;  %v2444_v19 = vld [vmem:[%s3564_s0 + $0x40] sm:$0xf0] }
  0xb7   :  { %v1839_v27 = vor.u32 %v2444_v19, %v1838_v18 }
  0xb8   :  { %v1120_v22 = vpop.f32.mrf.mxu1 }
  0xb9   :  { %v3166_v23 = vadd.f32 %v1120_v22, %v1071_v21 }
  0xbc   :  { %v1091_v33 = vpop.f32.mrf.mxu2 }
  0xbd   :  { %v1140_v34 = vpop.f32.mrf.mxu3 }
  0xbe   :  { %v3195_v35 = vadd.f32 %v1140_v34, %v1091_v33  ;;  %v1074_v40 = vpop.f32.mrf.mxu0 }
  0xc0   :  { %v1123_v41 = vpop.f32.mrf.mxu1 }
  0xc1   :  { %v3197_v42 = vadd.f32 %v1123_v41, %v1074_v40  ;;  %1191 = vmatmul.bf16.gmra.mxu2 %v2031_v36  ;;  %1289 = vmatmul.bf16.gmra.mxu0 %v2039_v38  ;;  %v2452_v40 = vld [vmem:[%s3564_s0 + $0x80] sm:$0xf0] }
  0xc2   :  { %1240 = vmatmul.bf16.gmra.mxu3 %v2035_v37  ;;  %v2448_v41 = vld [vmem:[%s3564_s0 + $0x64] sm:$0xf] }
  0xc3   :  { %1338 = vmatmul.bf16.gmra.mxu1 %v2043_v39  ;;  %v1866_v39 = vld [vmem:[%s3564_s0 + $0x60] sm:$0xf] }
  0xc4   :  { %v1094_v43 = vpop.f32.mrf.mxu2  ;;  %v1867_v52 = vor.u32 %v2452_v40, %v1866_v39  ;;  %v1938_v39 = vld [vmem:[%s3564_s0 + $0xf0] sm:$0xf]  ;;  %v2470_v40 = vld [vmem:[%s3564_s0 + $0x110] sm:$0xf0] }
  0xc5   :  { %v1143_v44 = vpop.f32.mrf.mxu3 }
  0xc6   :  { %v3199_v45 = vadd.f32 %v1143_v44, %v1094_v43  ;;  %v1076_v46 = vpop.f32.mrf.mxu0  ;;  %v1874_v43 = vld [vmem:[%s3564_s0 + $0x68] sm:$0xf]  ;;  %v2453_v44 = vld [vmem:[%s3564_s0 + $0x88] sm:$0xf0] }
  0xc7   :  { %v1875_v54 = vor.u32 %v2453_v44, %v1874_v43  ;;  %v2471_v43 = vld [vmem:[%s3564_s0 + $0x118] sm:$0xf0] }
  0xc8   :  { %v1125_v47 = vpop.f32.mrf.mxu1 }
  0xc9   :  { %v3201_v48 = vadd.f32 %v1125_v47, %v1076_v46 }
  0xcc   :  { %v1096_v60 = vpop.f32.mrf.mxu2 }
  0xcd   :  { %v1145_v61 = vpop.f32.mrf.mxu3 }
  0xce   :  { %v3227_v62 = vadd.f32 %v1145_v61, %v1096_v60  ;;  %v1079_v3 = vpop.f32.mrf.mxu0 }
  0xd0   :  { %v1128_v4 = vpop.f32.mrf.mxu1 }
  0xd1   :  { %v3229_v5 = vadd.f32 %v1128_v4, %v1079_v3  ;;  %1196 = vmatmul.bf16.gmra.mxu2 %v2067_v63  ;;  %1294 = vmatmul.bf16.gmra.mxu0 %v2075_v1 }
  0xd2   :  { %1245 = vmatmul.bf16.gmra.mxu3 %v2071_v0 }
  0xd3   :  { %1343 = vmatmul.bf16.gmra.mxu1 %v2079_v2 }
  0xd4   :  { %v1099_v6 = vpop.f32.mrf.mxu2 }
  0xd5   :  { %v1148_v8 = vpop.f32.mrf.mxu3 }
  0xd6   :  { %v3231_v9 = vadd.f32 %v1148_v8, %v1099_v6  ;;  %v1081_v10 = vpop.f32.mrf.mxu0  ;;  %v1902_v8 = vld [vmem:[%s3564_s0 + $0xa8] sm:$0xf] }
  0xd8   :  { %v1130_v11 = vpop.f32.mrf.mxu1 }
  0xd9   :  { %v3233_v12 = vadd.f32 %v1130_v11, %v1081_v10  ;;  %v2461_v10 = vld [vmem:[%s3564_s0 + $0xc8] sm:$0xf0] }
  0xda   :  { %v2457_v11 = vld [vmem:[%s3564_s0 + $0xac] sm:$0xf] }
  0xdc   :  { %v1101_v21 = vpop.f32.mrf.mxu2 }
  0xdd   :  { %v1150_v22 = vpop.f32.mrf.mxu3 }
  0xde   :  { %v3253_v24 = vadd.f32 %v1150_v22, %v1101_v21  ;;  %v1260_v29 = vpop.f32.mrf.mxu0  ;;  %v1903_v21 = vor.u32 %v2461_v10, %v1902_v8  ;;  %v1974_v8 = vld [vmem:[%s3564_s0 + $0x138] sm:$0xf]  ;;  %v2479_v10 = vld [vmem:[%s3564_s0 + $0x158] sm:$0xf0] }
  0xe0   :  { %v1309_v30 = vpop.f32.mrf.mxu1 }
  0xe1   :  { %1357 = vmatmul.bf16.vlgmr.msra.gmra.mxu2 %v1831_v25  ;;  %1455 = vmatmul.bf16.vlgmr.msra.gmra.mxu0 %v1839_v27  ;;  %v1911_v25 = vor.u32 %v2462_v14, %v1910_v13  ;;  %v2480_v13 = vld [vmem:[%s3564_s0 + $0x160] sm:$0xf0] }
  0xe2   :  { %1406 = vmatmul.bf16.vlgmr.msra.gmra.mxu3 %v1835_v26  ;;  %v2582_v26 = vld [vmem:[%s3568_s4 + $0x10] sm:$0xff] }
  0xe3   :  { %2428 = vmatmul.msk.bf16.vlgmr.msra.gmra.mxu1 %vm1624_vm0, %v2580_v28 }
  0xe4   :  { %v1162_v31 = vpop.f32.mrf.mxu2 }
  0xe5   :  { %v1211_v32 = vpop.f32.mrf.mxu3  ;;  %v1163_v33 = vadd.f32 %v1162_v31, %v3112_v51  ;;  %v1868_v51 = vld [vmem:[%s3564_s0 + $0x84] sm:$0xf0] }
  0xe6   :  { %v1262_v36 = vpop.f32.mrf.mxu0  ;;  %v1871_v53 = vor.u32 %v2448_v41, %v1868_v51  ;;  %v2466_v41 = vld [vmem:[%s3564_s0 + $0xf4] sm:$0xf]  ;;  %v1946_v51 = vld [vmem:[%s3564_s0 + $0xf8] sm:$0xf] }
  0xe7   :  { %v1212_v34 = vadd.f32 %v1211_v32, %v1163_v33 }
  0xe8   :  { %v1311_v37 = vpop.f32.mrf.mxu1 }
  0xe9   :  { %v1261_v38 = vadd.f32 %v1260_v29, %v1212_v34 }
  0xeb   :  { %v3278_v46 = vadd.f32 %v1309_v30, %v1261_v38 }
  0xec   :  { %v1164_v47 = vpop.f32.mrf.mxu2 }
  0xed   :  { %v1213_v49 = vpop.f32.mrf.mxu3  ;;  %v1165_v50 = vadd.f32 %v1164_v47, %v3122_v59 }
  0xee   :  { %v1265_v58 = vpop.f32.mrf.mxu0 }
  0xef   :  { %v1214_v57 = vadd.f32 %v1213_v49, %v1165_v50 }
  0xf0   :  { %v1314_v60 = vpop.f32.mrf.mxu1 }
  0xf1   :  { %v1263_v61 = vadd.f32 %v1262_v36, %v1214_v57  ;;  %1362 = vmatmul.bf16.gmra.mxu2 %v1867_v52  ;;  %1460 = vmatmul.bf16.gmra.mxu0 %v1875_v54  ;;  %v1939_v52 = vor.u32 %v2470_v40, %v1938_v39  ;;  %v1947_v54 = vor.u32 %v2471_v43, %v1946_v51  ;;  %v2010_v39 = vld [vmem:[%s3564_s0 + $0x180] sm:$0xf]  ;;  %v2488_v40 = vld [vmem:[%s3564_s0 + $0x1a0] sm:$0xf0]  ;;  %v2489_v51 = vld [vmem:[%s3564_s0 + $0x1a8] sm:$0xf0] }
  0xf2   :  { %1411 = vmatmul.bf16.gmra.mxu3 %v1871_v53 }
  0xf3   :  { %2429 = vmatmul.msk.bf16.gmra.mxu1 %vm1624_vm0, %v2581_v55  ;;  %v3285_v63 = vadd.f32 %v1311_v37, %v1263_v61  ;;  %v2583_v55 = vld [vmem:[%s3568_s4 + $0x18] sm:$0xff] }
  0xf4   :  { %v1167_v0 = vpop.f32.mrf.mxu2 }
  0xf5   :  { %v1216_v59 = vpop.f32.mrf.mxu3  ;;  %v1168_v1 = vadd.f32 %v1167_v0, %v3156_v15  ;;  %v1904_v15 = vld [vmem:[%s3564_s0 + $0xcc] sm:$0xf0] }
  0xf6   :  { %v1267_v3 = vpop.f32.mrf.mxu0  ;;  %v1907_v22 = vor.u32 %v2457_v11, %v1904_v15  ;;  %v2475_v11 = vld [vmem:[%s3564_s0 + $0x13c] sm:$0xf]  ;;  %v1982_v15 = vld [vmem:[%s3564_s0 + $0x140] sm:$0xf] }
  0xf7   :  { %v1217_v2 = vadd.f32 %v1216_v59, %v1168_v1 }
  0xf8   :  { %v1316_v4 = vpop.f32.mrf.mxu1 }
  0xf9   :  { %v1266_v6 = vadd.f32 %v1265_v58, %v1217_v2 }
  0xfb   :  { %v3306_v16 = vadd.f32 %v1314_v60, %v1266_v6 }
  0xfc   :  { %v1169_v17 = vpop.f32.mrf.mxu2 }
  0xfd   :  { %v1218_v18 = vpop.f32.mrf.mxu3  ;;  %v1170_v19 = vadd.f32 %v1169_v17, %v3166_v23 }
  0xfe   :  { %v1270_v28 = vpop.f32.mrf.mxu0 }
  0xff   :  { %v1219_v27 = vadd.f32 %v1218_v18, %v1170_v19 }
 0x100   :  { %v1319_v29 = vpop.f32.mrf.mxu1 }
 0x101   :  { %v1268_v30 = vadd.f32 %v1267_v3, %v1219_v27  ;;  %1367 = vmatmul.bf16.gmra.mxu2 %v1903_v21  ;;  %1465 = vmatmul.bf16.gmra.mxu0 %v1911_v25  ;;  %v1975_v21 = vor.u32 %v2479_v10, %v1974_v8  ;;  %v1983_v25 = vor.u32 %v2480_v13, %v1982_v15  ;;  %v2046_v8 = vld [vmem:[%s3564_s0 + $0x1c8] sm:$0xf]  ;;  %v2497_v10 = vld [vmem:[%s3564_s0 + $0x1e8] sm:$0xf0]  ;;  %v2498_v15 = vld [vmem:[%s3564_s0 + $0x1f0] sm:$0xf0] }
 0x102   :  { %1416 = vmatmul.bf16.gmra.mxu3 %v1907_v22 }
 0x103   :  { %2430 = vmatmul.msk.bf16.gmra.mxu1 %vm1624_vm0, %v2582_v26  ;;  %v3313_v31 = vadd.f32 %v1316_v4, %v1268_v30  ;;  %v2584_v26 = vld [vmem:[%s3568_s4 + $0x20] sm:$0xff] }
 0x104   :  { %v1172_v32 = vpop.f32.mrf.mxu2 }
 0x105   :  { %v1221_v23 = vpop.f32.mrf.mxu3  ;;  %v1173_v33 = vadd.f32 %v1172_v32, %v3197_v42  ;;  %v1940_v42 = vld [vmem:[%s3564_s0 + $0x114] sm:$0xf0] }
 0x106   :  { %v1272_v36 = vpop.f32.mrf.mxu0  ;;  %v1943_v53 = vor.u32 %v2466_v41, %v1940_v42  ;;  %v2484_v41 = vld [vmem:[%s3564_s0 + $0x184] sm:$0xf]  ;;  %v2018_v42 = vld [vmem:[%s3564_s0 + $0x188] sm:$0xf] }
 0x107   :  { %v1222_v34 = vadd.f32 %v1221_v23, %v1173_v33 }
 0x108   :  { %v1321_v37 = vpop.f32.mrf.mxu1 }
 0x109   :  { %v1271_v38 = vadd.f32 %v1270_v28, %v1222_v34 }
 0x10b   :  { %v3334_v44 = vadd.f32 %v1319_v29, %v1271_v38 }
 0x10c   :  { %v1174_v47 = vpop.f32.mrf.mxu2 }
 0x10d   :  { %v1223_v49 = vpop.f32.mrf.mxu3  ;;  %v1175_v50 = vadd.f32 %v1174_v47, %v3201_v48 }
 0x10e   :  { %v1275_v58 = vpop.f32.mrf.mxu0 }
 0x10f   :  { %v1224_v57 = vadd.f32 %v1223_v49, %v1175_v50 }
 0x110   :  { %v1324_v60 = vpop.f32.mrf.mxu1 }
 0x111   :  { %v1273_v61 = vadd.f32 %v1272_v36, %v1224_v57  ;;  %1372 = vmatmul.bf16.gmra.mxu2 %v1939_v52  ;;  %1470 = vmatmul.bf16.gmra.mxu0 %v1947_v54  ;;  %v2011_v52 = vor.u32 %v2488_v40, %v2010_v39  ;;  %v2019_v54 = vor.u32 %v2489_v51, %v2018_v42  ;;  %v2082_v39 = vld [vmem:[%s3564_s0 + $0x210] sm:$0xf]  ;;  %v2506_v40 = vld [vmem:[%s3564_s0 + $0x230] sm:$0xf0]  ;;  %v2507_v42 = vld [vmem:[%s3564_s0 + $0x238] sm:$0xf0] }
 0x112   :  { %1421 = vmatmul.bf16.gmra.mxu3 %v1943_v53 }
 0x113   :  { %2431 = vmatmul.msk.bf16.gmra.mxu1 %vm1624_vm0, %v2583_v55  ;;  %v3341_v0 = vadd.f32 %v1321_v37, %v1273_v61  ;;  %v2585_v55 = vld [vmem:[%s3568_s4 + $0x28] sm:$0xff] }
 0x114   :  { %v1177_v59 = vpop.f32.mrf.mxu2 }
 0x115   :  { %v1226_v48 = vpop.f32.mrf.mxu3  ;;  %v1178_v1 = vadd.f32 %v1177_v59, %v3229_v5  ;;  %v1976_v5 = vld [vmem:[%s3564_s0 + $0x15c] sm:$0xf0] }
 0x116   :  { %v1277_v3 = vpop.f32.mrf.mxu0  ;;  %v1979_v22 = vor.u32 %v2475_v11, %v1976_v5  ;;  %v2493_v11 = vld [vmem:[%s3564_s0 + $0x1cc] sm:$0xf]  ;;  %v2054_v5 = vld [vmem:[%s3564_s0 + $0x1d0] sm:$0xf] }
 0x117   :  { %v1227_v2 = vadd.f32 %v1226_v48, %v1178_v1 }
 0x118   :  { %v1326_v4 = vpop.f32.mrf.mxu1 }
 0x119   :  { %v1276_v6 = vadd.f32 %v1275_v58, %v1227_v2 }
 0x11b   :  { %v3362_v14 = vadd.f32 %v1324_v60, %v1276_v6 }
 0x11c   :  { %v1179_v17 = vpop.f32.mrf.mxu2 }
 0x11d   :  { %v1228_v18 = vpop.f32.mrf.mxu3  ;;  %v1180_v19 = vadd.f32 %v1179_v17, %v3233_v12 }
 0x11e   :  { %v1280_v28 = vpop.f32.mrf.mxu0 }
 0x11f   :  { %v1229_v27 = vadd.f32 %v1228_v18, %v1180_v19 }
 0x120   :  { %v1329_v29 = vpop.f32.mrf.mxu1 }
 0x121   :  { %v1278_v30 = vadd.f32 %v1277_v3, %v1229_v27  ;;  %1377 = vmatmul.bf16.gmra.mxu2 %v1975_v21  ;;  %1475 = vmatmul.bf16.gmra.mxu0 %v1983_v25  ;;  %v2047_v21 = vor.u32 %v2497_v10, %v2046_v8  ;;  %v2055_v25 = vor.u32 %v2498_v15, %v2054_v5 }
 0x122   :  { %1426 = vmatmul.bf16.gmra.mxu3 %v1979_v22 }
 0x123   :  { %2432 = vmatmul.msk.bf16.gmra.mxu1 %vm1624_vm0, %v2584_v26  ;;  %v3369_v32 = vadd.f32 %v1326_v4, %v1278_v30  ;;  %v2586_v26 = vld [vmem:[%s3568_s4 + $0x30] sm:$0xff] }
 0x124   :  { %v1182_v23 = vpop.f32.mrf.mxu2 }
 0x125   :  { %v1231_v12 = vpop.f32.mrf.mxu3  ;;  %v1183_v33 = vadd.f32 %v1182_v23, %v3120_v56  ;;  %v2012_v56 = vld [vmem:[%s3564_s0 + $0x1a4] sm:$0xf0] }
 0x126   :  { %v1282_v36 = vpop.f32.mrf.mxu0  ;;  %v2015_v53 = vor.u32 %v2484_v41, %v2012_v56  ;;  %v2502_v41 = vld [vmem:[%s3564_s0 + $0x214] sm:$0xf]  ;;  %v2090_v56 = vld [vmem:[%s3564_s0 + $0x218] sm:$0xf] }
 0x127   :  { %v1232_v34 = vadd.f32 %v1231_v12, %v1183_v33 }
 0x128   :  { %v1331_v37 = vpop.f32.mrf.mxu1 }
 0x129   :  { %v1281_v38 = vadd.f32 %v1280_v28, %v1232_v34 }
 0x12b   :  { %v3390_v43 = vadd.f32 %v1329_v29, %v1281_v38 }
 0x12c   :  { %v1184_v47 = vpop.f32.mrf.mxu2 }
 0x12d   :  { %v1233_v49 = vpop.f32.mrf.mxu3  ;;  %v1185_v50 = vadd.f32 %v1184_v47, %v3151_v7 }
 0x12e   :  { %v1285_v58 = vpop.f32.mrf.mxu0 }
 0x12f   :  { %v1234_v57 = vadd.f32 %v1233_v49, %v1185_v50 }
 0x130   :  { %v1334_v60 = vpop.f32.mrf.mxu1 }
 0x131   :  { %v1283_v61 = vadd.f32 %v1282_v36, %v1234_v57  ;;  %1382 = vmatmul.bf16.gmra.mxu2 %v2011_v52  ;;  %1480 = vmatmul.bf16.gmra.mxu0 %v2019_v54  ;;  %v2083_v52 = vor.u32 %v2506_v40, %v2082_v39  ;;  %v2091_v54 = vor.u32 %v2507_v42, %v2090_v56 }
 0x132   :  { %1431 = vmatmul.bf16.gmra.mxu3 %v2015_v53 }
 0x133   :  { %2433 = vmatmul.msk.bf16.gmra.mxu1 %vm1624_vm0, %v2585_v55  ;;  %v3397_v59 = vadd.f32 %v1331_v37, %v1283_v61  ;;  %v2587_v55 = vld [vmem:[%s3568_s4 + $0x38] sm:$0xff] }
 0x134   :  { %v1187_v48 = vpop.f32.mrf.mxu2 }
 0x135   :  { %v1236_v7 = vpop.f32.mrf.mxu3  ;;  %v1188_v1 = vadd.f32 %v1187_v48, %v3164_v20  ;;  %v2048_v20 = vld [vmem:[%s3564_s0 + $0x1ec] sm:$0xf0] }
 0x136   :  { %v1287_v3 = vpop.f32.mrf.mxu0  ;;  %v2051_v22 = vor.u32 %v2493_v11, %v2048_v20 }
 0x137   :  { %v1237_v2 = vadd.f32 %v1236_v7, %v1188_v1 }
 0x138   :  { %v1336_v4 = vpop.f32.mrf.mxu1 }
 0x139   :  { %v1286_v6 = vadd.f32 %v1285_v58, %v1237_v2 }
 0x13b   :  { %v3418_v13 = vadd.f32 %v1334_v60, %v1286_v6 }
 0x13c   :  { %v1189_v17 = vpop.f32.mrf.mxu2 }
 0x13d   :  { %v1238_v18 = vpop.f32.mrf.mxu3  ;;  %v1190_v19 = vadd.f32 %v1189_v17, %v3195_v35 }
 0x13e   :  { %v1290_v28 = vpop.f32.mrf.mxu0 }
 0x13f   :  { %v1239_v27 = vadd.f32 %v1238_v18, %v1190_v19  ;;  %v3462_v19 = vld [vmem:[%s3570_s6] ss:$0 sm:$0xff] }
 0x140   :  { %v1339_v29 = vpop.f32.mrf.mxu1 }
 0x141   :  { %v1288_v30 = vadd.f32 %v1287_v3, %v1239_v27  ;;  %1387 = vmatmul.bf16.gmra.mxu2 %v2047_v21  ;;  %1485 = vmatmul.bf16.gmra.mxu0 %v2055_v25 }
 0x142   :  { %1436 = vmatmul.bf16.gmra.mxu3 %v2051_v22 }
 0x143   :  { %2434 = vmatmul.msk.bf16.gmra.mxu1 %vm1624_vm0, %v2586_v26  ;;  %v3425_v23 = vadd.f32 %v1336_v4, %v1288_v30 }
 0x144   :  { %v1192_v12 = vpop.f32.mrf.mxu2 }
 0x145   :  { %v1241_v35 = vpop.f32.mrf.mxu3  ;;  %v1193_v33 = vadd.f32 %v1192_v12, %v3199_v45  ;;  %v2084_v45 = vld [vmem:[%s3564_s0 + $0x234] sm:$0xf0] }
 0x146   :  { %v1292_v36 = vpop.f32.mrf.mxu0  ;;  %v2087_v53 = vor.u32 %v2502_v41, %v2084_v45 }
 0x147   :  { %v1242_v34 = vadd.f32 %v1241_v35, %v1193_v33 }
 0x148   :  { %v1341_v37 = vpop.f32.mrf.mxu1 }
 0x149   :  { %v1291_v38 = vadd.f32 %v1290_v28, %v1242_v34  ;;  %v3476_v28 = vld [vmem:[%s3566_s2] ss:$0 sm:$0xff]  ;;  %s2641_s2 = smov [#allocation2]  }
 0x14b   :  { %v3446_v51 = vadd.f32 %v1339_v29, %v1291_v38 }
 0x14c   :  { %v1194_v47 = vpop.f32.mrf.mxu2 }
 0x14d   :  { %v1243_v49 = vpop.f32.mrf.mxu3  ;;  %v1195_v50 = vadd.f32 %v1194_v47, %v3227_v62 }
 0x14e   :  { %v1295_v58 = vpop.f32.mrf.mxu0 }
 0x14f   :  { %v1244_v57 = vadd.f32 %v1243_v49, %v1195_v50 }
 0x150   :  { %v1344_v60 = vpop.f32.mrf.mxu1 }
 0x151   :  { %v1293_v61 = vadd.f32 %v1292_v36, %v1244_v57  ;;  %1392 = vmatmul.bf16.gmra.mxu2 %v2083_v52  ;;  %1490 = vmatmul.bf16.gmra.mxu0 %v2091_v54 }
 0x152   :  { %1441 = vmatmul.bf16.gmra.mxu3 %v2087_v53 }
 0x153   :  { %2435 = vmatmul.msk.bf16.gmra.mxu1 %vm1624_vm0, %v2587_v55  ;;  %v3453_v48 = vadd.f32 %v1341_v37, %v1293_v61 }
 0x154   :  { %v1197_v7 = vpop.f32.mrf.mxu2 }
 0x155   :  { %v1246_v62 = vpop.f32.mrf.mxu3  ;;  %v1198_v1 = vadd.f32 %v1197_v7, %v3231_v9 }
 0x156   :  { %v1297_v3 = vpop.f32.mrf.mxu0 }
 0x157   :  { %v1247_v2 = vadd.f32 %v1246_v62, %v1198_v1 }
 0x158   :  { %v1346_v4 = vpop.f32.mrf.mxu1 }
 0x159   :  { %v1296_v6 = vadd.f32 %v1295_v58, %v1247_v2 }
 0x15b   :  { %v3456_v8 = vadd.f32 %v1344_v60, %v1296_v6 }
 0x15c   :  { %v1199_v10 = vpop.f32.mrf.mxu2 }
 0x15d   :  { %v1248_v11 = vpop.f32.mrf.mxu3  ;;  %v1200_v20 = vadd.f32 %v1199_v10, %v3253_v24  ;;  %v3471_v24 = vld [vmem:[%s3571_s7] ss:$0 sm:$0xff] }
 0x15e   :  { %v1456_v15 = vpop.f32.mrf.mxu0 }
 0x15f   :  { %v1249_v5 = vadd.f32 %v1248_v11, %v1200_v20 }
 0x160   :  { %v1658_v17 = vpop.f32.mrf.mxu1 }
 0x161   :  { %v1298_v18 = vadd.f32 %v1297_v3, %v1249_v5  ;;  %v1702_v26 = vmul.f32 %v3462_v19, %v1658_v17 }
 0x163   :  { %v3464_v9 = vadd.f32 %v1346_v4, %v1298_v18  ;;  %v1722_v35 = vadd.f32 %v3471_v24, %v1702_v26 }
 0x164   :  { %v1358_v21 = vpop.f32.mrf.mxu2 }
 0x165   :  { %v1407_v22 = vpop.f32.mrf.mxu3  ;;  %v1359_v25 = vadd.f32 %v1358_v21, %v3278_v46  ;;  %v3481_v46 = vld [vmem:[%s3567_s3] ss:$0 sm:$0xff]  ;;  %s1790_s3 = sshll.u32 %s2641_s2, 4  ;;  %s1791_s3 = int_to_ptr.vmem [resolvable:$true] %s1790_s3 }
 0x166   :  { %v1458_v29 = vpop.f32.mrf.mxu0 }
 0x167   :  { %v1408_v27 = vadd.f32 %v1407_v22, %v1359_v25 }
 0x168   :  { %v1660_v30 = vpop.f32.mrf.mxu1 }
 0x169   :  { %v1457_v12 = vadd.f32 %v1456_v15, %v1408_v27  ;;  %v1703_v42 = vmul.f32 %v3462_v19, %v1660_v30 }
 0x16b   :  { %v1500_v33 = vmul.f32 %v3476_v28, %v1457_v12  ;;  %v1723_v53 = vadd.f32 %v3471_v24, %v1703_v42 }
 0x16c   :  { %v1360_v34 = vpop.f32.mrf.mxu2 }
 0x16d   :  { %v1409_v36 = vpop.f32.mrf.mxu3  ;;  %v1520_v37 = vadd.f32 %v3481_v46, %v1500_v33  ;;  %v1361_v38 = vadd.f32 %v1360_v34, %v3285_v63 }
 0x16e   :  { %v1461_v41 = vpop.f32.mrf.mxu0 }
 0x16f   :  { %v1738_v39 = vadd.f32 %v1722_v35, %v1520_v37  ;;  %v1410_v40 = vadd.f32 %v1409_v36, %v1361_v38 }
 0x170   :  { %v1663_v45 = vpop.f32.mrf.mxu1 }
 0x171   :  { %v1754_v56 = vmax.f32 %v1738_v39, 0.0  ;;  %v1459_v47 = vadd.f32 %v1458_v29, %v1410_v40  ;;  %v1704_v57 = vmul.f32 %v3462_v19, %v1663_v45 }
 0x173   :  { %1770 = vst [vmem:[#allocation2] sm:$0xff] %v1754_v56  ;;  %v1501_v49 = vmul.f32 %v3476_v28, %v1459_v47  ;;  %v1724_v1 = vadd.f32 %v3471_v24, %v1704_v57 }
 0x174   :  { %v1363_v50 = vpop.f32.mrf.mxu2 }
 0x175   :  { %v1412_v52 = vpop.f32.mrf.mxu3  ;;  %v1521_v54 = vadd.f32 %v3481_v46, %v1501_v49  ;;  %v1364_v55 = vadd.f32 %v1363_v50, %v3306_v16 }
 0x176   :  { %v1463_v60 = vpop.f32.mrf.mxu0 }
 0x177   :  { %v1739_v63 = vadd.f32 %v1723_v53, %v1521_v54  ;;  %v1413_v58 = vadd.f32 %v1412_v52, %v1364_v55 }
 0x178   :  { %v1665_v61 = vpop.f32.mrf.mxu1 }
 0x179   :  { %v1755_v7 = vmax.f32 %v1739_v63, 0.0  ;;  %v1462_v62 = vadd.f32 %v1461_v41, %v1413_v58  ;;  %v1705_v17 = vmul.f32 %v3462_v19, %v1665_v61 }
 0x17b   :  { %1771 = vst [vmem:[#allocation2 + $0x8] sm:$0xff] %v1755_v7  ;;  %v1502_v2 = vmul.f32 %v3476_v28, %v1462_v62  ;;  %v1725_v26 = vadd.f32 %v3471_v24, %v1705_v17 }
 0x17c   :  { %v1365_v3 = vpop.f32.mrf.mxu2 }
 0x17d   :  { %v1414_v4 = vpop.f32.mrf.mxu3  ;;  %v1522_v6 = vadd.f32 %v3481_v46, %v1502_v2  ;;  %v1366_v10 = vadd.f32 %v1365_v3, %v3313_v31 }
 0x17e   :  { %v1466_v20 = vpop.f32.mrf.mxu0 }
 0x17f   :  { %v1740_v16 = vadd.f32 %v1724_v1, %v1522_v6  ;;  %v1415_v11 = vadd.f32 %v1414_v4, %v1366_v10 }
 0x180   :  { %v1668_v5 = vpop.f32.mrf.mxu1 }
 0x181   :  { %v1756_v15 = vmax.f32 %v1740_v16, 0.0  ;;  %v1464_v18 = vadd.f32 %v1463_v60, %v1415_v11  ;;  %v1706_v30 = vmul.f32 %v3462_v19, %v1668_v5 }
 0x183   :  { %1772 = vst [vmem:[#allocation2 + $0x10] sm:$0xff] %v1756_v15  ;;  %v1503_v21 = vmul.f32 %v3476_v28, %v1464_v18  ;;  %v1726_v37 = vadd.f32 %v3471_v24, %v1706_v30 }
 0x184   :  { %v1368_v22 = vpop.f32.mrf.mxu2 }
 0x185   :  { %v1417_v25 = vpop.f32.mrf.mxu3  ;;  %v1523_v27 = vadd.f32 %v3481_v46, %v1503_v21  ;;  %v1369_v29 = vadd.f32 %v1368_v22, %v3334_v44 }
 0x186   :  { %v1468_v35 = vpop.f32.mrf.mxu0 }
 0x187   :  { %v1741_v31 = vadd.f32 %v1725_v26, %v1523_v27  ;;  %v1418_v12 = vadd.f32 %v1417_v25, %v1369_v29 }
 0x188   :  { %v1670_v33 = vpop.f32.mrf.mxu1 }
 0x189   :  { %v1757_v34 = vmax.f32 %v1741_v31, 0.0  ;;  %v1467_v36 = vadd.f32 %v1466_v20, %v1418_v12  ;;  %v1707_v50 = vmul.f32 %v3462_v19, %v1670_v33 }
 0x18b   :  { %1773 = vst [vmem:[#allocation2 + $0x18] sm:$0xff] %v1757_v34  ;;  %v1504_v38 = vmul.f32 %v3476_v28, %v1467_v36  ;;  %v1727_v63 = vadd.f32 %v3471_v24, %v1707_v50 }
 0x18c   :  { %v1370_v39 = vpop.f32.mrf.mxu2 }
 0x18d   :  { %v1419_v40 = vpop.f32.mrf.mxu3  ;;  %v1524_v41 = vadd.f32 %v3481_v46, %v1504_v38  ;;  %v1371_v45 = vadd.f32 %v1370_v39, %v3341_v0 }
 0x18e   :  { %v1471_v42 = vpop.f32.mrf.mxu0 }
 0x18f   :  { %v1742_v44 = vadd.f32 %v1726_v37, %v1524_v41  ;;  %v1420_v56 = vadd.f32 %v1419_v40, %v1371_v45 }
 0x190   :  { %v1673_v47 = vpop.f32.mrf.mxu1 }
 0x191   :  { %v1758_v49 = vmax.f32 %v1742_v44, 0.0  ;;  %v1469_v52 = vadd.f32 %v1468_v35, %v1420_v56  ;;  %v1708_v60 = vmul.f32 %v3462_v19, %v1673_v47 }
 0x193   :  { %1774 = vst [vmem:[#allocation2 + $0x20] sm:$0xff] %v1758_v49  ;;  %v1505_v53 = vmul.f32 %v3476_v28, %v1469_v52  ;;  %v1728_v3 = vadd.f32 %v3471_v24, %v1708_v60 }
 0x194   :  { %v1373_v54 = vpop.f32.mrf.mxu2 }
 0x195   :  { %v1422_v55 = vpop.f32.mrf.mxu3  ;;  %v1525_v57 = vadd.f32 %v3481_v46, %v1505_v53  ;;  %v1374_v58 = vadd.f32 %v1373_v54, %v3362_v14 }
 0x196   :  { %v1473_v7 = vpop.f32.mrf.mxu0 }
 0x197   :  { %v1743_v0 = vadd.f32 %v1727_v63, %v1525_v57  ;;  %v1423_v61 = vadd.f32 %v1422_v55, %v1374_v58 }
 0x198   :  { %v1675_v62 = vpop.f32.mrf.mxu1 }
 0x199   :  { %v1759_v1 = vmax.f32 %v1743_v0, 0.0  ;;  %v1472_v2 = vadd.f32 %v1471_v42, %v1423_v61  ;;  %v1709_v18 = vmul.f32 %v3462_v19, %v1675_v62 }
 0x19b   :  { %1775 = vst [vmem:[#allocation2 + $0x28] sm:$0xff] %v1759_v1  ;;  %v1506_v4 = vmul.f32 %v3476_v28, %v1472_v2  ;;  %v1729_v27 = vadd.f32 %v3471_v24, %v1709_v18 }
 0x19c   :  { %v1375_v6 = vpop.f32.mrf.mxu2 }
 0x19d   :  { %v1424_v10 = vpop.f32.mrf.mxu3  ;;  %v1526_v16 = vadd.f32 %v3481_v46, %v1506_v4  ;;  %v1376_v11 = vadd.f32 %v1375_v6, %v3369_v32 }
 0x19e   :  { %v1476_v5 = vpop.f32.mrf.mxu0 }
 0x19f   :  { %v1744_v14 = vadd.f32 %v1728_v3, %v1526_v16  ;;  %v1425_v20 = vadd.f32 %v1424_v10, %v1376_v11 }
 0x1a0   :  { %v1678_v15 = vpop.f32.mrf.mxu1 }
 0x1a1   :  { %v1760_v17 = vmax.f32 %v1744_v14, 0.0  ;;  %v1474_v21 = vadd.f32 %v1473_v7, %v1425_v20  ;;  %v1710_v30 = vmul.f32 %v3462_v19, %v1678_v15 }
 0x1a3   :  { %1776 = vst [vmem:[#allocation2 + $0x30] sm:$0xff] %v1760_v17  ;;  %v1507_v22 = vmul.f32 %v3476_v28, %v1474_v21  ;;  %v1730_v37 = vadd.f32 %v3471_v24, %v1710_v30 }
 0x1a4   :  { %v1378_v25 = vpop.f32.mrf.mxu2 }
 0x1a5   :  { %v1427_v26 = vpop.f32.mrf.mxu3  ;;  %v1527_v29 = vadd.f32 %v3481_v46, %v1507_v22  ;;  %v1379_v31 = vadd.f32 %v1378_v25, %v3390_v43 }
 0x1a6   :  { %v1478_v35 = vpop.f32.mrf.mxu0 }
 0x1a7   :  { %v1745_v32 = vadd.f32 %v1729_v27, %v1527_v29  ;;  %v1428_v12 = vadd.f32 %v1427_v26, %v1379_v31 }
 0x1a8   :  { %v1680_v33 = vpop.f32.mrf.mxu1 }
 0x1a9   :  { %v1761_v34 = vmax.f32 %v1745_v32, 0.0  ;;  %v1477_v36 = vadd.f32 %v1476_v5, %v1428_v12  ;;  %v1711_v49 = vmul.f32 %v3462_v19, %v1680_v33 }
 0x1ab   :  { %1777 = vst [vmem:[#allocation2 + $0x38] sm:$0xff] %v1761_v34  ;;  %v1508_v38 = vmul.f32 %v3476_v28, %v1477_v36  ;;  %v1731_v55 = vadd.f32 %v3471_v24, %v1711_v49 }
 0x1ac   :  { %v1380_v39 = vpop.f32.mrf.mxu2 }
 0x1ad   :  { %v1429_v40 = vpop.f32.mrf.mxu3  ;;  %v1528_v41 = vadd.f32 %v3481_v46, %v1508_v38  ;;  %v1381_v45 = vadd.f32 %v1380_v39, %v3397_v59 }
 0x1ae   :  { %v1481_v56 = vpop.f32.mrf.mxu0 }
 0x1af   :  { %v1746_v43 = vadd.f32 %v1730_v37, %v1528_v41  ;;  %v1430_v44 = vadd.f32 %v1429_v40, %v1381_v45 }
 0x1b0   :  { %v1683_v42 = vpop.f32.mrf.mxu1 }
 0x1b1   :  { %v1762_v47 = vmax.f32 %v1746_v43, 0.0  ;;  %v1479_v50 = vadd.f32 %v1478_v35, %v1430_v44  ;;  %v1712_v58 = vmul.f32 %v3462_v19, %v1683_v42 }
 0x1b3   :  { %1778 = vst [vmem:[#allocation2 + $0x40] sm:$0xff] %v1762_v47  ;;  %v1509_v52 = vmul.f32 %v3476_v28, %v1479_v50  ;;  %v1732_v1 = vadd.f32 %v3471_v24, %v1712_v58 }
 0x1b4   :  { %v1383_v53 = vpop.f32.mrf.mxu2 }
 0x1b5   :  { %v1432_v54 = vpop.f32.mrf.mxu3  ;;  %v1529_v63 = vadd.f32 %v3481_v46, %v1509_v52  ;;  %v1384_v57 = vadd.f32 %v1383_v53, %v3418_v13 }
 0x1b6   :  { %v1483_v60 = vpop.f32.mrf.mxu0 }
 0x1b7   :  { %v1747_v59 = vadd.f32 %v1731_v55, %v1529_v63  ;;  %v1433_v0 = vadd.f32 %v1432_v54, %v1384_v57 }
 0x1b8   :  { %v1685_v61 = vpop.f32.mrf.mxu1 }
 0x1b9   :  { %v1763_v7 = vmax.f32 %v1747_v59, 0.0  ;;  %v1482_v62 = vadd.f32 %v1481_v56, %v1433_v0  ;;  %v1713_v20 = vmul.f32 %v3462_v19, %v1685_v61 }
 0x1bb   :  { %1779 = vst [vmem:[#allocation2 + $0x48] sm:$0xff] %v1763_v7  ;;  %v1510_v2 = vmul.f32 %v3476_v28, %v1482_v62  ;;  %v1733_v22 = vadd.f32 %v3471_v24, %v1713_v20 }
 0x1bc   :  { %v1385_v3 = vpop.f32.mrf.mxu2 }
 0x1bd   :  { %v1434_v4 = vpop.f32.mrf.mxu3  ;;  %v1530_v6 = vadd.f32 %v3481_v46, %v1510_v2  ;;  %v1386_v10 = vadd.f32 %v1385_v3, %v3425_v23 }
 0x1be   :  { %v1486_v15 = vpop.f32.mrf.mxu0 }
 0x1bf   :  { %v1748_v13 = vadd.f32 %v1732_v1, %v1530_v6  ;;  %v1435_v16 = vadd.f32 %v1434_v4, %v1386_v10 }
 0x1c0   :  { %v1688_v11 = vpop.f32.mrf.mxu1 }
 0x1c1   :  { %v1764_v14 = vmax.f32 %v1748_v13, 0.0  ;;  %v1484_v5 = vadd.f32 %v1483_v60, %v1435_v16  ;;  %v1714_v27 = vmul.f32 %v3462_v19, %v1688_v11 }
 0x1c3   :  { %1780 = vst [vmem:[#allocation2 + $0x50] sm:$0xff] %v1764_v14  ;;  %v1511_v17 = vmul.f32 %v3476_v28, %v1484_v5  ;;  %v1734_v12 = vadd.f32 %v3471_v24, %v1714_v27 }
 0x1c4   :  { %v1388_v18 = vpop.f32.mrf.mxu2 }
 0x1c5   :  { %v1437_v21 = vpop.f32.mrf.mxu3  ;;  %v1531_v25 = vadd.f32 %v3481_v46, %v1511_v17  ;;  %v1389_v26 = vadd.f32 %v1388_v18, %v3446_v51 }
 0x1c6   :  { %v1488_v33 = vpop.f32.mrf.mxu0 }
 0x1c7   :  { %v1749_v23 = vadd.f32 %v1733_v22, %v1531_v25  ;;  %v1438_v29 = vadd.f32 %v1437_v21, %v1389_v26 }
 0x1c8   :  { %v1690_v30 = vpop.f32.mrf.mxu1 }
 0x1c9   :  { %v1765_v31 = vmax.f32 %v1749_v23, 0.0  ;;  %v1487_v32 = vadd.f32 %v1486_v15, %v1438_v29  ;;  %v1715_v41 = vmul.f32 %v3462_v19, %v1690_v30 }
 0x1cb   :  { %1781 = vst [vmem:[#allocation2 + $0x58] sm:$0xff] %v1765_v31  ;;  %v1512_v35 = vmul.f32 %v3476_v28, %v1487_v32  ;;  %v1735_v47 = vadd.f32 %v3471_v24, %v1715_v41 }
 0x1cc   :  { %v1390_v34 = vpop.f32.mrf.mxu2 }
 0x1cd   :  { %v1439_v36 = vpop.f32.mrf.mxu3  ;;  %v1532_v37 = vadd.f32 %v3481_v46, %v1512_v35  ;;  %v1391_v38 = vadd.f32 %v1390_v34, %v3453_v48 }
 0x1ce   :  { %v1491_v52 = vpop.f32.mrf.mxu0 }
 0x1cf   :  { %v1750_v51 = vadd.f32 %v1734_v12, %v1532_v37  ;;  %v1440_v39 = vadd.f32 %v1439_v36, %v1391_v38 }
 0x1d0   :  { %v1693_v44 = vpop.f32.mrf.mxu1 }
 0x1d1   :  { %v1766_v40 = vmax.f32 %v1750_v51, 0.0  ;;  %v1489_v45 = vadd.f32 %v1488_v33, %v1440_v39  ;;  %v1716_v53 = vmul.f32 %v3462_v19, %v1693_v44 }
 0x1d3   :  { %1782 = vst [vmem:[#allocation2 + $0x60] sm:$0xff] %v1766_v40  ;;  %v1513_v43 = vmul.f32 %v3476_v28, %v1489_v45  ;;  %v1736_v57 = vadd.f32 %v3471_v24, %v1716_v53 }
 0x1d4   :  { %v1393_v56 = vpop.f32.mrf.mxu2 }
 0x1d5   :  { %v1442_v42 = vpop.f32.mrf.mxu3  ;;  %v1533_v49 = vadd.f32 %v3481_v46, %v1513_v43  ;;  %v1394_v50 = vadd.f32 %v1393_v56, %v3456_v8 }
 0x1d6   :  { %v1493_v1 = vpop.f32.mrf.mxu0 }
 0x1d7   :  { %v1751_v48 = vadd.f32 %v1735_v47, %v1533_v49  ;;  %v1443_v54 = vadd.f32 %v1442_v42, %v1394_v50 }
 0x1d8   :  { %v1695_v61 = vpop.f32.mrf.mxu1 }
 0x1d9   :  { %v1767_v55 = vmax.f32 %v1751_v48, 0.0  ;;  %v1492_v63 = vadd.f32 %v1491_v52, %v1443_v54  ;;  %v1717_v3 = vmul.f32 %v3462_v19, %v1695_v61 }
 0x1db   :  { %1783 = vst [vmem:[#allocation2 + $0x68] sm:$0xff] %v1767_v55  ;;  %v1514_v59 = vmul.f32 %v3476_v28, %v1492_v63  ;;  %v1737_v10 = vadd.f32 %v3471_v24, %v1717_v3 }
 0x1dc   :  { %v1395_v58 = vpop.f32.mrf.mxu2 }
 0x1dd   :  { %v1534_v0 = vadd.f32 %v3481_v46, %v1514_v59  ;;  %v1396_v60 = vadd.f32 %v1395_v58, %v3464_v9  ;;  %v1444_v7 = vpop.f32.mrf.mxu3 }
 0x1df   :  { %v1752_v8 = vadd.f32 %v1736_v57, %v1534_v0  ;;  %v1445_v62 = vadd.f32 %v1444_v7, %v1396_v60 }
 0x1e1   :  { %v1768_v2 = vmax.f32 %v1752_v8, 0.0  ;;  %v1494_v4 = vadd.f32 %v1493_v1, %v1445_v62 }
 0x1e3   :  { %1784 = vst [vmem:[#allocation2 + $0x70] sm:$0xff] %v1768_v2  ;;  %v1515_v6 = vmul.f32 %v3476_v28, %v1494_v4 }
 0x1e5   :  { %v1535_v13 = vadd.f32 %v3481_v46, %v1515_v6 }
 0x1e7   :  { %v1753_v9 = vadd.f32 %v1737_v10, %v1535_v13 }
 0x1e9   :  { %v1769_v16 = vmax.f32 %v1753_v9, 0.0 }
 0x1eb   :  { %1785 = vst [vmem:[#allocation2 + $0x78] sm:$0xff] %v1769_v16 }
 0x1ec   :  { %1798 = dma.vmem_to_hbm [thread:$0]  %s1791_s3, 2048, %s1793_s14, [#allocation3], %s2642_s15, %s2642_s15, %s2643_s16  }
 0x1ed   :  { %2639 = dma.done.wait [#allocation3], 2048  }
 0x1ee   :  { %2640 = vsyncadd [#allocation3], 4294965248 }
 0x1ef   :  { %1803 = vsyncpa [#allocation3], 1 }

</bundles_post_ra>
